<compile_context>
chip_gen: v7x
topology: tpu7x:2x2x1
jax: 0.10.0
libtpu: 0.0.40
codegen_flags: <defaults>
</compile_context>

<pallas_src>
import functools

import jax
import jax.numpy as jnp
from jax import lax
from jax.experimental import pallas as pl
from jax.experimental.pallas import tpu as pltpu

LANE = 128                     # lane width (fast axis)
SUBLANES = 8                   # f32 sublanes per vreg
PACK = 32                      # universally safe sublane packing (int8 worst case)
MIN_PALLAS_BYTES = 512 * 1024  # below this, plain jnp beats kernel launch cost


def _num_tensorcores():
    """Best effort: 2 TensorCores per device only on v7x-class chips."""
    try:
        kind = jax.devices()[0].device_kind.lower()
    except Exception:
        return 1
    return 2 if "v7" in kind else 1


def _dice_sums_kernel(p_ref, t_ref, o_ref, *, rows, block_rows, num_blocks,
                      blocks_per_slice, ragged):
    # o_ref: (1, 24, LANE) f32, resident across the inner (reduction) axis.
    #   rows  0: 7 -> partial sums of pred*target
    #   rows  8:15 -> partial sums of pred
    #   rows 16:23 -> partial sums of target
    @pl.when(pl.program_id(1) == 0)
    def _():
        o_ref[...] = jnp.zeros_like(o_ref)

    p = p_ref[...].astype(jnp.float32)
    t = t_ref[...].astype(jnp.float32)

    def accum(pf, tf):
        # Fold (block_rows, LANE) -> (block_rows//8, 8, LANE) and reduce the
        # leading axis only: pure vreg VPU adds, no per-step XLU sublane
        # reduce, full-tile (8,128) stores.  The final 8x128 reduction of the
        # partials happens once, in the wrapper.
        pr = pf.reshape(-1, SUBLANES, LANE)
        tr = tf.reshape(-1, SUBLANES, LANE)
        o_ref[0, 0:8, :] += jnp.sum(pr * tr, axis=0)
        o_ref[0, 8:16, :] += jnp.sum(pr, axis=0)
        o_ref[0, 16:24, :] += jnp.sum(tr, axis=0)

    if ragged:
        gblk = pl.program_id(0) * blocks_per_slice + pl.program_id(1)
        is_edge = gblk >= num_blocks - 1

        @pl.when(is_edge)
        def _():
            # Mask by the *logical* (unclamped) row index: rows past `rows`
            # belong to a partial / clamped-duplicate block and hold
            # unspecified data -> zero them BEFORE the multiply.
            row_ids = gblk * block_rows + lax.broadcasted_iota(
                jnp.int32, (block_rows, LANE), 0)
            valid = row_ids < rows
            accum(jnp.where(valid, p, 0.0), jnp.where(valid, t, 0.0))

        @pl.when(jnp.logical_not(is_edge))
        def _():
            accum(p, t)
    else:
        accum(p, t)


def _dice_sums(p2, t2, rows, block_rows, nslices):
    """Returns [sum(p*t), sum(p), sum(t)] over a (rows, LANE) view (f32)."""
    num_blocks = (rows + block_rows - 1) // block_rows
    nslices = max(1, min(nslices, num_blocks))
    bps = (num_blocks + nslices - 1) // nslices       # blocks per slice
    need_clamp = nslices * bps != num_blocks          # last slice: 1 OOB block
    ragged = (rows % block_rows != 0) or need_clamp

    if need_clamp:
        def in_map(pi, i):
            # Clamp so the DMA window always lands in-bounds; the in-kernel
            # row mask (driven by the unclamped index) zeroes the duplicate.
            return (jnp.minimum(pi * bps + i, num_blocks - 1), 0)
    else:
        def in_map(pi, i):
            return (pi * bps + i, 0)

    kernel = functools.partial(
        _dice_sums_kernel, rows=rows, block_rows=block_rows,
        num_blocks=num_blocks, blocks_per_slice=bps, ragged=ragged)

    in_bytes = p2.size * p2.dtype.itemsize + t2.size * t2.dtype.itemsize
    out_bytes = nslices * 3 * SUBLANES * LANE * 4
    # 2 inputs x 2 pipeline buffers x one block each, plus headroom for the
    # resident output block and Mosaic internal scratch.
    pipelined = 2 * block_rows * LANE * (p2.dtype.itemsize + t2.dtype.itemsize)
    vmem_limit = min(max(2 * pipelined, 16 << 20), 48 << 20)

    out = pl.pallas_call(
        kernel,
        out_shape=jax.ShapeDtypeStruct((nslices, 3 * SUBLANES, LANE),
                                       jnp.float32),
        grid=(nslices, bps),
        in_specs=[
            pl.BlockSpec((block_rows, LANE), in_map),
            pl.BlockSpec((block_rows, LANE), in_map),
        ],
        out_specs=pl.BlockSpec((1, 3 * SUBLANES, LANE),
                               lambda pi, i: (pi, 0, 0)),
        compiler_params=pltpu.CompilerParams(
            # NOTE: on v7x, if profiling shows only one TensorCore active,
            # switch axis 0 to pltpu.CORE_PARALLEL (or pl.core_map).
            dimension_semantics=("parallel", "arbitrary"),
            vmem_limit_bytes=vmem_limit),
        cost_estimate=pl.CostEstimate(
            flops=4 * rows * LANE, transcendentals=0,
            bytes_accessed=in_bytes + out_bytes),
    )(p2, t2)
    # Tiny final reduce of the per-slice (3, 8, LANE) lane/sublane partials.
    return out.reshape(nslices, 3, SUBLANES, LANE).sum(axis=(0, 2, 3))


def _default_block_rows(itemsize, two_tc):
    # Keep each input block at ~2 MiB of HBM bytes (>=85% of roofline on the
    # measured tile sweep); ~4 MiB on v7x where the fixed per-step overhead is
    # proportionally larger against the 3.2 TB/s HBM.
    per_block_bytes = (4 << 20) if two_tc else (2 << 20)
    return max(PACK, per_block_bytes // (LANE * itemsize))


def binary_dice_loss(pred, target, *, block_rows=None, force_slices=None):
    """JAX/Pallas equivalent of BinaryDiceLoss.forward."""
    smooth = jnp.float32(1.0)

    pf = pred.reshape(-1)
    tf = target.reshape(-1)
    # Bool -> int8 only (cheap widening); the f32 cast happens in-kernel so
    # HBM traffic stays at the native byte width.
    if pf.dtype == jnp.bool_:
        pf = pf.astype(jnp.int8)
    if tf.dtype == jnp.bool_:
        tf = tf.astype(jnp.int8)

    n = pf.shape[0]
    rows = n // LANE
    n_main = rows * LANE
    main_bytes = n_main * (pf.dtype.itemsize + tf.dtype.itemsize)
    use_pallas = rows >= PACK and main_bytes >= MIN_PALLAS_BYTES

    if use_pallas:
        two_tc = _num_tensorcores() >= 2
        itemsize = max(pf.dtype.itemsize, tf.dtype.itemsize)
        br = block_rows if block_rows is not None else _default_block_rows(
            itemsize, two_tc)
        br = min(br, rows)
        br = max(PACK, (br // PACK) * PACK)   # packing-aligned for bf16/int8
        num_blocks = (rows + br - 1) // br
        if force_slices is not None:
            nslices = force_slices
        else:
            nslices = 2 if (two_tc and num_blocks >= 8) else 1

        p2 = pf[:n_main].reshape(rows, LANE)
        t2 = tf[:n_main].reshape(rows, LANE)
        sums = _dice_sums(p2, t2, rows, br, nslices)
        inter, psum, tsum = sums[0], sums[1], sums[2]

        if n_main < n:
            # <128-element lane tail: plain jnp, sum-neutral split (no pad).
            tp = pf[n_main:].astype(jnp.float32)
            tt = tf[n_main:].astype(jnp.float32)
            inter = inter + jnp.sum(tp * tt)
            psum = psum + jnp.sum(tp)
            tsum = tsum + jnp.sum(tt)
    else:
        # Small-input fallback: kernel launch + pipeline warm-up would
        # dominate a tiny reduction.
        p32 = pf.astype(jnp.float32)
        t32 = tf.astype(jnp.float32)
        inter = jnp.sum(p32 * t32)
        psum = jnp.sum(p32)
        tsum = jnp.sum(t32)

    dice = (2.0 * inter + smooth) / (psum + tsum + smooth)
    return (1.0 - dice).astype(jnp.float32)


def _reference(pred, target):
    smooth = 1.0
    pf = pred.astype(jnp.float32)
    tf = target.astype(jnp.float32)
    intersection = jnp.sum(pf * tf)
    dice = (2.0 * intersection + smooth) / (jnp.sum(pf) + jnp.sum(tf) + smooth)
    return 1.0 - dice


if __name__ == "__main__":
    key = jax.random.PRNGKey(0)
    k1, k2, k3, k4, k5, k6, k7, k8 = jax.random.split(key, 8)

    # Case 1: small NCHW input (2x4x16x16) -> small-input jnp fallback path.
    pred = jax.nn.sigmoid(jax.random.normal(k1, (2, 4, 16, 16), dtype=jnp.float32))
    target = (jax.random.uniform(k2, (2, 4, 16, 16)) > 0.5).astype(jnp.float32)
    loss = jax.block_until_ready(binary_dice_loss(pred, target))
    ref = jax.block_until_ready(_reference(pred, target))
    assert jnp.allclose(loss, ref, rtol=1e-5, atol=1e-5), (loss, ref)

    # Case 2: segmentation-mask-sized f32 input -> single-block Pallas path.
    pred2 = jax.nn.sigmoid(jax.random.normal(k3, (2, 1, 512, 512), dtype=jnp.float32))
    target2 = (jax.random.uniform(k4, (2, 1, 512, 512)) > 0.5).astype(jnp.float32)
    loss2 = jax.block_until_ready(binary_dice_loss(pred2, target2))
    ref2 = jax.block_until_ready(_reference(pred2, target2))
    assert jnp.allclose(loss2, ref2, rtol=1e-5, atol=1e-5), (loss2, ref2)

    # Case 3: ragged size (397x357), small blocks, forced 2-slice grid ->
    # exercises the multi-block pipeline, the clamped duplicate block,
    # in-kernel edge masking, and the <128-element lane tail.
    pred3 = jax.nn.sigmoid(jax.random.normal(k5, (397, 357), dtype=jnp.float32))
    target3 = (jax.random.uniform(k6, (397, 357)) > 0.5).astype(jnp.float32)
    loss3 = jax.block_until_ready(
        binary_dice_loss(pred3, target3, block_rows=160, force_slices=2))
    ref3 = jax.block_until_ready(_reference(pred3, target3))
    assert jnp.allclose(loss3, ref3, rtol=1e-5, atol=1e-5), (loss3, ref3)

    # Case 4: bf16 pred + bool target -> native-dtype HBM reads, in-kernel cast.
    pred4 = jax.nn.sigmoid(jax.random.normal(k7, (4, 1, 256, 256), dtype=jnp.bfloat16))
    target4 = jax.random.uniform(k8, (4, 1, 256, 256)) > 0.5
    loss4 = jax.block_until_ready(binary_dice_loss(pred4, target4))
    ref4 = jax.block_until_ready(_reference(pred4, target4))
    assert jnp.allclose(loss4, ref4, rtol=1e-4, atol=1e-4), (loss4, ref4)

    print("KERNEL_OK")
</pallas_src>

<mosaic_0001>
module attributes {stable_mosaic.version = 11 : i64} {
  func.func @_dice_sums_kernel(%arg0: i32, %arg1: i32, %arg2: memref<4096x128xf32, #tpu.memory_space<vmem>>, %arg3: memref<4096x128xf32, #tpu.memory_space<vmem>>, %arg4: memref<1x24x128xf32, #tpu.memory_space<vmem>>) attributes {dimension_semantics = [#tpu.dimension_semantics<parallel>, #tpu.dimension_semantics<arbitrary>], iteration_bounds = array<i64: 1, 1>, scalar_prefetch = 0 : i64, scratch_operands = 0 : i64, tpu.core_type = #tpu.core_type<tc>, window_params = [{transform_indices = @transform_0, window_bounds = array<i64: 4096, 128>}, {transform_indices = @transform_1, window_bounds = array<i64: 4096, 128>}, {transform_indices = @transform_2, window_bounds = array<i64: 1, 24, 128>}]} {
    %c0_i32 = arith.constant 0 : i32
    %0 = arith.cmpi eq, %arg1, %c0_i32 : i32
    %1 = arith.extui %0 : i1 to i32
    %c0_i32_0 = arith.constant 0 : i32
    %2 = arith.cmpi ne, %1, %c0_i32_0 : i32
    scf.if %2 {
      %cst_22 = arith.constant 0.000000e+00 : f32
      %29 = vector.broadcast %cst_22 : f32 to vector<1x24x128xf32>
      %c0_23 = arith.constant 0 : index
      %c0_24 = arith.constant 0 : index
      %c0_25 = arith.constant 0 : index
      %30 = vector.load %arg4[%c0_23, %c0_24, %c0_25] : memref<1x24x128xf32, #tpu.memory_space<vmem>>, vector<1x24x128xf32>
      tpu.vector_store %arg4[%c0_23, %c0_24, %c0_25], %29 {strides = array<i32>} : memref<1x24x128xf32, #tpu.memory_space<vmem>>, vector<1x24x128xf32>,
    } else {
    }
    %c0 = arith.constant 0 : index
    %c0_1 = arith.constant 0 : index
    %3 = vector.load %arg2[%c0, %c0_1] : memref<4096x128xf32, #tpu.memory_space<vmem>>, vector<4096x128xf32>
    %c0_2 = arith.constant 0 : index
    %c0_3 = arith.constant 0 : index
    %4 = vector.load %arg3[%c0_2, %c0_3] : memref<4096x128xf32, #tpu.memory_space<vmem>>, vector<4096x128xf32>
    %5 = vector.shape_cast %3 : vector<4096x128xf32> to vector<512x8x128xf32>
    %6 = vector.shape_cast %4 : vector<4096x128xf32> to vector<512x8x128xf32>
    %c0_4 = arith.constant 0 : index
    %c0_5 = arith.constant 0 : index
    %c0_6 = arith.constant 0 : index
    %7 = vector.load %arg4[%c0_4, %c0_5, %c0_6] : memref<1x24x128xf32, #tpu.memory_space<vmem>>, vector<1x8x128xf32>
    %8 = vector.shape_cast %7 : vector<1x8x128xf32> to vector<8x128xf32>
    %9 = arith.mulf %5, %6 : vector<512x8x128xf32>
    %cst = arith.constant dense<0.000000e+00> : vector<8x128xf32>
    %10 = vector.multi_reduction <add>, %9, %cst [0] : vector<512x8x128xf32> to vector<8x128xf32>
    %11 = arith.addf %8, %10 : vector<8x128xf32>
    %c0_7 = arith.constant 0 : index
    %c0_8 = arith.constant 0 : index
    %c0_9 = arith.constant 0 : index
    %12 = vector.load %arg4[%c0_7, %c0_8, %c0_9] : memref<1x24x128xf32, #tpu.memory_space<vmem>>, vector<1x8x128xf32>
    %13 = vector.shape_cast %12 : vector<1x8x128xf32> to vector<8x128xf32>
    %14 = vector.shape_cast %11 : vector<8x128xf32> to vector<1x8x128xf32>
    tpu.vector_store %arg4[%c0_7, %c0_8, %c0_9], %14 {strides = array<i32>} : memref<1x24x128xf32, #tpu.memory_space<vmem>>, vector<1x8x128xf32>,
    %c0_10 = arith.constant 0 : index
    %c8 = arith.constant 8 : index
    %c0_11 = arith.constant 0 : index
    %15 = vector.load %arg4[%c0_10, %c8, %c0_11] : memref<1x24x128xf32, #tpu.memory_space<vmem>>, vector<1x8x128xf32>
    %16 = vector.shape_cast %15 : vector<1x8x128xf32> to vector<8x128xf32>
    %cst_12 = arith.constant dense<0.000000e+00> : vector<8x128xf32>
    %17 = vector.multi_reduction <add>, %5, %cst_12 [0] : vector<512x8x128xf32> to vector<8x128xf32>
    %18 = arith.addf %16, %17 : vector<8x128xf32>
    %c0_13 = arith.constant 0 : index
    %c8_14 = arith.constant 8 : index
    %c0_15 = arith.constant 0 : index
    %19 = vector.load %arg4[%c0_13, %c8_14, %c0_15] : memref<1x24x128xf32, #tpu.memory_space<vmem>>, vector<1x8x128xf32>
    %20 = vector.shape_cast %19 : vector<1x8x128xf32> to vector<8x128xf32>
    %21 = vector.shape_cast %18 : vector<8x128xf32> to vector<1x8x128xf32>
    tpu.vector_store %arg4[%c0_13, %c8_14, %c0_15], %21 {strides = array<i32>} : memref<1x24x128xf32, #tpu.memory_space<vmem>>, vector<1x8x128xf32>,
    %c0_16 = arith.constant 0 : index
    %c16 = arith.constant 16 : index
    %c0_17 = arith.constant 0 : index
    %22 = vector.load %arg4[%c0_16, %c16, %c0_17] : memref<1x24x128xf32, #tpu.memory_space<vmem>>, vector<1x8x128xf32>
    %23 = vector.shape_cast %22 : vector<1x8x128xf32> to vector<8x128xf32>
    %cst_18 = arith.constant dense<0.000000e+00> : vector<8x128xf32>
    %24 = vector.multi_reduction <add>, %6, %cst_18 [0] : vector<512x8x128xf32> to vector<8x128xf32>
    %25 = arith.addf %23, %24 : vector<8x128xf32>
    %c0_19 = arith.constant 0 : index
    %c16_20 = arith.constant 16 : index
    %c0_21 = arith.constant 0 : index
    %26 = vector.load %arg4[%c0_19, %c16_20, %c0_21] : memref<1x24x128xf32, #tpu.memory_space<vmem>>, vector<1x8x128xf32>
    %27 = vector.shape_cast %26 : vector<1x8x128xf32> to vector<8x128xf32>
    %28 = vector.shape_cast %25 : vector<8x128xf32> to vector<1x8x128xf32>
    tpu.vector_store %arg4[%c0_19, %c16_20, %c0_21], %28 {strides = array<i32>} : memref<1x24x128xf32, #tpu.memory_space<vmem>>, vector<1x8x128xf32>,
    return
  }
  func.func @transform_0(%arg0: i32, %arg1: i32) -> (i32, i32) {
    %c1_i32 = arith.constant 1 : i32
    %0 = arith.muli %arg0, %c1_i32 : i32
    %1 = arith.addi %0, %arg1 : i32
    %c0_i32 = arith.constant 0 : i32
    %c0_i32_0 = arith.constant 0 : i32
    return %1, %c0_i32 : i32, i32
  }
  func.func @transform_1(%arg0: i32, %arg1: i32) -> (i32, i32) {
    %c1_i32 = arith.constant 1 : i32
    %0 = arith.muli %arg0, %c1_i32 : i32
    %1 = arith.addi %0, %arg1 : i32
    %c0_i32 = arith.constant 0 : i32
    %c0_i32_0 = arith.constant 0 : i32
    return %1, %c0_i32 : i32, i32
  }
  func.func @transform_2(%arg0: i32, %arg1: i32) -> (i32, i32, i32) {
    %c0_i32 = arith.constant 0 : i32
    %c0_i32_0 = arith.constant 0 : i32
    %c0_i32_1 = arith.constant 0 : i32
    return %arg0, %c0_i32, %c0_i32_0 : i32, i32, i32
  }
}

</mosaic_0001>

<bundles_post_ra>
// kernel: tpu_custom_call.1
= control target key start
LH: loop header
LB: loop body
LE: loop exit
PB: predicated region body
PF: predicated region fallthrough
CT: control target
= control target key end

     0   :  { %7 = vsyncpa [#allocation3], 0  ;;  %s7357_s0 = inlined_call_operand.hbm [shape: f32[4096,128], index: 0, kind: input, shape index: {}]   ;;  %s7358_s1 = inlined_call_operand.hbm [shape: f32[4096,128], index: 1, kind: input, shape index: {}]   ;;  %s7359_s2 = inlined_call_operand.hbm [shape: f32[1,24,128], index: 2, kind: output, shape index: {}]  }
   0x1   :  { %8 = vsyncpa [#allocation6], 0 }
   0x2   :  { %9 = vsyncpa [#allocation4], 0  ;;  %s3233_s9 = smov [#allocation2]   ;;  %s3161_s13 = scalar_lea.hbm %s7357_s0, 65536 }
   0x3   :  { %s19_s10 = sshll.u32 %s3233_s9, 4  ;;  %p3162_p0 = scmp.ne.s32.totalorder %s7357_s0, %s3161_s13  ;;  %s20_s10 = int_to_ptr.vmem [resolvable:$true] %s19_s10 }
   0x4   :  { %p3165_p1 = scmp.lt.u32.totalorder %s3161_s13, %s7357_s0 }
   0x6   :  { %p3167_p2 = pnand %p3165_p1, %p3162_p0 }
   0x8   :  { %3170 = shalt.err (!%p3167_p2)
}
   0x9   :  { %s3171_s18 = scalar_lea.vmem %s20_s10, 65536  ;;  %p3176_p4 = scmp.lt.s32.totalorder %s20_s10, %s20_s10 }
   0xa   :  { %p3172_p3 = scmp.ne.s32.totalorder %s20_s10, %s3171_s18  ;;  %p3177_p5 = scmp.lt.s32.totalorder %s3171_s18, %s3171_s18 }
   0xc   :  { %p3178_p6 = por %p3177_p5, %p3176_p4 }
   0xe   :  { %p3179_p7 = pnand %p3178_p6, %p3172_p3 }
  0x10   :  { %3182 = shalt.err (!%p3179_p7)
}
  0x11   :  { %s3234_s19 = smov 128   ;;  %s3235_s20 = smov 8  }
  0x12   :  { %25 = dma.hbm_to_vmem [thread:$0]  %s7357_s0, 65536, %s20_s10, [#allocation3], %s3234_s19, %s3234_s19, %s3235_s20  }
  0x13   :  { %s3236_s23 = smov [#allocation5]   ;;  %s3183_s27 = scalar_lea.hbm %s7358_s1, 65536 }
  0x14   :  { %s35_s24 = sshll.u32 %s3236_s23, 4  ;;  %p3184_p8 = scmp.ne.s32.totalorder %s7358_s1, %s3183_s27  ;;  %s36_s24 = int_to_ptr.vmem [resolvable:$true] %s35_s24 }
  0x15   :  { %p3187_p9 = scmp.lt.u32.totalorder %s3183_s27, %s7358_s1 }
  0x17   :  { %p3189_p10 = pnand %p3187_p9, %p3184_p8 }
  0x19   :  { %3192 = shalt.err (!%p3189_p10)
}
  0x1a   :  { %s3193_s4 = scalar_lea.vmem %s36_s24, 65536  ;;  %p3198_p12 = scmp.lt.s32.totalorder %s36_s24, %s36_s24 }
  0x1b   :  { %p3194_p11 = scmp.ne.s32.totalorder %s36_s24, %s3193_s4  ;;  %p3199_p13 = scmp.lt.s32.totalorder %s3193_s4, %s3193_s4 }
  0x1d   :  { %p3200_p0 = por %p3199_p13, %p3198_p12 }
  0x1f   :  { %p3201_p1 = pnand %p3200_p0, %p3194_p11 }
  0x21   :  { %3204 = shalt.err (!%p3201_p1)
}
  0x22   :  { %41 = dma.hbm_to_vmem [thread:$0]  %s7358_s1, 65536, %s36_s24, [#allocation6], %s3234_s19, %s3234_s19, %s3235_s20  }
  0x23   :  { %3227 = dma.done.wait [#allocation3], 65536  }
  0x24   :  { %3228 = vsyncadd [#allocation3], 4294901760 }
  0x25   :  { %3229 = dma.done.wait [#allocation6], 65536  }
  0x26   :  { %3230 = vsyncadd [#allocation6], 4294901760  ;;  %v3283_v0 = vld [vmem:[#allocation2] sm:$0xff]  ;;  %v3285_v1 = vld [vmem:[#allocation2 + $0x8] sm:$0xff]  ;;  %s3237_s1 = smov [#allocation7]  }
  0x27   :  { %v2110_v2 = vadd.f32 %v3285_v1, %v3283_v0  ;;  %v3289_v3 = vld [vmem:[#allocation2 + $0x10] sm:$0xff]  ;;  %v3292_v5 = vld [vmem:[#allocation2 + $0x18] sm:$0xff]  ;;  %v3295_v7 = vld [vmem:[#allocation2 + $0x20] sm:$0xff]  ;;  %s3142_s6 = sshll.u32 %s3237_s1, 4  ;;  %s3143_s6 = int_to_ptr.vmem [resolvable:$true] %s3142_s6 }
  0x28   :  { %v3298_v9 = vld [vmem:[#allocation2 + $0x28] sm:$0xff]  ;;  %v3301_v11 = vld [vmem:[#allocation2 + $0x30] sm:$0xff]  ;;  %v3304_v13 = vld [vmem:[#allocation2 + $0x38] sm:$0xff]  ;;  %s3205_s7 = scalar_lea.vmem %s3143_s6, 384  ;;  %p3210_p3 = scmp.lt.s32.totalorder %s3143_s6, %s3143_s6 }
  0x29   :  { %v2111_v4 = vadd.f32 %v2110_v2, %v3289_v3  ;;  %v3307_v15 = vld [vmem:[#allocation2 + $0x40] sm:$0xff]  ;;  %v3310_v17 = vld [vmem:[#allocation2 + $0x48] sm:$0xff]  ;;  %v3313_v19 = vld [vmem:[#allocation2 + $0x50] sm:$0xff]  ;;  %p3206_p2 = scmp.ne.s32.totalorder %s3143_s6, %s3205_s7  ;;  %p3211_p4 = scmp.lt.s32.totalorder %s3205_s7, %s3205_s7 }
  0x2a   :  { %v3316_v21 = vld [vmem:[#allocation2 + $0x58] sm:$0xff]  ;;  %v3319_v23 = vld [vmem:[#allocation2 + $0x60] sm:$0xff]  ;;  %v3322_v25 = vld [vmem:[#allocation2 + $0x68] sm:$0xff] }
  0x2b   :  { %v2112_v6 = vadd.f32 %v2111_v4, %v3292_v5  ;;  %v3325_v27 = vld [vmem:[#allocation2 + $0x70] sm:$0xff]  ;;  %v3328_v29 = vld [vmem:[#allocation2 + $0x78] sm:$0xff]  ;;  %v3331_v31 = vld [vmem:[#allocation2 + $0x80] sm:$0xff]  ;;  %p3212_p5 = por %p3211_p4, %p3210_p3 }
  0x2c   :  { %v3334_v33 = vld [vmem:[#allocation2 + $0x88] sm:$0xff]  ;;  %v3337_v35 = vld [vmem:[#allocation2 + $0x90] sm:$0xff]  ;;  %v3340_v37 = vld [vmem:[#allocation2 + $0x98] sm:$0xff] }
  0x2d   :  { %v2113_v8 = vadd.f32 %v2112_v6, %v3295_v7  ;;  %v3343_v39 = vld [vmem:[#allocation2 + $0xa0] sm:$0xff]  ;;  %v3346_v41 = vld [vmem:[#allocation2 + $0xa8] sm:$0xff]  ;;  %v3349_v43 = vld [vmem:[#allocation2 + $0xb0] sm:$0xff]  ;;  %p3213_p6 = pnand %p3212_p5, %p3206_p2 }
  0x2e   :  { %v3352_v45 = vld [vmem:[#allocation2 + $0xb8] sm:$0xff]  ;;  %v3355_v47 = vld [vmem:[#allocation2 + $0xc0] sm:$0xff]  ;;  %v3358_v49 = vld [vmem:[#allocation2 + $0xc8] sm:$0xff] }
  0x2f   :  { %v2114_v10 = vadd.f32 %v2113_v8, %v3298_v9  ;;  %v3361_v51 = vld [vmem:[#allocation2 + $0xd0] sm:$0xff]  ;;  %v3364_v53 = vld [vmem:[#allocation2 + $0xd8] sm:$0xff]  ;;  %v3367_v55 = vld [vmem:[#allocation2 + $0xe0] sm:$0xff] }
  0x30   :  { %v3370_v57 = vld [vmem:[#allocation2 + $0xe8] sm:$0xff]  ;;  %v3373_v59 = vld [vmem:[#allocation2 + $0xf0] sm:$0xff]  ;;  %v3376_v61 = vld [vmem:[#allocation2 + $0xf8] sm:$0xff] }
  0x31   :  { %v2115_v12 = vadd.f32 %v2114_v10, %v3301_v11  ;;  %v3379_v63 = vld [vmem:[#allocation2 + $0x100] sm:$0xff]  ;;  %v3382_v4 = vld [vmem:[#allocation2 + $0x108] sm:$0xff]  ;;  %v3385_v8 = vld [vmem:[#allocation2 + $0x110] sm:$0xff] }
  0x33   :  { %v2116_v14 = vadd.f32 %v2115_v12, %v3304_v13  ;;  %v3388_v12 = vld [vmem:[#allocation2 + $0x118] sm:$0xff] }
  0x35   :  { %v2117_v16 = vadd.f32 %v2116_v14, %v3307_v15 }
  0x37   :  { %v2118_v18 = vadd.f32 %v2117_v16, %v3310_v17  ;;  %v3391_v16 = vld [vmem:[#allocation2 + $0x120] sm:$0xff] }
  0x39   :  { %v2119_v20 = vadd.f32 %v2118_v18, %v3313_v19 }
  0x3b   :  { %v2120_v22 = vadd.f32 %v2119_v20, %v3316_v21  ;;  %v3394_v20 = vld [vmem:[#allocation2 + $0x128] sm:$0xff] }
  0x3d   :  { %v2121_v24 = vadd.f32 %v2120_v22, %v3319_v23 }
  0x3f   :  { %v2122_v26 = vadd.f32 %v2121_v24, %v3322_v25  ;;  %v3397_v24 = vld [vmem:[#allocation2 + $0x130] sm:$0xff] }
  0x41   :  { %v2123_v28 = vadd.f32 %v2122_v26, %v3325_v27 }
  0x43   :  { %v2124_v30 = vadd.f32 %v2123_v28, %v3328_v29  ;;  %v3400_v28 = vld [vmem:[#allocation2 + $0x138] sm:$0xff] }
  0x45   :  { %v2125_v32 = vadd.f32 %v2124_v30, %v3331_v31 }
  0x47   :  { %v2126_v34 = vadd.f32 %v2125_v32, %v3334_v33  ;;  %v3403_v32 = vld [vmem:[#allocation2 + $0x140] sm:$0xff] }
  0x49   :  { %v2127_v36 = vadd.f32 %v2126_v34, %v3337_v35 }
  0x4b   :  { %v2128_v38 = vadd.f32 %v2127_v36, %v3340_v37  ;;  %v3406_v36 = vld [vmem:[#allocation2 + $0x148] sm:$0xff] }
  0x4d   :  { %v2129_v40 = vadd.f32 %v2128_v38, %v3343_v39 }
  0x4f   :  { %v2130_v42 = vadd.f32 %v2129_v40, %v3346_v41  ;;  %v3409_v40 = vld [vmem:[#allocation2 + $0x150] sm:$0xff] }
  0x51   :  { %v2131_v44 = vadd.f32 %v2130_v42, %v3349_v43 }
  0x53   :  { %v2132_v46 = vadd.f32 %v2131_v44, %v3352_v45  ;;  %v3412_v44 = vld [vmem:[#allocation2 + $0x158] sm:$0xff] }
  0x55   :  { %v2133_v48 = vadd.f32 %v2132_v46, %v3355_v47 }
  0x57   :  { %v2134_v50 = vadd.f32 %v2133_v48, %v3358_v49  ;;  %v3415_v48 = vld [vmem:[#allocation2 + $0x160] sm:$0xff] }
  0x58   :  { %7824 = vst [vmem:[#allocation11_spill] sm:$0xff] %v3415_v48 }
  0x59   :  { %v2135_v52 = vadd.f32 %v2134_v50, %v3361_v51 }
  0x5b   :  { %v2136_v54 = vadd.f32 %v2135_v52, %v3364_v53  ;;  %v3418_v52 = vld [vmem:[#allocation2 + $0x168] sm:$0xff] }
  0x5c   :  { %7825 = vst [vmem:[#allocation12_spill] sm:$0xff] %v3418_v52 }
  0x5d   :  { %v2137_v56 = vadd.f32 %v2136_v54, %v3367_v55  ;;  %v571_v54 = vld [vmem:[#allocation5] sm:$0xff] }
  0x5f   :  { %v2138_v58 = vadd.f32 %v2137_v56, %v3370_v57  ;;  %v572_v56 = vld [vmem:[#allocation5 + $0x8] sm:$0xff] }
  0x61   :  { %v2139_v60 = vadd.f32 %v2138_v58, %v3373_v59  ;;  %v573_v58 = vld [vmem:[#allocation5 + $0x10] sm:$0xff] }
  0x63   :  { %v2140_v62 = vadd.f32 %v2139_v60, %v3376_v61  ;;  %v574_v60 = vld [vmem:[#allocation5 + $0x18] sm:$0xff] }
  0x65   :  { %v2141_v2 = vadd.f32 %v2140_v62, %v3379_v63  ;;  %v1084_v62 = vmul.f32 %v571_v54, %v3283_v0 }
  0x67   :  { %v2142_v6 = vadd.f32 %v2141_v2, %v3382_v4 }
  0x69   :  { %v2143_v10 = vadd.f32 %v2142_v6, %v3385_v8  ;;  %v3422_v6 = vld [vmem:[#allocation2 + $0x170] sm:$0xff] }
  0x6a   :  { %7826 = vst [vmem:[#allocation13_spill] sm:$0xff] %v3422_v6 }
  0x6b   :  { %v2144_v14 = vadd.f32 %v2143_v10, %v3388_v12  ;;  %v1085_v10 = vmul.f32 %v572_v56, %v3285_v1 }
  0x6d   :  { %v2145_v18 = vadd.f32 %v2144_v14, %v3391_v16  ;;  %v1086_v14 = vmul.f32 %v573_v58, %v3289_v3  ;;  %v3433_v3 = vld [vmem:[#allocation2 + $0x180] sm:$0xff] }
  0x6f   :  { %v2146_v22 = vadd.f32 %v2145_v18, %v3394_v20  ;;  %v2624_v18 = vadd.f32 %v572_v56, %v571_v54  ;;  %v578_v54 = vld [vmem:[#allocation5 + $0x38] sm:$0xff] }
  0x71   :  { %v2147_v26 = vadd.f32 %v2146_v22, %v3397_v24  ;;  %v575_v22 = vld [vmem:[#allocation5 + $0x20] sm:$0xff] }
  0x72   :  { %v1088_v0 = vmul.f32 %v575_v22, %v3295_v7  ;;  %v3438_v7 = vld [vmem:[#allocation2 + $0x188] sm:$0xff] }
  0x73   :  { %v2148_v30 = vadd.f32 %v2147_v26, %v3400_v28 }
  0x75   :  { %v2149_v34 = vadd.f32 %v2148_v30, %v3403_v32  ;;  %v1087_v30 = vmul.f32 %v574_v60, %v3292_v5 }
  0x77   :  { %v2150_v38 = vadd.f32 %v2149_v34, %v3406_v36  ;;  %v1596_v34 = vadd.f32 %v1085_v10, %v1084_v62  ;;  %v579_v62 = vld [vmem:[#allocation5 + $0x40] sm:$0xff]  ;;  %v1091_v10 = vmul.f32 %v578_v54, %v3304_v13 }
  0x79   :  { %v2151_v42 = vadd.f32 %v2150_v38, %v3409_v40  ;;  %v3428_v38 = vld [vmem:[#allocation2 + $0x178] sm:$0xff] }
  0x7b   :  { %v2152_v46 = vadd.f32 %v2151_v42, %v3412_v44  ;;  %v576_v42 = vld [vmem:[#allocation5 + $0x28] sm:$0xff] }
  0x7c   :  { %v1089_v1 = vmul.f32 %v576_v42, %v3298_v9 }
  0x7d   :  { %v2153_v50 = vadd.f32 %v2152_v46, %v3415_v48  ;;  %v1597_v46 = vadd.f32 %v1596_v34, %v1086_v14  ;;  %v580_v14 = vld [vmem:[#allocation5 + $0x48] sm:$0xff] }
  0x7f   :  { %v2154_v2 = vadd.f32 %v2153_v50, %v3418_v52  ;;  %v577_v52 = vld [vmem:[#allocation5 + $0x30] sm:$0xff]  ;;  %v1598_v48 = vadd.f32 %v1597_v46, %v1087_v30  ;;  %v1093_v46 = vmul.f32 %v580_v14, %v3310_v17  ;;  %v3458_v17 = vld [vmem:[#allocation5 + $0x68] sm:$0xff] }
  0x80   :  { %v1090_v56 = vmul.f32 %v577_v52, %v3301_v11  ;;  %v3442_v30 = vld [vmem:[#allocation5 + $0x50] sm:$0xff]  ;;  %7829 = vst [vmem:[#allocation16_spill] sm:$0xff] %v3458_v17 }
  0x81   :  { %v2155_v26 = vadd.f32 %v2154_v2, %v3422_v6  ;;  %v1599_v2 = vadd.f32 %v1598_v48, %v1088_v0  ;;  %v3445_v48 = vld [vmem:[#allocation2 + $0x190] sm:$0xff]  ;;  %v3447_v0 = vld [vmem:[#allocation5 + $0x58] sm:$0xff]  ;;  %v1094_v13 = vmul.f32 %v3442_v30, %v3313_v19 }
  0x82   :  { %7827 = vst [vmem:[#allocation14_spill] sm:$0xff] %v3447_v0  ;;  %v3463_v19 = vld [vmem:[#allocation5 + $0x70] sm:$0xff] }
  0x83   :  { %v2156_v50 = vadd.f32 %v2155_v26, %v3428_v38  ;;  %v1600_v6 = vadd.f32 %v1599_v2, %v1089_v1  ;;  %v1092_v26 = vmul.f32 %v579_v62, %v3307_v15  ;;  %v3452_v2 = vld [vmem:[#allocation5 + $0x60] sm:$0xff]  ;;  %v1095_v15 = vmul.f32 %v3447_v0, %v3316_v21  ;;  %v3469_v21 = vld [vmem:[#allocation5 + $0x78] sm:$0xff] }
  0x84   :  { %7828 = vst [vmem:[#allocation15_spill] sm:$0xff] %v3452_v2 }
  0x85   :  { %v2157_v5 = vadd.f32 %v2156_v50, %v3433_v3  ;;  %v1601_v34 = vadd.f32 %v1600_v6, %v1090_v56  ;;  %v3456_v56 = vld [vmem:[#allocation2 + $0x198] sm:$0xff] }
  0x87   :  { %v2158_v9 = vadd.f32 %v2157_v5, %v3438_v7  ;;  %v1602_v11 = vadd.f32 %v1601_v34, %v1091_v10  ;;  %v1096_v5 = vmul.f32 %v3452_v2, %v3319_v23  ;;  %v3474_v23 = vld [vmem:[#allocation5 + $0x80] sm:$0xff]  ;;  %v3478_v2 = vld [vmem:[#allocation2 + $0x1a8] sm:$0xff] }
  0x89   :  { %v1603_v50 = vadd.f32 %v1602_v11, %v1092_v26  ;;  %v2159_v1 = vadd.f32 %v2158_v9, %v3445_v48  ;;  %v1097_v26 = vmul.f32 %v3458_v17, %v3322_v25  ;;  %v3467_v11 = vld [vmem:[#allocation2 + $0x1a0] sm:$0xff]  ;;  %v3480_v25 = vld [vmem:[#allocation5 + $0x88] sm:$0xff] }
  0x8b   :  { %v1604_v6 = vadd.f32 %v1603_v50, %v1093_v46  ;;  %v2160_v34 = vadd.f32 %v2159_v1, %v3456_v56  ;;  %v1098_v46 = vmul.f32 %v3463_v19, %v3325_v27  ;;  %v1099_v1 = vmul.f32 %v3469_v21, %v3328_v29  ;;  %v3489_v29 = vld [vmem:[#allocation2 + $0x1b0] sm:$0xff] }
  0x8d   :  { %v1605_v10 = vadd.f32 %v1604_v6, %v1094_v13  ;;  %v2161_v0 = vadd.f32 %v2160_v34, %v3467_v11  ;;  %v2625_v13 = vadd.f32 %v2624_v18, %v573_v58  ;;  %v1101_v58 = vmul.f32 %v3480_v25, %v3334_v33  ;;  %v3500_v33 = vld [vmem:[#allocation2 + $0x1b8] sm:$0xff] }
  0x8f   :  { %v1606_v9 = vadd.f32 %v1605_v10, %v1095_v15  ;;  %v2626_v15 = vadd.f32 %v2625_v13, %v574_v60  ;;  %v1100_v10 = vmul.f32 %v3474_v23, %v3331_v31  ;;  %v2162_v27 = vadd.f32 %v2161_v0, %v3478_v2 }
  0x91   :  { %v1607_v50 = vadd.f32 %v1606_v9, %v1096_v5  ;;  %v3485_v5 = vld [vmem:[#allocation5 + $0x90] sm:$0xff]  ;;  %v2627_v34 = vadd.f32 %v2626_v15, %v575_v22  ;;  %v2163_v31 = vadd.f32 %v2162_v27, %v3489_v29 }
  0x92   :  { %v1102_v60 = vmul.f32 %v3485_v5, %v3337_v35 }
  0x93   :  { %v1608_v6 = vadd.f32 %v1607_v50, %v1097_v26  ;;  %v3491_v26 = vld [vmem:[#allocation5 + $0x98] sm:$0xff]  ;;  %v2628_v9 = vadd.f32 %v2627_v34, %v576_v42 }
  0x94   :  { %7830 = vst [vmem:[#allocation17_spill] sm:$0xff] %v3491_v26  ;;  %v1103_v22 = vmul.f32 %v3491_v26, %v3340_v37  ;;  %v3510_v37 = vld [vmem:[#allocation2 + $0x1c8] sm:$0xff]  ;;  %v3560_v26 = vld [vmem:[#allocation5 + $0xd0] sm:$0xff] }
  0x95   :  { %v1609_v17 = vadd.f32 %v1608_v6, %v1098_v46  ;;  %v3496_v46 = vld [vmem:[#allocation5 + $0xa0] sm:$0xff]  ;;  %v2629_v0 = vadd.f32 %v2628_v9, %v577_v52  ;;  %v2164_v6 = vadd.f32 %v2163_v31, %v3500_v33  ;;  %v3525_v31 = vld [vmem:[#allocation2 + $0x1f0] sm:$0xff]  ;;  %7837 = vst [vmem:[#allocation24_spill] sm:$0xff] %v3560_v26 }
  0x96   :  { %7831 = vst [vmem:[#allocation18_spill] sm:$0xff] %v3496_v46  ;;  %v3519_v9 = vld [vmem:[#allocation2 + $0x1e0] sm:$0xff] }
  0x97   :  { %v1610_v18 = vadd.f32 %v1609_v17, %v1099_v1  ;;  %v2630_v17 = vadd.f32 %v2629_v0, %v578_v54  ;;  %v1104_v1 = vmul.f32 %v3496_v46, %v3343_v39  ;;  %v3513_v54 = vld [vmem:[#allocation2 + $0x1d0] sm:$0xff] }
  0x99   :  { %v1611_v50 = vadd.f32 %v1610_v18, %v1100_v10  ;;  %v2631_v35 = vadd.f32 %v2630_v17, %v579_v62  ;;  %v3505_v10 = vld [vmem:[#allocation2 + $0x1c0] sm:$0xff]  ;;  %v3516_v18 = vld [vmem:[#allocation2 + $0x1d8] sm:$0xff] }
  0x9a   :  { %v2165_v34 = vadd.f32 %v2164_v6, %v3505_v10  ;;  %v3531_v17 = vld [vmem:[#allocation2 + $0x200] sm:$0xff]  ;;  %v3536_v6 = vld [vmem:[#allocation5 + $0xb0] sm:$0xff] }
  0x9b   :  { %v1612_v13 = vadd.f32 %v1611_v50, %v1101_v58  ;;  %v3507_v27 = vadd.f32 %v2631_v35, %v580_v14  ;;  %7833 = vst [vmem:[#allocation20_spill] sm:$0xff] %v3536_v6  ;;  %v3538_v35 = vld [vmem:[#allocation2 + $0x208] sm:$0xff] }
  0x9c   :  { %v2166_v58 = vadd.f32 %v2165_v34, %v3510_v37  ;;  %v3542_v34 = vld [vmem:[#allocation5 + $0xb8] sm:$0xff] }
  0x9d   :  { %v1613_v42 = vadd.f32 %v1612_v13, %v1102_v60  ;;  %v3522_v60 = vld [vmem:[#allocation2 + $0x1e8] sm:$0xff]  ;;  %7834 = vst [vmem:[#allocation21_spill] sm:$0xff] %v3542_v34 }
  0x9e   :  { %v2167_v39 = vadd.f32 %v2166_v58, %v3513_v54 }
  0x9f   :  { %v1614_v15 = vadd.f32 %v1613_v42, %v1103_v22  ;;  %v3528_v22 = vld [vmem:[#allocation2 + $0x1f8] sm:$0xff] }
  0xa0   :  { %v2168_v62 = vadd.f32 %v2167_v39, %v3516_v18  ;;  %v1106_v39 = vmul.f32 %v3536_v6, %v3349_v43  ;;  %v3563_v6 = vld [vmem:[#allocation2 + $0x220] sm:$0xff] }
  0xa1   :  { %v1615_v52 = vadd.f32 %v1614_v15, %v1104_v1  ;;  %v3533_v1 = vld [vmem:[#allocation5 + $0xa8] sm:$0xff] }
  0xa2   :  { %v2169_v14 = vadd.f32 %v2168_v62, %v3519_v9  ;;  %7832 = vst [vmem:[#allocation19_spill] sm:$0xff] %v3533_v1  ;;  %v1105_v15 = vmul.f32 %v3533_v1, %v3346_v41  ;;  %v3547_v62 = vld [vmem:[#allocation5 + $0xc0] sm:$0xff]  ;;  %v3556_v41 = vld [vmem:[#allocation2 + $0x218] sm:$0xff] }
  0xa3   :  { %7835 = vst [vmem:[#allocation22_spill] sm:$0xff] %v3547_v62 }
  0xa4   :  { %v2170_v50 = vadd.f32 %v2169_v14, %v3522_v60  ;;  %v3549_v14 = vld [vmem:[#allocation2 + $0x210] sm:$0xff] }
  0xa6   :  { %v2171_v0 = vadd.f32 %v2170_v50, %v3525_v31  ;;  %v1107_v50 = vmul.f32 %v3542_v34, %v3352_v45  ;;  %v3570_v34 = vld [vmem:[#allocation2 + $0x228] sm:$0xff] }
  0xa8   :  { %v2172_v13 = vadd.f32 %v2171_v0, %v3528_v22  ;;  %v1616_v0 = vadd.f32 %v1615_v52, %v1105_v15  ;;  %v3567_v15 = vld [vmem:[#allocation5 + $0xd8] sm:$0xff] }
  0xa9   :  { %7838 = vst [vmem:[#allocation25_spill] sm:$0xff] %v3567_v15 }
  0xaa   :  { %v2173_v42 = vadd.f32 %v2172_v13, %v3531_v17  ;;  %v3553_v13 = vld [vmem:[#allocation5 + $0xc8] sm:$0xff]  ;;  %v1617_v1 = vadd.f32 %v1616_v0, %v1106_v39  ;;  %v3574_v0 = vld [vmem:[#allocation5 + $0xe0] sm:$0xff] }
  0xab   :  { %7836 = vst [vmem:[#allocation23_spill] sm:$0xff] %v3553_v13  ;;  %v1109_v45 = vmul.f32 %v3553_v13, %v3358_v49  ;;  %7839 = vst [vmem:[#allocation26_spill] sm:$0xff] %v3574_v0  ;;  %v1111_v49 = vmul.f32 %v3567_v15, %v3364_v53  ;;  %v3584_v13 = vld [vmem:[#allocation2 + $0x238] sm:$0xff]  ;;  %v3598_v15 = vld [vmem:[#allocation2 + $0x248] sm:$0xff] }
  0xac   :  { %v2174_v58 = vadd.f32 %v2173_v42, %v3538_v35  ;;  %v1108_v42 = vmul.f32 %v3547_v62, %v3355_v47  ;;  %v1618_v52 = vadd.f32 %v1617_v1, %v1107_v50  ;;  %v1110_v47 = vmul.f32 %v3560_v26, %v3361_v51  ;;  %v3577_v62 = vld [vmem:[#allocation2 + $0x230] sm:$0xff]  ;;  %v3581_v50 = vld [vmem:[#allocation5 + $0xe8] sm:$0xff]  ;;  %v3591_v26 = vld [vmem:[#allocation2 + $0x240] sm:$0xff] }
  0xad   :  { %7840 = vst [vmem:[#allocation27_spill] sm:$0xff] %v3581_v50  ;;  %v1112_v51 = vmul.f32 %v3574_v0, %v3367_v55  ;;  %v1113_v53 = vmul.f32 %v3581_v50, %v3370_v57  ;;  %v3605_v0 = vld [vmem:[#allocation2 + $0x250] sm:$0xff]  ;;  %v3612_v50 = vld [vmem:[#allocation2 + $0x258] sm:$0xff] }
  0xae   :  { %v2175_v46 = vadd.f32 %v2174_v58, %v3549_v14  ;;  %v1619_v39 = vadd.f32 %v1618_v52, %v1108_v42  ;;  %v3588_v52 = vld [vmem:[#allocation5 + $0xf0] sm:$0xff] }
  0xaf   :  { %7841 = vst [vmem:[#allocation28_spill] sm:$0xff] %v3588_v52  ;;  %v1114_v55 = vmul.f32 %v3588_v52, %v3373_v59  ;;  %v3619_v52 = vld [vmem:[#allocation2 + $0x260] sm:$0xff] }
  0xb0   :  { %v2176_v43 = vadd.f32 %v2175_v46, %v3556_v41  ;;  %v1620_v1 = vadd.f32 %v1619_v39, %v1109_v45  ;;  %v3595_v39 = vld [vmem:[#allocation5 + $0xf8] sm:$0xff] }
  0xb1   :  { %7842 = vst [vmem:[#allocation29_spill] sm:$0xff] %v3595_v39  ;;  %v1115_v57 = vmul.f32 %v3595_v39, %v3376_v61  ;;  %v3626_v39 = vld [vmem:[#allocation2 + $0x268] sm:$0xff] }
  0xb2   :  { %v2177_v58 = vadd.f32 %v2176_v43, %v3563_v6  ;;  %v1621_v42 = vadd.f32 %v1620_v1, %v1110_v47  ;;  %v3602_v1 = vld [vmem:[#allocation5 + $0x100] sm:$0xff] }
  0xb3   :  { %7843 = vst [vmem:[#allocation30_spill] sm:$0xff] %v3602_v1  ;;  %v1116_v59 = vmul.f32 %v3602_v1, %v3379_v63  ;;  %v3633_v1 = vld [vmem:[#allocation2 + $0x270] sm:$0xff] }
  0xb4   :  { %v2178_v46 = vadd.f32 %v2177_v58, %v3570_v34  ;;  %v1622_v45 = vadd.f32 %v1621_v42, %v1111_v49  ;;  %v3609_v42 = vld [vmem:[#allocation5 + $0x108] sm:$0xff] }
  0xb5   :  { %7844 = vst [vmem:[#allocation31_spill] sm:$0xff] %v3609_v42  ;;  %v1117_v61 = vmul.f32 %v3609_v42, %v3382_v4  ;;  %v3640_v42 = vld [vmem:[#allocation2 + $0x278] sm:$0xff] }
  0xb6   :  { %v2179_v43 = vadd.f32 %v2178_v46, %v3577_v62  ;;  %v1623_v47 = vadd.f32 %v1622_v45, %v1112_v51  ;;  %v3616_v45 = vld [vmem:[#allocation5 + $0x110] sm:$0xff] }
  0xb7   :  { %7845 = vst [vmem:[#allocation32_spill] sm:$0xff] %v3616_v45  ;;  %v1118_v63 = vmul.f32 %v3616_v45, %v3385_v8  ;;  %v3647_v45 = vld [vmem:[#allocation2 + $0x280] sm:$0xff] }
  0xb8   :  { %v2180_v58 = vadd.f32 %v2179_v43, %v3584_v13  ;;  %v1624_v49 = vadd.f32 %v1623_v47, %v1113_v53  ;;  %v3623_v47 = vld [vmem:[#allocation5 + $0x118] sm:$0xff] }
  0xb9   :  { %7846 = vst [vmem:[#allocation33_spill] sm:$0xff] %v3623_v47  ;;  %v1119_v4 = vmul.f32 %v3623_v47, %v3388_v12  ;;  %v3654_v47 = vld [vmem:[#allocation2 + $0x288] sm:$0xff] }
  0xba   :  { %v2181_v46 = vadd.f32 %v2180_v58, %v3591_v26  ;;  %v1625_v51 = vadd.f32 %v1624_v49, %v1114_v55  ;;  %v3630_v49 = vld [vmem:[#allocation5 + $0x120] sm:$0xff] }
  0xbb   :  { %7847 = vst [vmem:[#allocation34_spill] sm:$0xff] %v3630_v49  ;;  %v1120_v8 = vmul.f32 %v3630_v49, %v3391_v16  ;;  %v3661_v49 = vld [vmem:[#allocation2 + $0x290] sm:$0xff] }
  0xbc   :  { %v2182_v43 = vadd.f32 %v2181_v46, %v3598_v15  ;;  %v1626_v53 = vadd.f32 %v1625_v51, %v1115_v57  ;;  %v3637_v51 = vld [vmem:[#allocation5 + $0x128] sm:$0xff] }
  0xbd   :  { %7848 = vst [vmem:[#allocation35_spill] sm:$0xff] %v3637_v51  ;;  %v1121_v12 = vmul.f32 %v3637_v51, %v3394_v20  ;;  %v3668_v51 = vld [vmem:[#allocation2 + $0x298] sm:$0xff] }
  0xbe   :  { %v2183_v58 = vadd.f32 %v2182_v43, %v3605_v0  ;;  %v1627_v55 = vadd.f32 %v1626_v53, %v1116_v59  ;;  %v3644_v53 = vld [vmem:[#allocation5 + $0x130] sm:$0xff] }
  0xbf   :  { %7849 = vst [vmem:[#allocation36_spill] sm:$0xff] %v3644_v53  ;;  %v1122_v16 = vmul.f32 %v3644_v53, %v3397_v24  ;;  %v3675_v53 = vld [vmem:[#allocation2 + $0x2a0] sm:$0xff] }
  0xc0   :  { %v2184_v46 = vadd.f32 %v2183_v58, %v3612_v50  ;;  %v1628_v57 = vadd.f32 %v1627_v55, %v1117_v61  ;;  %v3651_v55 = vld [vmem:[#allocation5 + $0x138] sm:$0xff]  ;;  %7854 = vst [vmem:[#allocation41_spill] sm:$0xff] %v3675_v53 }
  0xc1   :  { %7850 = vst [vmem:[#allocation37_spill] sm:$0xff] %v3651_v55  ;;  %v1123_v20 = vmul.f32 %v3651_v55, %v3400_v28  ;;  %v3682_v55 = vld [vmem:[#allocation2 + $0x2a8] sm:$0xff] }
  0xc2   :  { %v2185_v43 = vadd.f32 %v2184_v46, %v3619_v52  ;;  %v1629_v59 = vadd.f32 %v1628_v57, %v1118_v63  ;;  %v3658_v57 = vld [vmem:[#allocation5 + $0x140] sm:$0xff]  ;;  %7856 = vst [vmem:[#allocation43_spill] sm:$0xff] %v3682_v55 }
  0xc3   :  { %7851 = vst [vmem:[#allocation38_spill] sm:$0xff] %v3658_v57  ;;  %v1124_v24 = vmul.f32 %v3658_v57, %v3403_v32  ;;  %v3689_v57 = vld [vmem:[#allocation2 + $0x2b0] sm:$0xff] }
  0xc4   :  { %v2186_v58 = vadd.f32 %v2185_v43, %v3626_v39  ;;  %v1630_v61 = vadd.f32 %v1629_v59, %v1119_v4  ;;  %v3665_v59 = vld [vmem:[#allocation5 + $0x148] sm:$0xff]  ;;  %7858 = vst [vmem:[#allocation45_spill] sm:$0xff] %v3689_v57 }
  0xc5   :  { %7852 = vst [vmem:[#allocation39_spill] sm:$0xff] %v3665_v59  ;;  %v1125_v28 = vmul.f32 %v3665_v59, %v3406_v36  ;;  %v3696_v59 = vld [vmem:[#allocation2 + $0x2b8] sm:$0xff] }
  0xc6   :  { %v2187_v46 = vadd.f32 %v2186_v58, %v3633_v1  ;;  %v1631_v63 = vadd.f32 %v1630_v61, %v1120_v8  ;;  %v3672_v61 = vld [vmem:[#allocation5 + $0x150] sm:$0xff] }
  0xc7   :  { %7853 = vst [vmem:[#allocation40_spill] sm:$0xff] %v3672_v61  ;;  %v1126_v32 = vmul.f32 %v3672_v61, %v3409_v40  ;;  %v3703_v61 = vld [vmem:[#allocation2 + $0x2c0] sm:$0xff] }
  0xc8   :  { %v2188_v43 = vadd.f32 %v2187_v46, %v3640_v42  ;;  %v1632_v4 = vadd.f32 %v1631_v63, %v1121_v12  ;;  %v3679_v63 = vld [vmem:[#allocation5 + $0x158] sm:$0xff] }
  0xc9   :  { %7855 = vst [vmem:[#allocation42_spill] sm:$0xff] %v3679_v63  ;;  %v1127_v36 = vmul.f32 %v3679_v63, %v3412_v44  ;;  %v3710_v63 = vld [vmem:[#allocation2 + $0x2c8] sm:$0xff] }
  0xca   :  { %v2189_v58 = vadd.f32 %v2188_v43, %v3647_v45  ;;  %v1633_v8 = vadd.f32 %v1632_v4, %v1122_v16  ;;  %v3686_v4 = vld [vmem:[#allocation5 + $0x160] sm:$0xff] }
  0xcb   :  { %7857 = vst [vmem:[#allocation44_spill] sm:$0xff] %v3686_v4 }
  0xcc   :  { %v2190_v46 = vadd.f32 %v2189_v58, %v3654_v47  ;;  %v1634_v12 = vadd.f32 %v1633_v8, %v1123_v20  ;;  %v3693_v8 = vld [vmem:[#allocation5 + $0x168] sm:$0xff] }
  0xcd   :  { %7859 = vst [vmem:[#allocation46_spill] sm:$0xff] %v3693_v8 }
  0xce   :  { %v2191_v43 = vadd.f32 %v2190_v46, %v3661_v49  ;;  %v1635_v16 = vadd.f32 %v1634_v12, %v1124_v24  ;;  %v3700_v12 = vld [vmem:[#allocation5 + $0x170] sm:$0xff] }
  0xd0   :  { %v2192_v58 = vadd.f32 %v2191_v43, %v3668_v51  ;;  %v1636_v20 = vadd.f32 %v1635_v16, %v1125_v28  ;;  %v3707_v16 = vld [vmem:[#allocation5 + $0x178] sm:$0xff] }
  0xd2   :  { %v2193_v46 = vadd.f32 %v2192_v58, %v3675_v53  ;;  %v7860_v53 = vld [vmem:[#allocation11_spill] sm:$0xff]  ;;  %v1637_v24 = vadd.f32 %v1636_v20, %v1126_v32  ;;  %v3714_v20 = vld [vmem:[#allocation5 + $0x180] sm:$0xff] }
  0xd3   :  { %v1128_v40 = vmul.f32 %v3686_v4, %v7860_v53  ;;  %7861 = vst [vmem:[#allocation11_spill] sm:$0xff] %v3700_v12  ;;  %v3717_v4 = vld [vmem:[#allocation2 + $0x2d0] sm:$0xff] }
  0xd4   :  { %v2194_v43 = vadd.f32 %v2193_v46, %v3682_v55  ;;  %v7862_v55 = vld [vmem:[#allocation12_spill] sm:$0xff]  ;;  %v1638_v28 = vadd.f32 %v1637_v24, %v1127_v36  ;;  %v3721_v24 = vld [vmem:[#allocation5 + $0x188] sm:$0xff] }
  0xd5   :  { %v1129_v44 = vmul.f32 %v3693_v8, %v7862_v55  ;;  %7863 = vst [vmem:[#allocation12_spill] sm:$0xff] %v3707_v16  ;;  %v1131_v55 = vmul.f32 %v3707_v16, %v3428_v38  ;;  %7866 = vst [vmem:[#allocation47_spill] sm:$0xff] %v3721_v24  ;;  %v3724_v8 = vld [vmem:[#allocation2 + $0x2d8] sm:$0xff]  ;;  %v1133_v38 = vmul.f32 %v3721_v24, %v3438_v7  ;;  %v3738_v16 = vld [vmem:[#allocation2 + $0x2e8] sm:$0xff] }
  0xd6   :  { %v2195_v58 = vadd.f32 %v2194_v43, %v3689_v57  ;;  %v7864_v57 = vld [vmem:[#allocation13_spill] sm:$0xff]  ;;  %v1639_v32 = vadd.f32 %v1638_v28, %v1128_v40  ;;  %v3728_v28 = vld [vmem:[#allocation5 + $0x190] sm:$0xff]  ;;  %v3752_v24 = vld [vmem:[#allocation2 + $0x2f8] sm:$0xff] }
  0xd7   :  { %v1130_v53 = vmul.f32 %v3700_v12, %v7864_v57  ;;  %7865 = vst [vmem:[#allocation13_spill] sm:$0xff] %v3714_v20  ;;  %v1132_v57 = vmul.f32 %v3714_v20, %v3433_v3  ;;  %7867 = vst [vmem:[#allocation48_spill] sm:$0xff] %v3728_v28  ;;  %v3731_v12 = vld [vmem:[#allocation2 + $0x2e0] sm:$0xff]  ;;  %v1134_v3 = vmul.f32 %v3728_v28, %v3445_v48  ;;  %v3745_v20 = vld [vmem:[#allocation2 + $0x2f0] sm:$0xff] }
  0xd8   :  { %v2196_v46 = vadd.f32 %v2195_v58, %v3696_v59  ;;  %v1640_v36 = vadd.f32 %v1639_v32, %v1129_v44  ;;  %v3735_v32 = vld [vmem:[#allocation5 + $0x198] sm:$0xff]  ;;  %v3759_v28 = vld [vmem:[#allocation2 + $0x300] sm:$0xff] }
  0xd9   :  { %7868 = vst [vmem:[#allocation49_spill] sm:$0xff] %v3735_v32  ;;  %v1135_v7 = vmul.f32 %v3735_v32, %v3456_v56  ;;  %v3766_v32 = vld [vmem:[#allocation2 + $0x308] sm:$0xff] }
  0xda   :  { %v2197_v43 = vadd.f32 %v2196_v46, %v3703_v61  ;;  %v1641_v40 = vadd.f32 %v1640_v36, %v1130_v53  ;;  %v3742_v36 = vld [vmem:[#allocation5 + $0x1a0] sm:$0xff] }
  0xdb   :  { %7869 = vst [vmem:[#allocation50_spill] sm:$0xff] %v3742_v36  ;;  %v1136_v48 = vmul.f32 %v3742_v36, %v3467_v11  ;;  %v3773_v36 = vld [vmem:[#allocation2 + $0x310] sm:$0xff] }
  0xdc   :  { %v2198_v58 = vadd.f32 %v2197_v43, %v3710_v63  ;;  %v1642_v44 = vadd.f32 %v1641_v40, %v1131_v55  ;;  %v3749_v40 = vld [vmem:[#allocation5 + $0x1a8] sm:$0xff] }
  0xdd   :  { %7870 = vst [vmem:[#allocation51_spill] sm:$0xff] %v3749_v40  ;;  %v1137_v56 = vmul.f32 %v3749_v40, %v3478_v2  ;;  %v3780_v40 = vld [vmem:[#allocation2 + $0x318] sm:$0xff] }
  0xde   :  { %v2199_v46 = vadd.f32 %v2198_v58, %v3717_v4  ;;  %v1643_v53 = vadd.f32 %v1642_v44, %v1132_v57  ;;  %v3756_v44 = vld [vmem:[#allocation5 + $0x1b0] sm:$0xff] }
  0xdf   :  { %7871 = vst [vmem:[#allocation52_spill] sm:$0xff] %v3756_v44  ;;  %v1138_v11 = vmul.f32 %v3756_v44, %v3489_v29  ;;  %v3787_v44 = vld [vmem:[#allocation2 + $0x320] sm:$0xff] }
  0xe0   :  { %v2200_v43 = vadd.f32 %v2199_v46, %v3724_v8  ;;  %v1644_v55 = vadd.f32 %v1643_v53, %v1133_v38  ;;  %v3763_v53 = vld [vmem:[#allocation5 + $0x1b8] sm:$0xff] }
  0xe1   :  { %7872 = vst [vmem:[#allocation53_spill] sm:$0xff] %v3763_v53  ;;  %v1139_v2 = vmul.f32 %v3763_v53, %v3500_v33  ;;  %v3794_v53 = vld [vmem:[#allocation2 + $0x328] sm:$0xff] }
  0xe2   :  { %v2201_v58 = vadd.f32 %v2200_v43, %v3731_v12  ;;  %v1645_v57 = vadd.f32 %v1644_v55, %v1134_v3  ;;  %v3770_v55 = vld [vmem:[#allocation5 + $0x1c0] sm:$0xff] }
  0xe3   :  { %7873 = vst [vmem:[#allocation54_spill] sm:$0xff] %v3770_v55  ;;  %v1140_v29 = vmul.f32 %v3770_v55, %v3505_v10  ;;  %v3801_v55 = vld [vmem:[#allocation2 + $0x330] sm:$0xff] }
  0xe4   :  { %v2202_v46 = vadd.f32 %v2201_v58, %v3738_v16  ;;  %v1646_v38 = vadd.f32 %v1645_v57, %v1135_v7  ;;  %v3777_v57 = vld [vmem:[#allocation5 + $0x1c8] sm:$0xff] }
  0xe5   :  { %7874 = vst [vmem:[#allocation55_spill] sm:$0xff] %v3777_v57  ;;  %v1141_v33 = vmul.f32 %v3777_v57, %v3510_v37  ;;  %v3808_v57 = vld [vmem:[#allocation2 + $0x338] sm:$0xff] }
  0xe6   :  { %v2203_v43 = vadd.f32 %v2202_v46, %v3745_v20  ;;  %v1647_v3 = vadd.f32 %v1646_v38, %v1136_v48  ;;  %v3784_v38 = vld [vmem:[#allocation5 + $0x1d0] sm:$0xff] }
  0xe7   :  { %7875 = vst [vmem:[#allocation56_spill] sm:$0xff] %v3784_v38  ;;  %v1142_v10 = vmul.f32 %v3784_v38, %v3513_v54  ;;  %v3815_v38 = vld [vmem:[#allocation2 + $0x340] sm:$0xff] }
  0xe8   :  { %v2204_v58 = vadd.f32 %v2203_v43, %v3752_v24  ;;  %v1648_v7 = vadd.f32 %v1647_v3, %v1137_v56  ;;  %v3791_v3 = vld [vmem:[#allocation5 + $0x1d8] sm:$0xff] }
  0xe9   :  { %7876 = vst [vmem:[#allocation57_spill] sm:$0xff] %v3791_v3  ;;  %v1143_v37 = vmul.f32 %v3791_v3, %v3516_v18  ;;  %v3822_v3 = vld [vmem:[#allocation2 + $0x348] sm:$0xff] }
  0xea   :  { %v2205_v46 = vadd.f32 %v2204_v58, %v3759_v28  ;;  %v1649_v48 = vadd.f32 %v1648_v7, %v1138_v11  ;;  %v3798_v7 = vld [vmem:[#allocation5 + $0x1e0] sm:$0xff] }
  0xeb   :  { %7877 = vst [vmem:[#allocation58_spill] sm:$0xff] %v3798_v7  ;;  %v1144_v54 = vmul.f32 %v3798_v7, %v3519_v9  ;;  %v3829_v7 = vld [vmem:[#allocation2 + $0x350] sm:$0xff] }
  0xec   :  { %v2206_v43 = vadd.f32 %v2205_v46, %v3766_v32  ;;  %v1650_v56 = vadd.f32 %v1649_v48, %v1139_v2  ;;  %v3805_v48 = vld [vmem:[#allocation5 + $0x1e8] sm:$0xff] }
  0xed   :  { %7878 = vst [vmem:[#allocation59_spill] sm:$0xff] %v3805_v48  ;;  %v1145_v18 = vmul.f32 %v3805_v48, %v3522_v60  ;;  %v3836_v48 = vld [vmem:[#allocation2 + $0x358] sm:$0xff] }
  0xee   :  { %v2207_v58 = vadd.f32 %v2206_v43, %v3773_v36  ;;  %v1651_v11 = vadd.f32 %v1650_v56, %v1140_v29  ;;  %v3812_v56 = vld [vmem:[#allocation5 + $0x1f0] sm:$0xff] }
  0xef   :  { %7879 = vst [vmem:[#allocation60_spill] sm:$0xff] %v3812_v56  ;;  %v1146_v9 = vmul.f32 %v3812_v56, %v3525_v31  ;;  %v3843_v56 = vld [vmem:[#allocation2 + $0x360] sm:$0xff] }
  0xf0   :  { %v2208_v46 = vadd.f32 %v2207_v58, %v3780_v40  ;;  %v1652_v2 = vadd.f32 %v1651_v11, %v1141_v33  ;;  %v3819_v11 = vld [vmem:[#allocation5 + $0x1f8] sm:$0xff] }
  0xf1   :  { %7880 = vst [vmem:[#allocation61_spill] sm:$0xff] %v3819_v11  ;;  %v1147_v60 = vmul.f32 %v3819_v11, %v3528_v22  ;;  %v3850_v11 = vld [vmem:[#allocation2 + $0x368] sm:$0xff] }
  0xf2   :  { %v2209_v43 = vadd.f32 %v2208_v46, %v3787_v44  ;;  %v1653_v29 = vadd.f32 %v1652_v2, %v1142_v10  ;;  %v3826_v2 = vld [vmem:[#allocation5 + $0x200] sm:$0xff]  ;;  %7885 = vst [vmem:[#allocation66_spill] sm:$0xff] %v3850_v11 }
  0xf3   :  { %7881 = vst [vmem:[#allocation62_spill] sm:$0xff] %v3826_v2  ;;  %v1148_v31 = vmul.f32 %v3826_v2, %v3531_v17  ;;  %v3857_v2 = vld [vmem:[#allocation2 + $0x370] sm:$0xff] }
  0xf4   :  { %v2210_v58 = vadd.f32 %v2209_v43, %v3794_v53  ;;  %v1654_v33 = vadd.f32 %v1653_v29, %v1143_v37  ;;  %v3833_v29 = vld [vmem:[#allocation5 + $0x208] sm:$0xff] }
  0xf5   :  { %7882 = vst [vmem:[#allocation63_spill] sm:$0xff] %v3833_v29  ;;  %v1149_v22 = vmul.f32 %v3833_v29, %v3538_v35  ;;  %v3864_v29 = vld [vmem:[#allocation2 + $0x378] sm:$0xff] }
  0xf6   :  { %v2211_v46 = vadd.f32 %v2210_v58, %v3801_v55  ;;  %v1655_v10 = vadd.f32 %v1654_v33, %v1144_v54  ;;  %v3840_v33 = vld [vmem:[#allocation5 + $0x210] sm:$0xff]  ;;  %7888 = vst [vmem:[#allocation69_spill] sm:$0xff] %v3864_v29 }
  0xf7   :  { %7883 = vst [vmem:[#allocation64_spill] sm:$0xff] %v3840_v33  ;;  %v1150_v17 = vmul.f32 %v3840_v33, %v3549_v14  ;;  %v2633_v33 = vadd.f32 %v3507_v27, %v3442_v30  ;;  %v7891_v27 = vld [vmem:[#allocation15_spill] sm:$0xff] }
  0xf8   :  { %v2212_v43 = vadd.f32 %v2211_v46, %v3808_v57  ;;  %v1656_v37 = vadd.f32 %v1655_v10, %v1145_v18  ;;  %v3847_v10 = vld [vmem:[#allocation5 + $0x218] sm:$0xff] }
  0xf9   :  { %7884 = vst [vmem:[#allocation65_spill] sm:$0xff] %v3847_v10  ;;  %v1151_v35 = vmul.f32 %v3847_v10, %v3556_v41  ;;  %v7889_v10 = vld [vmem:[#allocation14_spill] sm:$0xff] }
  0xfa   :  { %v2213_v58 = vadd.f32 %v2212_v43, %v3815_v38  ;;  %v1657_v54 = vadd.f32 %v1656_v37, %v1146_v9  ;;  %v3854_v37 = vld [vmem:[#allocation5 + $0x220] sm:$0xff] }
  0xfb   :  { %7886 = vst [vmem:[#allocation67_spill] sm:$0xff] %v3854_v37  ;;  %v1152_v14 = vmul.f32 %v3854_v37, %v3563_v6  ;;  %v2634_v6 = vadd.f32 %v2633_v33, %v7889_v10  ;;  %v3885_v37 = vld [vmem:[#allocation5 + $0x240] sm:$0xff] }
  0xfc   :  { %v2214_v46 = vadd.f32 %v2213_v58, %v3822_v3  ;;  %v1658_v18 = vadd.f32 %v1657_v54, %v1147_v60  ;;  %v3861_v54 = vld [vmem:[#allocation5 + $0x228] sm:$0xff]  ;;  %7890 = vst [vmem:[#allocation14_spill] sm:$0xff] %v3885_v37  ;;  %v7893_v10 = vld [vmem:[#allocation16_spill] sm:$0xff] }
  0xfd   :  { %7887 = vst [vmem:[#allocation68_spill] sm:$0xff] %v3861_v54  ;;  %v1153_v41 = vmul.f32 %v3861_v54, %v3570_v34  ;;  %v3889_v34 = vld [vmem:[#allocation2 + $0x390] sm:$0xff] }
  0xfe   :  { %v2215_v43 = vadd.f32 %v2214_v46, %v3829_v7  ;;  %v1659_v9 = vadd.f32 %v1658_v18, %v1148_v31  ;;  %v3868_v18 = vld [vmem:[#allocation5 + $0x230] sm:$0xff] }
 0x100   :  { %v2216_v58 = vadd.f32 %v2215_v43, %v3836_v48  ;;  %v1660_v60 = vadd.f32 %v1659_v9, %v1149_v22  ;;  %v3877_v9 = vld [vmem:[#allocation5 + $0x238] sm:$0xff] }
 0x102   :  { %v2217_v46 = vadd.f32 %v2216_v58, %v3843_v56  ;;  %v1661_v31 = vadd.f32 %v1660_v60, %v1150_v17  ;;  %v3881_v17 = vld [vmem:[#allocation2 + $0x388] sm:$0xff]  ;;  %v1154_v60 = vmul.f32 %v3868_v18, %v3577_v62  ;;  %v3897_v62 = vld [vmem:[#allocation2 + $0x398] sm:$0xff] }
 0x104   :  { %v2218_v43 = vadd.f32 %v2217_v46, %v3850_v11  ;;  %v3873_v11 = vld [vmem:[#allocation2 + $0x380] sm:$0xff]  ;;  %v1662_v22 = vadd.f32 %v1661_v31, %v1151_v35  ;;  %v1155_v35 = vmul.f32 %v3877_v9, %v3584_v13 }
 0x105   :  { %v3905_v13 = vld [vmem:[#allocation2 + $0x3a0] sm:$0xff] }
 0x106   :  { %v2219_v58 = vadd.f32 %v2218_v43, %v3857_v2 }
 0x108   :  { %v2220_v46 = vadd.f32 %v2219_v58, %v3864_v29  ;;  %v1663_v58 = vadd.f32 %v1662_v22, %v1152_v14  ;;  %v2635_v29 = vadd.f32 %v2634_v6, %v7891_v27  ;;  %v1156_v14 = vmul.f32 %v3885_v37, %v3591_v26  ;;  %v3913_v26 = vld [vmem:[#allocation2 + $0x3a8] sm:$0xff] }
 0x10a   :  { %v2221_v43 = vadd.f32 %v2220_v46, %v3873_v11  ;;  %v1664_v31 = vadd.f32 %v1663_v58, %v1153_v41  ;;  %v3893_v46 = vld [vmem:[#allocation5 + $0x248] sm:$0xff]  ;;  %v2636_v54 = vadd.f32 %v2635_v29, %v7893_v10 }
 0x10b   :  { %7892 = vst [vmem:[#allocation15_spill] sm:$0xff] %v3893_v46  ;;  %v1157_v41 = vmul.f32 %v3893_v46, %v3598_v15  ;;  %v3921_v15 = vld [vmem:[#allocation2 + $0x3b0] sm:$0xff] }
 0x10c   :  { %v2222_v30 = vadd.f32 %v2221_v43, %v3881_v17  ;;  %v1665_v22 = vadd.f32 %v1664_v31, %v1154_v60  ;;  %v3901_v43 = vld [vmem:[#allocation5 + $0x250] sm:$0xff]  ;;  %v2637_v27 = vadd.f32 %v2636_v54, %v3463_v19 }
 0x10d   :  { %7894 = vst [vmem:[#allocation16_spill] sm:$0xff] %v3901_v43  ;;  %v1158_v60 = vmul.f32 %v3901_v43, %v3605_v0  ;;  %v3929_v0 = vld [vmem:[#allocation2 + $0x3b8] sm:$0xff] }
 0x10e   :  { %v2223_v33 = vadd.f32 %v2222_v30, %v3889_v34  ;;  %v1666_v58 = vadd.f32 %v1665_v22, %v1155_v35  ;;  %v3909_v30 = vld [vmem:[#allocation5 + $0x258] sm:$0xff]  ;;  %v2638_v10 = vadd.f32 %v2637_v27, %v3469_v21 }
 0x10f   :  { %7895 = vst [vmem:[#allocation70_spill] sm:$0xff] %v3909_v30  ;;  %v1159_v35 = vmul.f32 %v3909_v30, %v3612_v50  ;;  %v3937_v50 = vld [vmem:[#allocation2 + $0x3c0] sm:$0xff] }
 0x110   :  { %v2224_v6 = vadd.f32 %v2223_v33, %v3897_v62  ;;  %v1667_v31 = vadd.f32 %v1666_v58, %v1156_v14  ;;  %v3917_v33 = vld [vmem:[#allocation5 + $0x260] sm:$0xff]  ;;  %v2639_v54 = vadd.f32 %v2638_v10, %v3474_v23 }
 0x111   :  { %7896 = vst [vmem:[#allocation71_spill] sm:$0xff] %v3917_v33  ;;  %v1160_v14 = vmul.f32 %v3917_v33, %v3619_v52  ;;  %v3945_v52 = vld [vmem:[#allocation2 + $0x3c8] sm:$0xff] }
 0x112   :  { %v2225_v29 = vadd.f32 %v2224_v6, %v3905_v13  ;;  %v1668_v22 = vadd.f32 %v1667_v31, %v1157_v41  ;;  %v3925_v6 = vld [vmem:[#allocation5 + $0x268] sm:$0xff]  ;;  %v2640_v27 = vadd.f32 %v2639_v54, %v3480_v25 }
 0x113   :  { %7897 = vst [vmem:[#allocation72_spill] sm:$0xff] %v3925_v6  ;;  %v1161_v41 = vmul.f32 %v3925_v6, %v3626_v39  ;;  %v7900_v54 = vld [vmem:[#allocation17_spill] sm:$0xff]  ;;  %v3953_v39 = vld [vmem:[#allocation2 + $0x3d0] sm:$0xff] }
 0x114   :  { %v2226_v19 = vadd.f32 %v2225_v29, %v3913_v26  ;;  %v1669_v58 = vadd.f32 %v1668_v22, %v1158_v60  ;;  %v3933_v29 = vld [vmem:[#allocation5 + $0x270] sm:$0xff]  ;;  %v2641_v10 = vadd.f32 %v2640_v27, %v3485_v5 }
 0x115   :  { %7898 = vst [vmem:[#allocation73_spill] sm:$0xff] %v3933_v29  ;;  %v1162_v60 = vmul.f32 %v3933_v29, %v3633_v1  ;;  %v7902_v27 = vld [vmem:[#allocation18_spill] sm:$0xff]  ;;  %v3961_v1 = vld [vmem:[#allocation2 + $0x3d8] sm:$0xff] }
 0x116   :  { %v2227_v21 = vadd.f32 %v2226_v19, %v3921_v15  ;;  %v1670_v31 = vadd.f32 %v1669_v58, %v1159_v35  ;;  %v3941_v19 = vld [vmem:[#allocation5 + $0x278] sm:$0xff]  ;;  %v2642_v30 = vadd.f32 %v2641_v10, %v7900_v54 }
 0x117   :  { %7899 = vst [vmem:[#allocation74_spill] sm:$0xff] %v3941_v19  ;;  %v1163_v35 = vmul.f32 %v3941_v19, %v3640_v42  ;;  %v7904_v54 = vld [vmem:[#allocation19_spill] sm:$0xff]  ;;  %v3969_v42 = vld [vmem:[#allocation2 + $0x3e0] sm:$0xff] }
 0x118   :  { %v2228_v23 = vadd.f32 %v2227_v21, %v3929_v0  ;;  %v1671_v22 = vadd.f32 %v1670_v31, %v1160_v14  ;;  %v3949_v21 = vld [vmem:[#allocation5 + $0x280] sm:$0xff]  ;;  %v2643_v33 = vadd.f32 %v2642_v30, %v7902_v27 }
 0x119   :  { %7901 = vst [vmem:[#allocation17_spill] sm:$0xff] %v3949_v21  ;;  %v1164_v14 = vmul.f32 %v3949_v21, %v3647_v45  ;;  %v7906_v27 = vld [vmem:[#allocation20_spill] sm:$0xff]  ;;  %v3977_v45 = vld [vmem:[#allocation2 + $0x3e8] sm:$0xff] }
 0x11a   :  { %v2229_v25 = vadd.f32 %v2228_v23, %v3937_v50  ;;  %v1672_v58 = vadd.f32 %v1671_v22, %v1161_v41  ;;  %v3957_v23 = vld [vmem:[#allocation5 + $0x288] sm:$0xff]  ;;  %v2644_v6 = vadd.f32 %v2643_v33, %v7904_v54 }
 0x11b   :  { %7903 = vst [vmem:[#allocation18_spill] sm:$0xff] %v3957_v23  ;;  %v1165_v41 = vmul.f32 %v3957_v23, %v3654_v47  ;;  %v7908_v54 = vld [vmem:[#allocation21_spill] sm:$0xff]  ;;  %v3985_v47 = vld [vmem:[#allocation2 + $0x3f0] sm:$0xff] }
 0x11c   :  { %v2230_v5 = vadd.f32 %v2229_v25, %v3945_v52  ;;  %v1673_v31 = vadd.f32 %v1672_v58, %v1162_v60  ;;  %v3965_v25 = vld [vmem:[#allocation5 + $0x290] sm:$0xff]  ;;  %v2645_v29 = vadd.f32 %v2644_v6, %v7906_v27 }
 0x11d   :  { %7905 = vst [vmem:[#allocation19_spill] sm:$0xff] %v3965_v25  ;;  %v1166_v60 = vmul.f32 %v3965_v25, %v3661_v49  ;;  %v7910_v27 = vld [vmem:[#allocation22_spill] sm:$0xff]  ;;  %v3993_v49 = vld [vmem:[#allocation2 + $0x3f8] sm:$0xff] }
 0x11e   :  { %v2231_v10 = vadd.f32 %v2230_v5, %v3953_v39  ;;  %v1674_v22 = vadd.f32 %v1673_v31, %v1163_v35  ;;  %v3973_v5 = vld [vmem:[#allocation5 + $0x298] sm:$0xff]  ;;  %v2646_v19 = vadd.f32 %v2645_v29, %v7908_v54  ;;  %v3997_v25 = vld [vmem:[#allocation5 + $0x2b0] sm:$0xff] }
 0x11f   :  { %7907 = vst [vmem:[#allocation20_spill] sm:$0xff] %v3973_v5  ;;  %v1167_v35 = vmul.f32 %v3973_v5, %v3668_v51  ;;  %v7912_v54 = vld [vmem:[#allocation23_spill] sm:$0xff]  ;;  %v4001_v51 = vld [vmem:[#allocation2 + $0x400] sm:$0xff] }
 0x120   :  { %v2232_v30 = vadd.f32 %v2231_v10, %v3961_v1  ;;  %v1675_v58 = vadd.f32 %v1674_v22, %v1164_v14  ;;  %v3981_v10 = vld [vmem:[#allocation5 + $0x2a0] sm:$0xff]  ;;  %v2647_v21 = vadd.f32 %v2646_v19, %v7910_v27  ;;  %v7913_v14 = vld [vmem:[#allocation41_spill] sm:$0xff]  ;;  %7914 = vst [vmem:[#allocation23_spill] sm:$0xff] %v3997_v25  ;;  %v4005_v5 = vld [vmem:[#allocation5 + $0x2b8] sm:$0xff] }
 0x121   :  { %7909 = vst [vmem:[#allocation21_spill] sm:$0xff] %v3981_v10  ;;  %v1168_v22 = vmul.f32 %v3981_v10, %v7913_v14  ;;  %v7915_v27 = vld [vmem:[#allocation24_spill] sm:$0xff]  ;;  %7917 = vst [vmem:[#allocation41_spill] sm:$0xff] %v4005_v5  ;;  %v4009_v14 = vld [vmem:[#allocation2 + $0x408] sm:$0xff] }
 0x122   :  { %v2233_v33 = vadd.f32 %v2232_v30, %v3969_v42  ;;  %v1676_v31 = vadd.f32 %v1675_v58, %v1165_v41  ;;  %v3989_v30 = vld [vmem:[#allocation5 + $0x2a8] sm:$0xff]  ;;  %v2648_v23 = vadd.f32 %v2647_v21, %v7912_v54  ;;  %v7916_v41 = vld [vmem:[#allocation43_spill] sm:$0xff]  ;;  %v4013_v10 = vld [vmem:[#allocation5 + $0x2c0] sm:$0xff] }
 0x123   :  { %7911 = vst [vmem:[#allocation22_spill] sm:$0xff] %v3989_v30  ;;  %v1169_v58 = vmul.f32 %v3989_v30, %v7916_v41  ;;  %v7918_v54 = vld [vmem:[#allocation25_spill] sm:$0xff]  ;;  %7920 = vst [vmem:[#allocation24_spill] sm:$0xff] %v4013_v10  ;;  %v4017_v41 = vld [vmem:[#allocation2 + $0x410] sm:$0xff] }
 0x124   :  { %v2234_v6 = vadd.f32 %v2233_v33, %v3977_v45  ;;  %v1677_v33 = vadd.f32 %v1676_v31, %v1166_v60  ;;  %v2649_v43 = vadd.f32 %v2648_v23, %v7915_v27  ;;  %v7919_v60 = vld [vmem:[#allocation45_spill] sm:$0xff]  ;;  %v7921_v27 = vld [vmem:[#allocation26_spill] sm:$0xff] }
 0x125   :  { %v1170_v31 = vmul.f32 %v3997_v25, %v7919_v60  ;;  %v4025_v60 = vld [vmem:[#allocation2 + $0x418] sm:$0xff] }
 0x126   :  { %v2235_v29 = vadd.f32 %v2234_v6, %v3985_v47  ;;  %v1678_v6 = vadd.f32 %v1677_v33, %v1167_v35  ;;  %v2650_v46 = vadd.f32 %v2649_v43, %v7918_v54  ;;  %v1171_v35 = vmul.f32 %v4005_v5, %v3696_v59  ;;  %v7923_v54 = vld [vmem:[#allocation27_spill] sm:$0xff]  ;;  %v4033_v59 = vld [vmem:[#allocation2 + $0x420] sm:$0xff] }
 0x128   :  { %v2236_v19 = vadd.f32 %v2235_v29, %v3993_v49  ;;  %v1679_v29 = vadd.f32 %v1678_v6, %v1168_v22  ;;  %v2651_v37 = vadd.f32 %v2650_v46, %v7921_v27  ;;  %v1172_v22 = vmul.f32 %v4013_v10, %v3703_v61  ;;  %v7925_v27 = vld [vmem:[#allocation28_spill] sm:$0xff]  ;;  %v4041_v61 = vld [vmem:[#allocation2 + $0x428] sm:$0xff] }
 0x12a   :  { %v2237_v21 = vadd.f32 %v2236_v19, %v4001_v51  ;;  %v1680_v33 = vadd.f32 %v1679_v29, %v1169_v58  ;;  %v4021_v19 = vld [vmem:[#allocation5 + $0x2c8] sm:$0xff]  ;;  %v2652_v30 = vadd.f32 %v2651_v37, %v7923_v54 }
 0x12b   :  { %7922 = vst [vmem:[#allocation43_spill] sm:$0xff] %v4021_v19  ;;  %v1173_v58 = vmul.f32 %v4021_v19, %v3710_v63  ;;  %v7927_v54 = vld [vmem:[#allocation29_spill] sm:$0xff]  ;;  %v4049_v63 = vld [vmem:[#allocation2 + $0x430] sm:$0xff] }
 0x12c   :  { %v2238_v23 = vadd.f32 %v2237_v21, %v4009_v14  ;;  %v1681_v6 = vadd.f32 %v1680_v33, %v1170_v31  ;;  %v4029_v21 = vld [vmem:[#allocation5 + $0x2d0] sm:$0xff]  ;;  %v2653_v25 = vadd.f32 %v2652_v30, %v7925_v27 }
 0x12d   :  { %7924 = vst [vmem:[#allocation25_spill] sm:$0xff] %v4029_v21  ;;  %v1174_v31 = vmul.f32 %v4029_v21, %v3717_v4  ;;  %v7929_v27 = vld [vmem:[#allocation30_spill] sm:$0xff]  ;;  %v4057_v4 = vld [vmem:[#allocation2 + $0x438] sm:$0xff] }
 0x12e   :  { %v2239_v43 = vadd.f32 %v2238_v23, %v4017_v41  ;;  %v1682_v29 = vadd.f32 %v1681_v6, %v1171_v35  ;;  %v4037_v23 = vld [vmem:[#allocation5 + $0x2d8] sm:$0xff]  ;;  %v2654_v5 = vadd.f32 %v2653_v25, %v7927_v54 }
 0x12f   :  { %7926 = vst [vmem:[#allocation45_spill] sm:$0xff] %v4037_v23  ;;  %v1175_v35 = vmul.f32 %v4037_v23, %v3724_v8  ;;  %v7931_v54 = vld [vmem:[#allocation31_spill] sm:$0xff]  ;;  %v4065_v8 = vld [vmem:[#allocation2 + $0x440] sm:$0xff] }
 0x130   :  { %v2240_v46 = vadd.f32 %v2239_v43, %v4025_v60  ;;  %v1683_v33 = vadd.f32 %v1682_v29, %v1172_v22  ;;  %v4045_v43 = vld [vmem:[#allocation5 + $0x2e0] sm:$0xff]  ;;  %v2655_v10 = vadd.f32 %v2654_v5, %v7929_v27 }
 0x131   :  { %7928 = vst [vmem:[#allocation26_spill] sm:$0xff] %v4045_v43  ;;  %v1176_v22 = vmul.f32 %v4045_v43, %v3731_v12  ;;  %v7933_v27 = vld [vmem:[#allocation32_spill] sm:$0xff]  ;;  %v4073_v12 = vld [vmem:[#allocation2 + $0x448] sm:$0xff] }
 0x132   :  { %v2241_v37 = vadd.f32 %v2240_v46, %v4033_v59  ;;  %v1684_v6 = vadd.f32 %v1683_v33, %v1173_v58  ;;  %v4053_v46 = vld [vmem:[#allocation5 + $0x2e8] sm:$0xff]  ;;  %v2656_v19 = vadd.f32 %v2655_v10, %v7931_v54 }
 0x133   :  { %7930 = vst [vmem:[#allocation27_spill] sm:$0xff] %v4053_v46  ;;  %v1177_v58 = vmul.f32 %v4053_v46, %v3738_v16  ;;  %v7935_v54 = vld [vmem:[#allocation33_spill] sm:$0xff]  ;;  %v4081_v16 = vld [vmem:[#allocation2 + $0x450] sm:$0xff] }
 0x134   :  { %v2242_v30 = vadd.f32 %v2241_v37, %v4041_v61  ;;  %v1685_v29 = vadd.f32 %v1684_v6, %v1174_v31  ;;  %v4061_v37 = vld [vmem:[#allocation5 + $0x2f0] sm:$0xff]  ;;  %v2657_v21 = vadd.f32 %v2656_v19, %v7933_v27 }
 0x135   :  { %7932 = vst [vmem:[#allocation28_spill] sm:$0xff] %v4061_v37  ;;  %v1178_v31 = vmul.f32 %v4061_v37, %v3745_v20  ;;  %v7937_v27 = vld [vmem:[#allocation34_spill] sm:$0xff]  ;;  %v4089_v20 = vld [vmem:[#allocation2 + $0x458] sm:$0xff] }
 0x136   :  { %v2243_v25 = vadd.f32 %v2242_v30, %v4049_v63  ;;  %v1686_v33 = vadd.f32 %v1685_v29, %v1175_v35  ;;  %v4069_v30 = vld [vmem:[#allocation5 + $0x2f8] sm:$0xff]  ;;  %v2658_v23 = vadd.f32 %v2657_v21, %v7935_v54 }
 0x137   :  { %7934 = vst [vmem:[#allocation29_spill] sm:$0xff] %v4069_v30  ;;  %v1179_v35 = vmul.f32 %v4069_v30, %v3752_v24  ;;  %v7939_v54 = vld [vmem:[#allocation35_spill] sm:$0xff]  ;;  %v4097_v24 = vld [vmem:[#allocation2 + $0x460] sm:$0xff] }
 0x138   :  { %v2244_v5 = vadd.f32 %v2243_v25, %v4057_v4  ;;  %v1687_v6 = vadd.f32 %v1686_v33, %v1176_v22  ;;  %v4077_v25 = vld [vmem:[#allocation5 + $0x300] sm:$0xff]  ;;  %v2659_v43 = vadd.f32 %v2658_v23, %v7937_v27 }
 0x139   :  { %7936 = vst [vmem:[#allocation30_spill] sm:$0xff] %v4077_v25  ;;  %v1180_v22 = vmul.f32 %v4077_v25, %v3759_v28  ;;  %v7941_v27 = vld [vmem:[#allocation36_spill] sm:$0xff]  ;;  %v4105_v28 = vld [vmem:[#allocation2 + $0x468] sm:$0xff] }
 0x13a   :  { %v2245_v10 = vadd.f32 %v2244_v5, %v4065_v8  ;;  %v1688_v29 = vadd.f32 %v1687_v6, %v1177_v58  ;;  %v4085_v5 = vld [vmem:[#allocation5 + $0x308] sm:$0xff]  ;;  %v2660_v46 = vadd.f32 %v2659_v43, %v7939_v54 }
 0x13b   :  { %7938 = vst [vmem:[#allocation31_spill] sm:$0xff] %v4085_v5  ;;  %v1181_v58 = vmul.f32 %v4085_v5, %v3766_v32  ;;  %v7943_v54 = vld [vmem:[#allocation37_spill] sm:$0xff]  ;;  %v4113_v32 = vld [vmem:[#allocation2 + $0x470] sm:$0xff] }
 0x13c   :  { %v2246_v19 = vadd.f32 %v2245_v10, %v4073_v12  ;;  %v1689_v33 = vadd.f32 %v1688_v29, %v1178_v31  ;;  %v4093_v10 = vld [vmem:[#allocation5 + $0x310] sm:$0xff]  ;;  %v2661_v37 = vadd.f32 %v2660_v46, %v7941_v27 }
 0x13d   :  { %7940 = vst [vmem:[#allocation32_spill] sm:$0xff] %v4093_v10  ;;  %v1182_v31 = vmul.f32 %v4093_v10, %v3773_v36  ;;  %v7945_v27 = vld [vmem:[#allocation38_spill] sm:$0xff]  ;;  %v4121_v36 = vld [vmem:[#allocation2 + $0x478] sm:$0xff] }
 0x13e   :  { %v2247_v21 = vadd.f32 %v2246_v19, %v4081_v16  ;;  %v1690_v6 = vadd.f32 %v1689_v33, %v1179_v35  ;;  %v4101_v19 = vld [vmem:[#allocation5 + $0x318] sm:$0xff]  ;;  %v2662_v30 = vadd.f32 %v2661_v37, %v7943_v54 }
 0x13f   :  { %7942 = vst [vmem:[#allocation33_spill] sm:$0xff] %v4101_v19  ;;  %v1183_v35 = vmul.f32 %v4101_v19, %v3780_v40  ;;  %v7947_v54 = vld [vmem:[#allocation39_spill] sm:$0xff]  ;;  %v4129_v40 = vld [vmem:[#allocation2 + $0x480] sm:$0xff] }
 0x140   :  { %v2248_v23 = vadd.f32 %v2247_v21, %v4089_v20  ;;  %v1691_v29 = vadd.f32 %v1690_v6, %v1180_v22  ;;  %v4109_v21 = vld [vmem:[#allocation5 + $0x320] sm:$0xff]  ;;  %v2663_v25 = vadd.f32 %v2662_v30, %v7945_v27 }
 0x141   :  { %7944 = vst [vmem:[#allocation34_spill] sm:$0xff] %v4109_v21  ;;  %v1184_v22 = vmul.f32 %v4109_v21, %v3787_v44  ;;  %v7949_v27 = vld [vmem:[#allocation40_spill] sm:$0xff]  ;;  %v4137_v44 = vld [vmem:[#allocation2 + $0x488] sm:$0xff] }
 0x142   :  { %v2249_v43 = vadd.f32 %v2248_v23, %v4097_v24  ;;  %v1692_v33 = vadd.f32 %v1691_v29, %v1181_v58  ;;  %v4117_v23 = vld [vmem:[#allocation5 + $0x328] sm:$0xff]  ;;  %v2664_v5 = vadd.f32 %v2663_v25, %v7947_v54  ;;  %v7951_v54 = vld [vmem:[#allocation42_spill] sm:$0xff] }
 0x143   :  { %7946 = vst [vmem:[#allocation35_spill] sm:$0xff] %v4117_v23  ;;  %v1185_v58 = vmul.f32 %v4117_v23, %v3794_v53  ;;  %v4145_v53 = vld [vmem:[#allocation2 + $0x490] sm:$0xff] }
 0x144   :  { %v2250_v46 = vadd.f32 %v2249_v43, %v4105_v28  ;;  %v1693_v6 = vadd.f32 %v1692_v33, %v1182_v31  ;;  %v4125_v43 = vld [vmem:[#allocation5 + $0x330] sm:$0xff]  ;;  %v2665_v10 = vadd.f32 %v2664_v5, %v7949_v27  ;;  %v7953_v27 = vld [vmem:[#allocation44_spill] sm:$0xff] }
 0x145   :  { %7948 = vst [vmem:[#allocation36_spill] sm:$0xff] %v4125_v43  ;;  %v1186_v31 = vmul.f32 %v4125_v43, %v3801_v55  ;;  %v4153_v55 = vld [vmem:[#allocation2 + $0x498] sm:$0xff] }
 0x146   :  { %v2251_v37 = vadd.f32 %v2250_v46, %v4113_v32  ;;  %v1694_v29 = vadd.f32 %v1693_v6, %v1183_v35  ;;  %v4133_v46 = vld [vmem:[#allocation5 + $0x338] sm:$0xff]  ;;  %v2666_v19 = vadd.f32 %v2665_v10, %v7951_v54  ;;  %v7955_v54 = vld [vmem:[#allocation46_spill] sm:$0xff] }
 0x147   :  { %7950 = vst [vmem:[#allocation37_spill] sm:$0xff] %v4133_v46  ;;  %v1187_v35 = vmul.f32 %v4133_v46, %v3808_v57  ;;  %v4161_v57 = vld [vmem:[#allocation2 + $0x4a0] sm:$0xff] }
 0x148   :  { %v2252_v30 = vadd.f32 %v2251_v37, %v4121_v36  ;;  %v1695_v33 = vadd.f32 %v1694_v29, %v1184_v22  ;;  %v4141_v37 = vld [vmem:[#allocation5 + $0x340] sm:$0xff]  ;;  %v2667_v21 = vadd.f32 %v2666_v19, %v7953_v27  ;;  %v7957_v27 = vld [vmem:[#allocation11_spill] sm:$0xff] }
 0x149   :  { %7952 = vst [vmem:[#allocation38_spill] sm:$0xff] %v4141_v37  ;;  %v1188_v22 = vmul.f32 %v4141_v37, %v3815_v38  ;;  %v4169_v38 = vld [vmem:[#allocation2 + $0x4a8] sm:$0xff] }
 0x14a   :  { %v2253_v25 = vadd.f32 %v2252_v30, %v4129_v40  ;;  %v1696_v6 = vadd.f32 %v1695_v33, %v1185_v58  ;;  %v4149_v30 = vld [vmem:[#allocation5 + $0x348] sm:$0xff]  ;;  %v2668_v23 = vadd.f32 %v2667_v21, %v7955_v54  ;;  %v7959_v54 = vld [vmem:[#allocation12_spill] sm:$0xff] }
 0x14b   :  { %7954 = vst [vmem:[#allocation39_spill] sm:$0xff] %v4149_v30  ;;  %v1189_v58 = vmul.f32 %v4149_v30, %v3822_v3  ;;  %v4177_v3 = vld [vmem:[#allocation2 + $0x4b0] sm:$0xff] }
 0x14c   :  { %v2254_v5 = vadd.f32 %v2253_v25, %v4137_v44  ;;  %v1697_v29 = vadd.f32 %v1696_v6, %v1186_v31  ;;  %v4157_v25 = vld [vmem:[#allocation5 + $0x350] sm:$0xff]  ;;  %v2669_v43 = vadd.f32 %v2668_v23, %v7957_v27  ;;  %v7961_v27 = vld [vmem:[#allocation13_spill] sm:$0xff]  ;;  %7962 = vst [vmem:[#allocation46_spill] sm:$0xff] %v4177_v3 }
 0x14d   :  { %7956 = vst [vmem:[#allocation40_spill] sm:$0xff] %v4157_v25  ;;  %v1190_v31 = vmul.f32 %v4157_v25, %v3829_v7  ;;  %v4185_v7 = vld [vmem:[#allocation2 + $0x4b8] sm:$0xff] }
 0x14e   :  { %v2255_v10 = vadd.f32 %v2254_v5, %v4145_v53  ;;  %v1698_v33 = vadd.f32 %v1697_v29, %v1187_v35  ;;  %v4165_v5 = vld [vmem:[#allocation5 + $0x358] sm:$0xff]  ;;  %v2670_v46 = vadd.f32 %v2669_v43, %v7959_v54 }
 0x14f   :  { %7958 = vst [vmem:[#allocation42_spill] sm:$0xff] %v4165_v5  ;;  %v1191_v35 = vmul.f32 %v4165_v5, %v3836_v48  ;;  %v7964_v54 = vld [vmem:[#allocation47_spill] sm:$0xff]  ;;  %v4193_v48 = vld [vmem:[#allocation2 + $0x4c0] sm:$0xff] }
 0x150   :  { %v2256_v19 = vadd.f32 %v2255_v10, %v4153_v55  ;;  %v1699_v6 = vadd.f32 %v1698_v33, %v1188_v22  ;;  %v4173_v10 = vld [vmem:[#allocation5 + $0x360] sm:$0xff]  ;;  %v2671_v37 = vadd.f32 %v2670_v46, %v7961_v27  ;;  %7967 = vst [vmem:[#allocation13_spill] sm:$0xff] %v4193_v48  ;;  %v4197_v5 = vld [vmem:[#allocation5 + $0x378] sm:$0xff] }
 0x151   :  { %7960 = vst [vmem:[#allocation44_spill] sm:$0xff] %v4173_v10  ;;  %v1192_v22 = vmul.f32 %v4173_v10, %v3843_v56  ;;  %v7966_v27 = vld [vmem:[#allocation48_spill] sm:$0xff]  ;;  %7969 = vst [vmem:[#allocation47_spill] sm:$0xff] %v4197_v5  ;;  %v4201_v56 = vld [vmem:[#allocation2 + $0x4c8] sm:$0xff] }
 0x152   :  { %v2257_v21 = vadd.f32 %v2256_v19, %v4161_v57  ;;  %v1700_v29 = vadd.f32 %v1699_v6, %v1189_v58  ;;  %v4181_v19 = vld [vmem:[#allocation5 + $0x368] sm:$0xff]  ;;  %v2672_v30 = vadd.f32 %v2671_v37, %v7964_v54  ;;  %v7968_v58 = vld [vmem:[#allocation66_spill] sm:$0xff] }
 0x153   :  { %7963 = vst [vmem:[#allocation11_spill] sm:$0xff] %v4181_v19  ;;  %v1193_v6 = vmul.f32 %v4181_v19, %v7968_v58  ;;  %v7970_v54 = vld [vmem:[#allocation49_spill] sm:$0xff]  ;;  %v4209_v58 = vld [vmem:[#allocation2 + $0x4d0] sm:$0xff] }
 0x154   :  { %v2258_v23 = vadd.f32 %v2257_v21, %v4169_v38  ;;  %v1701_v33 = vadd.f32 %v1700_v29, %v1190_v31  ;;  %v4189_v21 = vld [vmem:[#allocation5 + $0x370] sm:$0xff]  ;;  %v2673_v25 = vadd.f32 %v2672_v30, %v7966_v27  ;;  %v4213_v19 = vld [vmem:[#allocation5 + $0x388] sm:$0xff] }
 0x155   :  { %7965 = vst [vmem:[#allocation12_spill] sm:$0xff] %v4189_v21  ;;  %v1194_v31 = vmul.f32 %v4189_v21, %v3857_v2  ;;  %v7972_v27 = vld [vmem:[#allocation50_spill] sm:$0xff]  ;;  %7974 = vst [vmem:[#allocation66_spill] sm:$0xff] %v4213_v19  ;;  %v4217_v2 = vld [vmem:[#allocation2 + $0x4d8] sm:$0xff] }
 0x156   :  { %v2259_v43 = vadd.f32 %v2258_v23, %v4177_v3  ;;  %v1702_v23 = vadd.f32 %v1701_v33, %v1191_v35  ;;  %v2674_v3 = vadd.f32 %v2673_v25, %v7970_v54  ;;  %v7973_v35 = vld [vmem:[#allocation69_spill] sm:$0xff]  ;;  %v7975_v54 = vld [vmem:[#allocation51_spill] sm:$0xff] }
 0x157   :  { %v1195_v33 = vmul.f32 %v4197_v5, %v7973_v35  ;;  %v4225_v35 = vld [vmem:[#allocation2 + $0x4e0] sm:$0xff] }
 0x158   :  { %v2260_v46 = vadd.f32 %v2259_v43, %v4185_v7  ;;  %v1703_v29 = vadd.f32 %v1702_v23, %v1192_v22  ;;  %v4205_v43 = vld [vmem:[#allocation5 + $0x380] sm:$0xff]  ;;  %v2675_v10 = vadd.f32 %v2674_v3, %v7972_v27 }
 0x159   :  { %7971 = vst [vmem:[#allocation48_spill] sm:$0xff] %v4205_v43  ;;  %v1196_v22 = vmul.f32 %v4205_v43, %v3873_v11  ;;  %v7977_v27 = vld [vmem:[#allocation52_spill] sm:$0xff]  ;;  %v4233_v11 = vld [vmem:[#allocation2 + $0x4e8] sm:$0xff] }
 0x15a   :  { %v2261_v37 = vadd.f32 %v2260_v46, %v4193_v48  ;;  %v1704_v46 = vadd.f32 %v1703_v29, %v1193_v6  ;;  %v2676_v48 = vadd.f32 %v2675_v10, %v7975_v54  ;;  %v1197_v6 = vmul.f32 %v4213_v19, %v3881_v17  ;;  %v7979_v54 = vld [vmem:[#allocation53_spill] sm:$0xff]  ;;  %v4241_v17 = vld [vmem:[#allocation2 + $0x4f0] sm:$0xff] }
 0x15c   :  { %v2262_v30 = vadd.f32 %v2261_v37, %v4201_v56  ;;  %v1705_v23 = vadd.f32 %v1704_v46, %v1194_v31  ;;  %v4221_v37 = vld [vmem:[#allocation5 + $0x390] sm:$0xff]  ;;  %v2677_v21 = vadd.f32 %v2676_v48, %v7977_v27 }
 0x15d   :  { %7976 = vst [vmem:[#allocation49_spill] sm:$0xff] %v4221_v37  ;;  %v1198_v31 = vmul.f32 %v4221_v37, %v3889_v34  ;;  %v7981_v27 = vld [vmem:[#allocation54_spill] sm:$0xff]  ;;  %v4249_v34 = vld [vmem:[#allocation2 + $0x4f8] sm:$0xff] }
 0x15e   :  { %v2263_v25 = vadd.f32 %v2262_v30, %v4209_v58  ;;  %v1706_v29 = vadd.f32 %v1705_v23, %v1195_v33  ;;  %v4229_v30 = vld [vmem:[#allocation5 + $0x398] sm:$0xff]  ;;  %v2678_v5 = vadd.f32 %v2677_v21, %v7979_v54 }
 0x15f   :  { %7978 = vst [vmem:[#allocation50_spill] sm:$0xff] %v4229_v30  ;;  %v1199_v33 = vmul.f32 %v4229_v30, %v3897_v62  ;;  %v7983_v54 = vld [vmem:[#allocation55_spill] sm:$0xff]  ;;  %v4257_v62 = vld [vmem:[#allocation2 + $0x500] sm:$0xff] }
 0x160   :  { %v2264_v3 = vadd.f32 %v2263_v25, %v4217_v2  ;;  %v1707_v46 = vadd.f32 %v1706_v29, %v1196_v22  ;;  %v4237_v25 = vld [vmem:[#allocation5 + $0x3a0] sm:$0xff]  ;;  %v2679_v43 = vadd.f32 %v2678_v5, %v7981_v27 }
 0x161   :  { %7980 = vst [vmem:[#allocation69_spill] sm:$0xff] %v4237_v25  ;;  %v1200_v22 = vmul.f32 %v4237_v25, %v3905_v13  ;;  %v7985_v27 = vld [vmem:[#allocation56_spill] sm:$0xff]  ;;  %v4265_v13 = vld [vmem:[#allocation2 + $0x508] sm:$0xff] }
 0x162   :  { %v2265_v10 = vadd.f32 %v2264_v3, %v4225_v35  ;;  %v1708_v23 = vadd.f32 %v1707_v46, %v1197_v6  ;;  %v4245_v3 = vld [vmem:[#allocation5 + $0x3a8] sm:$0xff]  ;;  %v2680_v19 = vadd.f32 %v2679_v43, %v7983_v54 }
 0x163   :  { %7982 = vst [vmem:[#allocation51_spill] sm:$0xff] %v4245_v3  ;;  %v1201_v6 = vmul.f32 %v4245_v3, %v3913_v26  ;;  %v7987_v54 = vld [vmem:[#allocation57_spill] sm:$0xff]  ;;  %v4273_v26 = vld [vmem:[#allocation2 + $0x510] sm:$0xff] }
 0x164   :  { %v2266_v48 = vadd.f32 %v2265_v10, %v4233_v11  ;;  %v1709_v29 = vadd.f32 %v1708_v23, %v1198_v31  ;;  %v4253_v10 = vld [vmem:[#allocation5 + $0x3b0] sm:$0xff]  ;;  %v2681_v37 = vadd.f32 %v2680_v19, %v7985_v27 }
 0x165   :  { %7984 = vst [vmem:[#allocation52_spill] sm:$0xff] %v4253_v10  ;;  %v1202_v31 = vmul.f32 %v4253_v10, %v3921_v15  ;;  %v7989_v27 = vld [vmem:[#allocation58_spill] sm:$0xff]  ;;  %v4281_v15 = vld [vmem:[#allocation2 + $0x518] sm:$0xff] }
 0x166   :  { %v2267_v21 = vadd.f32 %v2266_v48, %v4241_v17  ;;  %v1710_v46 = vadd.f32 %v1709_v29, %v1199_v33  ;;  %v4261_v48 = vld [vmem:[#allocation5 + $0x3b8] sm:$0xff]  ;;  %v2682_v30 = vadd.f32 %v2681_v37, %v7987_v54 }
 0x167   :  { %7986 = vst [vmem:[#allocation53_spill] sm:$0xff] %v4261_v48  ;;  %v1203_v33 = vmul.f32 %v4261_v48, %v3929_v0  ;;  %v7991_v54 = vld [vmem:[#allocation59_spill] sm:$0xff]  ;;  %v4289_v0 = vld [vmem:[#allocation2 + $0x520] sm:$0xff] }
 0x168   :  { %v2268_v5 = vadd.f32 %v2267_v21, %v4249_v34  ;;  %v1711_v23 = vadd.f32 %v1710_v46, %v1200_v22  ;;  %v4269_v21 = vld [vmem:[#allocation5 + $0x3c0] sm:$0xff]  ;;  %v2683_v25 = vadd.f32 %v2682_v30, %v7989_v27 }
 0x169   :  { %7988 = vst [vmem:[#allocation54_spill] sm:$0xff] %v4269_v21  ;;  %v1204_v22 = vmul.f32 %v4269_v21, %v3937_v50  ;;  %v7993_v27 = vld [vmem:[#allocation60_spill] sm:$0xff]  ;;  %v4297_v50 = vld [vmem:[#allocation2 + $0x528] sm:$0xff] }
 0x16a   :  { %v2269_v43 = vadd.f32 %v2268_v5, %v4257_v62  ;;  %v1712_v29 = vadd.f32 %v1711_v23, %v1201_v6  ;;  %v4277_v5 = vld [vmem:[#allocation5 + $0x3c8] sm:$0xff]  ;;  %v2684_v3 = vadd.f32 %v2683_v25, %v7991_v54 }
 0x16b   :  { %7990 = vst [vmem:[#allocation55_spill] sm:$0xff] %v4277_v5  ;;  %v1205_v6 = vmul.f32 %v4277_v5, %v3945_v52  ;;  %v7995_v54 = vld [vmem:[#allocation61_spill] sm:$0xff]  ;;  %v4305_v52 = vld [vmem:[#allocation2 + $0x530] sm:$0xff] }
 0x16c   :  { %v2270_v19 = vadd.f32 %v2269_v43, %v4265_v13  ;;  %v1713_v46 = vadd.f32 %v1712_v29, %v1202_v31  ;;  %v4285_v43 = vld [vmem:[#allocation5 + $0x3d0] sm:$0xff]  ;;  %v2685_v10 = vadd.f32 %v2684_v3, %v7993_v27 }
 0x16d   :  { %7992 = vst [vmem:[#allocation56_spill] sm:$0xff] %v4285_v43  ;;  %v1206_v31 = vmul.f32 %v4285_v43, %v3953_v39  ;;  %v7997_v27 = vld [vmem:[#allocation62_spill] sm:$0xff]  ;;  %v4313_v39 = vld [vmem:[#allocation2 + $0x538] sm:$0xff] }
 0x16e   :  { %v2271_v37 = vadd.f32 %v2270_v19, %v4273_v26  ;;  %v1714_v23 = vadd.f32 %v1713_v46, %v1203_v33  ;;  %v4293_v19 = vld [vmem:[#allocation5 + $0x3d8] sm:$0xff]  ;;  %v2686_v48 = vadd.f32 %v2685_v10, %v7995_v54 }
 0x16f   :  { %7994 = vst [vmem:[#allocation57_spill] sm:$0xff] %v4293_v19  ;;  %v1207_v33 = vmul.f32 %v4293_v19, %v3961_v1  ;;  %v7999_v54 = vld [vmem:[#allocation63_spill] sm:$0xff]  ;;  %v4321_v1 = vld [vmem:[#allocation2 + $0x540] sm:$0xff] }
 0x170   :  { %v2272_v30 = vadd.f32 %v2271_v37, %v4281_v15  ;;  %v1715_v29 = vadd.f32 %v1714_v23, %v1204_v22  ;;  %v4301_v37 = vld [vmem:[#allocation5 + $0x3e0] sm:$0xff]  ;;  %v2687_v21 = vadd.f32 %v2686_v48, %v7997_v27 }
 0x171   :  { %7996 = vst [vmem:[#allocation58_spill] sm:$0xff] %v4301_v37  ;;  %v1208_v22 = vmul.f32 %v4301_v37, %v3969_v42  ;;  %v8000_v27 = vld [vmem:[#allocation64_spill] sm:$0xff]  ;;  %v4329_v42 = vld [vmem:[#allocation2 + $0x548] sm:$0xff] }
 0x172   :  { %v2273_v25 = vadd.f32 %v2272_v30, %v4289_v0  ;;  %v1716_v46 = vadd.f32 %v1715_v29, %v1205_v6  ;;  %v4309_v30 = vld [vmem:[#allocation5 + $0x3e8] sm:$0xff]  ;;  %v2688_v5 = vadd.f32 %v2687_v21, %v7999_v54 }
 0x173   :  { %7998 = vst [vmem:[#allocation59_spill] sm:$0xff] %v4309_v30  ;;  %v1209_v6 = vmul.f32 %v4309_v30, %v3977_v45  ;;  %v8001_v54 = vld [vmem:[#allocation65_spill] sm:$0xff]  ;;  %v4337_v45 = vld [vmem:[#allocation2 + $0x550] sm:$0xff] }
 0x174   :  { %v2274_v3 = vadd.f32 %v2273_v25, %v4297_v50  ;;  %v1717_v23 = vadd.f32 %v1716_v46, %v1206_v31  ;;  %v4317_v25 = vld [vmem:[#allocation5 + $0x3f0] sm:$0xff]  ;;  %v2689_v43 = vadd.f32 %v2688_v5, %v8000_v27  ;;  %v8003_v27 = vld [vmem:[#allocation67_spill] sm:$0xff] }
 0x175   :  { %v1210_v31 = vmul.f32 %v4317_v25, %v3985_v47  ;;  %v4345_v47 = vld [vmem:[#allocation2 + $0x558] sm:$0xff] }
 0x176   :  { %v2275_v10 = vadd.f32 %v2274_v3, %v4305_v52  ;;  %v1718_v29 = vadd.f32 %v1717_v23, %v1207_v33  ;;  %v4325_v3 = vld [vmem:[#allocation5 + $0x3f8] sm:$0xff]  ;;  %v2690_v19 = vadd.f32 %v2689_v43, %v8001_v54  ;;  %v8005_v54 = vld [vmem:[#allocation68_spill] sm:$0xff] }
 0x177   :  { %v1211_v33 = vmul.f32 %v4325_v3, %v3993_v49  ;;  %v4353_v49 = vld [vmem:[#allocation2 + $0x560] sm:$0xff] }
 0x178   :  { %v2276_v48 = vadd.f32 %v2275_v10, %v4313_v39  ;;  %v1719_v46 = vadd.f32 %v1718_v29, %v1208_v22  ;;  %v4333_v10 = vld [vmem:[#allocation5 + $0x400] sm:$0xff]  ;;  %v2691_v37 = vadd.f32 %v2690_v19, %v8003_v27 }
 0x179   :  { %8002 = vst [vmem:[#allocation60_spill] sm:$0xff] %v4333_v10  ;;  %v1212_v22 = vmul.f32 %v4333_v10, %v4001_v51  ;;  %v4361_v51 = vld [vmem:[#allocation2 + $0x568] sm:$0xff] }
 0x17a   :  { %v2277_v21 = vadd.f32 %v2276_v48, %v4321_v1  ;;  %v1720_v23 = vadd.f32 %v1719_v46, %v1209_v6  ;;  %v4341_v48 = vld [vmem:[#allocation5 + $0x408] sm:$0xff]  ;;  %v2692_v30 = vadd.f32 %v2691_v37, %v8005_v54 }
 0x17b   :  { %8004 = vst [vmem:[#allocation61_spill] sm:$0xff] %v4341_v48  ;;  %v1213_v6 = vmul.f32 %v4341_v48, %v4009_v14  ;;  %v4369_v14 = vld [vmem:[#allocation2 + $0x570] sm:$0xff] }
 0x17c   :  { %v2278_v5 = vadd.f32 %v2277_v21, %v4329_v42  ;;  %v1721_v29 = vadd.f32 %v1720_v23, %v1210_v31  ;;  %v4349_v21 = vld [vmem:[#allocation5 + $0x410] sm:$0xff]  ;;  %v2693_v27 = vadd.f32 %v2692_v30, %v3868_v18 }
 0x17d   :  { %8006 = vst [vmem:[#allocation62_spill] sm:$0xff] %v4349_v21  ;;  %v1214_v31 = vmul.f32 %v4349_v21, %v4017_v41  ;;  %v8009_v30 = vld [vmem:[#allocation14_spill] sm:$0xff]  ;;  %v4377_v41 = vld [vmem:[#allocation2 + $0x578] sm:$0xff] }
 0x17e   :  { %v2279_v43 = vadd.f32 %v2278_v5, %v4337_v45  ;;  %v1722_v46 = vadd.f32 %v1721_v29, %v1211_v33  ;;  %v4357_v5 = vld [vmem:[#allocation5 + $0x418] sm:$0xff]  ;;  %v2694_v54 = vadd.f32 %v2693_v27, %v3877_v9 }
 0x17f   :  { %8007 = vst [vmem:[#allocation63_spill] sm:$0xff] %v4357_v5  ;;  %v1215_v33 = vmul.f32 %v4357_v5, %v4025_v60  ;;  %v8011_v27 = vld [vmem:[#allocation15_spill] sm:$0xff]  ;;  %v4385_v60 = vld [vmem:[#allocation2 + $0x580] sm:$0xff] }
 0x180   :  { %v2280_v19 = vadd.f32 %v2279_v43, %v4345_v47  ;;  %v1723_v23 = vadd.f32 %v1722_v46, %v1212_v22  ;;  %v4365_v43 = vld [vmem:[#allocation5 + $0x420] sm:$0xff]  ;;  %v2695_v10 = vadd.f32 %v2694_v54, %v8009_v30 }
 0x181   :  { %8008 = vst [vmem:[#allocation64_spill] sm:$0xff] %v4365_v43  ;;  %v1216_v22 = vmul.f32 %v4365_v43, %v4033_v59  ;;  %v8013_v30 = vld [vmem:[#allocation16_spill] sm:$0xff]  ;;  %v4393_v59 = vld [vmem:[#allocation2 + $0x588] sm:$0xff] }
 0x182   :  { %v2281_v37 = vadd.f32 %v2280_v19, %v4353_v49  ;;  %v1724_v29 = vadd.f32 %v1723_v23, %v1213_v6  ;;  %v4373_v19 = vld [vmem:[#allocation5 + $0x428] sm:$0xff]  ;;  %v2696_v48 = vadd.f32 %v2695_v10, %v8011_v27  ;;  %v8015_v27 = vld [vmem:[#allocation70_spill] sm:$0xff] }
 0x183   :  { %8010 = vst [vmem:[#allocation65_spill] sm:$0xff] %v4373_v19  ;;  %v1217_v6 = vmul.f32 %v4373_v19, %v4041_v61  ;;  %v4401_v61 = vld [vmem:[#allocation2 + $0x590] sm:$0xff] }
 0x184   :  { %v2282_v18 = vadd.f32 %v2281_v37, %v4361_v51  ;;  %v1725_v46 = vadd.f32 %v1724_v29, %v1214_v31  ;;  %v4381_v37 = vld [vmem:[#allocation5 + $0x430] sm:$0xff]  ;;  %v2697_v21 = vadd.f32 %v2696_v48, %v8013_v30  ;;  %v8017_v30 = vld [vmem:[#allocation71_spill] sm:$0xff] }
 0x185   :  { %8012 = vst [vmem:[#allocation67_spill] sm:$0xff] %v4381_v37  ;;  %v1218_v31 = vmul.f32 %v4381_v37, %v4049_v63  ;;  %v4409_v63 = vld [vmem:[#allocation2 + $0x598] sm:$0xff] }
 0x186   :  { %v2283_v9 = vadd.f32 %v2282_v18, %v4369_v14  ;;  %v1726_v23 = vadd.f32 %v1725_v46, %v1215_v33  ;;  %v4389_v18 = vld [vmem:[#allocation5 + $0x438] sm:$0xff]  ;;  %v2698_v5 = vadd.f32 %v2697_v21, %v8015_v27  ;;  %v8019_v27 = vld [vmem:[#allocation72_spill] sm:$0xff] }
 0x187   :  { %8014 = vst [vmem:[#allocation68_spill] sm:$0xff] %v4389_v18  ;;  %v1219_v33 = vmul.f32 %v4389_v18, %v4057_v4  ;;  %v4417_v4 = vld [vmem:[#allocation2 + $0x5a0] sm:$0xff] }
 0x188   :  { %v2284_v54 = vadd.f32 %v2283_v9, %v4377_v41  ;;  %v1727_v29 = vadd.f32 %v1726_v23, %v1216_v22  ;;  %v4397_v9 = vld [vmem:[#allocation5 + $0x440] sm:$0xff]  ;;  %v2699_v43 = vadd.f32 %v2698_v5, %v8017_v30  ;;  %v8021_v30 = vld [vmem:[#allocation73_spill] sm:$0xff] }
 0x189   :  { %8016 = vst [vmem:[#allocation14_spill] sm:$0xff] %v4397_v9  ;;  %v1220_v22 = vmul.f32 %v4397_v9, %v4065_v8  ;;  %v4425_v8 = vld [vmem:[#allocation2 + $0x5a8] sm:$0xff] }
 0x18a   :  { %v2285_v10 = vadd.f32 %v2284_v54, %v4385_v60  ;;  %v1728_v46 = vadd.f32 %v1727_v29, %v1217_v6  ;;  %v4405_v54 = vld [vmem:[#allocation5 + $0x448] sm:$0xff]  ;;  %v2700_v19 = vadd.f32 %v2699_v43, %v8019_v27  ;;  %v8023_v27 = vld [vmem:[#allocation74_spill] sm:$0xff] }
 0x18b   :  { %8018 = vst [vmem:[#allocation15_spill] sm:$0xff] %v4405_v54  ;;  %v1221_v6 = vmul.f32 %v4405_v54, %v4073_v12  ;;  %v4433_v12 = vld [vmem:[#allocation2 + $0x5b0] sm:$0xff] }
 0x18c   :  { %v2286_v48 = vadd.f32 %v2285_v10, %v4393_v59  ;;  %v1729_v23 = vadd.f32 %v1728_v46, %v1218_v31  ;;  %v4413_v10 = vld [vmem:[#allocation5 + $0x450] sm:$0xff]  ;;  %v2701_v37 = vadd.f32 %v2700_v19, %v8021_v30  ;;  %v8025_v30 = vld [vmem:[#allocation17_spill] sm:$0xff] }
 0x18d   :  { %8020 = vst [vmem:[#allocation16_spill] sm:$0xff] %v4413_v10  ;;  %v1222_v31 = vmul.f32 %v4413_v10, %v4081_v16  ;;  %v4441_v16 = vld [vmem:[#allocation2 + $0x5b8] sm:$0xff] }
 0x18e   :  { %v2287_v21 = vadd.f32 %v2286_v48, %v4401_v61  ;;  %v1730_v29 = vadd.f32 %v1729_v23, %v1219_v33  ;;  %v4421_v48 = vld [vmem:[#allocation5 + $0x458] sm:$0xff]  ;;  %v2702_v18 = vadd.f32 %v2701_v37, %v8023_v27  ;;  %v8027_v27 = vld [vmem:[#allocation18_spill] sm:$0xff] }
 0x18f   :  { %8022 = vst [vmem:[#allocation70_spill] sm:$0xff] %v4421_v48  ;;  %v1223_v33 = vmul.f32 %v4421_v48, %v4089_v20  ;;  %v4449_v20 = vld [vmem:[#allocation2 + $0x5c0] sm:$0xff] }
 0x190   :  { %v2288_v5 = vadd.f32 %v2287_v21, %v4409_v63  ;;  %v1731_v46 = vadd.f32 %v1730_v29, %v1220_v22  ;;  %v4429_v21 = vld [vmem:[#allocation5 + $0x460] sm:$0xff]  ;;  %v2703_v9 = vadd.f32 %v2702_v18, %v8025_v30  ;;  %v8029_v30 = vld [vmem:[#allocation19_spill] sm:$0xff] }
 0x191   :  { %8024 = vst [vmem:[#allocation71_spill] sm:$0xff] %v4429_v21  ;;  %v1224_v22 = vmul.f32 %v4429_v21, %v4097_v24  ;;  %v4457_v24 = vld [vmem:[#allocation2 + $0x5c8] sm:$0xff] }
 0x192   :  { %v2289_v43 = vadd.f32 %v2288_v5, %v4417_v4  ;;  %v1732_v23 = vadd.f32 %v1731_v46, %v1221_v6  ;;  %v4437_v5 = vld [vmem:[#allocation5 + $0x468] sm:$0xff]  ;;  %v2704_v54 = vadd.f32 %v2703_v9, %v8027_v27  ;;  %v8031_v27 = vld [vmem:[#allocation20_spill] sm:$0xff] }
 0x193   :  { %8026 = vst [vmem:[#allocation72_spill] sm:$0xff] %v4437_v5  ;;  %v1225_v6 = vmul.f32 %v4437_v5, %v4105_v28  ;;  %v4465_v28 = vld [vmem:[#allocation2 + $0x5d0] sm:$0xff] }
 0x194   :  { %v2290_v19 = vadd.f32 %v2289_v43, %v4425_v8  ;;  %v1733_v29 = vadd.f32 %v1732_v23, %v1222_v31  ;;  %v4445_v43 = vld [vmem:[#allocation5 + $0x470] sm:$0xff]  ;;  %v2705_v10 = vadd.f32 %v2704_v54, %v8029_v30  ;;  %v8033_v30 = vld [vmem:[#allocation21_spill] sm:$0xff] }
 0x195   :  { %8028 = vst [vmem:[#allocation73_spill] sm:$0xff] %v4445_v43  ;;  %v1226_v31 = vmul.f32 %v4445_v43, %v4113_v32  ;;  %v4473_v32 = vld [vmem:[#allocation2 + $0x5d8] sm:$0xff] }
 0x196   :  { %v2291_v37 = vadd.f32 %v2290_v19, %v4433_v12  ;;  %v1734_v46 = vadd.f32 %v1733_v29, %v1223_v33  ;;  %v4453_v19 = vld [vmem:[#allocation5 + $0x478] sm:$0xff]  ;;  %v2706_v48 = vadd.f32 %v2705_v10, %v8031_v27  ;;  %v8035_v27 = vld [vmem:[#allocation22_spill] sm:$0xff] }
 0x197   :  { %8030 = vst [vmem:[#allocation74_spill] sm:$0xff] %v4453_v19  ;;  %v1227_v33 = vmul.f32 %v4453_v19, %v4121_v36  ;;  %v4481_v36 = vld [vmem:[#allocation2 + $0x5e0] sm:$0xff] }
 0x198   :  { %v2292_v18 = vadd.f32 %v2291_v37, %v4441_v16  ;;  %v1735_v23 = vadd.f32 %v1734_v46, %v1224_v22  ;;  %v4461_v37 = vld [vmem:[#allocation5 + $0x480] sm:$0xff]  ;;  %v2707_v21 = vadd.f32 %v2706_v48, %v8033_v30  ;;  %v8037_v30 = vld [vmem:[#allocation23_spill] sm:$0xff] }
 0x199   :  { %8032 = vst [vmem:[#allocation17_spill] sm:$0xff] %v4461_v37  ;;  %v1228_v22 = vmul.f32 %v4461_v37, %v4129_v40  ;;  %v4489_v40 = vld [vmem:[#allocation2 + $0x5e8] sm:$0xff] }
 0x19a   :  { %v2293_v9 = vadd.f32 %v2292_v18, %v4449_v20  ;;  %v1736_v29 = vadd.f32 %v1735_v23, %v1225_v6  ;;  %v4469_v18 = vld [vmem:[#allocation5 + $0x488] sm:$0xff]  ;;  %v2708_v5 = vadd.f32 %v2707_v21, %v8035_v27 }
 0x19b   :  { %8034 = vst [vmem:[#allocation18_spill] sm:$0xff] %v4469_v18  ;;  %v1229_v6 = vmul.f32 %v4469_v18, %v4137_v44  ;;  %v8039_v27 = vld [vmem:[#allocation41_spill] sm:$0xff]  ;;  %v4497_v44 = vld [vmem:[#allocation2 + $0x5f0] sm:$0xff] }
 0x19c   :  { %v2294_v54 = vadd.f32 %v2293_v9, %v4457_v24  ;;  %v1737_v46 = vadd.f32 %v1736_v29, %v1226_v31  ;;  %v4477_v9 = vld [vmem:[#allocation5 + $0x490] sm:$0xff]  ;;  %v2709_v43 = vadd.f32 %v2708_v5, %v8037_v30  ;;  %v8041_v30 = vld [vmem:[#allocation24_spill] sm:$0xff] }
 0x19d   :  { %8036 = vst [vmem:[#allocation19_spill] sm:$0xff] %v4477_v9  ;;  %v1230_v31 = vmul.f32 %v4477_v9, %v4145_v53  ;;  %v4505_v53 = vld [vmem:[#allocation2 + $0x5f8] sm:$0xff] }
 0x19e   :  { %v2295_v10 = vadd.f32 %v2294_v54, %v4465_v28  ;;  %v1738_v23 = vadd.f32 %v1737_v46, %v1227_v33  ;;  %v4485_v54 = vld [vmem:[#allocation5 + $0x498] sm:$0xff]  ;;  %v2710_v19 = vadd.f32 %v2709_v43, %v8039_v27  ;;  %8044 = vst [vmem:[#allocation23_spill] sm:$0xff] %v4505_v53 }
 0x19f   :  { %8038 = vst [vmem:[#allocation20_spill] sm:$0xff] %v4485_v54  ;;  %v1231_v33 = vmul.f32 %v4485_v54, %v4153_v55  ;;  %v8043_v27 = vld [vmem:[#allocation43_spill] sm:$0xff]  ;;  %v4513_v55 = vld [vmem:[#allocation2 + $0x600] sm:$0xff] }
 0x1a0   :  { %v2296_v48 = vadd.f32 %v2295_v10, %v4473_v32  ;;  %v1739_v29 = vadd.f32 %v1738_v23, %v1228_v22  ;;  %v4493_v10 = vld [vmem:[#allocation5 + $0x4a0] sm:$0xff]  ;;  %v2711_v37 = vadd.f32 %v2710_v19, %v8041_v30  ;;  %v8046_v30 = vld [vmem:[#allocation25_spill] sm:$0xff] }
 0x1a1   :  { %8040 = vst [vmem:[#allocation21_spill] sm:$0xff] %v4493_v10  ;;  %v1232_v22 = vmul.f32 %v4493_v10, %v4161_v57  ;;  %v4521_v57 = vld [vmem:[#allocation2 + $0x608] sm:$0xff]  ;;  %v4525_v10 = vld [vmem:[#allocation5 + $0x4c0] sm:$0xff] }
 0x1a2   :  { %v2297_v21 = vadd.f32 %v2296_v48, %v4481_v36  ;;  %v1740_v46 = vadd.f32 %v1739_v29, %v1229_v6  ;;  %v4501_v48 = vld [vmem:[#allocation5 + $0x4a8] sm:$0xff]  ;;  %v2712_v18 = vadd.f32 %v2711_v37, %v8043_v27  ;;  %8049 = vst [vmem:[#allocation43_spill] sm:$0xff] %v4521_v57  ;;  %8051 = vst [vmem:[#allocation25_spill] sm:$0xff] %v4525_v10 }
 0x1a3   :  { %8042 = vst [vmem:[#allocation22_spill] sm:$0xff] %v4501_v48  ;;  %v1233_v6 = vmul.f32 %v4501_v48, %v4169_v38  ;;  %v8048_v27 = vld [vmem:[#allocation45_spill] sm:$0xff]  ;;  %v4529_v38 = vld [vmem:[#allocation2 + $0x610] sm:$0xff] }
 0x1a4   :  { %v2298_v5 = vadd.f32 %v2297_v21, %v4489_v40  ;;  %v1741_v23 = vadd.f32 %v1740_v46, %v1230_v31  ;;  %v4509_v21 = vld [vmem:[#allocation5 + $0x4b0] sm:$0xff]  ;;  %v2713_v9 = vadd.f32 %v2712_v18, %v8046_v30 }
 0x1a5   :  { %8045 = vst [vmem:[#allocation41_spill] sm:$0xff] %v4509_v21  ;;  %v8050_v31 = vld [vmem:[#allocation46_spill] sm:$0xff] }
 0x1a6   :  { %v2299_v43 = vadd.f32 %v2298_v5, %v4497_v44  ;;  %v1742_v29 = vadd.f32 %v1741_v23, %v1231_v33  ;;  %v4517_v5 = vld [vmem:[#allocation5 + $0x4b8] sm:$0xff]  ;;  %v2714_v54 = vadd.f32 %v2713_v9, %v8048_v27  ;;  %v1234_v46 = vmul.f32 %v4509_v21, %v8050_v31  ;;  %v8052_v30 = vld [vmem:[#allocation26_spill] sm:$0xff] }
 0x1a7   :  { %8047 = vst [vmem:[#allocation24_spill] sm:$0xff] %v4517_v5  ;;  %v1235_v33 = vmul.f32 %v4517_v5, %v4185_v7  ;;  %v8054_v27 = vld [vmem:[#allocation27_spill] sm:$0xff]  ;;  %v4541_v21 = vld [vmem:[#allocation5 + $0x4d0] sm:$0xff]  ;;  %v4545_v7 = vld [vmem:[#allocation2 + $0x620] sm:$0xff] }
 0x1a8   :  { %v2300_v19 = vadd.f32 %v2299_v43, %v4505_v53  ;;  %v1743_v43 = vadd.f32 %v1742_v29, %v1232_v22  ;;  %v2715_v53 = vadd.f32 %v2714_v54, %v8052_v30  ;;  %v4537_v31 = vld [vmem:[#allocation2 + $0x618] sm:$0xff]  ;;  %v8055_v22 = vld [vmem:[#allocation13_spill] sm:$0xff]  ;;  %8056 = vst [vmem:[#allocation46_spill] sm:$0xff] %v4541_v21  ;;  %v8057_v30 = vld [vmem:[#allocation28_spill] sm:$0xff] }
 0x1a9   :  { %v1236_v29 = vmul.f32 %v4525_v10, %v8055_v22  ;;  %v4553_v22 = vld [vmem:[#allocation2 + $0x628] sm:$0xff] }
 0x1aa   :  { %v2301_v37 = vadd.f32 %v2300_v19, %v4513_v55  ;;  %v1744_v23 = vadd.f32 %v1743_v43, %v1233_v6  ;;  %v4533_v19 = vld [vmem:[#allocation5 + $0x4c8] sm:$0xff]  ;;  %v2716_v48 = vadd.f32 %v2715_v53, %v8054_v27 }
 0x1ab   :  { %8053 = vst [vmem:[#allocation45_spill] sm:$0xff] %v4533_v19  ;;  %v1237_v6 = vmul.f32 %v4533_v19, %v4201_v56  ;;  %v8059_v27 = vld [vmem:[#allocation29_spill] sm:$0xff]  ;;  %v4561_v56 = vld [vmem:[#allocation2 + $0x630] sm:$0xff] }
 0x1ac   :  { %v2302_v18 = vadd.f32 %v2301_v37, %v4521_v57  ;;  %v1745_v37 = vadd.f32 %v1744_v23, %v1234_v46  ;;  %v2717_v57 = vadd.f32 %v2716_v48, %v8057_v30  ;;  %v1238_v46 = vmul.f32 %v4541_v21, %v4209_v58  ;;  %v8061_v30 = vld [vmem:[#allocation30_spill] sm:$0xff]  ;;  %v4569_v58 = vld [vmem:[#allocation2 + $0x638] sm:$0xff] }
 0x1ae   :  { %v2303_v9 = vadd.f32 %v2302_v18, %v4529_v38  ;;  %v1746_v43 = vadd.f32 %v1745_v37, %v1235_v33  ;;  %v4549_v18 = vld [vmem:[#allocation5 + $0x4d8] sm:$0xff]  ;;  %v2718_v5 = vadd.f32 %v2717_v57, %v8059_v27 }
 0x1af   :  { %8058 = vst [vmem:[#allocation26_spill] sm:$0xff] %v4549_v18  ;;  %v1239_v33 = vmul.f32 %v4549_v18, %v4217_v2  ;;  %v8063_v27 = vld [vmem:[#allocation31_spill] sm:$0xff]  ;;  %v4577_v2 = vld [vmem:[#allocation2 + $0x640] sm:$0xff] }
 0x1b0   :  { %v2304_v54 = vadd.f32 %v2303_v9, %v4537_v31  ;;  %v1747_v23 = vadd.f32 %v1746_v43, %v1236_v29  ;;  %v4557_v9 = vld [vmem:[#allocation5 + $0x4e0] sm:$0xff]  ;;  %v2719_v10 = vadd.f32 %v2718_v5, %v8061_v30 }
 0x1b1   :  { %8060 = vst [vmem:[#allocation27_spill] sm:$0xff] %v4557_v9  ;;  %v1240_v29 = vmul.f32 %v4557_v9, %v4225_v35  ;;  %v8065_v30 = vld [vmem:[#allocation32_spill] sm:$0xff]  ;;  %v4585_v35 = vld [vmem:[#allocation2 + $0x648] sm:$0xff] }
 0x1b2   :  { %v2305_v53 = vadd.f32 %v2304_v54, %v4545_v7  ;;  %v1748_v37 = vadd.f32 %v1747_v23, %v1237_v6  ;;  %v4565_v54 = vld [vmem:[#allocation5 + $0x4e8] sm:$0xff]  ;;  %v2720_v19 = vadd.f32 %v2719_v10, %v8063_v27 }
 0x1b3   :  { %8062 = vst [vmem:[#allocation13_spill] sm:$0xff] %v4565_v54  ;;  %v1241_v6 = vmul.f32 %v4565_v54, %v4233_v11  ;;  %v8067_v27 = vld [vmem:[#allocation33_spill] sm:$0xff]  ;;  %v4593_v11 = vld [vmem:[#allocation2 + $0x650] sm:$0xff] }
 0x1b4   :  { %v2306_v48 = vadd.f32 %v2305_v53, %v4553_v22  ;;  %v1749_v43 = vadd.f32 %v1748_v37, %v1238_v46  ;;  %v4573_v53 = vld [vmem:[#allocation5 + $0x4f0] sm:$0xff]  ;;  %v2721_v21 = vadd.f32 %v2720_v19, %v8065_v30 }
 0x1b5   :  { %8064 = vst [vmem:[#allocation28_spill] sm:$0xff] %v4573_v53  ;;  %v1242_v46 = vmul.f32 %v4573_v53, %v4241_v17  ;;  %v8069_v30 = vld [vmem:[#allocation34_spill] sm:$0xff]  ;;  %v4601_v17 = vld [vmem:[#allocation2 + $0x658] sm:$0xff] }
 0x1b6   :  { %v2307_v57 = vadd.f32 %v2306_v48, %v4561_v56  ;;  %v1750_v23 = vadd.f32 %v1749_v43, %v1239_v33  ;;  %v4581_v48 = vld [vmem:[#allocation5 + $0x4f8] sm:$0xff]  ;;  %v2722_v18 = vadd.f32 %v2721_v21, %v8067_v27 }
 0x1b7   :  { %8066 = vst [vmem:[#allocation29_spill] sm:$0xff] %v4581_v48  ;;  %v1243_v33 = vmul.f32 %v4581_v48, %v4249_v34  ;;  %v8071_v27 = vld [vmem:[#allocation35_spill] sm:$0xff]  ;;  %v4609_v34 = vld [vmem:[#allocation2 + $0x660] sm:$0xff] }
 0x1b8   :  { %v2308_v5 = vadd.f32 %v2307_v57, %v4569_v58  ;;  %v1751_v37 = vadd.f32 %v1750_v23, %v1240_v29  ;;  %v4589_v57 = vld [vmem:[#allocation5 + $0x500] sm:$0xff]  ;;  %v2723_v9 = vadd.f32 %v2722_v18, %v8069_v30 }
 0x1b9   :  { %8068 = vst [vmem:[#allocation30_spill] sm:$0xff] %v4589_v57  ;;  %v1244_v29 = vmul.f32 %v4589_v57, %v4257_v62  ;;  %v8073_v30 = vld [vmem:[#allocation36_spill] sm:$0xff]  ;;  %v4617_v62 = vld [vmem:[#allocation2 + $0x668] sm:$0xff] }
 0x1ba   :  { %v2309_v10 = vadd.f32 %v2308_v5, %v4577_v2  ;;  %v1752_v43 = vadd.f32 %v1751_v37, %v1241_v6  ;;  %v4597_v5 = vld [vmem:[#allocation5 + $0x508] sm:$0xff]  ;;  %v2724_v54 = vadd.f32 %v2723_v9, %v8071_v27 }
 0x1bb   :  { %8070 = vst [vmem:[#allocation31_spill] sm:$0xff] %v4597_v5  ;;  %v1245_v6 = vmul.f32 %v4597_v5, %v4265_v13  ;;  %v8075_v27 = vld [vmem:[#allocation37_spill] sm:$0xff]  ;;  %v4625_v13 = vld [vmem:[#allocation2 + $0x670] sm:$0xff] }
 0x1bc   :  { %v2310_v19 = vadd.f32 %v2309_v10, %v4585_v35  ;;  %v1753_v23 = vadd.f32 %v1752_v43, %v1242_v46  ;;  %v4605_v10 = vld [vmem:[#allocation5 + $0x510] sm:$0xff]  ;;  %v2725_v53 = vadd.f32 %v2724_v54, %v8073_v30 }
 0x1bd   :  { %8072 = vst [vmem:[#allocation32_spill] sm:$0xff] %v4605_v10  ;;  %v1246_v46 = vmul.f32 %v4605_v10, %v4273_v26  ;;  %v8077_v30 = vld [vmem:[#allocation38_spill] sm:$0xff]  ;;  %v4633_v26 = vld [vmem:[#allocation2 + $0x678] sm:$0xff] }
 0x1be   :  { %v2311_v21 = vadd.f32 %v2310_v19, %v4593_v11  ;;  %v1754_v37 = vadd.f32 %v1753_v23, %v1243_v33  ;;  %v4613_v19 = vld [vmem:[#allocation5 + $0x518] sm:$0xff]  ;;  %v2726_v48 = vadd.f32 %v2725_v53, %v8075_v27 }
 0x1bf   :  { %8074 = vst [vmem:[#allocation33_spill] sm:$0xff] %v4613_v19  ;;  %v1247_v33 = vmul.f32 %v4613_v19, %v4281_v15  ;;  %v8079_v27 = vld [vmem:[#allocation39_spill] sm:$0xff]  ;;  %v4641_v15 = vld [vmem:[#allocation2 + $0x680] sm:$0xff] }
 0x1c0   :  { %v2312_v18 = vadd.f32 %v2311_v21, %v4601_v17  ;;  %v1755_v43 = vadd.f32 %v1754_v37, %v1244_v29  ;;  %v4621_v21 = vld [vmem:[#allocation5 + $0x520] sm:$0xff]  ;;  %v2727_v57 = vadd.f32 %v2726_v48, %v8077_v30 }
 0x1c1   :  { %8076 = vst [vmem:[#allocation34_spill] sm:$0xff] %v4621_v21  ;;  %v1248_v29 = vmul.f32 %v4621_v21, %v4289_v0  ;;  %v8081_v30 = vld [vmem:[#allocation40_spill] sm:$0xff]  ;;  %v4649_v0 = vld [vmem:[#allocation2 + $0x688] sm:$0xff] }
 0x1c2   :  { %v2313_v9 = vadd.f32 %v2312_v18, %v4609_v34  ;;  %v1756_v23 = vadd.f32 %v1755_v43, %v1245_v6  ;;  %v4629_v18 = vld [vmem:[#allocation5 + $0x528] sm:$0xff]  ;;  %v2728_v5 = vadd.f32 %v2727_v57, %v8079_v27  ;;  %v8083_v27 = vld [vmem:[#allocation42_spill] sm:$0xff] }
 0x1c3   :  { %8078 = vst [vmem:[#allocation35_spill] sm:$0xff] %v4629_v18  ;;  %v1249_v6 = vmul.f32 %v4629_v18, %v4297_v50  ;;  %v4657_v50 = vld [vmem:[#allocation2 + $0x690] sm:$0xff] }
 0x1c4   :  { %v2314_v54 = vadd.f32 %v2313_v9, %v4617_v62  ;;  %v1757_v37 = vadd.f32 %v1756_v23, %v1246_v46  ;;  %v4637_v9 = vld [vmem:[#allocation5 + $0x530] sm:$0xff]  ;;  %v2729_v10 = vadd.f32 %v2728_v5, %v8081_v30  ;;  %v8085_v30 = vld [vmem:[#allocation44_spill] sm:$0xff] }
 0x1c5   :  { %8080 = vst [vmem:[#allocation36_spill] sm:$0xff] %v4637_v9  ;;  %v1250_v46 = vmul.f32 %v4637_v9, %v4305_v52  ;;  %v4665_v52 = vld [vmem:[#allocation2 + $0x698] sm:$0xff] }
 0x1c6   :  { %v2315_v53 = vadd.f32 %v2314_v54, %v4625_v13  ;;  %v1758_v43 = vadd.f32 %v1757_v37, %v1247_v33  ;;  %v4645_v54 = vld [vmem:[#allocation5 + $0x538] sm:$0xff]  ;;  %v2730_v19 = vadd.f32 %v2729_v10, %v8083_v27 }
 0x1c7   :  { %8082 = vst [vmem:[#allocation37_spill] sm:$0xff] %v4645_v54  ;;  %v1251_v33 = vmul.f32 %v4645_v54, %v4313_v39  ;;  %v8087_v27 = vld [vmem:[#allocation11_spill] sm:$0xff]  ;;  %v4673_v39 = vld [vmem:[#allocation2 + $0x6a0] sm:$0xff] }
 0x1c8   :  { %v2316_v48 = vadd.f32 %v2315_v53, %v4633_v26  ;;  %v1759_v23 = vadd.f32 %v1758_v43, %v1248_v29  ;;  %v4653_v53 = vld [vmem:[#allocation5 + $0x540] sm:$0xff]  ;;  %v2731_v21 = vadd.f32 %v2730_v19, %v8085_v30 }
 0x1c9   :  { %8084 = vst [vmem:[#allocation38_spill] sm:$0xff] %v4653_v53  ;;  %v1252_v29 = vmul.f32 %v4653_v53, %v4321_v1  ;;  %v8089_v30 = vld [vmem:[#allocation12_spill] sm:$0xff]  ;;  %v4681_v1 = vld [vmem:[#allocation2 + $0x6a8] sm:$0xff] }
 0x1ca   :  { %v2317_v57 = vadd.f32 %v2316_v48, %v4641_v15  ;;  %v1760_v37 = vadd.f32 %v1759_v23, %v1249_v6  ;;  %v4661_v48 = vld [vmem:[#allocation5 + $0x548] sm:$0xff]  ;;  %v2732_v18 = vadd.f32 %v2731_v21, %v8087_v27  ;;  %v8091_v27 = vld [vmem:[#allocation47_spill] sm:$0xff] }
 0x1cb   :  { %8086 = vst [vmem:[#allocation39_spill] sm:$0xff] %v4661_v48  ;;  %v1253_v6 = vmul.f32 %v4661_v48, %v4329_v42  ;;  %v4689_v42 = vld [vmem:[#allocation2 + $0x6b0] sm:$0xff] }
 0x1cc   :  { %v2318_v5 = vadd.f32 %v2317_v57, %v4649_v0  ;;  %v1761_v43 = vadd.f32 %v1760_v37, %v1250_v46  ;;  %v4669_v57 = vld [vmem:[#allocation5 + $0x550] sm:$0xff]  ;;  %v2733_v9 = vadd.f32 %v2732_v18, %v8089_v30  ;;  %v8093_v30 = vld [vmem:[#allocation48_spill] sm:$0xff] }
 0x1cd   :  { %8088 = vst [vmem:[#allocation40_spill] sm:$0xff] %v4669_v57  ;;  %v1254_v46 = vmul.f32 %v4669_v57, %v4337_v45  ;;  %v4697_v45 = vld [vmem:[#allocation2 + $0x6b8] sm:$0xff] }
 0x1ce   :  { %v2319_v10 = vadd.f32 %v2318_v5, %v4657_v50  ;;  %v1762_v23 = vadd.f32 %v1761_v43, %v1251_v33  ;;  %v4677_v5 = vld [vmem:[#allocation5 + $0x558] sm:$0xff]  ;;  %v2734_v54 = vadd.f32 %v2733_v9, %v8091_v27  ;;  %v8095_v27 = vld [vmem:[#allocation66_spill] sm:$0xff] }
 0x1cf   :  { %8090 = vst [vmem:[#allocation42_spill] sm:$0xff] %v4677_v5  ;;  %v1255_v33 = vmul.f32 %v4677_v5, %v4345_v47  ;;  %v4705_v47 = vld [vmem:[#allocation2 + $0x6c0] sm:$0xff] }
 0x1d0   :  { %v2320_v19 = vadd.f32 %v2319_v10, %v4665_v52  ;;  %v1763_v37 = vadd.f32 %v1762_v23, %v1252_v29  ;;  %v4685_v10 = vld [vmem:[#allocation5 + $0x560] sm:$0xff]  ;;  %v2735_v53 = vadd.f32 %v2734_v54, %v8093_v30  ;;  %v8097_v30 = vld [vmem:[#allocation49_spill] sm:$0xff] }
 0x1d1   :  { %8092 = vst [vmem:[#allocation44_spill] sm:$0xff] %v4685_v10  ;;  %v1256_v29 = vmul.f32 %v4685_v10, %v4353_v49  ;;  %v4713_v49 = vld [vmem:[#allocation2 + $0x6c8] sm:$0xff] }
 0x1d2   :  { %v2321_v21 = vadd.f32 %v2320_v19, %v4673_v39  ;;  %v1764_v43 = vadd.f32 %v1763_v37, %v1253_v6  ;;  %v4693_v19 = vld [vmem:[#allocation5 + $0x568] sm:$0xff]  ;;  %v2736_v48 = vadd.f32 %v2735_v53, %v8095_v27  ;;  %v8099_v27 = vld [vmem:[#allocation50_spill] sm:$0xff] }
 0x1d3   :  { %8094 = vst [vmem:[#allocation11_spill] sm:$0xff] %v4693_v19  ;;  %v1257_v6 = vmul.f32 %v4693_v19, %v4361_v51  ;;  %v4721_v51 = vld [vmem:[#allocation2 + $0x6d0] sm:$0xff] }
 0x1d4   :  { %v2322_v18 = vadd.f32 %v2321_v21, %v4681_v1  ;;  %v1765_v23 = vadd.f32 %v1764_v43, %v1254_v46  ;;  %v4701_v21 = vld [vmem:[#allocation5 + $0x570] sm:$0xff]  ;;  %v2737_v57 = vadd.f32 %v2736_v48, %v8097_v30  ;;  %v8101_v30 = vld [vmem:[#allocation69_spill] sm:$0xff] }
 0x1d5   :  { %8096 = vst [vmem:[#allocation12_spill] sm:$0xff] %v4701_v21  ;;  %v1258_v46 = vmul.f32 %v4701_v21, %v4369_v14  ;;  %v4729_v14 = vld [vmem:[#allocation2 + $0x6d8] sm:$0xff] }
 0x1d6   :  { %v2323_v9 = vadd.f32 %v2322_v18, %v4689_v42  ;;  %v1766_v37 = vadd.f32 %v1765_v23, %v1255_v33  ;;  %v4709_v18 = vld [vmem:[#allocation5 + $0x578] sm:$0xff]  ;;  %v2738_v5 = vadd.f32 %v2737_v57, %v8099_v27 }
 0x1d7   :  { %8098 = vst [vmem:[#allocation47_spill] sm:$0xff] %v4709_v18  ;;  %v1259_v33 = vmul.f32 %v4709_v18, %v4377_v41  ;;  %v8103_v27 = vld [vmem:[#allocation51_spill] sm:$0xff]  ;;  %v4737_v41 = vld [vmem:[#allocation2 + $0x6e0] sm:$0xff] }
 0x1d8   :  { %v2324_v54 = vadd.f32 %v2323_v9, %v4697_v45  ;;  %v1767_v43 = vadd.f32 %v1766_v37, %v1256_v29  ;;  %v4717_v9 = vld [vmem:[#allocation5 + $0x580] sm:$0xff]  ;;  %v2739_v10 = vadd.f32 %v2738_v5, %v8101_v30 }
 0x1d9   :  { %8100 = vst [vmem:[#allocation48_spill] sm:$0xff] %v4717_v9  ;;  %v1260_v29 = vmul.f32 %v4717_v9, %v4385_v60  ;;  %v8105_v30 = vld [vmem:[#allocation52_spill] sm:$0xff]  ;;  %v4745_v60 = vld [vmem:[#allocation2 + $0x6e8] sm:$0xff] }
 0x1da   :  { %v2325_v53 = vadd.f32 %v2324_v54, %v4705_v47  ;;  %v1768_v23 = vadd.f32 %v1767_v43, %v1257_v6  ;;  %v4725_v54 = vld [vmem:[#allocation5 + $0x588] sm:$0xff]  ;;  %v2740_v19 = vadd.f32 %v2739_v10, %v8103_v27 }
 0x1db   :  { %8102 = vst [vmem:[#allocation66_spill] sm:$0xff] %v4725_v54  ;;  %v1261_v6 = vmul.f32 %v4725_v54, %v4393_v59  ;;  %v8107_v27 = vld [vmem:[#allocation53_spill] sm:$0xff]  ;;  %v4753_v59 = vld [vmem:[#allocation2 + $0x6f0] sm:$0xff] }
 0x1dc   :  { %v2326_v48 = vadd.f32 %v2325_v53, %v4713_v49  ;;  %v1769_v37 = vadd.f32 %v1768_v23, %v1258_v46  ;;  %v4733_v53 = vld [vmem:[#allocation5 + $0x590] sm:$0xff]  ;;  %v2741_v21 = vadd.f32 %v2740_v19, %v8105_v30 }
 0x1dd   :  { %8104 = vst [vmem:[#allocation49_spill] sm:$0xff] %v4733_v53  ;;  %v1262_v46 = vmul.f32 %v4733_v53, %v4401_v61  ;;  %v8109_v30 = vld [vmem:[#allocation54_spill] sm:$0xff]  ;;  %v4761_v61 = vld [vmem:[#allocation2 + $0x6f8] sm:$0xff] }
 0x1de   :  { %v2327_v57 = vadd.f32 %v2326_v48, %v4721_v51  ;;  %v1770_v43 = vadd.f32 %v1769_v37, %v1259_v33  ;;  %v4741_v48 = vld [vmem:[#allocation5 + $0x598] sm:$0xff]  ;;  %v2742_v18 = vadd.f32 %v2741_v21, %v8107_v27 }
 0x1df   :  { %8106 = vst [vmem:[#allocation50_spill] sm:$0xff] %v4741_v48  ;;  %v1263_v33 = vmul.f32 %v4741_v48, %v4409_v63  ;;  %v8111_v27 = vld [vmem:[#allocation55_spill] sm:$0xff]  ;;  %v4769_v63 = vld [vmem:[#allocation2 + $0x700] sm:$0xff] }
 0x1e0   :  { %v2328_v5 = vadd.f32 %v2327_v57, %v4729_v14  ;;  %v1771_v23 = vadd.f32 %v1770_v43, %v1260_v29  ;;  %v4749_v57 = vld [vmem:[#allocation5 + $0x5a0] sm:$0xff]  ;;  %v2743_v9 = vadd.f32 %v2742_v18, %v8109_v30 }
 0x1e1   :  { %8108 = vst [vmem:[#allocation69_spill] sm:$0xff] %v4749_v57  ;;  %v1264_v29 = vmul.f32 %v4749_v57, %v4417_v4  ;;  %v8113_v30 = vld [vmem:[#allocation56_spill] sm:$0xff]  ;;  %v4777_v4 = vld [vmem:[#allocation2 + $0x708] sm:$0xff] }
 0x1e2   :  { %v2329_v10 = vadd.f32 %v2328_v5, %v4737_v41  ;;  %v1772_v37 = vadd.f32 %v1771_v23, %v1261_v6  ;;  %v4757_v5 = vld [vmem:[#allocation5 + $0x5a8] sm:$0xff]  ;;  %v2744_v54 = vadd.f32 %v2743_v9, %v8111_v27 }
 0x1e3   :  { %8110 = vst [vmem:[#allocation51_spill] sm:$0xff] %v4757_v5  ;;  %v1265_v6 = vmul.f32 %v4757_v5, %v4425_v8  ;;  %v8115_v27 = vld [vmem:[#allocation57_spill] sm:$0xff]  ;;  %v4785_v8 = vld [vmem:[#allocation2 + $0x710] sm:$0xff] }
 0x1e4   :  { %v2330_v19 = vadd.f32 %v2329_v10, %v4745_v60  ;;  %v1773_v43 = vadd.f32 %v1772_v37, %v1262_v46  ;;  %v4765_v10 = vld [vmem:[#allocation5 + $0x5b0] sm:$0xff]  ;;  %v2745_v53 = vadd.f32 %v2744_v54, %v8113_v30 }
 0x1e5   :  { %8112 = vst [vmem:[#allocation52_spill] sm:$0xff] %v4765_v10  ;;  %v1266_v46 = vmul.f32 %v4765_v10, %v4433_v12  ;;  %v8117_v30 = vld [vmem:[#allocation58_spill] sm:$0xff]  ;;  %v4793_v12 = vld [vmem:[#allocation2 + $0x718] sm:$0xff] }
 0x1e6   :  { %v2331_v21 = vadd.f32 %v2330_v19, %v4753_v59  ;;  %v1774_v23 = vadd.f32 %v1773_v43, %v1263_v33  ;;  %v4773_v19 = vld [vmem:[#allocation5 + $0x5b8] sm:$0xff]  ;;  %v2746_v48 = vadd.f32 %v2745_v53, %v8115_v27 }
 0x1e7   :  { %8114 = vst [vmem:[#allocation53_spill] sm:$0xff] %v4773_v19  ;;  %v1267_v33 = vmul.f32 %v4773_v19, %v4441_v16  ;;  %v8119_v27 = vld [vmem:[#allocation59_spill] sm:$0xff]  ;;  %v4801_v16 = vld [vmem:[#allocation2 + $0x720] sm:$0xff] }
 0x1e8   :  { %v2332_v18 = vadd.f32 %v2331_v21, %v4761_v61  ;;  %v1775_v37 = vadd.f32 %v1774_v23, %v1264_v29  ;;  %v4781_v21 = vld [vmem:[#allocation5 + $0x5c0] sm:$0xff]  ;;  %v2747_v57 = vadd.f32 %v2746_v48, %v8117_v30 }
 0x1e9   :  { %8116 = vst [vmem:[#allocation54_spill] sm:$0xff] %v4781_v21  ;;  %v1268_v29 = vmul.f32 %v4781_v21, %v4449_v20  ;;  %v4809_v20 = vld [vmem:[#allocation2 + $0x728] sm:$0xff] }
 0x1ea   :  { %v2333_v9 = vadd.f32 %v2332_v18, %v4769_v63  ;;  %v1776_v43 = vadd.f32 %v1775_v37, %v1265_v6  ;;  %v4789_v18 = vld [vmem:[#allocation5 + $0x5c8] sm:$0xff]  ;;  %v2748_v5 = vadd.f32 %v2747_v57, %v8119_v27 }
 0x1eb   :  { %8118 = vst [vmem:[#allocation55_spill] sm:$0xff] %v4789_v18  ;;  %v1269_v6 = vmul.f32 %v4789_v18, %v4457_v24  ;;  %v4817_v24 = vld [vmem:[#allocation2 + $0x730] sm:$0xff] }
 0x1ec   :  { %v2334_v54 = vadd.f32 %v2333_v9, %v4777_v4  ;;  %v1777_v23 = vadd.f32 %v1776_v43, %v1266_v46  ;;  %v4797_v9 = vld [vmem:[#allocation5 + $0x5d0] sm:$0xff]  ;;  %v2749_v30 = vadd.f32 %v2748_v5, %v4317_v25  ;;  %v8123_v5 = vld [vmem:[#allocation60_spill] sm:$0xff] }
 0x1ed   :  { %8120 = vst [vmem:[#allocation56_spill] sm:$0xff] %v4797_v9  ;;  %v1270_v46 = vmul.f32 %v4797_v9, %v4465_v28  ;;  %v4825_v28 = vld [vmem:[#allocation2 + $0x738] sm:$0xff] }
 0x1ee   :  { %v2335_v53 = vadd.f32 %v2334_v54, %v4785_v8  ;;  %v1778_v37 = vadd.f32 %v1777_v23, %v1267_v33  ;;  %v4805_v54 = vld [vmem:[#allocation5 + $0x5d8] sm:$0xff]  ;;  %v2750_v27 = vadd.f32 %v2749_v30, %v4325_v3  ;;  %v8125_v30 = vld [vmem:[#allocation61_spill] sm:$0xff] }
 0x1ef   :  { %8121 = vst [vmem:[#allocation57_spill] sm:$0xff] %v4805_v54  ;;  %v1271_v33 = vmul.f32 %v4805_v54, %v4473_v32  ;;  %v4833_v32 = vld [vmem:[#allocation2 + $0x740] sm:$0xff] }
 0x1f0   :  { %v2336_v48 = vadd.f32 %v2335_v53, %v4793_v12  ;;  %v1779_v43 = vadd.f32 %v1778_v37, %v1268_v29  ;;  %v4813_v53 = vld [vmem:[#allocation5 + $0x5e0] sm:$0xff]  ;;  %v2751_v21 = vadd.f32 %v2750_v27, %v8123_v5  ;;  %v8127_v5 = vld [vmem:[#allocation62_spill] sm:$0xff] }
 0x1f1   :  { %8122 = vst [vmem:[#allocation58_spill] sm:$0xff] %v4813_v53  ;;  %v1272_v29 = vmul.f32 %v4813_v53, %v4481_v36  ;;  %v4841_v36 = vld [vmem:[#allocation2 + $0x748] sm:$0xff] }
 0x1f2   :  { %v2337_v57 = vadd.f32 %v2336_v48, %v4801_v16  ;;  %v1780_v23 = vadd.f32 %v1779_v43, %v1269_v6  ;;  %v4821_v48 = vld [vmem:[#allocation5 + $0x5e8] sm:$0xff]  ;;  %v2752_v18 = vadd.f32 %v2751_v21, %v8125_v30  ;;  %v8129_v30 = vld [vmem:[#allocation63_spill] sm:$0xff] }
 0x1f3   :  { %8124 = vst [vmem:[#allocation59_spill] sm:$0xff] %v4821_v48  ;;  %v1273_v6 = vmul.f32 %v4821_v48, %v4489_v40  ;;  %v4849_v40 = vld [vmem:[#allocation2 + $0x750] sm:$0xff]  ;;  %v4853_v48 = vld [vmem:[#allocation5 + $0x608] sm:$0xff] }
 0x1f4   :  { %v2338_v25 = vadd.f32 %v2337_v57, %v4809_v20  ;;  %v1781_v37 = vadd.f32 %v1780_v23, %v1270_v46  ;;  %v4829_v57 = vld [vmem:[#allocation5 + $0x5f0] sm:$0xff]  ;;  %v2753_v9 = vadd.f32 %v2752_v18, %v8127_v5  ;;  %v8131_v5 = vld [vmem:[#allocation64_spill] sm:$0xff]  ;;  %8133 = vst [vmem:[#allocation63_spill] sm:$0xff] %v4853_v48 }
 0x1f5   :  { %8126 = vst [vmem:[#allocation60_spill] sm:$0xff] %v4829_v57  ;;  %v1274_v46 = vmul.f32 %v4829_v57, %v4497_v44  ;;  %v4857_v44 = vld [vmem:[#allocation2 + $0x758] sm:$0xff] }
 0x1f6   :  { %v2339_v3 = vadd.f32 %v2338_v25, %v4817_v24  ;;  %v1782_v43 = vadd.f32 %v1781_v37, %v1271_v33  ;;  %v4837_v25 = vld [vmem:[#allocation5 + $0x5f8] sm:$0xff]  ;;  %v2754_v54 = vadd.f32 %v2753_v9, %v8129_v30  ;;  %v8134_v30 = vld [vmem:[#allocation65_spill] sm:$0xff] }
 0x1f7   :  { %8128 = vst [vmem:[#allocation61_spill] sm:$0xff] %v4837_v25  ;;  %v8132_v33 = vld [vmem:[#allocation23_spill] sm:$0xff] }
 0x1f8   :  { %v2340_v27 = vadd.f32 %v2339_v3, %v4825_v28  ;;  %v1783_v23 = vadd.f32 %v1782_v43, %v1272_v29  ;;  %v4845_v3 = vld [vmem:[#allocation5 + $0x600] sm:$0xff]  ;;  %v2755_v53 = vadd.f32 %v2754_v54, %v8131_v5  ;;  %v1275_v37 = vmul.f32 %v4837_v25, %v8132_v33  ;;  %v8136_v5 = vld [vmem:[#allocation67_spill] sm:$0xff] }
 0x1f9   :  { %8130 = vst [vmem:[#allocation62_spill] sm:$0xff] %v4845_v3  ;;  %v1276_v29 = vmul.f32 %v4845_v3, %v4513_v55  ;;  %v4865_v33 = vld [vmem:[#allocation2 + $0x760] sm:$0xff]  ;;  %v4869_v25 = vld [vmem:[#allocation5 + $0x618] sm:$0xff]  ;;  %v4873_v55 = vld [vmem:[#allocation2 + $0x768] sm:$0xff] }
 0x1fa   :  { %v2341_v21 = vadd.f32 %v2340_v27, %v4833_v32  ;;  %v1784_v27 = vadd.f32 %v1783_v23, %v1273_v6  ;;  %v2756_v19 = vadd.f32 %v2755_v53, %v8134_v30  ;;  %v8137_v6 = vld [vmem:[#allocation43_spill] sm:$0xff]  ;;  %8138 = vst [vmem:[#allocation23_spill] sm:$0xff] %v4869_v25  ;;  %v8139_v30 = vld [vmem:[#allocation68_spill] sm:$0xff] }
 0x1fb   :  { %v1277_v23 = vmul.f32 %v4853_v48, %v8137_v6  ;;  %v4881_v6 = vld [vmem:[#allocation2 + $0x770] sm:$0xff] }
 0x1fc   :  { %v2342_v18 = vadd.f32 %v2341_v21, %v4841_v36  ;;  %v1785_v43 = vadd.f32 %v1784_v27, %v1274_v46  ;;  %v4861_v21 = vld [vmem:[#allocation5 + $0x610] sm:$0xff]  ;;  %v2757_v57 = vadd.f32 %v2756_v19, %v8136_v5 }
 0x1fd   :  { %8135 = vst [vmem:[#allocation64_spill] sm:$0xff] %v4861_v21  ;;  %v1278_v46 = vmul.f32 %v4861_v21, %v4529_v38  ;;  %v8141_v5 = vld [vmem:[#allocation14_spill] sm:$0xff]  ;;  %v4889_v38 = vld [vmem:[#allocation2 + $0x778] sm:$0xff] }
 0x1fe   :  { %v2343_v9 = vadd.f32 %v2342_v18, %v4849_v40  ;;  %v1786_v18 = vadd.f32 %v1785_v43, %v1275_v37  ;;  %v2758_v10 = vadd.f32 %v2757_v57, %v8139_v30  ;;  %v1279_v37 = vmul.f32 %v4869_v25, %v4537_v31  ;;  %v8143_v30 = vld [vmem:[#allocation15_spill] sm:$0xff]  ;;  %v4897_v31 = vld [vmem:[#allocation2 + $0x780] sm:$0xff] }
 0x200   :  { %v2344_v54 = vadd.f32 %v2343_v9, %v4857_v44  ;;  %v1787_v27 = vadd.f32 %v1786_v18, %v1276_v29  ;;  %v4877_v9 = vld [vmem:[#allocation5 + $0x620] sm:$0xff]  ;;  %v2759_v3 = vadd.f32 %v2758_v10, %v8141_v5 }
 0x201   :  { %8140 = vst [vmem:[#allocation65_spill] sm:$0xff] %v4877_v9  ;;  %v1280_v29 = vmul.f32 %v4877_v9, %v4545_v7  ;;  %v8145_v5 = vld [vmem:[#allocation16_spill] sm:$0xff]  ;;  %v4905_v7 = vld [vmem:[#allocation2 + $0x788] sm:$0xff] }
 0x202   :  { %v2345_v53 = vadd.f32 %v2344_v54, %v4865_v33  ;;  %v1788_v43 = vadd.f32 %v1787_v27, %v1277_v23  ;;  %v4885_v54 = vld [vmem:[#allocation5 + $0x628] sm:$0xff]  ;;  %v2760_v48 = vadd.f32 %v2759_v3, %v8143_v30  ;;  %v8147_v30 = vld [vmem:[#allocation70_spill] sm:$0xff] }
 0x203   :  { %8142 = vst [vmem:[#allocation67_spill] sm:$0xff] %v4885_v54  ;;  %v1281_v23 = vmul.f32 %v4885_v54, %v4553_v22  ;;  %v4913_v22 = vld [vmem:[#allocation2 + $0x790] sm:$0xff] }
 0x204   :  { %v2346_v19 = vadd.f32 %v2345_v53, %v4873_v55  ;;  %v1789_v18 = vadd.f32 %v1788_v43, %v1278_v46  ;;  %v4893_v53 = vld [vmem:[#allocation5 + $0x630] sm:$0xff]  ;;  %v2761_v21 = vadd.f32 %v2760_v48, %v8145_v5  ;;  %v8149_v5 = vld [vmem:[#allocation71_spill] sm:$0xff] }
 0x205   :  { %8144 = vst [vmem:[#allocation43_spill] sm:$0xff] %v4893_v53  ;;  %v1282_v46 = vmul.f32 %v4893_v53, %v4561_v56  ;;  %v4921_v56 = vld [vmem:[#allocation2 + $0x798] sm:$0xff] }
 0x206   :  { %v2347_v57 = vadd.f32 %v2346_v19, %v4881_v6  ;;  %v1790_v27 = vadd.f32 %v1789_v18, %v1279_v37  ;;  %v4901_v19 = vld [vmem:[#allocation5 + $0x638] sm:$0xff]  ;;  %v2762_v25 = vadd.f32 %v2761_v21, %v8147_v30  ;;  %v8151_v30 = vld [vmem:[#allocation72_spill] sm:$0xff] }
 0x207   :  { %8146 = vst [vmem:[#allocation68_spill] sm:$0xff] %v4901_v19  ;;  %v1283_v37 = vmul.f32 %v4901_v19, %v4569_v58  ;;  %v4929_v58 = vld [vmem:[#allocation2 + $0x7a0] sm:$0xff] }
 0x208   :  { %v2348_v10 = vadd.f32 %v2347_v57, %v4889_v38  ;;  %v1791_v43 = vadd.f32 %v1790_v27, %v1280_v29  ;;  %v4909_v57 = vld [vmem:[#allocation5 + $0x640] sm:$0xff]  ;;  %v2763_v9 = vadd.f32 %v2762_v25, %v8149_v5  ;;  %v8153_v5 = vld [vmem:[#allocation73_spill] sm:$0xff] }
 0x209   :  { %8148 = vst [vmem:[#allocation14_spill] sm:$0xff] %v4909_v57  ;;  %v1284_v29 = vmul.f32 %v4909_v57, %v4577_v2  ;;  %v4937_v2 = vld [vmem:[#allocation2 + $0x7a8] sm:$0xff] }
 0x20a   :  { %v2349_v3 = vadd.f32 %v2348_v10, %v4897_v31  ;;  %v1792_v18 = vadd.f32 %v1791_v43, %v1281_v23  ;;  %v4917_v10 = vld [vmem:[#allocation5 + $0x648] sm:$0xff]  ;;  %v2764_v54 = vadd.f32 %v2763_v9, %v8151_v30  ;;  %v8155_v30 = vld [vmem:[#allocation74_spill] sm:$0xff] }
 0x20b   :  { %8150 = vst [vmem:[#allocation15_spill] sm:$0xff] %v4917_v10  ;;  %v1285_v23 = vmul.f32 %v4917_v10, %v4585_v35  ;;  %v4945_v35 = vld [vmem:[#allocation2 + $0x7b0] sm:$0xff] }
 0x20c   :  { %v2350_v48 = vadd.f32 %v2349_v3, %v4905_v7  ;;  %v1793_v27 = vadd.f32 %v1792_v18, %v1282_v46  ;;  %v4925_v3 = vld [vmem:[#allocation5 + $0x650] sm:$0xff]  ;;  %v2765_v53 = vadd.f32 %v2764_v54, %v8153_v5  ;;  %v8157_v5 = vld [vmem:[#allocation17_spill] sm:$0xff] }
 0x20d   :  { %8152 = vst [vmem:[#allocation16_spill] sm:$0xff] %v4925_v3  ;;  %v1286_v46 = vmul.f32 %v4925_v3, %v4593_v11  ;;  %v4953_v11 = vld [vmem:[#allocation2 + $0x7b8] sm:$0xff] }
 0x20e   :  { %v2351_v21 = vadd.f32 %v2350_v48, %v4913_v22  ;;  %v1794_v43 = vadd.f32 %v1793_v27, %v1283_v37  ;;  %v4933_v48 = vld [vmem:[#allocation5 + $0x658] sm:$0xff]  ;;  %v2766_v19 = vadd.f32 %v2765_v53, %v8155_v30  ;;  %v8159_v30 = vld [vmem:[#allocation18_spill] sm:$0xff] }
 0x20f   :  { %8154 = vst [vmem:[#allocation70_spill] sm:$0xff] %v4933_v48  ;;  %v1287_v37 = vmul.f32 %v4933_v48, %v4601_v17  ;;  %v4961_v17 = vld [vmem:[#allocation2 + $0x7c0] sm:$0xff] }
 0x210   :  { %v2352_v25 = vadd.f32 %v2351_v21, %v4921_v56  ;;  %v1795_v18 = vadd.f32 %v1794_v43, %v1284_v29  ;;  %v4941_v21 = vld [vmem:[#allocation5 + $0x660] sm:$0xff]  ;;  %v2767_v57 = vadd.f32 %v2766_v19, %v8157_v5  ;;  %v8161_v5 = vld [vmem:[#allocation19_spill] sm:$0xff] }
 0x211   :  { %8156 = vst [vmem:[#allocation71_spill] sm:$0xff] %v4941_v21  ;;  %v1288_v29 = vmul.f32 %v4941_v21, %v4609_v34  ;;  %v4969_v34 = vld [vmem:[#allocation2 + $0x7c8] sm:$0xff] }
 0x212   :  { %v2353_v9 = vadd.f32 %v2352_v25, %v4929_v58  ;;  %v1796_v27 = vadd.f32 %v1795_v18, %v1285_v23  ;;  %v4949_v25 = vld [vmem:[#allocation5 + $0x668] sm:$0xff]  ;;  %v2768_v10 = vadd.f32 %v2767_v57, %v8159_v30  ;;  %v8163_v30 = vld [vmem:[#allocation20_spill] sm:$0xff] }
 0x213   :  { %8158 = vst [vmem:[#allocation72_spill] sm:$0xff] %v4949_v25  ;;  %v1289_v23 = vmul.f32 %v4949_v25, %v4617_v62  ;;  %v4977_v62 = vld [vmem:[#allocation2 + $0x7d0] sm:$0xff] }
 0x214   :  { %v2354_v54 = vadd.f32 %v2353_v9, %v4937_v2  ;;  %v1797_v43 = vadd.f32 %v1796_v27, %v1286_v46  ;;  %v4957_v9 = vld [vmem:[#allocation5 + $0x670] sm:$0xff]  ;;  %v2769_v3 = vadd.f32 %v2768_v10, %v8161_v5  ;;  %v8165_v5 = vld [vmem:[#allocation21_spill] sm:$0xff] }
 0x215   :  { %8160 = vst [vmem:[#allocation73_spill] sm:$0xff] %v4957_v9  ;;  %v1290_v46 = vmul.f32 %v4957_v9, %v4625_v13  ;;  %v4985_v13 = vld [vmem:[#allocation2 + $0x7d8] sm:$0xff] }
 0x216   :  { %v2355_v53 = vadd.f32 %v2354_v54, %v4945_v35  ;;  %v1798_v18 = vadd.f32 %v1797_v43, %v1287_v37  ;;  %v4965_v54 = vld [vmem:[#allocation5 + $0x678] sm:$0xff]  ;;  %v2770_v48 = vadd.f32 %v2769_v3, %v8163_v30  ;;  %v8167_v30 = vld [vmem:[#allocation22_spill] sm:$0xff] }
 0x217   :  { %8162 = vst [vmem:[#allocation74_spill] sm:$0xff] %v4965_v54  ;;  %v1291_v37 = vmul.f32 %v4965_v54, %v4633_v26  ;;  %v4993_v26 = vld [vmem:[#allocation2 + $0x7e0] sm:$0xff] }
 0x218   :  { %v2356_v19 = vadd.f32 %v2355_v53, %v4953_v11  ;;  %v1799_v27 = vadd.f32 %v1798_v18, %v1288_v29  ;;  %v4973_v53 = vld [vmem:[#allocation5 + $0x680] sm:$0xff]  ;;  %v2771_v21 = vadd.f32 %v2770_v48, %v8165_v5  ;;  %v8169_v5 = vld [vmem:[#allocation41_spill] sm:$0xff] }
 0x219   :  { %8164 = vst [vmem:[#allocation17_spill] sm:$0xff] %v4973_v53  ;;  %v1292_v29 = vmul.f32 %v4973_v53, %v4641_v15  ;;  %v5001_v15 = vld [vmem:[#allocation2 + $0x7e8] sm:$0xff] }
 0x21a   :  { %v2357_v57 = vadd.f32 %v2356_v19, %v4961_v17  ;;  %v1800_v43 = vadd.f32 %v1799_v27, %v1289_v23  ;;  %v4981_v19 = vld [vmem:[#allocation5 + $0x688] sm:$0xff]  ;;  %v2772_v25 = vadd.f32 %v2771_v21, %v8167_v30  ;;  %v8171_v30 = vld [vmem:[#allocation24_spill] sm:$0xff] }
 0x21b   :  { %8166 = vst [vmem:[#allocation18_spill] sm:$0xff] %v4981_v19  ;;  %v1293_v23 = vmul.f32 %v4981_v19, %v4649_v0  ;;  %v5009_v0 = vld [vmem:[#allocation2 + $0x7f0] sm:$0xff] }
 0x21c   :  { %v2358_v10 = vadd.f32 %v2357_v57, %v4969_v34  ;;  %v1801_v18 = vadd.f32 %v1800_v43, %v1290_v46  ;;  %v4989_v57 = vld [vmem:[#allocation5 + $0x690] sm:$0xff]  ;;  %v2773_v9 = vadd.f32 %v2772_v25, %v8169_v5  ;;  %v8173_v5 = vld [vmem:[#allocation25_spill] sm:$0xff] }
 0x21d   :  { %8168 = vst [vmem:[#allocation19_spill] sm:$0xff] %v4989_v57  ;;  %v1294_v46 = vmul.f32 %v4989_v57, %v4657_v50  ;;  %v5017_v50 = vld [vmem:[#allocation2 + $0x7f8] sm:$0xff] }
 0x21e   :  { %v2359_v3 = vadd.f32 %v2358_v10, %v4977_v62  ;;  %v1802_v27 = vadd.f32 %v1801_v18, %v1291_v37  ;;  %v4997_v10 = vld [vmem:[#allocation5 + $0x698] sm:$0xff]  ;;  %v2774_v54 = vadd.f32 %v2773_v9, %v8171_v30  ;;  %v8175_v30 = vld [vmem:[#allocation45_spill] sm:$0xff] }
 0x21f   :  { %8170 = vst [vmem:[#allocation20_spill] sm:$0xff] %v4997_v10  ;;  %v1295_v37 = vmul.f32 %v4997_v10, %v4665_v52  ;;  %v5025_v52 = vld [vmem:[#allocation2 + $0x800] sm:$0xff] }
 0x220   :  { %v2360_v48 = vadd.f32 %v2359_v3, %v4985_v13  ;;  %v1803_v43 = vadd.f32 %v1802_v27, %v1292_v29  ;;  %v5005_v3 = vld [vmem:[#allocation5 + $0x6a0] sm:$0xff]  ;;  %v2775_v53 = vadd.f32 %v2774_v54, %v8173_v5  ;;  %v8177_v5 = vld [vmem:[#allocation46_spill] sm:$0xff] }
 0x221   :  { %8172 = vst [vmem:[#allocation21_spill] sm:$0xff] %v5005_v3  ;;  %v1296_v29 = vmul.f32 %v5005_v3, %v4673_v39  ;;  %v5033_v39 = vld [vmem:[#allocation2 + $0x808] sm:$0xff] }
 0x222   :  { %v2361_v21 = vadd.f32 %v2360_v48, %v4993_v26  ;;  %v1804_v18 = vadd.f32 %v1803_v43, %v1293_v23  ;;  %v5013_v48 = vld [vmem:[#allocation5 + $0x6a8] sm:$0xff]  ;;  %v2776_v19 = vadd.f32 %v2775_v53, %v8175_v30  ;;  %v8179_v30 = vld [vmem:[#allocation26_spill] sm:$0xff] }
 0x223   :  { %8174 = vst [vmem:[#allocation22_spill] sm:$0xff] %v5013_v48  ;;  %v1297_v23 = vmul.f32 %v5013_v48, %v4681_v1  ;;  %v5041_v1 = vld [vmem:[#allocation2 + $0x810] sm:$0xff] }
 0x224   :  { %v2362_v25 = vadd.f32 %v2361_v21, %v5001_v15  ;;  %v1805_v27 = vadd.f32 %v1804_v18, %v1294_v46  ;;  %v5021_v21 = vld [vmem:[#allocation5 + $0x6b0] sm:$0xff]  ;;  %v2777_v57 = vadd.f32 %v2776_v19, %v8177_v5  ;;  %v8181_v5 = vld [vmem:[#allocation27_spill] sm:$0xff] }
 0x225   :  { %8176 = vst [vmem:[#allocation41_spill] sm:$0xff] %v5021_v21  ;;  %v1298_v46 = vmul.f32 %v5021_v21, %v4689_v42  ;;  %v5049_v42 = vld [vmem:[#allocation2 + $0x818] sm:$0xff] }
 0x226   :  { %v2363_v9 = vadd.f32 %v2362_v25, %v5009_v0  ;;  %v1806_v43 = vadd.f32 %v1805_v27, %v1295_v37  ;;  %v5029_v25 = vld [vmem:[#allocation5 + $0x6b8] sm:$0xff]  ;;  %v2778_v10 = vadd.f32 %v2777_v57, %v8179_v30  ;;  %v8183_v30 = vld [vmem:[#allocation13_spill] sm:$0xff] }
 0x227   :  { %8178 = vst [vmem:[#allocation24_spill] sm:$0xff] %v5029_v25  ;;  %v1299_v37 = vmul.f32 %v5029_v25, %v4697_v45  ;;  %v5057_v45 = vld [vmem:[#allocation2 + $0x820] sm:$0xff] }
 0x228   :  { %v2364_v54 = vadd.f32 %v2363_v9, %v5017_v50  ;;  %v1807_v18 = vadd.f32 %v1806_v43, %v1296_v29  ;;  %v5037_v9 = vld [vmem:[#allocation5 + $0x6c0] sm:$0xff]  ;;  %v2779_v3 = vadd.f32 %v2778_v10, %v8181_v5 }
 0x229   :  { %8180 = vst [vmem:[#allocation25_spill] sm:$0xff] %v5037_v9  ;;  %v1300_v29 = vmul.f32 %v5037_v9, %v4705_v47  ;;  %v8185_v5 = vld [vmem:[#allocation28_spill] sm:$0xff]  ;;  %v5065_v47 = vld [vmem:[#allocation2 + $0x828] sm:$0xff] }
 0x22a   :  { %v2365_v53 = vadd.f32 %v2364_v54, %v5025_v52  ;;  %v1808_v27 = vadd.f32 %v1807_v18, %v1297_v23  ;;  %v5045_v54 = vld [vmem:[#allocation5 + $0x6c8] sm:$0xff]  ;;  %v2780_v48 = vadd.f32 %v2779_v3, %v8183_v30 }
 0x22b   :  { %8182 = vst [vmem:[#allocation45_spill] sm:$0xff] %v5045_v54  ;;  %v1301_v23 = vmul.f32 %v5045_v54, %v4713_v49  ;;  %v8187_v30 = vld [vmem:[#allocation29_spill] sm:$0xff]  ;;  %v5073_v49 = vld [vmem:[#allocation2 + $0x830] sm:$0xff] }
 0x22c   :  { %v2366_v19 = vadd.f32 %v2365_v53, %v5033_v39  ;;  %v1809_v43 = vadd.f32 %v1808_v27, %v1298_v46  ;;  %v5053_v53 = vld [vmem:[#allocation5 + $0x6d0] sm:$0xff]  ;;  %v2781_v21 = vadd.f32 %v2780_v48, %v8185_v5 }
 0x22d   :  { %8184 = vst [vmem:[#allocation46_spill] sm:$0xff] %v5053_v53  ;;  %v1302_v46 = vmul.f32 %v5053_v53, %v4721_v51  ;;  %v8189_v5 = vld [vmem:[#allocation30_spill] sm:$0xff]  ;;  %v5081_v51 = vld [vmem:[#allocation2 + $0x838] sm:$0xff] }
 0x22e   :  { %v2367_v57 = vadd.f32 %v2366_v19, %v5041_v1  ;;  %v1810_v18 = vadd.f32 %v1809_v43, %v1299_v37  ;;  %v5061_v19 = vld [vmem:[#allocation5 + $0x6d8] sm:$0xff]  ;;  %v2782_v25 = vadd.f32 %v2781_v21, %v8187_v30 }
 0x22f   :  { %8186 = vst [vmem:[#allocation26_spill] sm:$0xff] %v5061_v19  ;;  %v1303_v37 = vmul.f32 %v5061_v19, %v4729_v14  ;;  %v8191_v30 = vld [vmem:[#allocation31_spill] sm:$0xff]  ;;  %v5089_v14 = vld [vmem:[#allocation2 + $0x840] sm:$0xff] }
 0x230   :  { %v2368_v10 = vadd.f32 %v2367_v57, %v5049_v42  ;;  %v1811_v27 = vadd.f32 %v1810_v18, %v1300_v29  ;;  %v5069_v57 = vld [vmem:[#allocation5 + $0x6e0] sm:$0xff]  ;;  %v2783_v9 = vadd.f32 %v2782_v25, %v8189_v5 }
 0x231   :  { %8188 = vst [vmem:[#allocation27_spill] sm:$0xff] %v5069_v57  ;;  %v1304_v29 = vmul.f32 %v5069_v57, %v4737_v41  ;;  %v8193_v5 = vld [vmem:[#allocation32_spill] sm:$0xff]  ;;  %v5097_v41 = vld [vmem:[#allocation2 + $0x848] sm:$0xff] }
 0x232   :  { %v2369_v3 = vadd.f32 %v2368_v10, %v5057_v45  ;;  %v1812_v43 = vadd.f32 %v1811_v27, %v1301_v23  ;;  %v5077_v10 = vld [vmem:[#allocation5 + $0x6e8] sm:$0xff]  ;;  %v2784_v54 = vadd.f32 %v2783_v9, %v8191_v30 }
 0x233   :  { %8190 = vst [vmem:[#allocation13_spill] sm:$0xff] %v5077_v10  ;;  %v1305_v23 = vmul.f32 %v5077_v10, %v4745_v60  ;;  %v8195_v30 = vld [vmem:[#allocation33_spill] sm:$0xff]  ;;  %v5105_v60 = vld [vmem:[#allocation2 + $0x850] sm:$0xff] }
 0x234   :  { %v2370_v48 = vadd.f32 %v2369_v3, %v5065_v47  ;;  %v1813_v18 = vadd.f32 %v1812_v43, %v1302_v46  ;;  %v5085_v3 = vld [vmem:[#allocation5 + $0x6f0] sm:$0xff]  ;;  %v2785_v53 = vadd.f32 %v2784_v54, %v8193_v5 }
 0x235   :  { %8192 = vst [vmem:[#allocation28_spill] sm:$0xff] %v5085_v3  ;;  %v1306_v46 = vmul.f32 %v5085_v3, %v4753_v59  ;;  %v8197_v5 = vld [vmem:[#allocation34_spill] sm:$0xff]  ;;  %v5113_v59 = vld [vmem:[#allocation2 + $0x858] sm:$0xff] }
 0x236   :  { %v2371_v21 = vadd.f32 %v2370_v48, %v5073_v49  ;;  %v1814_v27 = vadd.f32 %v1813_v18, %v1303_v37  ;;  %v5093_v48 = vld [vmem:[#allocation5 + $0x6f8] sm:$0xff]  ;;  %v2786_v19 = vadd.f32 %v2785_v53, %v8195_v30 }
 0x237   :  { %8194 = vst [vmem:[#allocation29_spill] sm:$0xff] %v5093_v48  ;;  %v1307_v37 = vmul.f32 %v5093_v48, %v4761_v61  ;;  %v8199_v30 = vld [vmem:[#allocation35_spill] sm:$0xff]  ;;  %v5121_v61 = vld [vmem:[#allocation2 + $0x860] sm:$0xff] }
 0x238   :  { %v2372_v25 = vadd.f32 %v2371_v21, %v5081_v51  ;;  %v1815_v43 = vadd.f32 %v1814_v27, %v1304_v29  ;;  %v5101_v21 = vld [vmem:[#allocation5 + $0x700] sm:$0xff]  ;;  %v2787_v57 = vadd.f32 %v2786_v19, %v8197_v5 }
 0x239   :  { %8196 = vst [vmem:[#allocation30_spill] sm:$0xff] %v5101_v21  ;;  %v1308_v29 = vmul.f32 %v5101_v21, %v4769_v63  ;;  %v8201_v5 = vld [vmem:[#allocation36_spill] sm:$0xff]  ;;  %v5129_v63 = vld [vmem:[#allocation2 + $0x868] sm:$0xff] }
 0x23a   :  { %v2373_v9 = vadd.f32 %v2372_v25, %v5089_v14  ;;  %v1816_v18 = vadd.f32 %v1815_v43, %v1305_v23  ;;  %v5109_v25 = vld [vmem:[#allocation5 + $0x708] sm:$0xff]  ;;  %v2788_v10 = vadd.f32 %v2787_v57, %v8199_v30 }
 0x23b   :  { %8198 = vst [vmem:[#allocation31_spill] sm:$0xff] %v5109_v25  ;;  %v1309_v23 = vmul.f32 %v5109_v25, %v4777_v4  ;;  %v8203_v30 = vld [vmem:[#allocation37_spill] sm:$0xff]  ;;  %v5137_v4 = vld [vmem:[#allocation2 + $0x870] sm:$0xff] }
 0x23c   :  { %v2374_v54 = vadd.f32 %v2373_v9, %v5097_v41  ;;  %v1817_v27 = vadd.f32 %v1816_v18, %v1306_v46  ;;  %v5117_v9 = vld [vmem:[#allocation5 + $0x710] sm:$0xff]  ;;  %v2789_v3 = vadd.f32 %v2788_v10, %v8201_v5 }
 0x23d   :  { %8200 = vst [vmem:[#allocation32_spill] sm:$0xff] %v5117_v9  ;;  %v1310_v46 = vmul.f32 %v5117_v9, %v4785_v8  ;;  %v8205_v5 = vld [vmem:[#allocation38_spill] sm:$0xff]  ;;  %v5145_v8 = vld [vmem:[#allocation2 + $0x878] sm:$0xff] }
 0x23e   :  { %v2375_v53 = vadd.f32 %v2374_v54, %v5105_v60  ;;  %v1818_v43 = vadd.f32 %v1817_v27, %v1307_v37  ;;  %v5125_v54 = vld [vmem:[#allocation5 + $0x718] sm:$0xff]  ;;  %v2790_v48 = vadd.f32 %v2789_v3, %v8203_v30 }
 0x23f   :  { %8202 = vst [vmem:[#allocation33_spill] sm:$0xff] %v5125_v54  ;;  %v1311_v37 = vmul.f32 %v5125_v54, %v4793_v12  ;;  %v8207_v30 = vld [vmem:[#allocation39_spill] sm:$0xff]  ;;  %v5153_v12 = vld [vmem:[#allocation2 + $0x880] sm:$0xff] }
 0x240   :  { %v2376_v19 = vadd.f32 %v2375_v53, %v5113_v59  ;;  %v1819_v18 = vadd.f32 %v1818_v43, %v1308_v29  ;;  %v5133_v53 = vld [vmem:[#allocation5 + $0x720] sm:$0xff]  ;;  %v2791_v21 = vadd.f32 %v2790_v48, %v8205_v5 }
 0x241   :  { %8204 = vst [vmem:[#allocation34_spill] sm:$0xff] %v5133_v53  ;;  %v1312_v29 = vmul.f32 %v5133_v53, %v4801_v16  ;;  %v8209_v5 = vld [vmem:[#allocation40_spill] sm:$0xff]  ;;  %v5161_v16 = vld [vmem:[#allocation2 + $0x888] sm:$0xff] }
 0x242   :  { %v2377_v57 = vadd.f32 %v2376_v19, %v5121_v61  ;;  %v1820_v27 = vadd.f32 %v1819_v18, %v1309_v23  ;;  %v5141_v19 = vld [vmem:[#allocation5 + $0x728] sm:$0xff]  ;;  %v2792_v25 = vadd.f32 %v2791_v21, %v8207_v30  ;;  %v8211_v30 = vld [vmem:[#allocation42_spill] sm:$0xff] }
 0x243   :  { %8206 = vst [vmem:[#allocation35_spill] sm:$0xff] %v5141_v19  ;;  %v1313_v23 = vmul.f32 %v5141_v19, %v4809_v20  ;;  %v5169_v20 = vld [vmem:[#allocation2 + $0x890] sm:$0xff] }
 0x244   :  { %v2378_v10 = vadd.f32 %v2377_v57, %v5129_v63  ;;  %v1821_v43 = vadd.f32 %v1820_v27, %v1310_v46  ;;  %v5149_v57 = vld [vmem:[#allocation5 + $0x730] sm:$0xff]  ;;  %v2793_v9 = vadd.f32 %v2792_v25, %v8209_v5  ;;  %v8213_v5 = vld [vmem:[#allocation44_spill] sm:$0xff] }
 0x245   :  { %8208 = vst [vmem:[#allocation36_spill] sm:$0xff] %v5149_v57  ;;  %v1314_v46 = vmul.f32 %v5149_v57, %v4817_v24  ;;  %v5177_v24 = vld [vmem:[#allocation2 + $0x898] sm:$0xff] }
 0x246   :  { %v2379_v3 = vadd.f32 %v2378_v10, %v5137_v4  ;;  %v1822_v18 = vadd.f32 %v1821_v43, %v1311_v37  ;;  %v5157_v10 = vld [vmem:[#allocation5 + $0x738] sm:$0xff]  ;;  %v2794_v54 = vadd.f32 %v2793_v9, %v8211_v30 }
 0x247   :  { %8210 = vst [vmem:[#allocation37_spill] sm:$0xff] %v5157_v10  ;;  %v1315_v37 = vmul.f32 %v5157_v10, %v4825_v28  ;;  %v8215_v30 = vld [vmem:[#allocation11_spill] sm:$0xff]  ;;  %v5185_v28 = vld [vmem:[#allocation2 + $0x8a0] sm:$0xff] }
 0x248   :  { %v2380_v48 = vadd.f32 %v2379_v3, %v5145_v8  ;;  %v1823_v27 = vadd.f32 %v1822_v18, %v1312_v29  ;;  %v5165_v3 = vld [vmem:[#allocation5 + $0x740] sm:$0xff]  ;;  %v2795_v53 = vadd.f32 %v2794_v54, %v8213_v5 }
 0x249   :  { %8212 = vst [vmem:[#allocation38_spill] sm:$0xff] %v5165_v3  ;;  %v1316_v29 = vmul.f32 %v5165_v3, %v4833_v32  ;;  %v8217_v5 = vld [vmem:[#allocation12_spill] sm:$0xff]  ;;  %v5193_v32 = vld [vmem:[#allocation2 + $0x8a8] sm:$0xff] }
 0x24a   :  { %v2381_v21 = vadd.f32 %v2380_v48, %v5153_v12  ;;  %v1824_v43 = vadd.f32 %v1823_v27, %v1313_v23  ;;  %v5173_v48 = vld [vmem:[#allocation5 + $0x748] sm:$0xff]  ;;  %v2796_v19 = vadd.f32 %v2795_v53, %v8215_v30  ;;  %v8219_v30 = vld [vmem:[#allocation47_spill] sm:$0xff] }
 0x24b   :  { %8214 = vst [vmem:[#allocation39_spill] sm:$0xff] %v5173_v48  ;;  %v1317_v23 = vmul.f32 %v5173_v48, %v4841_v36  ;;  %v5201_v36 = vld [vmem:[#allocation2 + $0x8b0] sm:$0xff] }
 0x24c   :  { %v2382_v25 = vadd.f32 %v2381_v21, %v5161_v16  ;;  %v1825_v18 = vadd.f32 %v1824_v43, %v1314_v46  ;;  %v5181_v21 = vld [vmem:[#allocation5 + $0x750] sm:$0xff]  ;;  %v2797_v57 = vadd.f32 %v2796_v19, %v8217_v5  ;;  %v8221_v5 = vld [vmem:[#allocation48_spill] sm:$0xff] }
 0x24d   :  { %8216 = vst [vmem:[#allocation40_spill] sm:$0xff] %v5181_v21  ;;  %v1318_v46 = vmul.f32 %v5181_v21, %v4849_v40  ;;  %v5209_v40 = vld [vmem:[#allocation2 + $0x8b8] sm:$0xff] }
 0x24e   :  { %v2383_v9 = vadd.f32 %v2382_v25, %v5169_v20  ;;  %v1826_v27 = vadd.f32 %v1825_v18, %v1315_v37  ;;  %v5189_v25 = vld [vmem:[#allocation5 + $0x758] sm:$0xff]  ;;  %v2798_v10 = vadd.f32 %v2797_v57, %v8219_v30  ;;  %v8223_v30 = vld [vmem:[#allocation66_spill] sm:$0xff] }
 0x24f   :  { %8218 = vst [vmem:[#allocation42_spill] sm:$0xff] %v5189_v25  ;;  %v1319_v37 = vmul.f32 %v5189_v25, %v4857_v44  ;;  %v5217_v44 = vld [vmem:[#allocation2 + $0x8c0] sm:$0xff] }
 0x250   :  { %v2384_v54 = vadd.f32 %v2383_v9, %v5177_v24  ;;  %v1827_v43 = vadd.f32 %v1826_v27, %v1316_v29  ;;  %v5197_v9 = vld [vmem:[#allocation5 + $0x760] sm:$0xff]  ;;  %v2799_v3 = vadd.f32 %v2798_v10, %v8221_v5  ;;  %v8225_v5 = vld [vmem:[#allocation49_spill] sm:$0xff] }
 0x251   :  { %8220 = vst [vmem:[#allocation44_spill] sm:$0xff] %v5197_v9  ;;  %v1320_v29 = vmul.f32 %v5197_v9, %v4865_v33  ;;  %v5225_v33 = vld [vmem:[#allocation2 + $0x8c8] sm:$0xff] }
 0x252   :  { %v2385_v53 = vadd.f32 %v2384_v54, %v5185_v28  ;;  %v1828_v18 = vadd.f32 %v1827_v43, %v1317_v23  ;;  %v5205_v54 = vld [vmem:[#allocation5 + $0x768] sm:$0xff]  ;;  %v2800_v48 = vadd.f32 %v2799_v3, %v8223_v30  ;;  %v8227_v30 = vld [vmem:[#allocation50_spill] sm:$0xff] }
 0x253   :  { %8222 = vst [vmem:[#allocation11_spill] sm:$0xff] %v5205_v54  ;;  %v1321_v23 = vmul.f32 %v5205_v54, %v4873_v55  ;;  %v5233_v55 = vld [vmem:[#allocation2 + $0x8d0] sm:$0xff] }
 0x254   :  { %v2386_v19 = vadd.f32 %v2385_v53, %v5193_v32  ;;  %v1829_v27 = vadd.f32 %v1828_v18, %v1318_v46  ;;  %v5213_v53 = vld [vmem:[#allocation5 + $0x770] sm:$0xff]  ;;  %v2801_v21 = vadd.f32 %v2800_v48, %v8225_v5  ;;  %v8229_v5 = vld [vmem:[#allocation69_spill] sm:$0xff] }
 0x255   :  { %8224 = vst [vmem:[#allocation12_spill] sm:$0xff] %v5213_v53  ;;  %v1322_v46 = vmul.f32 %v5213_v53, %v4881_v6  ;;  %v5241_v6 = vld [vmem:[#allocation2 + $0x8d8] sm:$0xff] }
 0x256   :  { %v2387_v57 = vadd.f32 %v2386_v19, %v5201_v36  ;;  %v1830_v43 = vadd.f32 %v1829_v27, %v1319_v37  ;;  %v5221_v19 = vld [vmem:[#allocation5 + $0x778] sm:$0xff]  ;;  %v2802_v25 = vadd.f32 %v2801_v21, %v8227_v30 }
 0x257   :  { %8226 = vst [vmem:[#allocation47_spill] sm:$0xff] %v5221_v19  ;;  %v1323_v37 = vmul.f32 %v5221_v19, %v4889_v38  ;;  %v8231_v30 = vld [vmem:[#allocation51_spill] sm:$0xff]  ;;  %v5249_v38 = vld [vmem:[#allocation2 + $0x8e0] sm:$0xff] }
 0x258   :  { %v2388_v10 = vadd.f32 %v2387_v57, %v5209_v40  ;;  %v1831_v18 = vadd.f32 %v1830_v43, %v1320_v29  ;;  %v5229_v57 = vld [vmem:[#allocation5 + $0x780] sm:$0xff]  ;;  %v2803_v9 = vadd.f32 %v2802_v25, %v8229_v5 }
 0x259   :  { %8228 = vst [vmem:[#allocation48_spill] sm:$0xff] %v5229_v57  ;;  %v1324_v29 = vmul.f32 %v5229_v57, %v4897_v31  ;;  %v8233_v5 = vld [vmem:[#allocation52_spill] sm:$0xff]  ;;  %v5257_v31 = vld [vmem:[#allocation2 + $0x8e8] sm:$0xff] }
 0x25a   :  { %v2389_v3 = vadd.f32 %v2388_v10, %v5217_v44  ;;  %v1832_v27 = vadd.f32 %v1831_v18, %v1321_v23  ;;  %v5237_v10 = vld [vmem:[#allocation5 + $0x788] sm:$0xff]  ;;  %v2804_v54 = vadd.f32 %v2803_v9, %v8231_v30 }
 0x25b   :  { %8230 = vst [vmem:[#allocation66_spill] sm:$0xff] %v5237_v10  ;;  %v1325_v23 = vmul.f32 %v5237_v10, %v4905_v7  ;;  %v8235_v30 = vld [vmem:[#allocation53_spill] sm:$0xff]  ;;  %v5265_v7 = vld [vmem:[#allocation2 + $0x8f0] sm:$0xff] }
 0x25c   :  { %v2390_v48 = vadd.f32 %v2389_v3, %v5225_v33  ;;  %v1833_v43 = vadd.f32 %v1832_v27, %v1322_v46  ;;  %v5245_v3 = vld [vmem:[#allocation5 + $0x790] sm:$0xff]  ;;  %v2805_v53 = vadd.f32 %v2804_v54, %v8233_v5 }
 0x25d   :  { %8232 = vst [vmem:[#allocation49_spill] sm:$0xff] %v5245_v3  ;;  %v1326_v46 = vmul.f32 %v5245_v3, %v4913_v22  ;;  %v8237_v5 = vld [vmem:[#allocation54_spill] sm:$0xff]  ;;  %v5273_v22 = vld [vmem:[#allocation2 + $0x8f8] sm:$0xff] }
 0x25e   :  { %v2391_v21 = vadd.f32 %v2390_v48, %v5233_v55  ;;  %v1834_v18 = vadd.f32 %v1833_v43, %v1323_v37  ;;  %v5253_v48 = vld [vmem:[#allocation5 + $0x798] sm:$0xff]  ;;  %v2806_v19 = vadd.f32 %v2805_v53, %v8235_v30 }
 0x25f   :  { %8234 = vst [vmem:[#allocation50_spill] sm:$0xff] %v5253_v48  ;;  %v1327_v37 = vmul.f32 %v5253_v48, %v4921_v56  ;;  %v8239_v30 = vld [vmem:[#allocation55_spill] sm:$0xff]  ;;  %v5281_v56 = vld [vmem:[#allocation2 + $0x900] sm:$0xff] }
 0x260   :  { %v2392_v25 = vadd.f32 %v2391_v21, %v5241_v6  ;;  %v1835_v27 = vadd.f32 %v1834_v18, %v1324_v29  ;;  %v5261_v21 = vld [vmem:[#allocation5 + $0x7a0] sm:$0xff]  ;;  %v2807_v57 = vadd.f32 %v2806_v19, %v8237_v5 }
 0x261   :  { %8236 = vst [vmem:[#allocation69_spill] sm:$0xff] %v5261_v21  ;;  %v1328_v29 = vmul.f32 %v5261_v21, %v4929_v58  ;;  %v8241_v5 = vld [vmem:[#allocation56_spill] sm:$0xff]  ;;  %v5289_v58 = vld [vmem:[#allocation2 + $0x908] sm:$0xff] }
 0x262   :  { %v2393_v9 = vadd.f32 %v2392_v25, %v5249_v38  ;;  %v1836_v43 = vadd.f32 %v1835_v27, %v1325_v23  ;;  %v5269_v25 = vld [vmem:[#allocation5 + $0x7a8] sm:$0xff]  ;;  %v2808_v10 = vadd.f32 %v2807_v57, %v8239_v30 }
 0x263   :  { %8238 = vst [vmem:[#allocation51_spill] sm:$0xff] %v5269_v25  ;;  %v1329_v23 = vmul.f32 %v5269_v25, %v4937_v2  ;;  %v8243_v30 = vld [vmem:[#allocation57_spill] sm:$0xff]  ;;  %v5297_v2 = vld [vmem:[#allocation2 + $0x910] sm:$0xff] }
 0x264   :  { %v2394_v54 = vadd.f32 %v2393_v9, %v5257_v31  ;;  %v1837_v18 = vadd.f32 %v1836_v43, %v1326_v46  ;;  %v5277_v9 = vld [vmem:[#allocation5 + $0x7b0] sm:$0xff]  ;;  %v2809_v3 = vadd.f32 %v2808_v10, %v8241_v5 }
 0x265   :  { %8240 = vst [vmem:[#allocation52_spill] sm:$0xff] %v5277_v9  ;;  %v1330_v46 = vmul.f32 %v5277_v9, %v4945_v35  ;;  %v8245_v5 = vld [vmem:[#allocation58_spill] sm:$0xff]  ;;  %v5305_v35 = vld [vmem:[#allocation2 + $0x918] sm:$0xff] }
 0x266   :  { %v2395_v53 = vadd.f32 %v2394_v54, %v5265_v7  ;;  %v1838_v27 = vadd.f32 %v1837_v18, %v1327_v37  ;;  %v5285_v54 = vld [vmem:[#allocation5 + $0x7b8] sm:$0xff]  ;;  %v2810_v48 = vadd.f32 %v2809_v3, %v8243_v30 }
 0x267   :  { %8242 = vst [vmem:[#allocation53_spill] sm:$0xff] %v5285_v54  ;;  %v1331_v37 = vmul.f32 %v5285_v54, %v4953_v11  ;;  %v8247_v30 = vld [vmem:[#allocation59_spill] sm:$0xff]  ;;  %v5313_v11 = vld [vmem:[#allocation2 + $0x920] sm:$0xff] }
 0x268   :  { %v2396_v19 = vadd.f32 %v2395_v53, %v5273_v22  ;;  %v1839_v43 = vadd.f32 %v1838_v27, %v1328_v29  ;;  %v5293_v53 = vld [vmem:[#allocation5 + $0x7c0] sm:$0xff]  ;;  %v2811_v21 = vadd.f32 %v2810_v48, %v8245_v5 }
 0x269   :  { %8244 = vst [vmem:[#allocation54_spill] sm:$0xff] %v5293_v53  ;;  %v1332_v29 = vmul.f32 %v5293_v53, %v4961_v17  ;;  %v8249_v5 = vld [vmem:[#allocation60_spill] sm:$0xff]  ;;  %v5321_v17 = vld [vmem:[#allocation2 + $0x928] sm:$0xff] }
 0x26a   :  { %v2397_v57 = vadd.f32 %v2396_v19, %v5281_v56  ;;  %v1840_v18 = vadd.f32 %v1839_v43, %v1329_v23  ;;  %v5301_v19 = vld [vmem:[#allocation5 + $0x7c8] sm:$0xff]  ;;  %v2812_v25 = vadd.f32 %v2811_v21, %v8247_v30 }
 0x26b   :  { %8246 = vst [vmem:[#allocation55_spill] sm:$0xff] %v5301_v19  ;;  %v1333_v23 = vmul.f32 %v5301_v19, %v4969_v34  ;;  %v8251_v30 = vld [vmem:[#allocation61_spill] sm:$0xff]  ;;  %v5329_v34 = vld [vmem:[#allocation2 + $0x930] sm:$0xff] }
 0x26c   :  { %v2398_v10 = vadd.f32 %v2397_v57, %v5289_v58  ;;  %v1841_v27 = vadd.f32 %v1840_v18, %v1330_v46  ;;  %v5309_v57 = vld [vmem:[#allocation5 + $0x7d0] sm:$0xff]  ;;  %v2813_v9 = vadd.f32 %v2812_v25, %v8249_v5 }
 0x26d   :  { %8248 = vst [vmem:[#allocation56_spill] sm:$0xff] %v5309_v57  ;;  %v1334_v46 = vmul.f32 %v5309_v57, %v4977_v62  ;;  %v8253_v5 = vld [vmem:[#allocation62_spill] sm:$0xff]  ;;  %v5337_v62 = vld [vmem:[#allocation2 + $0x938] sm:$0xff] }
 0x26e   :  { %v2399_v3 = vadd.f32 %v2398_v10, %v5297_v2  ;;  %v1842_v43 = vadd.f32 %v1841_v27, %v1331_v37  ;;  %v5317_v10 = vld [vmem:[#allocation5 + $0x7d8] sm:$0xff]  ;;  %v2814_v54 = vadd.f32 %v2813_v9, %v8251_v30 }
 0x26f   :  { %8250 = vst [vmem:[#allocation57_spill] sm:$0xff] %v5317_v10  ;;  %v1335_v37 = vmul.f32 %v5317_v10, %v4985_v13  ;;  %v8255_v30 = vld [vmem:[#allocation63_spill] sm:$0xff]  ;;  %v5345_v13 = vld [vmem:[#allocation2 + $0x940] sm:$0xff] }
 0x270   :  { %v2400_v48 = vadd.f32 %v2399_v3, %v5305_v35  ;;  %v1843_v18 = vadd.f32 %v1842_v43, %v1332_v29  ;;  %v5325_v3 = vld [vmem:[#allocation5 + $0x7e0] sm:$0xff]  ;;  %v2815_v53 = vadd.f32 %v2814_v54, %v8253_v5 }
 0x271   :  { %8252 = vst [vmem:[#allocation58_spill] sm:$0xff] %v5325_v3  ;;  %v1336_v29 = vmul.f32 %v5325_v3, %v4993_v26  ;;  %v8257_v5 = vld [vmem:[#allocation64_spill] sm:$0xff]  ;;  %v5353_v26 = vld [vmem:[#allocation2 + $0x948] sm:$0xff] }
 0x272   :  { %v2401_v21 = vadd.f32 %v2400_v48, %v5313_v11  ;;  %v1844_v27 = vadd.f32 %v1843_v18, %v1333_v23  ;;  %v5333_v48 = vld [vmem:[#allocation5 + $0x7e8] sm:$0xff]  ;;  %v2816_v19 = vadd.f32 %v2815_v53, %v8255_v30  ;;  %v8259_v30 = vld [vmem:[#allocation23_spill] sm:$0xff] }
 0x273   :  { %8254 = vst [vmem:[#allocation59_spill] sm:$0xff] %v5333_v48  ;;  %v1337_v23 = vmul.f32 %v5333_v48, %v5001_v15  ;;  %v5361_v15 = vld [vmem:[#allocation2 + $0x950] sm:$0xff] }
 0x274   :  { %v2402_v25 = vadd.f32 %v2401_v21, %v5321_v17  ;;  %v1845_v43 = vadd.f32 %v1844_v27, %v1334_v46  ;;  %v5341_v21 = vld [vmem:[#allocation5 + $0x7f0] sm:$0xff]  ;;  %v2817_v57 = vadd.f32 %v2816_v19, %v8257_v5  ;;  %v8261_v5 = vld [vmem:[#allocation65_spill] sm:$0xff] }
 0x275   :  { %8256 = vst [vmem:[#allocation60_spill] sm:$0xff] %v5341_v21  ;;  %v1338_v46 = vmul.f32 %v5341_v21, %v5009_v0  ;;  %v5369_v0 = vld [vmem:[#allocation2 + $0x958] sm:$0xff] }
 0x276   :  { %v2403_v9 = vadd.f32 %v2402_v25, %v5329_v34  ;;  %v1846_v18 = vadd.f32 %v1845_v43, %v1335_v37  ;;  %v5349_v25 = vld [vmem:[#allocation5 + $0x7f8] sm:$0xff]  ;;  %v2818_v10 = vadd.f32 %v2817_v57, %v8259_v30 }
 0x277   :  { %8258 = vst [vmem:[#allocation61_spill] sm:$0xff] %v5349_v25  ;;  %v1339_v37 = vmul.f32 %v5349_v25, %v5017_v50  ;;  %v8263_v30 = vld [vmem:[#allocation67_spill] sm:$0xff]  ;;  %v5377_v50 = vld [vmem:[#allocation2 + $0x960] sm:$0xff] }
 0x278   :  { %v2404_v54 = vadd.f32 %v2403_v9, %v5337_v62  ;;  %v1847_v27 = vadd.f32 %v1846_v18, %v1336_v29  ;;  %v5357_v9 = vld [vmem:[#allocation5 + $0x800] sm:$0xff]  ;;  %v2819_v3 = vadd.f32 %v2818_v10, %v8261_v5  ;;  %v8265_v5 = vld [vmem:[#allocation43_spill] sm:$0xff] }
 0x279   :  { %8260 = vst [vmem:[#allocation62_spill] sm:$0xff] %v5357_v9  ;;  %v1340_v29 = vmul.f32 %v5357_v9, %v5025_v52  ;;  %v5385_v52 = vld [vmem:[#allocation2 + $0x968] sm:$0xff] }
 0x27a   :  { %v2405_v53 = vadd.f32 %v2404_v54, %v5345_v13  ;;  %v1848_v43 = vadd.f32 %v1847_v27, %v1337_v23  ;;  %v5365_v54 = vld [vmem:[#allocation5 + $0x808] sm:$0xff]  ;;  %v2820_v48 = vadd.f32 %v2819_v3, %v8263_v30  ;;  %v8267_v30 = vld [vmem:[#allocation68_spill] sm:$0xff] }
 0x27b   :  { %8262 = vst [vmem:[#allocation63_spill] sm:$0xff] %v5365_v54  ;;  %v1341_v23 = vmul.f32 %v5365_v54, %v5033_v39  ;;  %v5393_v39 = vld [vmem:[#allocation2 + $0x970] sm:$0xff] }
 0x27c   :  { %v2406_v19 = vadd.f32 %v2405_v53, %v5353_v26  ;;  %v1849_v18 = vadd.f32 %v1848_v43, %v1338_v46  ;;  %v5373_v53 = vld [vmem:[#allocation5 + $0x810] sm:$0xff]  ;;  %v2821_v21 = vadd.f32 %v2820_v48, %v8265_v5 }
 0x27d   :  { %8264 = vst [vmem:[#allocation64_spill] sm:$0xff] %v5373_v53  ;;  %v1342_v46 = vmul.f32 %v5373_v53, %v5041_v1  ;;  %v8269_v5 = vld [vmem:[#allocation14_spill] sm:$0xff]  ;;  %v5401_v1 = vld [vmem:[#allocation2 + $0x978] sm:$0xff] }
 0x27e   :  { %v2407_v57 = vadd.f32 %v2406_v19, %v5361_v15  ;;  %v1850_v27 = vadd.f32 %v1849_v18, %v1339_v37  ;;  %v5381_v19 = vld [vmem:[#allocation5 + $0x818] sm:$0xff]  ;;  %v2822_v25 = vadd.f32 %v2821_v21, %v8267_v30 }
 0x27f   :  { %8266 = vst [vmem:[#allocation23_spill] sm:$0xff] %v5381_v19  ;;  %v1343_v37 = vmul.f32 %v5381_v19, %v5049_v42  ;;  %v8271_v30 = vld [vmem:[#allocation15_spill] sm:$0xff]  ;;  %v5409_v42 = vld [vmem:[#allocation2 + $0x980] sm:$0xff] }
 0x280   :  { %v2408_v10 = vadd.f32 %v2407_v57, %v5369_v0  ;;  %v1851_v43 = vadd.f32 %v1850_v27, %v1340_v29  ;;  %v5389_v57 = vld [vmem:[#allocation5 + $0x820] sm:$0xff]  ;;  %v2823_v9 = vadd.f32 %v2822_v25, %v8269_v5 }
 0x281   :  { %8268 = vst [vmem:[#allocation65_spill] sm:$0xff] %v5389_v57  ;;  %v1344_v29 = vmul.f32 %v5389_v57, %v5057_v45  ;;  %v8273_v5 = vld [vmem:[#allocation16_spill] sm:$0xff]  ;;  %v5417_v45 = vld [vmem:[#allocation2 + $0x988] sm:$0xff] }
 0x282   :  { %v2409_v3 = vadd.f32 %v2408_v10, %v5377_v50  ;;  %v1852_v18 = vadd.f32 %v1851_v43, %v1341_v23  ;;  %v5397_v10 = vld [vmem:[#allocation5 + $0x828] sm:$0xff]  ;;  %v2824_v54 = vadd.f32 %v2823_v9, %v8271_v30  ;;  %v8275_v30 = vld [vmem:[#allocation70_spill] sm:$0xff] }
 0x283   :  { %8270 = vst [vmem:[#allocation67_spill] sm:$0xff] %v5397_v10  ;;  %v1345_v23 = vmul.f32 %v5397_v10, %v5065_v47  ;;  %v5425_v47 = vld [vmem:[#allocation2 + $0x990] sm:$0xff] }
 0x284   :  { %v2410_v48 = vadd.f32 %v2409_v3, %v5385_v52  ;;  %v1853_v27 = vadd.f32 %v1852_v18, %v1342_v46  ;;  %v5405_v3 = vld [vmem:[#allocation5 + $0x830] sm:$0xff]  ;;  %v2825_v53 = vadd.f32 %v2824_v54, %v8273_v5  ;;  %v8277_v5 = vld [vmem:[#allocation71_spill] sm:$0xff] }
 0x285   :  { %8272 = vst [vmem:[#allocation43_spill] sm:$0xff] %v5405_v3  ;;  %v1346_v46 = vmul.f32 %v5405_v3, %v5073_v49  ;;  %v5433_v49 = vld [vmem:[#allocation2 + $0x998] sm:$0xff] }
 0x286   :  { %v2411_v21 = vadd.f32 %v2410_v48, %v5393_v39  ;;  %v1854_v43 = vadd.f32 %v1853_v27, %v1343_v37  ;;  %v5413_v48 = vld [vmem:[#allocation5 + $0x838] sm:$0xff]  ;;  %v2826_v19 = vadd.f32 %v2825_v53, %v8275_v30  ;;  %v8279_v30 = vld [vmem:[#allocation72_spill] sm:$0xff] }
 0x287   :  { %8274 = vst [vmem:[#allocation68_spill] sm:$0xff] %v5413_v48  ;;  %v1347_v37 = vmul.f32 %v5413_v48, %v5081_v51  ;;  %v5441_v51 = vld [vmem:[#allocation2 + $0x9a0] sm:$0xff] }
 0x288   :  { %v2412_v25 = vadd.f32 %v2411_v21, %v5401_v1  ;;  %v1855_v18 = vadd.f32 %v1854_v43, %v1344_v29  ;;  %v5421_v21 = vld [vmem:[#allocation5 + $0x840] sm:$0xff]  ;;  %v2827_v57 = vadd.f32 %v2826_v19, %v8277_v5  ;;  %v8281_v5 = vld [vmem:[#allocation73_spill] sm:$0xff] }
 0x289   :  { %8276 = vst [vmem:[#allocation14_spill] sm:$0xff] %v5421_v21  ;;  %v1348_v29 = vmul.f32 %v5421_v21, %v5089_v14  ;;  %v5449_v14 = vld [vmem:[#allocation2 + $0x9a8] sm:$0xff] }
 0x28a   :  { %v2413_v9 = vadd.f32 %v2412_v25, %v5409_v42  ;;  %v1856_v27 = vadd.f32 %v1855_v18, %v1345_v23  ;;  %v5429_v25 = vld [vmem:[#allocation5 + $0x848] sm:$0xff]  ;;  %v2828_v10 = vadd.f32 %v2827_v57, %v8279_v30  ;;  %v8283_v30 = vld [vmem:[#allocation74_spill] sm:$0xff] }
 0x28b   :  { %8278 = vst [vmem:[#allocation15_spill] sm:$0xff] %v5429_v25  ;;  %v1349_v23 = vmul.f32 %v5429_v25, %v5097_v41  ;;  %v5457_v41 = vld [vmem:[#allocation2 + $0x9b0] sm:$0xff] }
 0x28c   :  { %v2414_v54 = vadd.f32 %v2413_v9, %v5417_v45  ;;  %v1857_v43 = vadd.f32 %v1856_v27, %v1346_v46  ;;  %v5437_v9 = vld [vmem:[#allocation5 + $0x850] sm:$0xff]  ;;  %v2829_v3 = vadd.f32 %v2828_v10, %v8281_v5  ;;  %v8285_v5 = vld [vmem:[#allocation17_spill] sm:$0xff] }
 0x28d   :  { %8280 = vst [vmem:[#allocation16_spill] sm:$0xff] %v5437_v9  ;;  %v1350_v46 = vmul.f32 %v5437_v9, %v5105_v60  ;;  %v5465_v60 = vld [vmem:[#allocation2 + $0x9b8] sm:$0xff] }
 0x28e   :  { %v2415_v53 = vadd.f32 %v2414_v54, %v5425_v47  ;;  %v1858_v18 = vadd.f32 %v1857_v43, %v1347_v37  ;;  %v5445_v54 = vld [vmem:[#allocation5 + $0x858] sm:$0xff]  ;;  %v2830_v48 = vadd.f32 %v2829_v3, %v8283_v30  ;;  %v8287_v30 = vld [vmem:[#allocation18_spill] sm:$0xff] }
 0x28f   :  { %8282 = vst [vmem:[#allocation70_spill] sm:$0xff] %v5445_v54  ;;  %v1351_v37 = vmul.f32 %v5445_v54, %v5113_v59  ;;  %v5473_v59 = vld [vmem:[#allocation2 + $0x9c0] sm:$0xff] }
 0x290   :  { %v2416_v19 = vadd.f32 %v2415_v53, %v5433_v49  ;;  %v1859_v27 = vadd.f32 %v1858_v18, %v1348_v29  ;;  %v5453_v53 = vld [vmem:[#allocation5 + $0x860] sm:$0xff]  ;;  %v2831_v21 = vadd.f32 %v2830_v48, %v8285_v5  ;;  %v8289_v5 = vld [vmem:[#allocation19_spill] sm:$0xff] }
 0x291   :  { %8284 = vst [vmem:[#allocation71_spill] sm:$0xff] %v5453_v53  ;;  %v1352_v29 = vmul.f32 %v5453_v53, %v5121_v61  ;;  %v5481_v61 = vld [vmem:[#allocation2 + $0x9c8] sm:$0xff] }
 0x292   :  { %v2417_v57 = vadd.f32 %v2416_v19, %v5441_v51  ;;  %v1860_v43 = vadd.f32 %v1859_v27, %v1349_v23  ;;  %v5461_v19 = vld [vmem:[#allocation5 + $0x868] sm:$0xff]  ;;  %v2832_v25 = vadd.f32 %v2831_v21, %v8287_v30  ;;  %v8291_v30 = vld [vmem:[#allocation20_spill] sm:$0xff] }
 0x293   :  { %8286 = vst [vmem:[#allocation72_spill] sm:$0xff] %v5461_v19  ;;  %v1353_v23 = vmul.f32 %v5461_v19, %v5129_v63  ;;  %v5489_v63 = vld [vmem:[#allocation2 + $0x9d0] sm:$0xff] }
 0x294   :  { %v2418_v10 = vadd.f32 %v2417_v57, %v5449_v14  ;;  %v1861_v18 = vadd.f32 %v1860_v43, %v1350_v46  ;;  %v5469_v57 = vld [vmem:[#allocation5 + $0x870] sm:$0xff]  ;;  %v2833_v9 = vadd.f32 %v2832_v25, %v8289_v5  ;;  %v8293_v5 = vld [vmem:[#allocation21_spill] sm:$0xff] }
 0x295   :  { %8288 = vst [vmem:[#allocation73_spill] sm:$0xff] %v5469_v57  ;;  %v1354_v46 = vmul.f32 %v5469_v57, %v5137_v4  ;;  %v5497_v4 = vld [vmem:[#allocation2 + $0x9d8] sm:$0xff] }
 0x296   :  { %v2419_v3 = vadd.f32 %v2418_v10, %v5457_v41  ;;  %v1862_v27 = vadd.f32 %v1861_v18, %v1351_v37  ;;  %v5477_v10 = vld [vmem:[#allocation5 + $0x878] sm:$0xff]  ;;  %v2834_v54 = vadd.f32 %v2833_v9, %v8291_v30  ;;  %v8295_v30 = vld [vmem:[#allocation22_spill] sm:$0xff] }
 0x297   :  { %8290 = vst [vmem:[#allocation74_spill] sm:$0xff] %v5477_v10  ;;  %v1355_v37 = vmul.f32 %v5477_v10, %v5145_v8  ;;  %v5505_v8 = vld [vmem:[#allocation2 + $0x9e0] sm:$0xff] }
 0x298   :  { %v2420_v48 = vadd.f32 %v2419_v3, %v5465_v60  ;;  %v1863_v43 = vadd.f32 %v1862_v27, %v1352_v29  ;;  %v5485_v3 = vld [vmem:[#allocation5 + $0x880] sm:$0xff]  ;;  %v2835_v53 = vadd.f32 %v2834_v54, %v8293_v5  ;;  %v8297_v5 = vld [vmem:[#allocation41_spill] sm:$0xff] }
 0x299   :  { %8292 = vst [vmem:[#allocation17_spill] sm:$0xff] %v5485_v3  ;;  %v1356_v29 = vmul.f32 %v5485_v3, %v5153_v12  ;;  %v5513_v12 = vld [vmem:[#allocation2 + $0x9e8] sm:$0xff] }
 0x29a   :  { %v2421_v21 = vadd.f32 %v2420_v48, %v5473_v59  ;;  %v1864_v18 = vadd.f32 %v1863_v43, %v1353_v23  ;;  %v5493_v48 = vld [vmem:[#allocation5 + $0x888] sm:$0xff]  ;;  %v2836_v19 = vadd.f32 %v2835_v53, %v8295_v30  ;;  %v8299_v30 = vld [vmem:[#allocation24_spill] sm:$0xff] }
 0x29b   :  { %8294 = vst [vmem:[#allocation18_spill] sm:$0xff] %v5493_v48  ;;  %v1357_v23 = vmul.f32 %v5493_v48, %v5161_v16  ;;  %v5521_v16 = vld [vmem:[#allocation2 + $0x9f0] sm:$0xff] }
 0x29c   :  { %v2422_v25 = vadd.f32 %v2421_v21, %v5481_v61  ;;  %v1865_v27 = vadd.f32 %v1864_v18, %v1354_v46  ;;  %v5501_v21 = vld [vmem:[#allocation5 + $0x890] sm:$0xff]  ;;  %v2837_v57 = vadd.f32 %v2836_v19, %v8297_v5  ;;  %v8301_v5 = vld [vmem:[#allocation25_spill] sm:$0xff] }
 0x29d   :  { %8296 = vst [vmem:[#allocation19_spill] sm:$0xff] %v5501_v21  ;;  %v1358_v46 = vmul.f32 %v5501_v21, %v5169_v20  ;;  %v5529_v20 = vld [vmem:[#allocation2 + $0x9f8] sm:$0xff] }
 0x29e   :  { %v2423_v9 = vadd.f32 %v2422_v25, %v5489_v63  ;;  %v1866_v43 = vadd.f32 %v1865_v27, %v1355_v37  ;;  %v5509_v25 = vld [vmem:[#allocation5 + $0x898] sm:$0xff]  ;;  %v2838_v10 = vadd.f32 %v2837_v57, %v8299_v30  ;;  %v8303_v30 = vld [vmem:[#allocation45_spill] sm:$0xff] }
 0x29f   :  { %8298 = vst [vmem:[#allocation20_spill] sm:$0xff] %v5509_v25  ;;  %v1359_v37 = vmul.f32 %v5509_v25, %v5177_v24  ;;  %v5537_v24 = vld [vmem:[#allocation2 + $0xa00] sm:$0xff] }
 0x2a0   :  { %v2424_v54 = vadd.f32 %v2423_v9, %v5497_v4  ;;  %v1867_v18 = vadd.f32 %v1866_v43, %v1356_v29  ;;  %v5517_v9 = vld [vmem:[#allocation5 + $0x8a0] sm:$0xff]  ;;  %v2839_v3 = vadd.f32 %v2838_v10, %v8301_v5  ;;  %v8305_v5 = vld [vmem:[#allocation46_spill] sm:$0xff] }
 0x2a1   :  { %8300 = vst [vmem:[#allocation21_spill] sm:$0xff] %v5517_v9  ;;  %v1360_v29 = vmul.f32 %v5517_v9, %v5185_v28  ;;  %v5545_v28 = vld [vmem:[#allocation2 + $0xa08] sm:$0xff] }
 0x2a2   :  { %v2425_v53 = vadd.f32 %v2424_v54, %v5505_v8  ;;  %v1868_v27 = vadd.f32 %v1867_v18, %v1357_v23  ;;  %v5525_v54 = vld [vmem:[#allocation5 + $0x8a8] sm:$0xff]  ;;  %v2840_v48 = vadd.f32 %v2839_v3, %v8303_v30  ;;  %v8307_v30 = vld [vmem:[#allocation26_spill] sm:$0xff] }
 0x2a3   :  { %8302 = vst [vmem:[#allocation22_spill] sm:$0xff] %v5525_v54  ;;  %v1361_v23 = vmul.f32 %v5525_v54, %v5193_v32  ;;  %v5553_v32 = vld [vmem:[#allocation2 + $0xa10] sm:$0xff] }
 0x2a4   :  { %v2426_v19 = vadd.f32 %v2425_v53, %v5513_v12  ;;  %v1869_v43 = vadd.f32 %v1868_v27, %v1358_v46  ;;  %v5533_v53 = vld [vmem:[#allocation5 + $0x8b0] sm:$0xff]  ;;  %v2841_v21 = vadd.f32 %v2840_v48, %v8305_v5  ;;  %v8309_v5 = vld [vmem:[#allocation27_spill] sm:$0xff] }
 0x2a5   :  { %8304 = vst [vmem:[#allocation41_spill] sm:$0xff] %v5533_v53  ;;  %v1362_v46 = vmul.f32 %v5533_v53, %v5201_v36  ;;  %v5561_v36 = vld [vmem:[#allocation2 + $0xa18] sm:$0xff] }
 0x2a6   :  { %v2427_v57 = vadd.f32 %v2426_v19, %v5521_v16  ;;  %v1870_v18 = vadd.f32 %v1869_v43, %v1359_v37  ;;  %v5541_v19 = vld [vmem:[#allocation5 + $0x8b8] sm:$0xff]  ;;  %v2842_v25 = vadd.f32 %v2841_v21, %v8307_v30  ;;  %v8311_v30 = vld [vmem:[#allocation13_spill] sm:$0xff] }
 0x2a7   :  { %8306 = vst [vmem:[#allocation24_spill] sm:$0xff] %v5541_v19  ;;  %v1363_v37 = vmul.f32 %v5541_v19, %v5209_v40  ;;  %v5569_v40 = vld [vmem:[#allocation2 + $0xa20] sm:$0xff] }
 0x2a8   :  { %v2428_v10 = vadd.f32 %v2427_v57, %v5529_v20  ;;  %v1871_v27 = vadd.f32 %v1870_v18, %v1360_v29  ;;  %v5549_v57 = vld [vmem:[#allocation5 + $0x8c0] sm:$0xff]  ;;  %v2843_v9 = vadd.f32 %v2842_v25, %v8309_v5 }
 0x2a9   :  { %8308 = vst [vmem:[#allocation25_spill] sm:$0xff] %v5549_v57  ;;  %v1364_v29 = vmul.f32 %v5549_v57, %v5217_v44  ;;  %v8313_v5 = vld [vmem:[#allocation28_spill] sm:$0xff]  ;;  %v5577_v44 = vld [vmem:[#allocation2 + $0xa28] sm:$0xff] }
 0x2aa   :  { %v2429_v3 = vadd.f32 %v2428_v10, %v5537_v24  ;;  %v1872_v43 = vadd.f32 %v1871_v27, %v1361_v23  ;;  %v5557_v10 = vld [vmem:[#allocation5 + $0x8c8] sm:$0xff]  ;;  %v2844_v54 = vadd.f32 %v2843_v9, %v8311_v30 }
 0x2ab   :  { %8310 = vst [vmem:[#allocation45_spill] sm:$0xff] %v5557_v10  ;;  %v1365_v23 = vmul.f32 %v5557_v10, %v5225_v33  ;;  %v8315_v30 = vld [vmem:[#allocation29_spill] sm:$0xff]  ;;  %v5585_v33 = vld [vmem:[#allocation2 + $0xa30] sm:$0xff] }
 0x2ac   :  { %v2430_v48 = vadd.f32 %v2429_v3, %v5545_v28  ;;  %v1873_v18 = vadd.f32 %v1872_v43, %v1362_v46  ;;  %v5565_v3 = vld [vmem:[#allocation5 + $0x8d0] sm:$0xff]  ;;  %v2845_v53 = vadd.f32 %v2844_v54, %v8313_v5 }
 0x2ad   :  { %8312 = vst [vmem:[#allocation46_spill] sm:$0xff] %v5565_v3  ;;  %v1366_v46 = vmul.f32 %v5565_v3, %v5233_v55  ;;  %v8317_v5 = vld [vmem:[#allocation30_spill] sm:$0xff]  ;;  %v5593_v55 = vld [vmem:[#allocation2 + $0xa38] sm:$0xff] }
 0x2ae   :  { %v2431_v21 = vadd.f32 %v2430_v48, %v5553_v32  ;;  %v1874_v27 = vadd.f32 %v1873_v18, %v1363_v37  ;;  %v5573_v48 = vld [vmem:[#allocation5 + $0x8d8] sm:$0xff]  ;;  %v2846_v19 = vadd.f32 %v2845_v53, %v8315_v30 }
 0x2af   :  { %8314 = vst [vmem:[#allocation26_spill] sm:$0xff] %v5573_v48  ;;  %v1367_v37 = vmul.f32 %v5573_v48, %v5241_v6  ;;  %v8319_v30 = vld [vmem:[#allocation31_spill] sm:$0xff]  ;;  %v5601_v6 = vld [vmem:[#allocation2 + $0xa40] sm:$0xff] }
 0x2b0   :  { %v2432_v25 = vadd.f32 %v2431_v21, %v5561_v36  ;;  %v1875_v43 = vadd.f32 %v1874_v27, %v1364_v29  ;;  %v5581_v21 = vld [vmem:[#allocation5 + $0x8e0] sm:$0xff]  ;;  %v2847_v57 = vadd.f32 %v2846_v19, %v8317_v5 }
 0x2b1   :  { %8316 = vst [vmem:[#allocation27_spill] sm:$0xff] %v5581_v21  ;;  %v1368_v29 = vmul.f32 %v5581_v21, %v5249_v38  ;;  %v8321_v5 = vld [vmem:[#allocation32_spill] sm:$0xff]  ;;  %v5609_v38 = vld [vmem:[#allocation2 + $0xa48] sm:$0xff] }
 0x2b2   :  { %v2433_v9 = vadd.f32 %v2432_v25, %v5569_v40  ;;  %v1876_v18 = vadd.f32 %v1875_v43, %v1365_v23  ;;  %v5589_v25 = vld [vmem:[#allocation5 + $0x8e8] sm:$0xff]  ;;  %v2848_v10 = vadd.f32 %v2847_v57, %v8319_v30 }
 0x2b3   :  { %8318 = vst [vmem:[#allocation13_spill] sm:$0xff] %v5589_v25  ;;  %v1369_v23 = vmul.f32 %v5589_v25, %v5257_v31  ;;  %v8323_v30 = vld [vmem:[#allocation33_spill] sm:$0xff]  ;;  %v5617_v31 = vld [vmem:[#allocation2 + $0xa50] sm:$0xff] }
 0x2b4   :  { %v2434_v54 = vadd.f32 %v2433_v9, %v5577_v44  ;;  %v1877_v27 = vadd.f32 %v1876_v18, %v1366_v46  ;;  %v5597_v9 = vld [vmem:[#allocation5 + $0x8f0] sm:$0xff]  ;;  %v2849_v3 = vadd.f32 %v2848_v10, %v8321_v5 }
 0x2b5   :  { %8320 = vst [vmem:[#allocation28_spill] sm:$0xff] %v5597_v9  ;;  %v1370_v46 = vmul.f32 %v5597_v9, %v5265_v7  ;;  %v8325_v5 = vld [vmem:[#allocation34_spill] sm:$0xff]  ;;  %v5625_v7 = vld [vmem:[#allocation2 + $0xa58] sm:$0xff] }
 0x2b6   :  { %v2435_v53 = vadd.f32 %v2434_v54, %v5585_v33  ;;  %v1878_v43 = vadd.f32 %v1877_v27, %v1367_v37  ;;  %v5605_v54 = vld [vmem:[#allocation5 + $0x8f8] sm:$0xff]  ;;  %v2850_v48 = vadd.f32 %v2849_v3, %v8323_v30 }
 0x2b7   :  { %8322 = vst [vmem:[#allocation29_spill] sm:$0xff] %v5605_v54  ;;  %v1371_v37 = vmul.f32 %v5605_v54, %v5273_v22  ;;  %v8327_v30 = vld [vmem:[#allocation35_spill] sm:$0xff]  ;;  %v5633_v22 = vld [vmem:[#allocation2 + $0xa60] sm:$0xff] }
 0x2b8   :  { %v2436_v19 = vadd.f32 %v2435_v53, %v5593_v55  ;;  %v1879_v18 = vadd.f32 %v1878_v43, %v1368_v29  ;;  %v5613_v53 = vld [vmem:[#allocation5 + $0x900] sm:$0xff]  ;;  %v2851_v21 = vadd.f32 %v2850_v48, %v8325_v5 }
 0x2b9   :  { %8324 = vst [vmem:[#allocation30_spill] sm:$0xff] %v5613_v53  ;;  %v1372_v29 = vmul.f32 %v5613_v53, %v5281_v56  ;;  %v8329_v5 = vld [vmem:[#allocation36_spill] sm:$0xff]  ;;  %v5641_v56 = vld [vmem:[#allocation2 + $0xa68] sm:$0xff] }
 0x2ba   :  { %v2437_v57 = vadd.f32 %v2436_v19, %v5601_v6  ;;  %v1880_v27 = vadd.f32 %v1879_v18, %v1369_v23  ;;  %v5621_v19 = vld [vmem:[#allocation5 + $0x908] sm:$0xff]  ;;  %v2852_v25 = vadd.f32 %v2851_v21, %v8327_v30 }
 0x2bb   :  { %8326 = vst [vmem:[#allocation31_spill] sm:$0xff] %v5621_v19  ;;  %v1373_v23 = vmul.f32 %v5621_v19, %v5289_v58  ;;  %v8331_v30 = vld [vmem:[#allocation37_spill] sm:$0xff]  ;;  %v5649_v58 = vld [vmem:[#allocation2 + $0xa70] sm:$0xff] }
 0x2bc   :  { %v2438_v10 = vadd.f32 %v2437_v57, %v5609_v38  ;;  %v1881_v43 = vadd.f32 %v1880_v27, %v1370_v46  ;;  %v5629_v57 = vld [vmem:[#allocation5 + $0x910] sm:$0xff]  ;;  %v2853_v9 = vadd.f32 %v2852_v25, %v8329_v5 }
 0x2bd   :  { %8328 = vst [vmem:[#allocation32_spill] sm:$0xff] %v5629_v57  ;;  %v1374_v46 = vmul.f32 %v5629_v57, %v5297_v2  ;;  %v8333_v5 = vld [vmem:[#allocation38_spill] sm:$0xff]  ;;  %v5657_v2 = vld [vmem:[#allocation2 + $0xa78] sm:$0xff] }
 0x2be   :  { %v2439_v3 = vadd.f32 %v2438_v10, %v5617_v31  ;;  %v1882_v18 = vadd.f32 %v1881_v43, %v1371_v37  ;;  %v5637_v10 = vld [vmem:[#allocation5 + $0x918] sm:$0xff]  ;;  %v2854_v54 = vadd.f32 %v2853_v9, %v8331_v30 }
 0x2bf   :  { %8330 = vst [vmem:[#allocation33_spill] sm:$0xff] %v5637_v10  ;;  %v1375_v37 = vmul.f32 %v5637_v10, %v5305_v35  ;;  %v8335_v30 = vld [vmem:[#allocation39_spill] sm:$0xff]  ;;  %v5665_v35 = vld [vmem:[#allocation2 + $0xa80] sm:$0xff] }
 0x2c0   :  { %v2440_v48 = vadd.f32 %v2439_v3, %v5625_v7  ;;  %v1883_v27 = vadd.f32 %v1882_v18, %v1372_v29  ;;  %v5645_v3 = vld [vmem:[#allocation5 + $0x920] sm:$0xff]  ;;  %v2855_v53 = vadd.f32 %v2854_v54, %v8333_v5 }
 0x2c1   :  { %8332 = vst [vmem:[#allocation34_spill] sm:$0xff] %v5645_v3  ;;  %v1376_v29 = vmul.f32 %v5645_v3, %v5313_v11  ;;  %v8337_v5 = vld [vmem:[#allocation40_spill] sm:$0xff]  ;;  %v5673_v11 = vld [vmem:[#allocation2 + $0xa88] sm:$0xff] }
 0x2c2   :  { %v2441_v21 = vadd.f32 %v2440_v48, %v5633_v22  ;;  %v1884_v43 = vadd.f32 %v1883_v27, %v1373_v23  ;;  %v5653_v48 = vld [vmem:[#allocation5 + $0x928] sm:$0xff]  ;;  %v2856_v19 = vadd.f32 %v2855_v53, %v8335_v30  ;;  %v8339_v30 = vld [vmem:[#allocation42_spill] sm:$0xff] }
 0x2c3   :  { %8334 = vst [vmem:[#allocation35_spill] sm:$0xff] %v5653_v48  ;;  %v1377_v23 = vmul.f32 %v5653_v48, %v5321_v17  ;;  %v5681_v17 = vld [vmem:[#allocation2 + $0xa90] sm:$0xff] }
 0x2c4   :  { %v2442_v25 = vadd.f32 %v2441_v21, %v5641_v56  ;;  %v1885_v18 = vadd.f32 %v1884_v43, %v1374_v46  ;;  %v5661_v21 = vld [vmem:[#allocation5 + $0x930] sm:$0xff]  ;;  %v2857_v57 = vadd.f32 %v2856_v19, %v8337_v5  ;;  %v8341_v5 = vld [vmem:[#allocation44_spill] sm:$0xff] }
 0x2c5   :  { %8336 = vst [vmem:[#allocation36_spill] sm:$0xff] %v5661_v21  ;;  %v1378_v46 = vmul.f32 %v5661_v21, %v5329_v34  ;;  %v5689_v34 = vld [vmem:[#allocation2 + $0xa98] sm:$0xff] }
 0x2c6   :  { %v2443_v9 = vadd.f32 %v2442_v25, %v5649_v58  ;;  %v1886_v27 = vadd.f32 %v1885_v18, %v1375_v37  ;;  %v5669_v25 = vld [vmem:[#allocation5 + $0x938] sm:$0xff]  ;;  %v2858_v10 = vadd.f32 %v2857_v57, %v8339_v30 }
 0x2c7   :  { %8338 = vst [vmem:[#allocation37_spill] sm:$0xff] %v5669_v25  ;;  %v1379_v37 = vmul.f32 %v5669_v25, %v5337_v62  ;;  %v8343_v30 = vld [vmem:[#allocation11_spill] sm:$0xff]  ;;  %v5697_v62 = vld [vmem:[#allocation2 + $0xaa0] sm:$0xff] }
 0x2c8   :  { %v2444_v54 = vadd.f32 %v2443_v9, %v5657_v2  ;;  %v1887_v43 = vadd.f32 %v1886_v27, %v1376_v29  ;;  %v5677_v9 = vld [vmem:[#allocation5 + $0x940] sm:$0xff]  ;;  %v2859_v3 = vadd.f32 %v2858_v10, %v8341_v5 }
 0x2c9   :  { %8340 = vst [vmem:[#allocation38_spill] sm:$0xff] %v5677_v9  ;;  %v1380_v29 = vmul.f32 %v5677_v9, %v5345_v13  ;;  %v8345_v5 = vld [vmem:[#allocation12_spill] sm:$0xff]  ;;  %v5705_v13 = vld [vmem:[#allocation2 + $0xaa8] sm:$0xff] }
 0x2ca   :  { %v2445_v53 = vadd.f32 %v2444_v54, %v5665_v35  ;;  %v1888_v18 = vadd.f32 %v1887_v43, %v1377_v23  ;;  %v5685_v54 = vld [vmem:[#allocation5 + $0x948] sm:$0xff]  ;;  %v2860_v48 = vadd.f32 %v2859_v3, %v8343_v30  ;;  %v8347_v30 = vld [vmem:[#allocation47_spill] sm:$0xff] }
 0x2cb   :  { %8342 = vst [vmem:[#allocation39_spill] sm:$0xff] %v5685_v54  ;;  %v1381_v23 = vmul.f32 %v5685_v54, %v5353_v26  ;;  %v5713_v26 = vld [vmem:[#allocation2 + $0xab0] sm:$0xff] }
 0x2cc   :  { %v2446_v19 = vadd.f32 %v2445_v53, %v5673_v11  ;;  %v1889_v27 = vadd.f32 %v1888_v18, %v1378_v46  ;;  %v5693_v53 = vld [vmem:[#allocation5 + $0x950] sm:$0xff]  ;;  %v2861_v21 = vadd.f32 %v2860_v48, %v8345_v5  ;;  %v8349_v5 = vld [vmem:[#allocation48_spill] sm:$0xff] }
 0x2cd   :  { %8344 = vst [vmem:[#allocation40_spill] sm:$0xff] %v5693_v53  ;;  %v1382_v46 = vmul.f32 %v5693_v53, %v5361_v15  ;;  %v5721_v15 = vld [vmem:[#allocation2 + $0xab8] sm:$0xff] }
 0x2ce   :  { %v2447_v57 = vadd.f32 %v2446_v19, %v5681_v17  ;;  %v1890_v43 = vadd.f32 %v1889_v27, %v1379_v37  ;;  %v5701_v19 = vld [vmem:[#allocation5 + $0x958] sm:$0xff]  ;;  %v2862_v25 = vadd.f32 %v2861_v21, %v8347_v30  ;;  %v8351_v30 = vld [vmem:[#allocation66_spill] sm:$0xff] }
 0x2cf   :  { %8346 = vst [vmem:[#allocation42_spill] sm:$0xff] %v5701_v19  ;;  %v1383_v37 = vmul.f32 %v5701_v19, %v5369_v0  ;;  %v5729_v0 = vld [vmem:[#allocation2 + $0xac0] sm:$0xff] }
 0x2d0   :  { %v2448_v10 = vadd.f32 %v2447_v57, %v5689_v34  ;;  %v1891_v18 = vadd.f32 %v1890_v43, %v1380_v29  ;;  %v5709_v57 = vld [vmem:[#allocation5 + $0x960] sm:$0xff]  ;;  %v2863_v9 = vadd.f32 %v2862_v25, %v8349_v5  ;;  %v8353_v5 = vld [vmem:[#allocation49_spill] sm:$0xff] }
 0x2d1   :  { %8348 = vst [vmem:[#allocation44_spill] sm:$0xff] %v5709_v57  ;;  %v1384_v29 = vmul.f32 %v5709_v57, %v5377_v50  ;;  %v5737_v50 = vld [vmem:[#allocation2 + $0xac8] sm:$0xff] }
 0x2d2   :  { %v2449_v3 = vadd.f32 %v2448_v10, %v5697_v62  ;;  %v1892_v27 = vadd.f32 %v1891_v18, %v1381_v23  ;;  %v5717_v10 = vld [vmem:[#allocation5 + $0x968] sm:$0xff]  ;;  %v2864_v54 = vadd.f32 %v2863_v9, %v8351_v30  ;;  %v8355_v30 = vld [vmem:[#allocation50_spill] sm:$0xff] }
 0x2d3   :  { %8350 = vst [vmem:[#allocation11_spill] sm:$0xff] %v5717_v10  ;;  %v1385_v23 = vmul.f32 %v5717_v10, %v5385_v52  ;;  %v5745_v52 = vld [vmem:[#allocation2 + $0xad0] sm:$0xff] }
 0x2d4   :  { %v2450_v48 = vadd.f32 %v2449_v3, %v5705_v13  ;;  %v1893_v43 = vadd.f32 %v1892_v27, %v1382_v46  ;;  %v5725_v3 = vld [vmem:[#allocation5 + $0x970] sm:$0xff]  ;;  %v2865_v53 = vadd.f32 %v2864_v54, %v8353_v5  ;;  %v8357_v5 = vld [vmem:[#allocation69_spill] sm:$0xff] }
 0x2d5   :  { %8352 = vst [vmem:[#allocation12_spill] sm:$0xff] %v5725_v3  ;;  %v1386_v46 = vmul.f32 %v5725_v3, %v5393_v39  ;;  %v5753_v39 = vld [vmem:[#allocation2 + $0xad8] sm:$0xff] }
 0x2d6   :  { %v2451_v21 = vadd.f32 %v2450_v48, %v5713_v26  ;;  %v1894_v18 = vadd.f32 %v1893_v43, %v1383_v37  ;;  %v5733_v48 = vld [vmem:[#allocation5 + $0x978] sm:$0xff]  ;;  %v2866_v19 = vadd.f32 %v2865_v53, %v8355_v30 }
 0x2d7   :  { %8354 = vst [vmem:[#allocation47_spill] sm:$0xff] %v5733_v48  ;;  %v1387_v37 = vmul.f32 %v5733_v48, %v5401_v1  ;;  %v8359_v30 = vld [vmem:[#allocation51_spill] sm:$0xff]  ;;  %v5761_v1 = vld [vmem:[#allocation2 + $0xae0] sm:$0xff] }
 0x2d8   :  { %v2452_v25 = vadd.f32 %v2451_v21, %v5721_v15  ;;  %v1895_v27 = vadd.f32 %v1894_v18, %v1384_v29  ;;  %v5741_v21 = vld [vmem:[#allocation5 + $0x980] sm:$0xff]  ;;  %v2867_v57 = vadd.f32 %v2866_v19, %v8357_v5 }
 0x2d9   :  { %8356 = vst [vmem:[#allocation48_spill] sm:$0xff] %v5741_v21  ;;  %v1388_v29 = vmul.f32 %v5741_v21, %v5409_v42  ;;  %v8361_v5 = vld [vmem:[#allocation52_spill] sm:$0xff]  ;;  %v5769_v42 = vld [vmem:[#allocation2 + $0xae8] sm:$0xff] }
 0x2da   :  { %v2453_v9 = vadd.f32 %v2452_v25, %v5729_v0  ;;  %v1896_v43 = vadd.f32 %v1895_v27, %v1385_v23  ;;  %v5749_v25 = vld [vmem:[#allocation5 + $0x988] sm:$0xff]  ;;  %v2868_v10 = vadd.f32 %v2867_v57, %v8359_v30 }
 0x2db   :  { %8358 = vst [vmem:[#allocation66_spill] sm:$0xff] %v5749_v25  ;;  %v1389_v23 = vmul.f32 %v5749_v25, %v5417_v45  ;;  %v8363_v30 = vld [vmem:[#allocation53_spill] sm:$0xff]  ;;  %v5777_v45 = vld [vmem:[#allocation2 + $0xaf0] sm:$0xff] }
 0x2dc   :  { %v2454_v54 = vadd.f32 %v2453_v9, %v5737_v50  ;;  %v1897_v18 = vadd.f32 %v1896_v43, %v1386_v46  ;;  %v5757_v9 = vld [vmem:[#allocation5 + $0x990] sm:$0xff]  ;;  %v2869_v3 = vadd.f32 %v2868_v10, %v8361_v5 }
 0x2dd   :  { %8360 = vst [vmem:[#allocation49_spill] sm:$0xff] %v5757_v9  ;;  %v1390_v46 = vmul.f32 %v5757_v9, %v5425_v47  ;;  %v8365_v5 = vld [vmem:[#allocation54_spill] sm:$0xff]  ;;  %v5785_v47 = vld [vmem:[#allocation2 + $0xaf8] sm:$0xff] }
 0x2de   :  { %v2455_v53 = vadd.f32 %v2454_v54, %v5745_v52  ;;  %v1898_v27 = vadd.f32 %v1897_v18, %v1387_v37  ;;  %v5765_v54 = vld [vmem:[#allocation5 + $0x998] sm:$0xff]  ;;  %v2870_v48 = vadd.f32 %v2869_v3, %v8363_v30 }
 0x2df   :  { %8362 = vst [vmem:[#allocation50_spill] sm:$0xff] %v5765_v54  ;;  %v1391_v37 = vmul.f32 %v5765_v54, %v5433_v49  ;;  %v8367_v30 = vld [vmem:[#allocation55_spill] sm:$0xff]  ;;  %v5793_v49 = vld [vmem:[#allocation2 + $0xb00] sm:$0xff] }
 0x2e0   :  { %v2456_v19 = vadd.f32 %v2455_v53, %v5753_v39  ;;  %v1899_v43 = vadd.f32 %v1898_v27, %v1388_v29  ;;  %v5773_v53 = vld [vmem:[#allocation5 + $0x9a0] sm:$0xff]  ;;  %v2871_v21 = vadd.f32 %v2870_v48, %v8365_v5 }
 0x2e1   :  { %8364 = vst [vmem:[#allocation69_spill] sm:$0xff] %v5773_v53  ;;  %v1392_v29 = vmul.f32 %v5773_v53, %v5441_v51  ;;  %v8369_v5 = vld [vmem:[#allocation56_spill] sm:$0xff]  ;;  %v5801_v51 = vld [vmem:[#allocation2 + $0xb08] sm:$0xff] }
 0x2e2   :  { %v2457_v57 = vadd.f32 %v2456_v19, %v5761_v1  ;;  %v1900_v18 = vadd.f32 %v1899_v43, %v1389_v23  ;;  %v5781_v19 = vld [vmem:[#allocation5 + $0x9a8] sm:$0xff]  ;;  %v2872_v25 = vadd.f32 %v2871_v21, %v8367_v30 }
 0x2e3   :  { %8366 = vst [vmem:[#allocation51_spill] sm:$0xff] %v5781_v19  ;;  %v1393_v23 = vmul.f32 %v5781_v19, %v5449_v14  ;;  %v8371_v30 = vld [vmem:[#allocation57_spill] sm:$0xff]  ;;  %v5809_v14 = vld [vmem:[#allocation2 + $0xb10] sm:$0xff] }
 0x2e4   :  { %v2458_v10 = vadd.f32 %v2457_v57, %v5769_v42  ;;  %v1901_v27 = vadd.f32 %v1900_v18, %v1390_v46  ;;  %v5789_v57 = vld [vmem:[#allocation5 + $0x9b0] sm:$0xff]  ;;  %v2873_v9 = vadd.f32 %v2872_v25, %v8369_v5 }
 0x2e5   :  { %8368 = vst [vmem:[#allocation52_spill] sm:$0xff] %v5789_v57  ;;  %v1394_v46 = vmul.f32 %v5789_v57, %v5457_v41  ;;  %v8373_v5 = vld [vmem:[#allocation58_spill] sm:$0xff]  ;;  %v5817_v41 = vld [vmem:[#allocation2 + $0xb18] sm:$0xff] }
 0x2e6   :  { %v2459_v3 = vadd.f32 %v2458_v10, %v5777_v45  ;;  %v1902_v43 = vadd.f32 %v1901_v27, %v1391_v37  ;;  %v5797_v10 = vld [vmem:[#allocation5 + $0x9b8] sm:$0xff]  ;;  %v2874_v54 = vadd.f32 %v2873_v9, %v8371_v30 }
 0x2e7   :  { %8370 = vst [vmem:[#allocation53_spill] sm:$0xff] %v5797_v10  ;;  %v1395_v37 = vmul.f32 %v5797_v10, %v5465_v60  ;;  %v8375_v30 = vld [vmem:[#allocation59_spill] sm:$0xff]  ;;  %v5825_v60 = vld [vmem:[#allocation2 + $0xb20] sm:$0xff] }
 0x2e8   :  { %v2460_v48 = vadd.f32 %v2459_v3, %v5785_v47  ;;  %v1903_v18 = vadd.f32 %v1902_v43, %v1392_v29  ;;  %v5805_v3 = vld [vmem:[#allocation5 + $0x9c0] sm:$0xff]  ;;  %v2875_v53 = vadd.f32 %v2874_v54, %v8373_v5 }
 0x2e9   :  { %8372 = vst [vmem:[#allocation54_spill] sm:$0xff] %v5805_v3  ;;  %v1396_v29 = vmul.f32 %v5805_v3, %v5473_v59  ;;  %v8377_v5 = vld [vmem:[#allocation60_spill] sm:$0xff]  ;;  %v5833_v59 = vld [vmem:[#allocation2 + $0xb28] sm:$0xff] }
 0x2ea   :  { %v2461_v21 = vadd.f32 %v2460_v48, %v5793_v49  ;;  %v1904_v27 = vadd.f32 %v1903_v18, %v1393_v23  ;;  %v5813_v48 = vld [vmem:[#allocation5 + $0x9c8] sm:$0xff]  ;;  %v2876_v19 = vadd.f32 %v2875_v53, %v8375_v30 }
 0x2eb   :  { %8374 = vst [vmem:[#allocation55_spill] sm:$0xff] %v5813_v48  ;;  %v1397_v23 = vmul.f32 %v5813_v48, %v5481_v61  ;;  %v8379_v30 = vld [vmem:[#allocation61_spill] sm:$0xff]  ;;  %v5841_v61 = vld [vmem:[#allocation2 + $0xb30] sm:$0xff] }
 0x2ec   :  { %v2462_v25 = vadd.f32 %v2461_v21, %v5801_v51  ;;  %v1905_v43 = vadd.f32 %v1904_v27, %v1394_v46  ;;  %v5821_v21 = vld [vmem:[#allocation5 + $0x9d0] sm:$0xff]  ;;  %v2877_v57 = vadd.f32 %v2876_v19, %v8377_v5 }
 0x2ed   :  { %8376 = vst [vmem:[#allocation56_spill] sm:$0xff] %v5821_v21  ;;  %v1398_v46 = vmul.f32 %v5821_v21, %v5489_v63  ;;  %v8381_v5 = vld [vmem:[#allocation62_spill] sm:$0xff]  ;;  %v5849_v63 = vld [vmem:[#allocation2 + $0xb38] sm:$0xff] }
 0x2ee   :  { %v2463_v9 = vadd.f32 %v2462_v25, %v5809_v14  ;;  %v1906_v18 = vadd.f32 %v1905_v43, %v1395_v37  ;;  %v5829_v25 = vld [vmem:[#allocation5 + $0x9d8] sm:$0xff]  ;;  %v2878_v10 = vadd.f32 %v2877_v57, %v8379_v30 }
 0x2ef   :  { %8378 = vst [vmem:[#allocation57_spill] sm:$0xff] %v5829_v25  ;;  %v1399_v37 = vmul.f32 %v5829_v25, %v5497_v4  ;;  %v8383_v30 = vld [vmem:[#allocation63_spill] sm:$0xff]  ;;  %v5857_v4 = vld [vmem:[#allocation2 + $0xb40] sm:$0xff] }
 0x2f0   :  { %v2464_v54 = vadd.f32 %v2463_v9, %v5817_v41  ;;  %v1907_v27 = vadd.f32 %v1906_v18, %v1396_v29  ;;  %v5837_v9 = vld [vmem:[#allocation5 + $0x9e0] sm:$0xff]  ;;  %v2879_v3 = vadd.f32 %v2878_v10, %v8381_v5 }
 0x2f1   :  { %8380 = vst [vmem:[#allocation58_spill] sm:$0xff] %v5837_v9  ;;  %v1400_v29 = vmul.f32 %v5837_v9, %v5505_v8  ;;  %v8385_v5 = vld [vmem:[#allocation64_spill] sm:$0xff]  ;;  %v5865_v8 = vld [vmem:[#allocation2 + $0xb48] sm:$0xff] }
 0x2f2   :  { %v2465_v53 = vadd.f32 %v2464_v54, %v5825_v60  ;;  %v1908_v43 = vadd.f32 %v1907_v27, %v1397_v23  ;;  %v5845_v54 = vld [vmem:[#allocation5 + $0x9e8] sm:$0xff]  ;;  %v2880_v48 = vadd.f32 %v2879_v3, %v8383_v30  ;;  %v8387_v30 = vld [vmem:[#allocation23_spill] sm:$0xff] }
 0x2f3   :  { %8382 = vst [vmem:[#allocation59_spill] sm:$0xff] %v5845_v54  ;;  %v1401_v23 = vmul.f32 %v5845_v54, %v5513_v12  ;;  %v5873_v12 = vld [vmem:[#allocation2 + $0xb50] sm:$0xff] }
 0x2f4   :  { %v2466_v19 = vadd.f32 %v2465_v53, %v5833_v59  ;;  %v1909_v18 = vadd.f32 %v1908_v43, %v1398_v46  ;;  %v5853_v53 = vld [vmem:[#allocation5 + $0x9f0] sm:$0xff]  ;;  %v2881_v21 = vadd.f32 %v2880_v48, %v8385_v5  ;;  %v8389_v5 = vld [vmem:[#allocation65_spill] sm:$0xff] }
 0x2f5   :  { %8384 = vst [vmem:[#allocation60_spill] sm:$0xff] %v5853_v53  ;;  %v1402_v46 = vmul.f32 %v5853_v53, %v5521_v16  ;;  %v5881_v16 = vld [vmem:[#allocation2 + $0xb58] sm:$0xff] }
 0x2f6   :  { %v2467_v57 = vadd.f32 %v2466_v19, %v5841_v61  ;;  %v1910_v27 = vadd.f32 %v1909_v18, %v1399_v37  ;;  %v5861_v19 = vld [vmem:[#allocation5 + $0x9f8] sm:$0xff]  ;;  %v2882_v25 = vadd.f32 %v2881_v21, %v8387_v30 }
 0x2f7   :  { %8386 = vst [vmem:[#allocation61_spill] sm:$0xff] %v5861_v19  ;;  %v1403_v37 = vmul.f32 %v5861_v19, %v5529_v20  ;;  %v8391_v30 = vld [vmem:[#allocation67_spill] sm:$0xff]  ;;  %v5889_v20 = vld [vmem:[#allocation2 + $0xb60] sm:$0xff] }
 0x2f8   :  { %v2468_v10 = vadd.f32 %v2467_v57, %v5849_v63  ;;  %v1911_v43 = vadd.f32 %v1910_v27, %v1400_v29  ;;  %v5869_v57 = vld [vmem:[#allocation5 + $0xa00] sm:$0xff]  ;;  %v2883_v9 = vadd.f32 %v2882_v25, %v8389_v5  ;;  %v8393_v5 = vld [vmem:[#allocation43_spill] sm:$0xff] }
 0x2f9   :  { %8388 = vst [vmem:[#allocation62_spill] sm:$0xff] %v5869_v57  ;;  %v1404_v29 = vmul.f32 %v5869_v57, %v5537_v24  ;;  %v5897_v24 = vld [vmem:[#allocation2 + $0xb68] sm:$0xff] }
 0x2fa   :  { %v2469_v3 = vadd.f32 %v2468_v10, %v5857_v4  ;;  %v1912_v18 = vadd.f32 %v1911_v43, %v1401_v23  ;;  %v5877_v10 = vld [vmem:[#allocation5 + $0xa08] sm:$0xff]  ;;  %v2884_v54 = vadd.f32 %v2883_v9, %v8391_v30  ;;  %v8395_v30 = vld [vmem:[#allocation68_spill] sm:$0xff] }
 0x2fb   :  { %8390 = vst [vmem:[#allocation63_spill] sm:$0xff] %v5877_v10  ;;  %v1405_v23 = vmul.f32 %v5877_v10, %v5545_v28  ;;  %v5905_v28 = vld [vmem:[#allocation2 + $0xb70] sm:$0xff] }
 0x2fc   :  { %v2470_v48 = vadd.f32 %v2469_v3, %v5865_v8  ;;  %v1913_v27 = vadd.f32 %v1912_v18, %v1402_v46  ;;  %v5885_v3 = vld [vmem:[#allocation5 + $0xa10] sm:$0xff]  ;;  %v2885_v53 = vadd.f32 %v2884_v54, %v8393_v5 }
 0x2fd   :  { %8392 = vst [vmem:[#allocation64_spill] sm:$0xff] %v5885_v3  ;;  %v1406_v46 = vmul.f32 %v5885_v3, %v5553_v32  ;;  %v8397_v5 = vld [vmem:[#allocation14_spill] sm:$0xff]  ;;  %v5913_v32 = vld [vmem:[#allocation2 + $0xb78] sm:$0xff] }
 0x2fe   :  { %v2471_v21 = vadd.f32 %v2470_v48, %v5873_v12  ;;  %v1914_v43 = vadd.f32 %v1913_v27, %v1403_v37  ;;  %v5893_v48 = vld [vmem:[#allocation5 + $0xa18] sm:$0xff]  ;;  %v2886_v19 = vadd.f32 %v2885_v53, %v8395_v30 }
 0x2ff   :  { %8394 = vst [vmem:[#allocation23_spill] sm:$0xff] %v5893_v48  ;;  %v1407_v37 = vmul.f32 %v5893_v48, %v5561_v36  ;;  %v8399_v30 = vld [vmem:[#allocation15_spill] sm:$0xff]  ;;  %v5921_v36 = vld [vmem:[#allocation2 + $0xb80] sm:$0xff] }
 0x300   :  { %v2472_v25 = vadd.f32 %v2471_v21, %v5881_v16  ;;  %v1915_v18 = vadd.f32 %v1914_v43, %v1404_v29  ;;  %v5901_v21 = vld [vmem:[#allocation5 + $0xa20] sm:$0xff]  ;;  %v2887_v57 = vadd.f32 %v2886_v19, %v8397_v5 }
 0x301   :  { %8396 = vst [vmem:[#allocation65_spill] sm:$0xff] %v5901_v21  ;;  %v1408_v29 = vmul.f32 %v5901_v21, %v5569_v40  ;;  %v8401_v5 = vld [vmem:[#allocation16_spill] sm:$0xff]  ;;  %v5929_v40 = vld [vmem:[#allocation2 + $0xb88] sm:$0xff] }
 0x302   :  { %v2473_v9 = vadd.f32 %v2472_v25, %v5889_v20  ;;  %v1916_v27 = vadd.f32 %v1915_v18, %v1405_v23  ;;  %v5909_v25 = vld [vmem:[#allocation5 + $0xa28] sm:$0xff]  ;;  %v2888_v10 = vadd.f32 %v2887_v57, %v8399_v30  ;;  %v8403_v30 = vld [vmem:[#allocation70_spill] sm:$0xff] }
 0x303   :  { %8398 = vst [vmem:[#allocation67_spill] sm:$0xff] %v5909_v25  ;;  %v1409_v23 = vmul.f32 %v5909_v25, %v5577_v44  ;;  %v5937_v44 = vld [vmem:[#allocation2 + $0xb90] sm:$0xff] }
 0x304   :  { %v2474_v54 = vadd.f32 %v2473_v9, %v5897_v24  ;;  %v1917_v43 = vadd.f32 %v1916_v27, %v1406_v46  ;;  %v5917_v9 = vld [vmem:[#allocation5 + $0xa30] sm:$0xff]  ;;  %v2889_v3 = vadd.f32 %v2888_v10, %v8401_v5  ;;  %v8405_v5 = vld [vmem:[#allocation71_spill] sm:$0xff] }
 0x305   :  { %8400 = vst [vmem:[#allocation43_spill] sm:$0xff] %v5917_v9  ;;  %v1410_v46 = vmul.f32 %v5917_v9, %v5585_v33  ;;  %v5945_v33 = vld [vmem:[#allocation2 + $0xb98] sm:$0xff] }
 0x306   :  { %v2475_v53 = vadd.f32 %v2474_v54, %v5905_v28  ;;  %v1918_v18 = vadd.f32 %v1917_v43, %v1407_v37  ;;  %v5925_v54 = vld [vmem:[#allocation5 + $0xa38] sm:$0xff]  ;;  %v2890_v48 = vadd.f32 %v2889_v3, %v8403_v30  ;;  %v8407_v30 = vld [vmem:[#allocation72_spill] sm:$0xff] }
 0x307   :  { %8402 = vst [vmem:[#allocation68_spill] sm:$0xff] %v5925_v54  ;;  %v1411_v37 = vmul.f32 %v5925_v54, %v5593_v55  ;;  %v5953_v55 = vld [vmem:[#allocation2 + $0xba0] sm:$0xff] }
 0x308   :  { %v2476_v19 = vadd.f32 %v2475_v53, %v5913_v32  ;;  %v1919_v27 = vadd.f32 %v1918_v18, %v1408_v29  ;;  %v5933_v53 = vld [vmem:[#allocation5 + $0xa40] sm:$0xff]  ;;  %v2891_v21 = vadd.f32 %v2890_v48, %v8405_v5  ;;  %v8409_v5 = vld [vmem:[#allocation73_spill] sm:$0xff] }
 0x309   :  { %8404 = vst [vmem:[#allocation14_spill] sm:$0xff] %v5933_v53  ;;  %v1412_v29 = vmul.f32 %v5933_v53, %v5601_v6  ;;  %v5961_v6 = vld [vmem:[#allocation2 + $0xba8] sm:$0xff] }
 0x30a   :  { %v2477_v57 = vadd.f32 %v2476_v19, %v5921_v36  ;;  %v1920_v43 = vadd.f32 %v1919_v27, %v1409_v23  ;;  %v5941_v19 = vld [vmem:[#allocation5 + $0xa48] sm:$0xff]  ;;  %v2892_v25 = vadd.f32 %v2891_v21, %v8407_v30  ;;  %v8411_v30 = vld [vmem:[#allocation74_spill] sm:$0xff] }
 0x30b   :  { %8406 = vst [vmem:[#allocation15_spill] sm:$0xff] %v5941_v19  ;;  %v1413_v23 = vmul.f32 %v5941_v19, %v5609_v38  ;;  %v5969_v38 = vld [vmem:[#allocation2 + $0xbb0] sm:$0xff] }
 0x30c   :  { %v2478_v10 = vadd.f32 %v2477_v57, %v5929_v40  ;;  %v1921_v18 = vadd.f32 %v1920_v43, %v1410_v46  ;;  %v5949_v57 = vld [vmem:[#allocation5 + $0xa50] sm:$0xff]  ;;  %v2893_v9 = vadd.f32 %v2892_v25, %v8409_v5  ;;  %v8413_v5 = vld [vmem:[#allocation17_spill] sm:$0xff] }
 0x30d   :  { %8408 = vst [vmem:[#allocation16_spill] sm:$0xff] %v5949_v57  ;;  %v1414_v46 = vmul.f32 %v5949_v57, %v5617_v31  ;;  %v5977_v31 = vld [vmem:[#allocation2 + $0xbb8] sm:$0xff] }
 0x30e   :  { %v2479_v3 = vadd.f32 %v2478_v10, %v5937_v44  ;;  %v1922_v27 = vadd.f32 %v1921_v18, %v1411_v37  ;;  %v5957_v10 = vld [vmem:[#allocation5 + $0xa58] sm:$0xff]  ;;  %v2894_v54 = vadd.f32 %v2893_v9, %v8411_v30  ;;  %v8415_v30 = vld [vmem:[#allocation18_spill] sm:$0xff] }
 0x30f   :  { %8410 = vst [vmem:[#allocation70_spill] sm:$0xff] %v5957_v10  ;;  %v1415_v37 = vmul.f32 %v5957_v10, %v5625_v7  ;;  %v5985_v7 = vld [vmem:[#allocation2 + $0xbc0] sm:$0xff] }
 0x310   :  { %v2480_v48 = vadd.f32 %v2479_v3, %v5945_v33  ;;  %v1923_v43 = vadd.f32 %v1922_v27, %v1412_v29  ;;  %v5965_v3 = vld [vmem:[#allocation5 + $0xa60] sm:$0xff]  ;;  %v2895_v53 = vadd.f32 %v2894_v54, %v8413_v5  ;;  %v8417_v5 = vld [vmem:[#allocation19_spill] sm:$0xff] }
 0x311   :  { %8412 = vst [vmem:[#allocation71_spill] sm:$0xff] %v5965_v3  ;;  %v1416_v29 = vmul.f32 %v5965_v3, %v5633_v22  ;;  %v5993_v22 = vld [vmem:[#allocation2 + $0xbc8] sm:$0xff] }
 0x312   :  { %v2481_v21 = vadd.f32 %v2480_v48, %v5953_v55  ;;  %v1924_v18 = vadd.f32 %v1923_v43, %v1413_v23  ;;  %v5973_v48 = vld [vmem:[#allocation5 + $0xa68] sm:$0xff]  ;;  %v2896_v19 = vadd.f32 %v2895_v53, %v8415_v30  ;;  %v8419_v30 = vld [vmem:[#allocation20_spill] sm:$0xff] }
 0x313   :  { %8414 = vst [vmem:[#allocation72_spill] sm:$0xff] %v5973_v48  ;;  %v1417_v23 = vmul.f32 %v5973_v48, %v5641_v56  ;;  %v6001_v56 = vld [vmem:[#allocation2 + $0xbd0] sm:$0xff] }
 0x314   :  { %v2482_v25 = vadd.f32 %v2481_v21, %v5961_v6  ;;  %v1925_v27 = vadd.f32 %v1924_v18, %v1414_v46  ;;  %v5981_v21 = vld [vmem:[#allocation5 + $0xa70] sm:$0xff]  ;;  %v2897_v57 = vadd.f32 %v2896_v19, %v8417_v5  ;;  %v8421_v5 = vld [vmem:[#allocation21_spill] sm:$0xff] }
 0x315   :  { %8416 = vst [vmem:[#allocation73_spill] sm:$0xff] %v5981_v21  ;;  %v1418_v46 = vmul.f32 %v5981_v21, %v5649_v58  ;;  %v6009_v58 = vld [vmem:[#allocation2 + $0xbd8] sm:$0xff] }
 0x316   :  { %v2483_v9 = vadd.f32 %v2482_v25, %v5969_v38  ;;  %v1926_v43 = vadd.f32 %v1925_v27, %v1415_v37  ;;  %v5989_v25 = vld [vmem:[#allocation5 + $0xa78] sm:$0xff]  ;;  %v2898_v10 = vadd.f32 %v2897_v57, %v8419_v30  ;;  %v8423_v30 = vld [vmem:[#allocation22_spill] sm:$0xff] }
 0x317   :  { %8418 = vst [vmem:[#allocation74_spill] sm:$0xff] %v5989_v25  ;;  %v1419_v37 = vmul.f32 %v5989_v25, %v5657_v2  ;;  %v6017_v2 = vld [vmem:[#allocation2 + $0xbe0] sm:$0xff] }
 0x318   :  { %v2484_v54 = vadd.f32 %v2483_v9, %v5977_v31  ;;  %v1927_v18 = vadd.f32 %v1926_v43, %v1416_v29  ;;  %v5997_v9 = vld [vmem:[#allocation5 + $0xa80] sm:$0xff]  ;;  %v2899_v3 = vadd.f32 %v2898_v10, %v8421_v5  ;;  %v8425_v5 = vld [vmem:[#allocation41_spill] sm:$0xff] }
 0x319   :  { %8420 = vst [vmem:[#allocation17_spill] sm:$0xff] %v5997_v9  ;;  %v1420_v29 = vmul.f32 %v5997_v9, %v5665_v35  ;;  %v6025_v35 = vld [vmem:[#allocation2 + $0xbe8] sm:$0xff] }
 0x31a   :  { %v2485_v53 = vadd.f32 %v2484_v54, %v5985_v7  ;;  %v1928_v27 = vadd.f32 %v1927_v18, %v1417_v23  ;;  %v6005_v54 = vld [vmem:[#allocation5 + $0xa88] sm:$0xff]  ;;  %v2900_v48 = vadd.f32 %v2899_v3, %v8423_v30  ;;  %v8427_v30 = vld [vmem:[#allocation24_spill] sm:$0xff] }
 0x31b   :  { %8422 = vst [vmem:[#allocation18_spill] sm:$0xff] %v6005_v54  ;;  %v1421_v23 = vmul.f32 %v6005_v54, %v5673_v11  ;;  %v6033_v11 = vld [vmem:[#allocation2 + $0xbf0] sm:$0xff] }
 0x31c   :  { %v2486_v19 = vadd.f32 %v2485_v53, %v5993_v22  ;;  %v1929_v43 = vadd.f32 %v1928_v27, %v1418_v46  ;;  %v6013_v53 = vld [vmem:[#allocation5 + $0xa90] sm:$0xff]  ;;  %v2901_v21 = vadd.f32 %v2900_v48, %v8425_v5  ;;  %v8429_v5 = vld [vmem:[#allocation25_spill] sm:$0xff] }
 0x31d   :  { %8424 = vst [vmem:[#allocation19_spill] sm:$0xff] %v6013_v53  ;;  %v1422_v46 = vmul.f32 %v6013_v53, %v5681_v17  ;;  %v6041_v17 = vld [vmem:[#allocation2 + $0xbf8] sm:$0xff] }
 0x31e   :  { %v2487_v57 = vadd.f32 %v2486_v19, %v6001_v56  ;;  %v1930_v18 = vadd.f32 %v1929_v43, %v1419_v37  ;;  %v6021_v19 = vld [vmem:[#allocation5 + $0xa98] sm:$0xff]  ;;  %v2902_v25 = vadd.f32 %v2901_v21, %v8427_v30  ;;  %v8431_v30 = vld [vmem:[#allocation45_spill] sm:$0xff] }
 0x31f   :  { %8426 = vst [vmem:[#allocation20_spill] sm:$0xff] %v6021_v19  ;;  %v1423_v37 = vmul.f32 %v6021_v19, %v5689_v34  ;;  %v6049_v34 = vld [vmem:[#allocation2 + $0xc00] sm:$0xff] }
 0x320   :  { %v2488_v10 = vadd.f32 %v2487_v57, %v6009_v58  ;;  %v1931_v27 = vadd.f32 %v1930_v18, %v1420_v29  ;;  %v6029_v57 = vld [vmem:[#allocation5 + $0xaa0] sm:$0xff]  ;;  %v2903_v9 = vadd.f32 %v2902_v25, %v8429_v5  ;;  %v8433_v5 = vld [vmem:[#allocation46_spill] sm:$0xff] }
 0x321   :  { %8428 = vst [vmem:[#allocation21_spill] sm:$0xff] %v6029_v57  ;;  %v1424_v29 = vmul.f32 %v6029_v57, %v5697_v62  ;;  %v6057_v62 = vld [vmem:[#allocation2 + $0xc08] sm:$0xff] }
 0x322   :  { %v2489_v3 = vadd.f32 %v2488_v10, %v6017_v2  ;;  %v1932_v43 = vadd.f32 %v1931_v27, %v1421_v23  ;;  %v6037_v10 = vld [vmem:[#allocation5 + $0xaa8] sm:$0xff]  ;;  %v2904_v54 = vadd.f32 %v2903_v9, %v8431_v30  ;;  %v8435_v30 = vld [vmem:[#allocation26_spill] sm:$0xff] }
 0x323   :  { %8430 = vst [vmem:[#allocation22_spill] sm:$0xff] %v6037_v10  ;;  %v1425_v23 = vmul.f32 %v6037_v10, %v5705_v13  ;;  %v6065_v13 = vld [vmem:[#allocation2 + $0xc10] sm:$0xff] }
 0x324   :  { %v2490_v48 = vadd.f32 %v2489_v3, %v6025_v35  ;;  %v1933_v18 = vadd.f32 %v1932_v43, %v1422_v46  ;;  %v6045_v3 = vld [vmem:[#allocation5 + $0xab0] sm:$0xff]  ;;  %v2905_v53 = vadd.f32 %v2904_v54, %v8433_v5  ;;  %v8437_v5 = vld [vmem:[#allocation27_spill] sm:$0xff] }
 0x325   :  { %8432 = vst [vmem:[#allocation41_spill] sm:$0xff] %v6045_v3  ;;  %v1426_v46 = vmul.f32 %v6045_v3, %v5713_v26  ;;  %v6073_v26 = vld [vmem:[#allocation2 + $0xc18] sm:$0xff] }
 0x326   :  { %v2491_v21 = vadd.f32 %v2490_v48, %v6033_v11  ;;  %v1934_v27 = vadd.f32 %v1933_v18, %v1423_v37  ;;  %v6053_v48 = vld [vmem:[#allocation5 + $0xab8] sm:$0xff]  ;;  %v2906_v19 = vadd.f32 %v2905_v53, %v8435_v30  ;;  %v8439_v30 = vld [vmem:[#allocation13_spill] sm:$0xff] }
 0x327   :  { %8434 = vst [vmem:[#allocation24_spill] sm:$0xff] %v6053_v48  ;;  %v1427_v37 = vmul.f32 %v6053_v48, %v5721_v15  ;;  %v6081_v15 = vld [vmem:[#allocation2 + $0xc20] sm:$0xff] }
 0x328   :  { %v2492_v25 = vadd.f32 %v2491_v21, %v6041_v17  ;;  %v1935_v43 = vadd.f32 %v1934_v27, %v1424_v29  ;;  %v6061_v21 = vld [vmem:[#allocation5 + $0xac0] sm:$0xff]  ;;  %v2907_v57 = vadd.f32 %v2906_v19, %v8437_v5 }
 0x329   :  { %8436 = vst [vmem:[#allocation25_spill] sm:$0xff] %v6061_v21  ;;  %v1428_v29 = vmul.f32 %v6061_v21, %v5729_v0  ;;  %v8441_v5 = vld [vmem:[#allocation28_spill] sm:$0xff]  ;;  %v6089_v0 = vld [vmem:[#allocation2 + $0xc28] sm:$0xff] }
 0x32a   :  { %v2493_v9 = vadd.f32 %v2492_v25, %v6049_v34  ;;  %v1936_v18 = vadd.f32 %v1935_v43, %v1425_v23  ;;  %v6069_v25 = vld [vmem:[#allocation5 + $0xac8] sm:$0xff]  ;;  %v2908_v10 = vadd.f32 %v2907_v57, %v8439_v30 }
 0x32b   :  { %8438 = vst [vmem:[#allocation45_spill] sm:$0xff] %v6069_v25  ;;  %v1429_v23 = vmul.f32 %v6069_v25, %v5737_v50  ;;  %v8443_v30 = vld [vmem:[#allocation29_spill] sm:$0xff]  ;;  %v6097_v50 = vld [vmem:[#allocation2 + $0xc30] sm:$0xff] }
 0x32c   :  { %v2494_v54 = vadd.f32 %v2493_v9, %v6057_v62  ;;  %v1937_v27 = vadd.f32 %v1936_v18, %v1426_v46  ;;  %v6077_v9 = vld [vmem:[#allocation5 + $0xad0] sm:$0xff]  ;;  %v2909_v3 = vadd.f32 %v2908_v10, %v8441_v5 }
 0x32d   :  { %8440 = vst [vmem:[#allocation46_spill] sm:$0xff] %v6077_v9  ;;  %v1430_v46 = vmul.f32 %v6077_v9, %v5745_v52  ;;  %v8445_v5 = vld [vmem:[#allocation30_spill] sm:$0xff]  ;;  %v6105_v52 = vld [vmem:[#allocation2 + $0xc38] sm:$0xff] }
 0x32e   :  { %v2495_v53 = vadd.f32 %v2494_v54, %v6065_v13  ;;  %v1938_v43 = vadd.f32 %v1937_v27, %v1427_v37  ;;  %v6085_v54 = vld [vmem:[#allocation5 + $0xad8] sm:$0xff]  ;;  %v2910_v48 = vadd.f32 %v2909_v3, %v8443_v30 }
 0x32f   :  { %8442 = vst [vmem:[#allocation26_spill] sm:$0xff] %v6085_v54  ;;  %v1431_v37 = vmul.f32 %v6085_v54, %v5753_v39  ;;  %v8447_v30 = vld [vmem:[#allocation31_spill] sm:$0xff]  ;;  %v6113_v39 = vld [vmem:[#allocation2 + $0xc40] sm:$0xff] }
 0x330   :  { %v2496_v19 = vadd.f32 %v2495_v53, %v6073_v26  ;;  %v1939_v18 = vadd.f32 %v1938_v43, %v1428_v29  ;;  %v6093_v53 = vld [vmem:[#allocation5 + $0xae0] sm:$0xff]  ;;  %v2911_v21 = vadd.f32 %v2910_v48, %v8445_v5 }
 0x331   :  { %8444 = vst [vmem:[#allocation27_spill] sm:$0xff] %v6093_v53  ;;  %v1432_v29 = vmul.f32 %v6093_v53, %v5761_v1  ;;  %v8449_v5 = vld [vmem:[#allocation32_spill] sm:$0xff]  ;;  %v6121_v1 = vld [vmem:[#allocation2 + $0xc48] sm:$0xff] }
 0x332   :  { %v2497_v57 = vadd.f32 %v2496_v19, %v6081_v15  ;;  %v1940_v27 = vadd.f32 %v1939_v18, %v1429_v23  ;;  %v6101_v19 = vld [vmem:[#allocation5 + $0xae8] sm:$0xff]  ;;  %v2912_v25 = vadd.f32 %v2911_v21, %v8447_v30 }
 0x333   :  { %8446 = vst [vmem:[#allocation13_spill] sm:$0xff] %v6101_v19  ;;  %v1433_v23 = vmul.f32 %v6101_v19, %v5769_v42  ;;  %v8451_v30 = vld [vmem:[#allocation33_spill] sm:$0xff]  ;;  %v6129_v42 = vld [vmem:[#allocation2 + $0xc50] sm:$0xff] }
 0x334   :  { %v2498_v10 = vadd.f32 %v2497_v57, %v6089_v0  ;;  %v1941_v43 = vadd.f32 %v1940_v27, %v1430_v46  ;;  %v6109_v57 = vld [vmem:[#allocation5 + $0xaf0] sm:$0xff]  ;;  %v2913_v9 = vadd.f32 %v2912_v25, %v8449_v5 }
 0x335   :  { %8448 = vst [vmem:[#allocation28_spill] sm:$0xff] %v6109_v57  ;;  %v1434_v46 = vmul.f32 %v6109_v57, %v5777_v45  ;;  %v8453_v5 = vld [vmem:[#allocation34_spill] sm:$0xff]  ;;  %v6137_v45 = vld [vmem:[#allocation2 + $0xc58] sm:$0xff] }
 0x336   :  { %v2499_v3 = vadd.f32 %v2498_v10, %v6097_v50  ;;  %v1942_v18 = vadd.f32 %v1941_v43, %v1431_v37  ;;  %v6117_v10 = vld [vmem:[#allocation5 + $0xaf8] sm:$0xff]  ;;  %v2914_v54 = vadd.f32 %v2913_v9, %v8451_v30 }
 0x337   :  { %8450 = vst [vmem:[#allocation29_spill] sm:$0xff] %v6117_v10  ;;  %v1435_v37 = vmul.f32 %v6117_v10, %v5785_v47  ;;  %v8455_v30 = vld [vmem:[#allocation35_spill] sm:$0xff]  ;;  %v6145_v47 = vld [vmem:[#allocation2 + $0xc60] sm:$0xff] }
 0x338   :  { %v2500_v48 = vadd.f32 %v2499_v3, %v6105_v52  ;;  %v1943_v27 = vadd.f32 %v1942_v18, %v1432_v29  ;;  %v6125_v3 = vld [vmem:[#allocation5 + $0xb00] sm:$0xff]  ;;  %v2915_v53 = vadd.f32 %v2914_v54, %v8453_v5 }
 0x339   :  { %8452 = vst [vmem:[#allocation30_spill] sm:$0xff] %v6125_v3  ;;  %v1436_v29 = vmul.f32 %v6125_v3, %v5793_v49  ;;  %v8457_v5 = vld [vmem:[#allocation36_spill] sm:$0xff]  ;;  %v6153_v49 = vld [vmem:[#allocation2 + $0xc68] sm:$0xff] }
 0x33a   :  { %v2501_v21 = vadd.f32 %v2500_v48, %v6113_v39  ;;  %v1944_v43 = vadd.f32 %v1943_v27, %v1433_v23  ;;  %v6133_v48 = vld [vmem:[#allocation5 + $0xb08] sm:$0xff]  ;;  %v2916_v19 = vadd.f32 %v2915_v53, %v8455_v30 }
 0x33b   :  { %8454 = vst [vmem:[#allocation31_spill] sm:$0xff] %v6133_v48  ;;  %v1437_v23 = vmul.f32 %v6133_v48, %v5801_v51  ;;  %v8459_v30 = vld [vmem:[#allocation37_spill] sm:$0xff]  ;;  %v6161_v51 = vld [vmem:[#allocation2 + $0xc70] sm:$0xff] }
 0x33c   :  { %v2502_v25 = vadd.f32 %v2501_v21, %v6121_v1  ;;  %v1945_v18 = vadd.f32 %v1944_v43, %v1434_v46  ;;  %v6141_v21 = vld [vmem:[#allocation5 + $0xb10] sm:$0xff]  ;;  %v2917_v57 = vadd.f32 %v2916_v19, %v8457_v5 }
 0x33d   :  { %8456 = vst [vmem:[#allocation32_spill] sm:$0xff] %v6141_v21  ;;  %v1438_v46 = vmul.f32 %v6141_v21, %v5809_v14  ;;  %v8461_v5 = vld [vmem:[#allocation38_spill] sm:$0xff]  ;;  %v6169_v14 = vld [vmem:[#allocation2 + $0xc78] sm:$0xff] }
 0x33e   :  { %v2503_v9 = vadd.f32 %v2502_v25, %v6129_v42  ;;  %v1946_v27 = vadd.f32 %v1945_v18, %v1435_v37  ;;  %v6149_v25 = vld [vmem:[#allocation5 + $0xb18] sm:$0xff]  ;;  %v2918_v10 = vadd.f32 %v2917_v57, %v8459_v30 }
 0x33f   :  { %8458 = vst [vmem:[#allocation33_spill] sm:$0xff] %v6149_v25  ;;  %v1439_v37 = vmul.f32 %v6149_v25, %v5817_v41  ;;  %v8463_v30 = vld [vmem:[#allocation39_spill] sm:$0xff]  ;;  %v6177_v41 = vld [vmem:[#allocation2 + $0xc80] sm:$0xff] }
 0x340   :  { %v2504_v54 = vadd.f32 %v2503_v9, %v6137_v45  ;;  %v1947_v43 = vadd.f32 %v1946_v27, %v1436_v29  ;;  %v6157_v9 = vld [vmem:[#allocation5 + $0xb20] sm:$0xff]  ;;  %v2919_v3 = vadd.f32 %v2918_v10, %v8461_v5 }
 0x341   :  { %8460 = vst [vmem:[#allocation34_spill] sm:$0xff] %v6157_v9  ;;  %v1440_v29 = vmul.f32 %v6157_v9, %v5825_v60  ;;  %v8465_v5 = vld [vmem:[#allocation40_spill] sm:$0xff]  ;;  %v6185_v60 = vld [vmem:[#allocation2 + $0xc88] sm:$0xff] }
 0x342   :  { %v2505_v53 = vadd.f32 %v2504_v54, %v6145_v47  ;;  %v1948_v18 = vadd.f32 %v1947_v43, %v1437_v23  ;;  %v6165_v54 = vld [vmem:[#allocation5 + $0xb28] sm:$0xff]  ;;  %v2920_v48 = vadd.f32 %v2919_v3, %v8463_v30  ;;  %v8467_v30 = vld [vmem:[#allocation42_spill] sm:$0xff] }
 0x343   :  { %8462 = vst [vmem:[#allocation35_spill] sm:$0xff] %v6165_v54  ;;  %v1441_v23 = vmul.f32 %v6165_v54, %v5833_v59  ;;  %v6193_v59 = vld [vmem:[#allocation2 + $0xc90] sm:$0xff] }
 0x344   :  { %v2506_v19 = vadd.f32 %v2505_v53, %v6153_v49  ;;  %v1949_v27 = vadd.f32 %v1948_v18, %v1438_v46  ;;  %v6173_v53 = vld [vmem:[#allocation5 + $0xb30] sm:$0xff]  ;;  %v2921_v21 = vadd.f32 %v2920_v48, %v8465_v5  ;;  %v8469_v5 = vld [vmem:[#allocation44_spill] sm:$0xff] }
 0x345   :  { %8464 = vst [vmem:[#allocation36_spill] sm:$0xff] %v6173_v53  ;;  %v1442_v46 = vmul.f32 %v6173_v53, %v5841_v61  ;;  %v6201_v61 = vld [vmem:[#allocation2 + $0xc98] sm:$0xff] }
 0x346   :  { %v2507_v57 = vadd.f32 %v2506_v19, %v6161_v51  ;;  %v1950_v43 = vadd.f32 %v1949_v27, %v1439_v37  ;;  %v6181_v19 = vld [vmem:[#allocation5 + $0xb38] sm:$0xff]  ;;  %v2922_v25 = vadd.f32 %v2921_v21, %v8467_v30 }
 0x347   :  { %8466 = vst [vmem:[#allocation37_spill] sm:$0xff] %v6181_v19  ;;  %v1443_v37 = vmul.f32 %v6181_v19, %v5849_v63  ;;  %v8471_v30 = vld [vmem:[#allocation11_spill] sm:$0xff]  ;;  %v6209_v63 = vld [vmem:[#allocation2 + $0xca0] sm:$0xff] }
 0x348   :  { %v2508_v10 = vadd.f32 %v2507_v57, %v6169_v14  ;;  %v1951_v18 = vadd.f32 %v1950_v43, %v1440_v29  ;;  %v6189_v57 = vld [vmem:[#allocation5 + $0xb40] sm:$0xff]  ;;  %v2923_v9 = vadd.f32 %v2922_v25, %v8469_v5 }
 0x349   :  { %8468 = vst [vmem:[#allocation38_spill] sm:$0xff] %v6189_v57  ;;  %v1444_v29 = vmul.f32 %v6189_v57, %v5857_v4  ;;  %v8473_v5 = vld [vmem:[#allocation12_spill] sm:$0xff]  ;;  %v6217_v4 = vld [vmem:[#allocation2 + $0xca8] sm:$0xff] }
 0x34a   :  { %v2509_v3 = vadd.f32 %v2508_v10, %v6177_v41  ;;  %v1952_v27 = vadd.f32 %v1951_v18, %v1441_v23  ;;  %v6197_v10 = vld [vmem:[#allocation5 + $0xb48] sm:$0xff]  ;;  %v2924_v54 = vadd.f32 %v2923_v9, %v8471_v30  ;;  %v8475_v30 = vld [vmem:[#allocation47_spill] sm:$0xff] }
 0x34b   :  { %8470 = vst [vmem:[#allocation39_spill] sm:$0xff] %v6197_v10  ;;  %v1445_v23 = vmul.f32 %v6197_v10, %v5865_v8  ;;  %v6225_v8 = vld [vmem:[#allocation2 + $0xcb0] sm:$0xff] }
 0x34c   :  { %v2510_v48 = vadd.f32 %v2509_v3, %v6185_v60  ;;  %v1953_v43 = vadd.f32 %v1952_v27, %v1442_v46  ;;  %v6205_v3 = vld [vmem:[#allocation5 + $0xb50] sm:$0xff]  ;;  %v2925_v53 = vadd.f32 %v2924_v54, %v8473_v5  ;;  %v8477_v5 = vld [vmem:[#allocation48_spill] sm:$0xff] }
 0x34d   :  { %8472 = vst [vmem:[#allocation40_spill] sm:$0xff] %v6205_v3  ;;  %v1446_v46 = vmul.f32 %v6205_v3, %v5873_v12  ;;  %v6233_v12 = vld [vmem:[#allocation2 + $0xcb8] sm:$0xff] }
 0x34e   :  { %v2511_v21 = vadd.f32 %v2510_v48, %v6193_v59  ;;  %v1954_v18 = vadd.f32 %v1953_v43, %v1443_v37  ;;  %v6213_v48 = vld [vmem:[#allocation5 + $0xb58] sm:$0xff]  ;;  %v2926_v19 = vadd.f32 %v2925_v53, %v8475_v30  ;;  %v8479_v30 = vld [vmem:[#allocation66_spill] sm:$0xff] }
 0x34f   :  { %8474 = vst [vmem:[#allocation42_spill] sm:$0xff] %v6213_v48  ;;  %v1447_v37 = vmul.f32 %v6213_v48, %v5881_v16  ;;  %v6241_v16 = vld [vmem:[#allocation2 + $0xcc0] sm:$0xff] }
 0x350   :  { %v2512_v25 = vadd.f32 %v2511_v21, %v6201_v61  ;;  %v1955_v27 = vadd.f32 %v1954_v18, %v1444_v29  ;;  %v6221_v21 = vld [vmem:[#allocation5 + $0xb60] sm:$0xff]  ;;  %v2927_v57 = vadd.f32 %v2926_v19, %v8477_v5  ;;  %v8481_v5 = vld [vmem:[#allocation49_spill] sm:$0xff] }
 0x351   :  { %8476 = vst [vmem:[#allocation44_spill] sm:$0xff] %v6221_v21  ;;  %v1448_v29 = vmul.f32 %v6221_v21, %v5889_v20  ;;  %v6249_v20 = vld [vmem:[#allocation2 + $0xcc8] sm:$0xff] }
 0x352   :  { %v2513_v9 = vadd.f32 %v2512_v25, %v6209_v63  ;;  %v1956_v43 = vadd.f32 %v1955_v27, %v1445_v23  ;;  %v6229_v25 = vld [vmem:[#allocation5 + $0xb68] sm:$0xff]  ;;  %v2928_v10 = vadd.f32 %v2927_v57, %v8479_v30  ;;  %v8483_v30 = vld [vmem:[#allocation50_spill] sm:$0xff] }
 0x353   :  { %8478 = vst [vmem:[#allocation11_spill] sm:$0xff] %v6229_v25  ;;  %v1449_v23 = vmul.f32 %v6229_v25, %v5897_v24  ;;  %v6257_v24 = vld [vmem:[#allocation2 + $0xcd0] sm:$0xff] }
 0x354   :  { %v2514_v54 = vadd.f32 %v2513_v9, %v6217_v4  ;;  %v1957_v18 = vadd.f32 %v1956_v43, %v1446_v46  ;;  %v6237_v9 = vld [vmem:[#allocation5 + $0xb70] sm:$0xff]  ;;  %v2929_v3 = vadd.f32 %v2928_v10, %v8481_v5  ;;  %v8485_v5 = vld [vmem:[#allocation69_spill] sm:$0xff] }
 0x355   :  { %8480 = vst [vmem:[#allocation12_spill] sm:$0xff] %v6237_v9  ;;  %v1450_v46 = vmul.f32 %v6237_v9, %v5905_v28  ;;  %v6265_v28 = vld [vmem:[#allocation2 + $0xcd8] sm:$0xff] }
 0x356   :  { %v2515_v53 = vadd.f32 %v2514_v54, %v6225_v8  ;;  %v1958_v27 = vadd.f32 %v1957_v18, %v1447_v37  ;;  %v6245_v54 = vld [vmem:[#allocation5 + $0xb78] sm:$0xff]  ;;  %v2930_v48 = vadd.f32 %v2929_v3, %v8483_v30 }
 0x357   :  { %8482 = vst [vmem:[#allocation47_spill] sm:$0xff] %v6245_v54  ;;  %v1451_v37 = vmul.f32 %v6245_v54, %v5913_v32  ;;  %v8487_v30 = vld [vmem:[#allocation51_spill] sm:$0xff]  ;;  %v6273_v32 = vld [vmem:[#allocation2 + $0xce0] sm:$0xff] }
 0x358   :  { %v2516_v19 = vadd.f32 %v2515_v53, %v6233_v12  ;;  %v1959_v43 = vadd.f32 %v1958_v27, %v1448_v29  ;;  %v6253_v53 = vld [vmem:[#allocation5 + $0xb80] sm:$0xff]  ;;  %v2931_v21 = vadd.f32 %v2930_v48, %v8485_v5 }
 0x359   :  { %8484 = vst [vmem:[#allocation48_spill] sm:$0xff] %v6253_v53  ;;  %v1452_v29 = vmul.f32 %v6253_v53, %v5921_v36  ;;  %v8489_v5 = vld [vmem:[#allocation52_spill] sm:$0xff]  ;;  %v6281_v36 = vld [vmem:[#allocation2 + $0xce8] sm:$0xff] }
 0x35a   :  { %v2517_v57 = vadd.f32 %v2516_v19, %v6241_v16  ;;  %v1960_v18 = vadd.f32 %v1959_v43, %v1449_v23  ;;  %v6261_v19 = vld [vmem:[#allocation5 + $0xb88] sm:$0xff]  ;;  %v2932_v25 = vadd.f32 %v2931_v21, %v8487_v30 }
 0x35b   :  { %8486 = vst [vmem:[#allocation66_spill] sm:$0xff] %v6261_v19  ;;  %v1453_v23 = vmul.f32 %v6261_v19, %v5929_v40  ;;  %v8491_v30 = vld [vmem:[#allocation53_spill] sm:$0xff]  ;;  %v6289_v40 = vld [vmem:[#allocation2 + $0xcf0] sm:$0xff] }
 0x35c   :  { %v2518_v10 = vadd.f32 %v2517_v57, %v6249_v20  ;;  %v1961_v27 = vadd.f32 %v1960_v18, %v1450_v46  ;;  %v6269_v57 = vld [vmem:[#allocation5 + $0xb90] sm:$0xff]  ;;  %v2933_v9 = vadd.f32 %v2932_v25, %v8489_v5 }
 0x35d   :  { %8488 = vst [vmem:[#allocation49_spill] sm:$0xff] %v6269_v57  ;;  %v1454_v46 = vmul.f32 %v6269_v57, %v5937_v44  ;;  %v8493_v5 = vld [vmem:[#allocation54_spill] sm:$0xff]  ;;  %v6297_v44 = vld [vmem:[#allocation2 + $0xcf8] sm:$0xff] }
 0x35e   :  { %v2519_v3 = vadd.f32 %v2518_v10, %v6257_v24  ;;  %v1962_v43 = vadd.f32 %v1961_v27, %v1451_v37  ;;  %v6277_v10 = vld [vmem:[#allocation5 + $0xb98] sm:$0xff]  ;;  %v2934_v54 = vadd.f32 %v2933_v9, %v8491_v30 }
 0x35f   :  { %8490 = vst [vmem:[#allocation50_spill] sm:$0xff] %v6277_v10  ;;  %v1455_v37 = vmul.f32 %v6277_v10, %v5945_v33  ;;  %v8495_v30 = vld [vmem:[#allocation55_spill] sm:$0xff]  ;;  %v6305_v33 = vld [vmem:[#allocation2 + $0xd00] sm:$0xff] }
 0x360   :  { %v2520_v48 = vadd.f32 %v2519_v3, %v6265_v28  ;;  %v1963_v18 = vadd.f32 %v1962_v43, %v1452_v29  ;;  %v6285_v3 = vld [vmem:[#allocation5 + $0xba0] sm:$0xff]  ;;  %v2935_v53 = vadd.f32 %v2934_v54, %v8493_v5 }
 0x361   :  { %8492 = vst [vmem:[#allocation69_spill] sm:$0xff] %v6285_v3  ;;  %v1456_v29 = vmul.f32 %v6285_v3, %v5953_v55  ;;  %v8497_v5 = vld [vmem:[#allocation56_spill] sm:$0xff]  ;;  %v6313_v55 = vld [vmem:[#allocation2 + $0xd08] sm:$0xff] }
 0x362   :  { %v2521_v21 = vadd.f32 %v2520_v48, %v6273_v32  ;;  %v1964_v27 = vadd.f32 %v1963_v18, %v1453_v23  ;;  %v6293_v48 = vld [vmem:[#allocation5 + $0xba8] sm:$0xff]  ;;  %v2936_v19 = vadd.f32 %v2935_v53, %v8495_v30 }
 0x363   :  { %8494 = vst [vmem:[#allocation51_spill] sm:$0xff] %v6293_v48  ;;  %v1457_v23 = vmul.f32 %v6293_v48, %v5961_v6  ;;  %v8499_v30 = vld [vmem:[#allocation57_spill] sm:$0xff]  ;;  %v6321_v6 = vld [vmem:[#allocation2 + $0xd10] sm:$0xff] }
 0x364   :  { %v2522_v25 = vadd.f32 %v2521_v21, %v6281_v36  ;;  %v1965_v43 = vadd.f32 %v1964_v27, %v1454_v46  ;;  %v6301_v21 = vld [vmem:[#allocation5 + $0xbb0] sm:$0xff]  ;;  %v2937_v57 = vadd.f32 %v2936_v19, %v8497_v5 }
 0x365   :  { %8496 = vst [vmem:[#allocation52_spill] sm:$0xff] %v6301_v21  ;;  %v1458_v46 = vmul.f32 %v6301_v21, %v5969_v38  ;;  %v8501_v5 = vld [vmem:[#allocation58_spill] sm:$0xff]  ;;  %v6329_v38 = vld [vmem:[#allocation2 + $0xd18] sm:$0xff] }
 0x366   :  { %v2523_v9 = vadd.f32 %v2522_v25, %v6289_v40  ;;  %v1966_v18 = vadd.f32 %v1965_v43, %v1455_v37  ;;  %v6309_v25 = vld [vmem:[#allocation5 + $0xbb8] sm:$0xff]  ;;  %v2938_v10 = vadd.f32 %v2937_v57, %v8499_v30 }
 0x367   :  { %8498 = vst [vmem:[#allocation53_spill] sm:$0xff] %v6309_v25  ;;  %v1459_v37 = vmul.f32 %v6309_v25, %v5977_v31  ;;  %v8503_v30 = vld [vmem:[#allocation59_spill] sm:$0xff]  ;;  %v6337_v31 = vld [vmem:[#allocation2 + $0xd20] sm:$0xff] }
 0x368   :  { %v2524_v54 = vadd.f32 %v2523_v9, %v6297_v44  ;;  %v1967_v27 = vadd.f32 %v1966_v18, %v1456_v29  ;;  %v6317_v9 = vld [vmem:[#allocation5 + $0xbc0] sm:$0xff]  ;;  %v2939_v3 = vadd.f32 %v2938_v10, %v8501_v5 }
 0x369   :  { %8500 = vst [vmem:[#allocation54_spill] sm:$0xff] %v6317_v9  ;;  %v1460_v29 = vmul.f32 %v6317_v9, %v5985_v7  ;;  %v8505_v5 = vld [vmem:[#allocation60_spill] sm:$0xff]  ;;  %v6345_v7 = vld [vmem:[#allocation2 + $0xd28] sm:$0xff] }
 0x36a   :  { %v2525_v53 = vadd.f32 %v2524_v54, %v6305_v33  ;;  %v1968_v43 = vadd.f32 %v1967_v27, %v1457_v23  ;;  %v6325_v54 = vld [vmem:[#allocation5 + $0xbc8] sm:$0xff]  ;;  %v2940_v48 = vadd.f32 %v2939_v3, %v8503_v30 }
 0x36b   :  { %8502 = vst [vmem:[#allocation55_spill] sm:$0xff] %v6325_v54  ;;  %v1461_v23 = vmul.f32 %v6325_v54, %v5993_v22  ;;  %v8507_v30 = vld [vmem:[#allocation61_spill] sm:$0xff]  ;;  %v6353_v22 = vld [vmem:[#allocation2 + $0xd30] sm:$0xff] }
 0x36c   :  { %v2526_v19 = vadd.f32 %v2525_v53, %v6313_v55  ;;  %v1969_v18 = vadd.f32 %v1968_v43, %v1458_v46  ;;  %v6333_v53 = vld [vmem:[#allocation5 + $0xbd0] sm:$0xff]  ;;  %v2941_v21 = vadd.f32 %v2940_v48, %v8505_v5 }
 0x36d   :  { %8504 = vst [vmem:[#allocation56_spill] sm:$0xff] %v6333_v53  ;;  %v1462_v46 = vmul.f32 %v6333_v53, %v6001_v56  ;;  %v8509_v5 = vld [vmem:[#allocation62_spill] sm:$0xff]  ;;  %v6361_v56 = vld [vmem:[#allocation2 + $0xd38] sm:$0xff] }
 0x36e   :  { %v2527_v57 = vadd.f32 %v2526_v19, %v6321_v6  ;;  %v1970_v27 = vadd.f32 %v1969_v18, %v1459_v37  ;;  %v6341_v19 = vld [vmem:[#allocation5 + $0xbd8] sm:$0xff]  ;;  %v2942_v25 = vadd.f32 %v2941_v21, %v8507_v30 }
 0x36f   :  { %8506 = vst [vmem:[#allocation57_spill] sm:$0xff] %v6341_v19  ;;  %v1463_v37 = vmul.f32 %v6341_v19, %v6009_v58  ;;  %v8511_v30 = vld [vmem:[#allocation63_spill] sm:$0xff]  ;;  %v6369_v58 = vld [vmem:[#allocation2 + $0xd40] sm:$0xff] }
 0x370   :  { %v2528_v10 = vadd.f32 %v2527_v57, %v6329_v38  ;;  %v1971_v43 = vadd.f32 %v1970_v27, %v1460_v29  ;;  %v6349_v57 = vld [vmem:[#allocation5 + $0xbe0] sm:$0xff]  ;;  %v2943_v9 = vadd.f32 %v2942_v25, %v8509_v5 }
 0x371   :  { %8508 = vst [vmem:[#allocation58_spill] sm:$0xff] %v6349_v57  ;;  %v1464_v29 = vmul.f32 %v6349_v57, %v6017_v2  ;;  %v8513_v5 = vld [vmem:[#allocation64_spill] sm:$0xff]  ;;  %v6377_v2 = vld [vmem:[#allocation2 + $0xd48] sm:$0xff] }
 0x372   :  { %v2529_v3 = vadd.f32 %v2528_v10, %v6337_v31  ;;  %v1972_v18 = vadd.f32 %v1971_v43, %v1461_v23  ;;  %v6357_v10 = vld [vmem:[#allocation5 + $0xbe8] sm:$0xff]  ;;  %v2944_v54 = vadd.f32 %v2943_v9, %v8511_v30  ;;  %v8515_v30 = vld [vmem:[#allocation23_spill] sm:$0xff] }
 0x373   :  { %8510 = vst [vmem:[#allocation59_spill] sm:$0xff] %v6357_v10  ;;  %v1465_v23 = vmul.f32 %v6357_v10, %v6025_v35  ;;  %v6385_v35 = vld [vmem:[#allocation2 + $0xd50] sm:$0xff] }
 0x374   :  { %v2530_v48 = vadd.f32 %v2529_v3, %v6345_v7  ;;  %v1973_v27 = vadd.f32 %v1972_v18, %v1462_v46  ;;  %v6365_v3 = vld [vmem:[#allocation5 + $0xbf0] sm:$0xff]  ;;  %v2945_v53 = vadd.f32 %v2944_v54, %v8513_v5  ;;  %v8517_v5 = vld [vmem:[#allocation65_spill] sm:$0xff] }
 0x375   :  { %8512 = vst [vmem:[#allocation60_spill] sm:$0xff] %v6365_v3  ;;  %v1466_v46 = vmul.f32 %v6365_v3, %v6033_v11  ;;  %v6393_v11 = vld [vmem:[#allocation2 + $0xd58] sm:$0xff] }
 0x376   :  { %v2531_v21 = vadd.f32 %v2530_v48, %v6353_v22  ;;  %v1974_v43 = vadd.f32 %v1973_v27, %v1463_v37  ;;  %v6373_v48 = vld [vmem:[#allocation5 + $0xbf8] sm:$0xff]  ;;  %v2946_v19 = vadd.f32 %v2945_v53, %v8515_v30 }
 0x377   :  { %8514 = vst [vmem:[#allocation61_spill] sm:$0xff] %v6373_v48  ;;  %v1467_v37 = vmul.f32 %v6373_v48, %v6041_v17  ;;  %v8519_v30 = vld [vmem:[#allocation67_spill] sm:$0xff]  ;;  %v6401_v17 = vld [vmem:[#allocation2 + $0xd60] sm:$0xff] }
 0x378   :  { %v2532_v25 = vadd.f32 %v2531_v21, %v6361_v56  ;;  %v1975_v18 = vadd.f32 %v1974_v43, %v1464_v29  ;;  %v6381_v21 = vld [vmem:[#allocation5 + $0xc00] sm:$0xff]  ;;  %v2947_v57 = vadd.f32 %v2946_v19, %v8517_v5  ;;  %v8521_v5 = vld [vmem:[#allocation43_spill] sm:$0xff] }
 0x379   :  { %8516 = vst [vmem:[#allocation62_spill] sm:$0xff] %v6381_v21  ;;  %v1468_v29 = vmul.f32 %v6381_v21, %v6049_v34  ;;  %v6409_v34 = vld [vmem:[#allocation2 + $0xd68] sm:$0xff] }
 0x37a   :  { %v2533_v9 = vadd.f32 %v2532_v25, %v6369_v58  ;;  %v1976_v27 = vadd.f32 %v1975_v18, %v1465_v23  ;;  %v6389_v25 = vld [vmem:[#allocation5 + $0xc08] sm:$0xff]  ;;  %v2948_v10 = vadd.f32 %v2947_v57, %v8519_v30  ;;  %v8523_v30 = vld [vmem:[#allocation68_spill] sm:$0xff] }
 0x37b   :  { %8518 = vst [vmem:[#allocation63_spill] sm:$0xff] %v6389_v25  ;;  %v1469_v23 = vmul.f32 %v6389_v25, %v6057_v62  ;;  %v6417_v62 = vld [vmem:[#allocation2 + $0xd70] sm:$0xff] }
 0x37c   :  { %v2534_v54 = vadd.f32 %v2533_v9, %v6377_v2  ;;  %v1977_v43 = vadd.f32 %v1976_v27, %v1466_v46  ;;  %v6397_v9 = vld [vmem:[#allocation5 + $0xc10] sm:$0xff]  ;;  %v2949_v3 = vadd.f32 %v2948_v10, %v8521_v5 }
 0x37d   :  { %8520 = vst [vmem:[#allocation64_spill] sm:$0xff] %v6397_v9  ;;  %v1470_v46 = vmul.f32 %v6397_v9, %v6065_v13  ;;  %v8525_v5 = vld [vmem:[#allocation14_spill] sm:$0xff]  ;;  %v6425_v13 = vld [vmem:[#allocation2 + $0xd78] sm:$0xff] }
 0x37e   :  { %v2535_v53 = vadd.f32 %v2534_v54, %v6385_v35  ;;  %v1978_v18 = vadd.f32 %v1977_v43, %v1467_v37  ;;  %v6405_v54 = vld [vmem:[#allocation5 + $0xc18] sm:$0xff]  ;;  %v2950_v48 = vadd.f32 %v2949_v3, %v8523_v30 }
 0x37f   :  { %8522 = vst [vmem:[#allocation23_spill] sm:$0xff] %v6405_v54  ;;  %v1471_v37 = vmul.f32 %v6405_v54, %v6073_v26  ;;  %v8527_v30 = vld [vmem:[#allocation15_spill] sm:$0xff]  ;;  %v6433_v26 = vld [vmem:[#allocation2 + $0xd80] sm:$0xff] }
 0x380   :  { %v2536_v19 = vadd.f32 %v2535_v53, %v6393_v11  ;;  %v1979_v27 = vadd.f32 %v1978_v18, %v1468_v29  ;;  %v6413_v53 = vld [vmem:[#allocation5 + $0xc20] sm:$0xff]  ;;  %v2951_v21 = vadd.f32 %v2950_v48, %v8525_v5 }
 0x381   :  { %8524 = vst [vmem:[#allocation65_spill] sm:$0xff] %v6413_v53  ;;  %v1472_v29 = vmul.f32 %v6413_v53, %v6081_v15  ;;  %v8529_v5 = vld [vmem:[#allocation16_spill] sm:$0xff]  ;;  %v6441_v15 = vld [vmem:[#allocation2 + $0xd88] sm:$0xff] }
 0x382   :  { %v2537_v57 = vadd.f32 %v2536_v19, %v6401_v17  ;;  %v1980_v43 = vadd.f32 %v1979_v27, %v1469_v23  ;;  %v6421_v19 = vld [vmem:[#allocation5 + $0xc28] sm:$0xff]  ;;  %v2952_v25 = vadd.f32 %v2951_v21, %v8527_v30  ;;  %v8531_v30 = vld [vmem:[#allocation70_spill] sm:$0xff] }
 0x383   :  { %8526 = vst [vmem:[#allocation67_spill] sm:$0xff] %v6421_v19  ;;  %v1473_v23 = vmul.f32 %v6421_v19, %v6089_v0  ;;  %v6449_v0 = vld [vmem:[#allocation2 + $0xd90] sm:$0xff] }
 0x384   :  { %v2538_v10 = vadd.f32 %v2537_v57, %v6409_v34  ;;  %v1981_v18 = vadd.f32 %v1980_v43, %v1470_v46  ;;  %v6429_v57 = vld [vmem:[#allocation5 + $0xc30] sm:$0xff]  ;;  %v2953_v9 = vadd.f32 %v2952_v25, %v8529_v5  ;;  %v8533_v5 = vld [vmem:[#allocation71_spill] sm:$0xff] }
 0x385   :  { %8528 = vst [vmem:[#allocation43_spill] sm:$0xff] %v6429_v57  ;;  %v1474_v46 = vmul.f32 %v6429_v57, %v6097_v50  ;;  %v6457_v50 = vld [vmem:[#allocation2 + $0xd98] sm:$0xff] }
 0x386   :  { %v2539_v3 = vadd.f32 %v2538_v10, %v6417_v62  ;;  %v1982_v27 = vadd.f32 %v1981_v18, %v1471_v37  ;;  %v6437_v10 = vld [vmem:[#allocation5 + $0xc38] sm:$0xff]  ;;  %v2954_v54 = vadd.f32 %v2953_v9, %v8531_v30  ;;  %v8535_v30 = vld [vmem:[#allocation72_spill] sm:$0xff] }
 0x387   :  { %8530 = vst [vmem:[#allocation68_spill] sm:$0xff] %v6437_v10  ;;  %v1475_v37 = vmul.f32 %v6437_v10, %v6105_v52  ;;  %v6465_v52 = vld [vmem:[#allocation2 + $0xda0] sm:$0xff] }
 0x388   :  { %v2540_v48 = vadd.f32 %v2539_v3, %v6425_v13  ;;  %v1983_v43 = vadd.f32 %v1982_v27, %v1472_v29  ;;  %v6445_v3 = vld [vmem:[#allocation5 + $0xc40] sm:$0xff]  ;;  %v2955_v53 = vadd.f32 %v2954_v54, %v8533_v5  ;;  %v8537_v5 = vld [vmem:[#allocation73_spill] sm:$0xff] }
 0x389   :  { %8532 = vst [vmem:[#allocation14_spill] sm:$0xff] %v6445_v3  ;;  %v1476_v29 = vmul.f32 %v6445_v3, %v6113_v39  ;;  %v6473_v39 = vld [vmem:[#allocation2 + $0xda8] sm:$0xff] }
 0x38a   :  { %v2541_v21 = vadd.f32 %v2540_v48, %v6433_v26  ;;  %v1984_v18 = vadd.f32 %v1983_v43, %v1473_v23  ;;  %v6453_v48 = vld [vmem:[#allocation5 + $0xc48] sm:$0xff]  ;;  %v2956_v19 = vadd.f32 %v2955_v53, %v8535_v30  ;;  %v8539_v30 = vld [vmem:[#allocation74_spill] sm:$0xff] }
 0x38b   :  { %8534 = vst [vmem:[#allocation15_spill] sm:$0xff] %v6453_v48  ;;  %v1477_v23 = vmul.f32 %v6453_v48, %v6121_v1  ;;  %v6481_v1 = vld [vmem:[#allocation2 + $0xdb0] sm:$0xff] }
 0x38c   :  { %v2542_v25 = vadd.f32 %v2541_v21, %v6441_v15  ;;  %v1985_v27 = vadd.f32 %v1984_v18, %v1474_v46  ;;  %v6461_v21 = vld [vmem:[#allocation5 + $0xc50] sm:$0xff]  ;;  %v2957_v57 = vadd.f32 %v2956_v19, %v8537_v5  ;;  %v8541_v5 = vld [vmem:[#allocation17_spill] sm:$0xff] }
 0x38d   :  { %8536 = vst [vmem:[#allocation16_spill] sm:$0xff] %v6461_v21  ;;  %v1478_v46 = vmul.f32 %v6461_v21, %v6129_v42  ;;  %v6489_v42 = vld [vmem:[#allocation2 + $0xdb8] sm:$0xff] }
 0x38e   :  { %v2543_v9 = vadd.f32 %v2542_v25, %v6449_v0  ;;  %v1986_v43 = vadd.f32 %v1985_v27, %v1475_v37  ;;  %v6469_v25 = vld [vmem:[#allocation5 + $0xc58] sm:$0xff]  ;;  %v2958_v10 = vadd.f32 %v2957_v57, %v8539_v30  ;;  %v8543_v30 = vld [vmem:[#allocation18_spill] sm:$0xff] }
 0x38f   :  { %8538 = vst [vmem:[#allocation70_spill] sm:$0xff] %v6469_v25  ;;  %v1479_v37 = vmul.f32 %v6469_v25, %v6137_v45  ;;  %v6497_v45 = vld [vmem:[#allocation2 + $0xdc0] sm:$0xff] }
 0x390   :  { %v2544_v54 = vadd.f32 %v2543_v9, %v6457_v50  ;;  %v1987_v18 = vadd.f32 %v1986_v43, %v1476_v29  ;;  %v6477_v9 = vld [vmem:[#allocation5 + $0xc60] sm:$0xff]  ;;  %v2959_v3 = vadd.f32 %v2958_v10, %v8541_v5  ;;  %v8545_v5 = vld [vmem:[#allocation19_spill] sm:$0xff] }
 0x391   :  { %8540 = vst [vmem:[#allocation71_spill] sm:$0xff] %v6477_v9  ;;  %v1480_v29 = vmul.f32 %v6477_v9, %v6145_v47  ;;  %v6505_v47 = vld [vmem:[#allocation2 + $0xdc8] sm:$0xff] }
 0x392   :  { %v2545_v53 = vadd.f32 %v2544_v54, %v6465_v52  ;;  %v1988_v27 = vadd.f32 %v1987_v18, %v1477_v23  ;;  %v6485_v54 = vld [vmem:[#allocation5 + $0xc68] sm:$0xff]  ;;  %v2960_v48 = vadd.f32 %v2959_v3, %v8543_v30  ;;  %v8547_v30 = vld [vmem:[#allocation20_spill] sm:$0xff] }
 0x393   :  { %8542 = vst [vmem:[#allocation72_spill] sm:$0xff] %v6485_v54  ;;  %v1481_v23 = vmul.f32 %v6485_v54, %v6153_v49  ;;  %v6513_v49 = vld [vmem:[#allocation2 + $0xdd0] sm:$0xff] }
 0x394   :  { %v2546_v19 = vadd.f32 %v2545_v53, %v6473_v39  ;;  %v1989_v43 = vadd.f32 %v1988_v27, %v1478_v46  ;;  %v6493_v53 = vld [vmem:[#allocation5 + $0xc70] sm:$0xff]  ;;  %v2961_v21 = vadd.f32 %v2960_v48, %v8545_v5  ;;  %v8549_v5 = vld [vmem:[#allocation21_spill] sm:$0xff] }
 0x395   :  { %8544 = vst [vmem:[#allocation73_spill] sm:$0xff] %v6493_v53  ;;  %v1482_v46 = vmul.f32 %v6493_v53, %v6161_v51  ;;  %v6521_v51 = vld [vmem:[#allocation2 + $0xdd8] sm:$0xff] }
 0x396   :  { %v2547_v57 = vadd.f32 %v2546_v19, %v6481_v1  ;;  %v1990_v18 = vadd.f32 %v1989_v43, %v1479_v37  ;;  %v6501_v19 = vld [vmem:[#allocation5 + $0xc78] sm:$0xff]  ;;  %v2962_v25 = vadd.f32 %v2961_v21, %v8547_v30  ;;  %v8551_v30 = vld [vmem:[#allocation22_spill] sm:$0xff] }
 0x397   :  { %8546 = vst [vmem:[#allocation74_spill] sm:$0xff] %v6501_v19  ;;  %v1483_v37 = vmul.f32 %v6501_v19, %v6169_v14  ;;  %v6529_v14 = vld [vmem:[#allocation2 + $0xde0] sm:$0xff] }
 0x398   :  { %v2548_v10 = vadd.f32 %v2547_v57, %v6489_v42  ;;  %v1991_v27 = vadd.f32 %v1990_v18, %v1480_v29  ;;  %v6509_v57 = vld [vmem:[#allocation5 + $0xc80] sm:$0xff]  ;;  %v2963_v9 = vadd.f32 %v2962_v25, %v8549_v5  ;;  %v8553_v5 = vld [vmem:[#allocation41_spill] sm:$0xff] }
 0x399   :  { %8548 = vst [vmem:[#allocation17_spill] sm:$0xff] %v6509_v57  ;;  %v1484_v29 = vmul.f32 %v6509_v57, %v6177_v41  ;;  %v6537_v41 = vld [vmem:[#allocation2 + $0xde8] sm:$0xff] }
 0x39a   :  { %v2549_v3 = vadd.f32 %v2548_v10, %v6497_v45  ;;  %v1992_v43 = vadd.f32 %v1991_v27, %v1481_v23  ;;  %v6517_v10 = vld [vmem:[#allocation5 + $0xc88] sm:$0xff]  ;;  %v2964_v54 = vadd.f32 %v2963_v9, %v8551_v30  ;;  %v8555_v30 = vld [vmem:[#allocation24_spill] sm:$0xff] }
 0x39b   :  { %8550 = vst [vmem:[#allocation18_spill] sm:$0xff] %v6517_v10  ;;  %v1485_v23 = vmul.f32 %v6517_v10, %v6185_v60  ;;  %v6545_v60 = vld [vmem:[#allocation2 + $0xdf0] sm:$0xff] }
 0x39c   :  { %v2550_v48 = vadd.f32 %v2549_v3, %v6505_v47  ;;  %v1993_v18 = vadd.f32 %v1992_v43, %v1482_v46  ;;  %v6525_v3 = vld [vmem:[#allocation5 + $0xc90] sm:$0xff]  ;;  %v2965_v53 = vadd.f32 %v2964_v54, %v8553_v5  ;;  %v8557_v5 = vld [vmem:[#allocation25_spill] sm:$0xff] }
 0x39d   :  { %8552 = vst [vmem:[#allocation19_spill] sm:$0xff] %v6525_v3  ;;  %v1486_v46 = vmul.f32 %v6525_v3, %v6193_v59  ;;  %v6553_v59 = vld [vmem:[#allocation2 + $0xdf8] sm:$0xff] }
 0x39e   :  { %v2551_v21 = vadd.f32 %v2550_v48, %v6513_v49  ;;  %v1994_v27 = vadd.f32 %v1993_v18, %v1483_v37  ;;  %v6533_v48 = vld [vmem:[#allocation5 + $0xc98] sm:$0xff]  ;;  %v2966_v19 = vadd.f32 %v2965_v53, %v8555_v30  ;;  %v8559_v30 = vld [vmem:[#allocation45_spill] sm:$0xff] }
 0x39f   :  { %8554 = vst [vmem:[#allocation20_spill] sm:$0xff] %v6533_v48  ;;  %v1487_v37 = vmul.f32 %v6533_v48, %v6201_v61  ;;  %v6561_v61 = vld [vmem:[#allocation2 + $0xe00] sm:$0xff] }
 0x3a0   :  { %v2552_v25 = vadd.f32 %v2551_v21, %v6521_v51  ;;  %v1995_v43 = vadd.f32 %v1994_v27, %v1484_v29  ;;  %v6541_v21 = vld [vmem:[#allocation5 + $0xca0] sm:$0xff]  ;;  %v2967_v57 = vadd.f32 %v2966_v19, %v8557_v5  ;;  %v8561_v5 = vld [vmem:[#allocation46_spill] sm:$0xff] }
 0x3a1   :  { %8556 = vst [vmem:[#allocation21_spill] sm:$0xff] %v6541_v21  ;;  %v1488_v29 = vmul.f32 %v6541_v21, %v6209_v63  ;;  %v6569_v63 = vld [vmem:[#allocation2 + $0xe08] sm:$0xff] }
 0x3a2   :  { %v2553_v9 = vadd.f32 %v2552_v25, %v6529_v14  ;;  %v1996_v18 = vadd.f32 %v1995_v43, %v1485_v23  ;;  %v6549_v25 = vld [vmem:[#allocation5 + $0xca8] sm:$0xff]  ;;  %v2968_v10 = vadd.f32 %v2967_v57, %v8559_v30  ;;  %v8563_v30 = vld [vmem:[#allocation26_spill] sm:$0xff] }
 0x3a3   :  { %8558 = vst [vmem:[#allocation22_spill] sm:$0xff] %v6549_v25  ;;  %v1489_v23 = vmul.f32 %v6549_v25, %v6217_v4  ;;  %v6577_v4 = vld [vmem:[#allocation2 + $0xe10] sm:$0xff] }
 0x3a4   :  { %v2554_v54 = vadd.f32 %v2553_v9, %v6537_v41  ;;  %v1997_v27 = vadd.f32 %v1996_v18, %v1486_v46  ;;  %v6557_v9 = vld [vmem:[#allocation5 + $0xcb0] sm:$0xff]  ;;  %v2969_v3 = vadd.f32 %v2968_v10, %v8561_v5  ;;  %v8565_v5 = vld [vmem:[#allocation27_spill] sm:$0xff] }
 0x3a5   :  { %8560 = vst [vmem:[#allocation41_spill] sm:$0xff] %v6557_v9  ;;  %v1490_v46 = vmul.f32 %v6557_v9, %v6225_v8  ;;  %v6585_v8 = vld [vmem:[#allocation2 + $0xe18] sm:$0xff] }
 0x3a6   :  { %v2555_v53 = vadd.f32 %v2554_v54, %v6545_v60  ;;  %v1998_v43 = vadd.f32 %v1997_v27, %v1487_v37  ;;  %v6565_v54 = vld [vmem:[#allocation5 + $0xcb8] sm:$0xff]  ;;  %v2970_v48 = vadd.f32 %v2969_v3, %v8563_v30  ;;  %v8567_v30 = vld [vmem:[#allocation13_spill] sm:$0xff] }
 0x3a7   :  { %8562 = vst [vmem:[#allocation24_spill] sm:$0xff] %v6565_v54  ;;  %v1491_v37 = vmul.f32 %v6565_v54, %v6233_v12  ;;  %v6593_v12 = vld [vmem:[#allocation2 + $0xe20] sm:$0xff] }
 0x3a8   :  { %v2556_v19 = vadd.f32 %v2555_v53, %v6553_v59  ;;  %v1999_v18 = vadd.f32 %v1998_v43, %v1488_v29  ;;  %v6573_v53 = vld [vmem:[#allocation5 + $0xcc0] sm:$0xff]  ;;  %v2971_v21 = vadd.f32 %v2970_v48, %v8565_v5 }
 0x3a9   :  { %8564 = vst [vmem:[#allocation25_spill] sm:$0xff] %v6573_v53  ;;  %v1492_v29 = vmul.f32 %v6573_v53, %v6241_v16  ;;  %v8569_v5 = vld [vmem:[#allocation28_spill] sm:$0xff]  ;;  %v6601_v16 = vld [vmem:[#allocation2 + $0xe28] sm:$0xff] }
 0x3aa   :  { %v2557_v57 = vadd.f32 %v2556_v19, %v6561_v61  ;;  %v2000_v27 = vadd.f32 %v1999_v18, %v1489_v23  ;;  %v6581_v19 = vld [vmem:[#allocation5 + $0xcc8] sm:$0xff]  ;;  %v2972_v25 = vadd.f32 %v2971_v21, %v8567_v30 }
 0x3ab   :  { %8566 = vst [vmem:[#allocation45_spill] sm:$0xff] %v6581_v19  ;;  %v1493_v23 = vmul.f32 %v6581_v19, %v6249_v20  ;;  %v8571_v30 = vld [vmem:[#allocation29_spill] sm:$0xff]  ;;  %v6609_v20 = vld [vmem:[#allocation2 + $0xe30] sm:$0xff] }
 0x3ac   :  { %v2558_v10 = vadd.f32 %v2557_v57, %v6569_v63  ;;  %v2001_v43 = vadd.f32 %v2000_v27, %v1490_v46  ;;  %v6589_v57 = vld [vmem:[#allocation5 + $0xcd0] sm:$0xff]  ;;  %v2973_v9 = vadd.f32 %v2972_v25, %v8569_v5 }
 0x3ad   :  { %8568 = vst [vmem:[#allocation46_spill] sm:$0xff] %v6589_v57  ;;  %v1494_v46 = vmul.f32 %v6589_v57, %v6257_v24  ;;  %v8573_v5 = vld [vmem:[#allocation30_spill] sm:$0xff]  ;;  %v6617_v24 = vld [vmem:[#allocation2 + $0xe38] sm:$0xff] }
 0x3ae   :  { %v2559_v3 = vadd.f32 %v2558_v10, %v6577_v4  ;;  %v2002_v18 = vadd.f32 %v2001_v43, %v1491_v37  ;;  %v6597_v10 = vld [vmem:[#allocation5 + $0xcd8] sm:$0xff]  ;;  %v2974_v54 = vadd.f32 %v2973_v9, %v8571_v30 }
 0x3af   :  { %8570 = vst [vmem:[#allocation26_spill] sm:$0xff] %v6597_v10  ;;  %v1495_v37 = vmul.f32 %v6597_v10, %v6265_v28  ;;  %v8575_v30 = vld [vmem:[#allocation31_spill] sm:$0xff]  ;;  %v6625_v28 = vld [vmem:[#allocation2 + $0xe40] sm:$0xff] }
 0x3b0   :  { %v2560_v48 = vadd.f32 %v2559_v3, %v6585_v8  ;;  %v2003_v27 = vadd.f32 %v2002_v18, %v1492_v29  ;;  %v6605_v3 = vld [vmem:[#allocation5 + $0xce0] sm:$0xff]  ;;  %v2975_v53 = vadd.f32 %v2974_v54, %v8573_v5 }
 0x3b1   :  { %8572 = vst [vmem:[#allocation27_spill] sm:$0xff] %v6605_v3  ;;  %v1496_v29 = vmul.f32 %v6605_v3, %v6273_v32  ;;  %v8577_v5 = vld [vmem:[#allocation32_spill] sm:$0xff]  ;;  %v6633_v32 = vld [vmem:[#allocation2 + $0xe48] sm:$0xff] }
 0x3b2   :  { %v2561_v21 = vadd.f32 %v2560_v48, %v6593_v12  ;;  %v2004_v43 = vadd.f32 %v2003_v27, %v1493_v23  ;;  %v6613_v48 = vld [vmem:[#allocation5 + $0xce8] sm:$0xff]  ;;  %v2976_v19 = vadd.f32 %v2975_v53, %v8575_v30 }
 0x3b3   :  { %8574 = vst [vmem:[#allocation13_spill] sm:$0xff] %v6613_v48  ;;  %v1497_v23 = vmul.f32 %v6613_v48, %v6281_v36  ;;  %v8579_v30 = vld [vmem:[#allocation33_spill] sm:$0xff]  ;;  %v6641_v36 = vld [vmem:[#allocation2 + $0xe50] sm:$0xff] }
 0x3b4   :  { %v2562_v25 = vadd.f32 %v2561_v21, %v6601_v16  ;;  %v2005_v18 = vadd.f32 %v2004_v43, %v1494_v46  ;;  %v6621_v21 = vld [vmem:[#allocation5 + $0xcf0] sm:$0xff]  ;;  %v2977_v57 = vadd.f32 %v2976_v19, %v8577_v5 }
 0x3b5   :  { %8576 = vst [vmem:[#allocation28_spill] sm:$0xff] %v6621_v21  ;;  %v1498_v46 = vmul.f32 %v6621_v21, %v6289_v40  ;;  %v8581_v5 = vld [vmem:[#allocation34_spill] sm:$0xff]  ;;  %v6649_v40 = vld [vmem:[#allocation2 + $0xe58] sm:$0xff] }
 0x3b6   :  { %v2563_v9 = vadd.f32 %v2562_v25, %v6609_v20  ;;  %v2006_v27 = vadd.f32 %v2005_v18, %v1495_v37  ;;  %v6629_v25 = vld [vmem:[#allocation5 + $0xcf8] sm:$0xff]  ;;  %v2978_v10 = vadd.f32 %v2977_v57, %v8579_v30 }
 0x3b7   :  { %8578 = vst [vmem:[#allocation29_spill] sm:$0xff] %v6629_v25  ;;  %v1499_v37 = vmul.f32 %v6629_v25, %v6297_v44  ;;  %v8583_v30 = vld [vmem:[#allocation35_spill] sm:$0xff]  ;;  %v6657_v44 = vld [vmem:[#allocation2 + $0xe60] sm:$0xff] }
 0x3b8   :  { %v2564_v54 = vadd.f32 %v2563_v9, %v6617_v24  ;;  %v2007_v43 = vadd.f32 %v2006_v27, %v1496_v29  ;;  %v6637_v9 = vld [vmem:[#allocation5 + $0xd00] sm:$0xff]  ;;  %v2979_v3 = vadd.f32 %v2978_v10, %v8581_v5 }
 0x3b9   :  { %8580 = vst [vmem:[#allocation30_spill] sm:$0xff] %v6637_v9  ;;  %v1500_v29 = vmul.f32 %v6637_v9, %v6305_v33  ;;  %v8585_v5 = vld [vmem:[#allocation36_spill] sm:$0xff]  ;;  %v6665_v33 = vld [vmem:[#allocation2 + $0xe68] sm:$0xff] }
 0x3ba   :  { %v2565_v53 = vadd.f32 %v2564_v54, %v6625_v28  ;;  %v2008_v18 = vadd.f32 %v2007_v43, %v1497_v23  ;;  %v6645_v54 = vld [vmem:[#allocation5 + $0xd08] sm:$0xff]  ;;  %v2980_v48 = vadd.f32 %v2979_v3, %v8583_v30 }
 0x3bb   :  { %8582 = vst [vmem:[#allocation31_spill] sm:$0xff] %v6645_v54  ;;  %v1501_v23 = vmul.f32 %v6645_v54, %v6313_v55  ;;  %v8587_v30 = vld [vmem:[#allocation37_spill] sm:$0xff]  ;;  %v6673_v55 = vld [vmem:[#allocation2 + $0xe70] sm:$0xff] }
 0x3bc   :  { %v2566_v19 = vadd.f32 %v2565_v53, %v6633_v32  ;;  %v2009_v27 = vadd.f32 %v2008_v18, %v1498_v46  ;;  %v6653_v53 = vld [vmem:[#allocation5 + $0xd10] sm:$0xff]  ;;  %v2981_v21 = vadd.f32 %v2980_v48, %v8585_v5 }
 0x3bd   :  { %8584 = vst [vmem:[#allocation32_spill] sm:$0xff] %v6653_v53  ;;  %v1502_v46 = vmul.f32 %v6653_v53, %v6321_v6  ;;  %v8589_v5 = vld [vmem:[#allocation38_spill] sm:$0xff]  ;;  %v6681_v6 = vld [vmem:[#allocation2 + $0xe78] sm:$0xff] }
 0x3be   :  { %v2567_v57 = vadd.f32 %v2566_v19, %v6641_v36  ;;  %v2010_v43 = vadd.f32 %v2009_v27, %v1499_v37  ;;  %v6661_v19 = vld [vmem:[#allocation5 + $0xd18] sm:$0xff]  ;;  %v2982_v25 = vadd.f32 %v2981_v21, %v8587_v30 }
 0x3bf   :  { %8586 = vst [vmem:[#allocation33_spill] sm:$0xff] %v6661_v19  ;;  %v1503_v37 = vmul.f32 %v6661_v19, %v6329_v38  ;;  %v8591_v30 = vld [vmem:[#allocation39_spill] sm:$0xff]  ;;  %v6689_v38 = vld [vmem:[#allocation2 + $0xe80] sm:$0xff] }
 0x3c0   :  { %v2568_v10 = vadd.f32 %v2567_v57, %v6649_v40  ;;  %v2011_v18 = vadd.f32 %v2010_v43, %v1500_v29  ;;  %v6669_v57 = vld [vmem:[#allocation5 + $0xd20] sm:$0xff]  ;;  %v2983_v9 = vadd.f32 %v2982_v25, %v8589_v5 }
 0x3c1   :  { %8588 = vst [vmem:[#allocation34_spill] sm:$0xff] %v6669_v57  ;;  %v1504_v29 = vmul.f32 %v6669_v57, %v6337_v31  ;;  %v8593_v5 = vld [vmem:[#allocation40_spill] sm:$0xff]  ;;  %v6697_v31 = vld [vmem:[#allocation2 + $0xe88] sm:$0xff] }
 0x3c2   :  { %v2569_v3 = vadd.f32 %v2568_v10, %v6657_v44  ;;  %v2012_v27 = vadd.f32 %v2011_v18, %v1501_v23  ;;  %v6677_v10 = vld [vmem:[#allocation5 + $0xd28] sm:$0xff]  ;;  %v2984_v54 = vadd.f32 %v2983_v9, %v8591_v30  ;;  %v8595_v30 = vld [vmem:[#allocation42_spill] sm:$0xff] }
 0x3c3   :  { %8590 = vst [vmem:[#allocation35_spill] sm:$0xff] %v6677_v10  ;;  %v1505_v23 = vmul.f32 %v6677_v10, %v6345_v7  ;;  %v6705_v7 = vld [vmem:[#allocation2 + $0xe90] sm:$0xff] }
 0x3c4   :  { %v2570_v48 = vadd.f32 %v2569_v3, %v6665_v33  ;;  %v2013_v43 = vadd.f32 %v2012_v27, %v1502_v46  ;;  %v6685_v3 = vld [vmem:[#allocation5 + $0xd30] sm:$0xff]  ;;  %v2985_v53 = vadd.f32 %v2984_v54, %v8593_v5  ;;  %v8597_v5 = vld [vmem:[#allocation44_spill] sm:$0xff] }
 0x3c5   :  { %8592 = vst [vmem:[#allocation36_spill] sm:$0xff] %v6685_v3  ;;  %v1506_v46 = vmul.f32 %v6685_v3, %v6353_v22  ;;  %v6713_v22 = vld [vmem:[#allocation2 + $0xe98] sm:$0xff] }
 0x3c6   :  { %v2571_v21 = vadd.f32 %v2570_v48, %v6673_v55  ;;  %v2014_v18 = vadd.f32 %v2013_v43, %v1503_v37  ;;  %v6693_v48 = vld [vmem:[#allocation5 + $0xd38] sm:$0xff]  ;;  %v2986_v19 = vadd.f32 %v2985_v53, %v8595_v30 }
 0x3c7   :  { %8594 = vst [vmem:[#allocation37_spill] sm:$0xff] %v6693_v48  ;;  %v1507_v37 = vmul.f32 %v6693_v48, %v6361_v56  ;;  %v8599_v30 = vld [vmem:[#allocation11_spill] sm:$0xff]  ;;  %v6721_v56 = vld [vmem:[#allocation2 + $0xea0] sm:$0xff] }
 0x3c8   :  { %v2572_v25 = vadd.f32 %v2571_v21, %v6681_v6  ;;  %v2015_v27 = vadd.f32 %v2014_v18, %v1504_v29  ;;  %v6701_v21 = vld [vmem:[#allocation5 + $0xd40] sm:$0xff]  ;;  %v2987_v57 = vadd.f32 %v2986_v19, %v8597_v5 }
 0x3c9   :  { %8596 = vst [vmem:[#allocation38_spill] sm:$0xff] %v6701_v21  ;;  %v1508_v29 = vmul.f32 %v6701_v21, %v6369_v58  ;;  %v8601_v5 = vld [vmem:[#allocation12_spill] sm:$0xff]  ;;  %v6729_v58 = vld [vmem:[#allocation2 + $0xea8] sm:$0xff] }
 0x3ca   :  { %v2573_v9 = vadd.f32 %v2572_v25, %v6689_v38  ;;  %v2016_v43 = vadd.f32 %v2015_v27, %v1505_v23  ;;  %v6709_v25 = vld [vmem:[#allocation5 + $0xd48] sm:$0xff]  ;;  %v2988_v10 = vadd.f32 %v2987_v57, %v8599_v30  ;;  %v8603_v30 = vld [vmem:[#allocation47_spill] sm:$0xff] }
 0x3cb   :  { %8598 = vst [vmem:[#allocation39_spill] sm:$0xff] %v6709_v25  ;;  %v1509_v23 = vmul.f32 %v6709_v25, %v6377_v2  ;;  %v6737_v2 = vld [vmem:[#allocation2 + $0xeb0] sm:$0xff] }
 0x3cc   :  { %v2574_v54 = vadd.f32 %v2573_v9, %v6697_v31  ;;  %v2017_v18 = vadd.f32 %v2016_v43, %v1506_v46  ;;  %v6717_v9 = vld [vmem:[#allocation5 + $0xd50] sm:$0xff]  ;;  %v2989_v3 = vadd.f32 %v2988_v10, %v8601_v5  ;;  %v8605_v5 = vld [vmem:[#allocation48_spill] sm:$0xff] }
 0x3cd   :  { %8600 = vst [vmem:[#allocation40_spill] sm:$0xff] %v6717_v9  ;;  %v1510_v46 = vmul.f32 %v6717_v9, %v6385_v35  ;;  %v6745_v35 = vld [vmem:[#allocation2 + $0xeb8] sm:$0xff] }
 0x3ce   :  { %v2575_v53 = vadd.f32 %v2574_v54, %v6705_v7  ;;  %v2018_v27 = vadd.f32 %v2017_v18, %v1507_v37  ;;  %v6725_v54 = vld [vmem:[#allocation5 + $0xd58] sm:$0xff]  ;;  %v2990_v48 = vadd.f32 %v2989_v3, %v8603_v30  ;;  %v8607_v30 = vld [vmem:[#allocation66_spill] sm:$0xff] }
 0x3cf   :  { %8602 = vst [vmem:[#allocation42_spill] sm:$0xff] %v6725_v54  ;;  %v1511_v37 = vmul.f32 %v6725_v54, %v6393_v11  ;;  %v6753_v11 = vld [vmem:[#allocation2 + $0xec0] sm:$0xff] }
 0x3d0   :  { %v2576_v19 = vadd.f32 %v2575_v53, %v6713_v22  ;;  %v2019_v43 = vadd.f32 %v2018_v27, %v1508_v29  ;;  %v6733_v53 = vld [vmem:[#allocation5 + $0xd60] sm:$0xff]  ;;  %v2991_v21 = vadd.f32 %v2990_v48, %v8605_v5  ;;  %v8609_v5 = vld [vmem:[#allocation49_spill] sm:$0xff] }
 0x3d1   :  { %8604 = vst [vmem:[#allocation44_spill] sm:$0xff] %v6733_v53  ;;  %v1512_v29 = vmul.f32 %v6733_v53, %v6401_v17  ;;  %v6761_v17 = vld [vmem:[#allocation2 + $0xec8] sm:$0xff] }
 0x3d2   :  { %v2577_v57 = vadd.f32 %v2576_v19, %v6721_v56  ;;  %v2020_v18 = vadd.f32 %v2019_v43, %v1509_v23  ;;  %v6741_v19 = vld [vmem:[#allocation5 + $0xd68] sm:$0xff]  ;;  %v2992_v25 = vadd.f32 %v2991_v21, %v8607_v30  ;;  %v8611_v30 = vld [vmem:[#allocation50_spill] sm:$0xff] }
 0x3d3   :  { %8606 = vst [vmem:[#allocation11_spill] sm:$0xff] %v6741_v19  ;;  %v1513_v23 = vmul.f32 %v6741_v19, %v6409_v34  ;;  %v6769_v34 = vld [vmem:[#allocation2 + $0xed0] sm:$0xff] }
 0x3d4   :  { %v2578_v10 = vadd.f32 %v2577_v57, %v6729_v58  ;;  %v2021_v27 = vadd.f32 %v2020_v18, %v1510_v46  ;;  %v6749_v57 = vld [vmem:[#allocation5 + $0xd70] sm:$0xff]  ;;  %v2993_v9 = vadd.f32 %v2992_v25, %v8609_v5  ;;  %v8613_v5 = vld [vmem:[#allocation69_spill] sm:$0xff] }
 0x3d5   :  { %8608 = vst [vmem:[#allocation12_spill] sm:$0xff] %v6749_v57  ;;  %v1514_v46 = vmul.f32 %v6749_v57, %v6417_v62  ;;  %v6777_v62 = vld [vmem:[#allocation2 + $0xed8] sm:$0xff] }
 0x3d6   :  { %v2579_v3 = vadd.f32 %v2578_v10, %v6737_v2  ;;  %v2022_v43 = vadd.f32 %v2021_v27, %v1511_v37  ;;  %v6757_v10 = vld [vmem:[#allocation5 + $0xd78] sm:$0xff]  ;;  %v2994_v54 = vadd.f32 %v2993_v9, %v8611_v30 }
 0x3d7   :  { %8610 = vst [vmem:[#allocation47_spill] sm:$0xff] %v6757_v10  ;;  %v1515_v37 = vmul.f32 %v6757_v10, %v6425_v13  ;;  %v8615_v30 = vld [vmem:[#allocation51_spill] sm:$0xff]  ;;  %v6785_v13 = vld [vmem:[#allocation2 + $0xee0] sm:$0xff] }
 0x3d8   :  { %v2580_v48 = vadd.f32 %v2579_v3, %v6745_v35  ;;  %v2023_v18 = vadd.f32 %v2022_v43, %v1512_v29  ;;  %v6765_v3 = vld [vmem:[#allocation5 + $0xd80] sm:$0xff]  ;;  %v2995_v53 = vadd.f32 %v2994_v54, %v8613_v5 }
 0x3d9   :  { %8612 = vst [vmem:[#allocation48_spill] sm:$0xff] %v6765_v3  ;;  %v1516_v29 = vmul.f32 %v6765_v3, %v6433_v26  ;;  %v8617_v5 = vld [vmem:[#allocation52_spill] sm:$0xff]  ;;  %v6793_v26 = vld [vmem:[#allocation2 + $0xee8] sm:$0xff] }
 0x3da   :  { %v2581_v21 = vadd.f32 %v2580_v48, %v6753_v11  ;;  %v2024_v27 = vadd.f32 %v2023_v18, %v1513_v23  ;;  %v6773_v48 = vld [vmem:[#allocation5 + $0xd88] sm:$0xff]  ;;  %v2996_v19 = vadd.f32 %v2995_v53, %v8615_v30 }
 0x3db   :  { %8614 = vst [vmem:[#allocation66_spill] sm:$0xff] %v6773_v48  ;;  %v1517_v23 = vmul.f32 %v6773_v48, %v6441_v15  ;;  %v8619_v30 = vld [vmem:[#allocation53_spill] sm:$0xff]  ;;  %v6801_v15 = vld [vmem:[#allocation2 + $0xef0] sm:$0xff] }
 0x3dc   :  { %v2582_v25 = vadd.f32 %v2581_v21, %v6761_v17  ;;  %v2025_v43 = vadd.f32 %v2024_v27, %v1514_v46  ;;  %v6781_v21 = vld [vmem:[#allocation5 + $0xd90] sm:$0xff]  ;;  %v2997_v57 = vadd.f32 %v2996_v19, %v8617_v5 }
 0x3dd   :  { %8616 = vst [vmem:[#allocation49_spill] sm:$0xff] %v6781_v21  ;;  %v1518_v46 = vmul.f32 %v6781_v21, %v6449_v0  ;;  %v8621_v5 = vld [vmem:[#allocation54_spill] sm:$0xff]  ;;  %v6809_v0 = vld [vmem:[#allocation2 + $0xef8] sm:$0xff] }
 0x3de   :  { %v2583_v9 = vadd.f32 %v2582_v25, %v6769_v34  ;;  %v2026_v18 = vadd.f32 %v2025_v43, %v1515_v37  ;;  %v6789_v25 = vld [vmem:[#allocation5 + $0xd98] sm:$0xff]  ;;  %v2998_v10 = vadd.f32 %v2997_v57, %v8619_v30 }
 0x3df   :  { %8618 = vst [vmem:[#allocation50_spill] sm:$0xff] %v6789_v25  ;;  %v1519_v37 = vmul.f32 %v6789_v25, %v6457_v50  ;;  %v8623_v30 = vld [vmem:[#allocation55_spill] sm:$0xff]  ;;  %v6817_v50 = vld [vmem:[#allocation2 + $0xf00] sm:$0xff] }
 0x3e0   :  { %v2584_v54 = vadd.f32 %v2583_v9, %v6777_v62  ;;  %v2027_v27 = vadd.f32 %v2026_v18, %v1516_v29  ;;  %v6797_v9 = vld [vmem:[#allocation5 + $0xda0] sm:$0xff]  ;;  %v2999_v3 = vadd.f32 %v2998_v10, %v8621_v5 }
 0x3e1   :  { %8620 = vst [vmem:[#allocation69_spill] sm:$0xff] %v6797_v9  ;;  %v1520_v29 = vmul.f32 %v6797_v9, %v6465_v52  ;;  %v8625_v5 = vld [vmem:[#allocation56_spill] sm:$0xff]  ;;  %v6825_v52 = vld [vmem:[#allocation2 + $0xf08] sm:$0xff] }
 0x3e2   :  { %v2585_v53 = vadd.f32 %v2584_v54, %v6785_v13  ;;  %v2028_v43 = vadd.f32 %v2027_v27, %v1517_v23  ;;  %v6805_v54 = vld [vmem:[#allocation5 + $0xda8] sm:$0xff]  ;;  %v3000_v48 = vadd.f32 %v2999_v3, %v8623_v30 }
 0x3e3   :  { %8622 = vst [vmem:[#allocation51_spill] sm:$0xff] %v6805_v54  ;;  %v1521_v23 = vmul.f32 %v6805_v54, %v6473_v39  ;;  %v8627_v30 = vld [vmem:[#allocation57_spill] sm:$0xff]  ;;  %v6833_v39 = vld [vmem:[#allocation2 + $0xf10] sm:$0xff] }
 0x3e4   :  { %v2586_v19 = vadd.f32 %v2585_v53, %v6793_v26  ;;  %v2029_v18 = vadd.f32 %v2028_v43, %v1518_v46  ;;  %v6813_v53 = vld [vmem:[#allocation5 + $0xdb0] sm:$0xff]  ;;  %v3001_v21 = vadd.f32 %v3000_v48, %v8625_v5 }
 0x3e5   :  { %8624 = vst [vmem:[#allocation52_spill] sm:$0xff] %v6813_v53  ;;  %v1522_v46 = vmul.f32 %v6813_v53, %v6481_v1  ;;  %v8629_v5 = vld [vmem:[#allocation58_spill] sm:$0xff]  ;;  %v6841_v1 = vld [vmem:[#allocation2 + $0xf18] sm:$0xff] }
 0x3e6   :  { %v2587_v57 = vadd.f32 %v2586_v19, %v6801_v15  ;;  %v2030_v27 = vadd.f32 %v2029_v18, %v1519_v37  ;;  %v6821_v19 = vld [vmem:[#allocation5 + $0xdb8] sm:$0xff]  ;;  %v3002_v25 = vadd.f32 %v3001_v21, %v8627_v30 }
 0x3e7   :  { %8626 = vst [vmem:[#allocation53_spill] sm:$0xff] %v6821_v19  ;;  %v1523_v37 = vmul.f32 %v6821_v19, %v6489_v42  ;;  %v8631_v30 = vld [vmem:[#allocation59_spill] sm:$0xff]  ;;  %v6849_v42 = vld [vmem:[#allocation2 + $0xf20] sm:$0xff] }
 0x3e8   :  { %v2588_v10 = vadd.f32 %v2587_v57, %v6809_v0  ;;  %v2031_v43 = vadd.f32 %v2030_v27, %v1520_v29  ;;  %v6829_v57 = vld [vmem:[#allocation5 + $0xdc0] sm:$0xff]  ;;  %v3003_v9 = vadd.f32 %v3002_v25, %v8629_v5 }
 0x3e9   :  { %8628 = vst [vmem:[#allocation54_spill] sm:$0xff] %v6829_v57  ;;  %v1524_v29 = vmul.f32 %v6829_v57, %v6497_v45  ;;  %v8633_v5 = vld [vmem:[#allocation60_spill] sm:$0xff]  ;;  %v6857_v45 = vld [vmem:[#allocation2 + $0xf28] sm:$0xff] }
 0x3ea   :  { %v2589_v3 = vadd.f32 %v2588_v10, %v6817_v50  ;;  %v2032_v18 = vadd.f32 %v2031_v43, %v1521_v23  ;;  %v6837_v10 = vld [vmem:[#allocation5 + $0xdc8] sm:$0xff]  ;;  %v3004_v54 = vadd.f32 %v3003_v9, %v8631_v30 }
 0x3eb   :  { %8630 = vst [vmem:[#allocation55_spill] sm:$0xff] %v6837_v10  ;;  %v1525_v23 = vmul.f32 %v6837_v10, %v6505_v47  ;;  %v8635_v30 = vld [vmem:[#allocation61_spill] sm:$0xff]  ;;  %v6865_v47 = vld [vmem:[#allocation2 + $0xf30] sm:$0xff] }
 0x3ec   :  { %v2590_v48 = vadd.f32 %v2589_v3, %v6825_v52  ;;  %v2033_v27 = vadd.f32 %v2032_v18, %v1522_v46  ;;  %v6845_v3 = vld [vmem:[#allocation5 + $0xdd0] sm:$0xff]  ;;  %v3005_v53 = vadd.f32 %v3004_v54, %v8633_v5 }
 0x3ed   :  { %8632 = vst [vmem:[#allocation56_spill] sm:$0xff] %v6845_v3  ;;  %v1526_v46 = vmul.f32 %v6845_v3, %v6513_v49  ;;  %v8637_v5 = vld [vmem:[#allocation62_spill] sm:$0xff]  ;;  %v6873_v49 = vld [vmem:[#allocation2 + $0xf38] sm:$0xff] }
 0x3ee   :  { %v2591_v21 = vadd.f32 %v2590_v48, %v6833_v39  ;;  %v2034_v43 = vadd.f32 %v2033_v27, %v1523_v37  ;;  %v6853_v48 = vld [vmem:[#allocation5 + $0xdd8] sm:$0xff]  ;;  %v3006_v19 = vadd.f32 %v3005_v53, %v8635_v30 }
 0x3ef   :  { %8634 = vst [vmem:[#allocation57_spill] sm:$0xff] %v6853_v48  ;;  %v1527_v37 = vmul.f32 %v6853_v48, %v6521_v51  ;;  %v8639_v30 = vld [vmem:[#allocation63_spill] sm:$0xff]  ;;  %v6881_v51 = vld [vmem:[#allocation2 + $0xf40] sm:$0xff] }
 0x3f0   :  { %v2592_v25 = vadd.f32 %v2591_v21, %v6841_v1  ;;  %v2035_v18 = vadd.f32 %v2034_v43, %v1524_v29  ;;  %v6861_v21 = vld [vmem:[#allocation5 + $0xde0] sm:$0xff]  ;;  %v3007_v57 = vadd.f32 %v3006_v19, %v8637_v5 }
 0x3f1   :  { %8636 = vst [vmem:[#allocation58_spill] sm:$0xff] %v6861_v21  ;;  %v1528_v29 = vmul.f32 %v6861_v21, %v6529_v14  ;;  %v8641_v5 = vld [vmem:[#allocation64_spill] sm:$0xff]  ;;  %v6889_v14 = vld [vmem:[#allocation2 + $0xf48] sm:$0xff] }
 0x3f2   :  { %v2593_v9 = vadd.f32 %v2592_v25, %v6849_v42  ;;  %v2036_v27 = vadd.f32 %v2035_v18, %v1525_v23  ;;  %v6869_v25 = vld [vmem:[#allocation5 + $0xde8] sm:$0xff]  ;;  %v3008_v10 = vadd.f32 %v3007_v57, %v8639_v30  ;;  %v8643_v30 = vld [vmem:[#allocation23_spill] sm:$0xff] }
 0x3f3   :  { %8638 = vst [vmem:[#allocation59_spill] sm:$0xff] %v6869_v25  ;;  %v1529_v23 = vmul.f32 %v6869_v25, %v6537_v41  ;;  %v6897_v41 = vld [vmem:[#allocation2 + $0xf50] sm:$0xff] }
 0x3f4   :  { %v2594_v54 = vadd.f32 %v2593_v9, %v6857_v45  ;;  %v2037_v43 = vadd.f32 %v2036_v27, %v1526_v46  ;;  %v6877_v9 = vld [vmem:[#allocation5 + $0xdf0] sm:$0xff]  ;;  %v3009_v3 = vadd.f32 %v3008_v10, %v8641_v5  ;;  %v8645_v5 = vld [vmem:[#allocation65_spill] sm:$0xff] }
 0x3f5   :  { %8640 = vst [vmem:[#allocation60_spill] sm:$0xff] %v6877_v9  ;;  %v1530_v46 = vmul.f32 %v6877_v9, %v6545_v60  ;;  %v6905_v60 = vld [vmem:[#allocation2 + $0xf58] sm:$0xff] }
 0x3f6   :  { %v2595_v53 = vadd.f32 %v2594_v54, %v6865_v47  ;;  %v2038_v18 = vadd.f32 %v2037_v43, %v1527_v37  ;;  %v6885_v54 = vld [vmem:[#allocation5 + $0xdf8] sm:$0xff]  ;;  %v3010_v48 = vadd.f32 %v3009_v3, %v8643_v30 }
 0x3f7   :  { %8642 = vst [vmem:[#allocation61_spill] sm:$0xff] %v6885_v54  ;;  %v1531_v37 = vmul.f32 %v6885_v54, %v6553_v59  ;;  %v8647_v30 = vld [vmem:[#allocation67_spill] sm:$0xff]  ;;  %v6913_v59 = vld [vmem:[#allocation2 + $0xf60] sm:$0xff] }
 0x3f8   :  { %v2596_v19 = vadd.f32 %v2595_v53, %v6873_v49  ;;  %v2039_v27 = vadd.f32 %v2038_v18, %v1528_v29  ;;  %v6893_v53 = vld [vmem:[#allocation5 + $0xe00] sm:$0xff]  ;;  %v3011_v21 = vadd.f32 %v3010_v48, %v8645_v5  ;;  %v8649_v5 = vld [vmem:[#allocation43_spill] sm:$0xff] }
 0x3f9   :  { %8644 = vst [vmem:[#allocation62_spill] sm:$0xff] %v6893_v53  ;;  %v1532_v29 = vmul.f32 %v6893_v53, %v6561_v61  ;;  %v6921_v61 = vld [vmem:[#allocation2 + $0xf68] sm:$0xff] }
 0x3fa   :  { %v2597_v57 = vadd.f32 %v2596_v19, %v6881_v51  ;;  %v2040_v43 = vadd.f32 %v2039_v27, %v1529_v23  ;;  %v6901_v19 = vld [vmem:[#allocation5 + $0xe08] sm:$0xff]  ;;  %v3012_v25 = vadd.f32 %v3011_v21, %v8647_v30  ;;  %v8651_v30 = vld [vmem:[#allocation68_spill] sm:$0xff] }
 0x3fb   :  { %8646 = vst [vmem:[#allocation63_spill] sm:$0xff] %v6901_v19  ;;  %v1533_v23 = vmul.f32 %v6901_v19, %v6569_v63  ;;  %v6929_v63 = vld [vmem:[#allocation2 + $0xf70] sm:$0xff] }
 0x3fc   :  { %v2598_v10 = vadd.f32 %v2597_v57, %v6889_v14  ;;  %v2041_v18 = vadd.f32 %v2040_v43, %v1530_v46  ;;  %v6909_v57 = vld [vmem:[#allocation5 + $0xe10] sm:$0xff]  ;;  %v3013_v9 = vadd.f32 %v3012_v25, %v8649_v5 }
 0x3fd   :  { %8648 = vst [vmem:[#allocation64_spill] sm:$0xff] %v6909_v57  ;;  %v1534_v46 = vmul.f32 %v6909_v57, %v6577_v4  ;;  %v8653_v5 = vld [vmem:[#allocation14_spill] sm:$0xff]  ;;  %v6937_v4 = vld [vmem:[#allocation2 + $0xf78] sm:$0xff] }
 0x3fe   :  { %v2599_v3 = vadd.f32 %v2598_v10, %v6897_v41  ;;  %v2042_v27 = vadd.f32 %v2041_v18, %v1531_v37  ;;  %v6917_v10 = vld [vmem:[#allocation5 + $0xe18] sm:$0xff]  ;;  %v3014_v54 = vadd.f32 %v3013_v9, %v8651_v30 }
 0x3ff   :  { %8650 = vst [vmem:[#allocation23_spill] sm:$0xff] %v6917_v10  ;;  %v1535_v37 = vmul.f32 %v6917_v10, %v6585_v8  ;;  %v8655_v30 = vld [vmem:[#allocation15_spill] sm:$0xff]  ;;  %v6945_v8 = vld [vmem:[#allocation2 + $0xf80] sm:$0xff] }
 0x400   :  { %v2600_v48 = vadd.f32 %v2599_v3, %v6905_v60  ;;  %v2043_v43 = vadd.f32 %v2042_v27, %v1532_v29  ;;  %v6925_v3 = vld [vmem:[#allocation5 + $0xe20] sm:$0xff]  ;;  %v3015_v53 = vadd.f32 %v3014_v54, %v8653_v5 }
 0x401   :  { %8652 = vst [vmem:[#allocation65_spill] sm:$0xff] %v6925_v3  ;;  %v1536_v29 = vmul.f32 %v6925_v3, %v6593_v12  ;;  %v8657_v5 = vld [vmem:[#allocation16_spill] sm:$0xff]  ;;  %v6953_v12 = vld [vmem:[#allocation2 + $0xf88] sm:$0xff] }
 0x402   :  { %v2601_v21 = vadd.f32 %v2600_v48, %v6913_v59  ;;  %v2044_v18 = vadd.f32 %v2043_v43, %v1533_v23  ;;  %v6933_v48 = vld [vmem:[#allocation5 + $0xe28] sm:$0xff]  ;;  %v3016_v19 = vadd.f32 %v3015_v53, %v8655_v30  ;;  %v8659_v30 = vld [vmem:[#allocation70_spill] sm:$0xff] }
 0x403   :  { %8654 = vst [vmem:[#allocation67_spill] sm:$0xff] %v6933_v48  ;;  %v1537_v23 = vmul.f32 %v6933_v48, %v6601_v16  ;;  %v6961_v16 = vld [vmem:[#allocation2 + $0xf90] sm:$0xff] }
 0x404   :  { %v2602_v25 = vadd.f32 %v2601_v21, %v6921_v61  ;;  %v2045_v27 = vadd.f32 %v2044_v18, %v1534_v46  ;;  %v6941_v21 = vld [vmem:[#allocation5 + $0xe30] sm:$0xff]  ;;  %v3017_v57 = vadd.f32 %v3016_v19, %v8657_v5  ;;  %v8661_v5 = vld [vmem:[#allocation71_spill] sm:$0xff] }
 0x405   :  { %8656 = vst [vmem:[#allocation43_spill] sm:$0xff] %v6941_v21  ;;  %v1538_v46 = vmul.f32 %v6941_v21, %v6609_v20  ;;  %v6969_v20 = vld [vmem:[#allocation2 + $0xf98] sm:$0xff] }
 0x406   :  { %v2603_v9 = vadd.f32 %v2602_v25, %v6929_v63  ;;  %v2046_v43 = vadd.f32 %v2045_v27, %v1535_v37  ;;  %v6949_v25 = vld [vmem:[#allocation5 + $0xe38] sm:$0xff]  ;;  %v3018_v10 = vadd.f32 %v3017_v57, %v8659_v30  ;;  %v8663_v30 = vld [vmem:[#allocation72_spill] sm:$0xff] }
 0x407   :  { %8658 = vst [vmem:[#allocation68_spill] sm:$0xff] %v6949_v25  ;;  %v1539_v37 = vmul.f32 %v6949_v25, %v6617_v24  ;;  %v6977_v24 = vld [vmem:[#allocation2 + $0xfa0] sm:$0xff] }
 0x408   :  { %v2604_v54 = vadd.f32 %v2603_v9, %v6937_v4  ;;  %v2047_v18 = vadd.f32 %v2046_v43, %v1536_v29  ;;  %v6957_v9 = vld [vmem:[#allocation5 + $0xe40] sm:$0xff]  ;;  %v3019_v3 = vadd.f32 %v3018_v10, %v8661_v5  ;;  %v8665_v5 = vld [vmem:[#allocation73_spill] sm:$0xff] }
 0x409   :  { %8660 = vst [vmem:[#allocation14_spill] sm:$0xff] %v6957_v9  ;;  %v1540_v29 = vmul.f32 %v6957_v9, %v6625_v28  ;;  %v6985_v28 = vld [vmem:[#allocation2 + $0xfa8] sm:$0xff] }
 0x40a   :  { %v2605_v53 = vadd.f32 %v2604_v54, %v6945_v8  ;;  %v2048_v27 = vadd.f32 %v2047_v18, %v1537_v23  ;;  %v6965_v54 = vld [vmem:[#allocation5 + $0xe48] sm:$0xff]  ;;  %v3020_v48 = vadd.f32 %v3019_v3, %v8663_v30  ;;  %v8667_v30 = vld [vmem:[#allocation74_spill] sm:$0xff] }
 0x40b   :  { %8662 = vst [vmem:[#allocation15_spill] sm:$0xff] %v6965_v54  ;;  %v1541_v23 = vmul.f32 %v6965_v54, %v6633_v32  ;;  %v6993_v32 = vld [vmem:[#allocation2 + $0xfb0] sm:$0xff] }
 0x40c   :  { %v2606_v19 = vadd.f32 %v2605_v53, %v6953_v12  ;;  %v2049_v43 = vadd.f32 %v2048_v27, %v1538_v46  ;;  %v6973_v53 = vld [vmem:[#allocation5 + $0xe50] sm:$0xff]  ;;  %v3021_v21 = vadd.f32 %v3020_v48, %v8665_v5  ;;  %v8669_v5 = vld [vmem:[#allocation17_spill] sm:$0xff] }
 0x40d   :  { %8664 = vst [vmem:[#allocation16_spill] sm:$0xff] %v6973_v53  ;;  %v1542_v46 = vmul.f32 %v6973_v53, %v6641_v36  ;;  %v7001_v36 = vld [vmem:[#allocation2 + $0xfb8] sm:$0xff] }
 0x40e   :  { %v2607_v57 = vadd.f32 %v2606_v19, %v6961_v16  ;;  %v2050_v18 = vadd.f32 %v2049_v43, %v1539_v37  ;;  %v6981_v19 = vld [vmem:[#allocation5 + $0xe58] sm:$0xff]  ;;  %v3022_v25 = vadd.f32 %v3021_v21, %v8667_v30  ;;  %v8671_v30 = vld [vmem:[#allocation18_spill] sm:$0xff] }
 0x40f   :  { %8666 = vst [vmem:[#allocation70_spill] sm:$0xff] %v6981_v19  ;;  %v1543_v37 = vmul.f32 %v6981_v19, %v6649_v40  ;;  %v7009_v40 = vld [vmem:[#allocation2 + $0xfc0] sm:$0xff] }
 0x410   :  { %v2608_v10 = vadd.f32 %v2607_v57, %v6969_v20  ;;  %v2051_v27 = vadd.f32 %v2050_v18, %v1540_v29  ;;  %v6989_v57 = vld [vmem:[#allocation5 + $0xe60] sm:$0xff]  ;;  %v3023_v9 = vadd.f32 %v3022_v25, %v8669_v5  ;;  %v8673_v5 = vld [vmem:[#allocation19_spill] sm:$0xff] }
 0x411   :  { %8668 = vst [vmem:[#allocation71_spill] sm:$0xff] %v6989_v57  ;;  %v1544_v29 = vmul.f32 %v6989_v57, %v6657_v44  ;;  %v7017_v44 = vld [vmem:[#allocation2 + $0xfc8] sm:$0xff] }
 0x412   :  { %v2609_v3 = vadd.f32 %v2608_v10, %v6977_v24  ;;  %v2052_v43 = vadd.f32 %v2051_v27, %v1541_v23  ;;  %v6997_v10 = vld [vmem:[#allocation5 + $0xe68] sm:$0xff]  ;;  %v3024_v54 = vadd.f32 %v3023_v9, %v8671_v30  ;;  %v8675_v30 = vld [vmem:[#allocation20_spill] sm:$0xff] }
 0x413   :  { %8670 = vst [vmem:[#allocation72_spill] sm:$0xff] %v6997_v10  ;;  %v1545_v23 = vmul.f32 %v6997_v10, %v6665_v33  ;;  %v7025_v33 = vld [vmem:[#allocation2 + $0xfd0] sm:$0xff] }
 0x414   :  { %v2610_v48 = vadd.f32 %v2609_v3, %v6985_v28  ;;  %v2053_v18 = vadd.f32 %v2052_v43, %v1542_v46  ;;  %v7005_v3 = vld [vmem:[#allocation5 + $0xe70] sm:$0xff]  ;;  %v3025_v53 = vadd.f32 %v3024_v54, %v8673_v5  ;;  %v8677_v5 = vld [vmem:[#allocation21_spill] sm:$0xff] }
 0x415   :  { %8672 = vst [vmem:[#allocation73_spill] sm:$0xff] %v7005_v3  ;;  %v1546_v46 = vmul.f32 %v7005_v3, %v6673_v55  ;;  %v7033_v55 = vld [vmem:[#allocation2 + $0xfd8] sm:$0xff] }
 0x416   :  { %v2611_v21 = vadd.f32 %v2610_v48, %v6993_v32  ;;  %v2054_v27 = vadd.f32 %v2053_v18, %v1543_v37  ;;  %v7013_v48 = vld [vmem:[#allocation5 + $0xe78] sm:$0xff]  ;;  %v3026_v19 = vadd.f32 %v3025_v53, %v8675_v30  ;;  %v8679_v30 = vld [vmem:[#allocation22_spill] sm:$0xff] }
 0x417   :  { %8674 = vst [vmem:[#allocation74_spill] sm:$0xff] %v7013_v48  ;;  %v1547_v37 = vmul.f32 %v7013_v48, %v6681_v6  ;;  %v7041_v6 = vld [vmem:[#allocation2 + $0xfe0] sm:$0xff] }
 0x418   :  { %v2612_v25 = vadd.f32 %v2611_v21, %v7001_v36  ;;  %v2055_v43 = vadd.f32 %v2054_v27, %v1544_v29  ;;  %v7021_v21 = vld [vmem:[#allocation5 + $0xe80] sm:$0xff]  ;;  %v3027_v57 = vadd.f32 %v3026_v19, %v8677_v5  ;;  %v8681_v5 = vld [vmem:[#allocation41_spill] sm:$0xff] }
 0x419   :  { %8676 = vst [vmem:[#allocation17_spill] sm:$0xff] %v7021_v21  ;;  %v1548_v29 = vmul.f32 %v7021_v21, %v6689_v38  ;;  %v7049_v38 = vld [vmem:[#allocation2 + $0xfe8] sm:$0xff] }
 0x41a   :  { %v2613_v9 = vadd.f32 %v2612_v25, %v7009_v40  ;;  %v2056_v18 = vadd.f32 %v2055_v43, %v1545_v23  ;;  %v7029_v25 = vld [vmem:[#allocation5 + $0xe88] sm:$0xff]  ;;  %v3028_v10 = vadd.f32 %v3027_v57, %v8679_v30  ;;  %v8683_v30 = vld [vmem:[#allocation24_spill] sm:$0xff] }
 0x41b   :  { %8678 = vst [vmem:[#allocation18_spill] sm:$0xff] %v7029_v25  ;;  %v1549_v23 = vmul.f32 %v7029_v25, %v6697_v31  ;;  %v7057_v31 = vld [vmem:[#allocation2 + $0xff0] sm:$0xff] }
 0x41c   :  { %v2614_v54 = vadd.f32 %v2613_v9, %v7017_v44  ;;  %v2057_v27 = vadd.f32 %v2056_v18, %v1546_v46  ;;  %v7037_v9 = vld [vmem:[#allocation5 + $0xe90] sm:$0xff]  ;;  %v3029_v3 = vadd.f32 %v3028_v10, %v8681_v5  ;;  %v8684_v5 = vld [vmem:[#allocation25_spill] sm:$0xff] }
 0x41d   :  { %8680 = vst [vmem:[#allocation19_spill] sm:$0xff] %v7037_v9  ;;  %v1550_v46 = vmul.f32 %v7037_v9, %v6705_v7  ;;  %v7065_v7 = vld [vmem:[#allocation2 + $0xff8] sm:$0xff] }
 0x41e   :  { %v2615_v53 = vadd.f32 %v2614_v54, %v7025_v33  ;;  %v2058_v43 = vadd.f32 %v2057_v27, %v1547_v37  ;;  %v7045_v54 = vld [vmem:[#allocation5 + $0xe98] sm:$0xff]  ;;  %v3030_v48 = vadd.f32 %v3029_v3, %v8683_v30  ;;  %v8685_v30 = vld [vmem:[#allocation45_spill] sm:$0xff] }
 0x41f   :  { %8682 = vst [vmem:[#allocation20_spill] sm:$0xff] %v7045_v54  ;;  %v1551_v37 = vmul.f32 %v7045_v54, %v6713_v22 }
 0x420   :  { %v2616_v19 = vadd.f32 %v2615_v53, %v7033_v55  ;;  %v2059_v18 = vadd.f32 %v2058_v43, %v1548_v29  ;;  %v7053_v53 = vld [vmem:[#allocation5 + $0xea0] sm:$0xff]  ;;  %v3031_v21 = vadd.f32 %v3030_v48, %v8684_v5  ;;  %v8686_v5 = vld [vmem:[#allocation46_spill] sm:$0xff] }
 0x421   :  { %v1552_v29 = vmul.f32 %v7053_v53, %v6721_v56  ;;  %v7080_v56 = vld [vmem:[#allocation5 + $0xec0] sm:$0xff] }
 0x422   :  { %v2617_v57 = vadd.f32 %v2616_v19, %v7041_v6  ;;  %v2060_v27 = vadd.f32 %v2059_v18, %v1549_v23  ;;  %v7061_v19 = vld [vmem:[#allocation5 + $0xea8] sm:$0xff]  ;;  %v3032_v25 = vadd.f32 %v3031_v21, %v8685_v30  ;;  %v7075_v18 = vld [vmem:[#allocation5 + $0xeb8] sm:$0xff] }
 0x423   :  { %v1553_v22 = vmul.f32 %v7061_v19, %v6729_v58  ;;  %v8689_v58 = vld [vmem:[#allocation13_spill] sm:$0xff] }
 0x424   :  { %v2618_v10 = vadd.f32 %v2617_v57, %v7049_v38  ;;  %v2061_v43 = vadd.f32 %v2060_v27, %v1550_v46  ;;  %v7069_v57 = vld [vmem:[#allocation5 + $0xeb0] sm:$0xff]  ;;  %v3033_v9 = vadd.f32 %v3032_v25, %v8686_v5  ;;  %v8688_v46 = vld [vmem:[#allocation27_spill] sm:$0xff]  ;;  %v1555_v25 = vmul.f32 %v7075_v18, %v6745_v35  ;;  %v7085_v5 = vld [vmem:[#allocation5 + $0xec8] sm:$0xff] }
 0x425   :  { %v1554_v30 = vmul.f32 %v7069_v57, %v6737_v2  ;;  %v8690_v2 = vld [vmem:[#allocation28_spill] sm:$0xff]  ;;  %v8691_v35 = vld [vmem:[#allocation29_spill] sm:$0xff] }
 0x426   :  { %v2619_v3 = vadd.f32 %v2618_v10, %v7057_v31  ;;  %v2062_v23 = vadd.f32 %v2061_v43, %v1551_v37  ;;  %v8687_v10 = vld [vmem:[#allocation26_spill] sm:$0xff] }
 0x427   :  { %v3034_v21 = vadd.f32 %v3033_v9, %v8687_v10  ;;  %v1556_v9 = vmul.f32 %v7080_v56, %v6753_v11  ;;  %v7090_v10 = vld [vmem:[#allocation5 + $0xed0] sm:$0xff] }
 0x428   :  { %v2620_v48 = vadd.f32 %v2619_v3, %v7065_v7  ;;  %v2063_v54 = vadd.f32 %v2062_v23, %v1552_v29  ;;  %v8692_v11 = vld [vmem:[#allocation30_spill] sm:$0xff] }
 0x429   :  { %v3035_v27 = vadd.f32 %v3034_v21, %v8688_v46  ;;  %v7095_v21 = vld [vmem:[#allocation5 + $0xed8] sm:$0xff] }
 0x42a   :  { %2622 = vst [vmem:[#allocation7 + $0x8] sm:$0xff] %v2620_v48  ;;  %v2064_v3 = vadd.f32 %v2063_v54, %v1553_v22  ;;  %v1557_v48 = vmul.f32 %v7085_v5, %v6761_v17  ;;  %v1558_v22 = vmul.f32 %v7090_v10, %v6769_v34  ;;  %v8693_v17 = vld [vmem:[#allocation31_spill] sm:$0xff]  ;;  %v8694_v34 = vld [vmem:[#allocation32_spill] sm:$0xff] }
 0x42b   :  { %v3036_v37 = vadd.f32 %v3035_v27, %v8689_v58  ;;  %v7100_v27 = vld [vmem:[#allocation5 + $0xee0] sm:$0xff] }
 0x42c   :  { %v2065_v43 = vadd.f32 %v2064_v3, %v1554_v30  ;;  %v1559_v3 = vmul.f32 %v7095_v21, %v6777_v62  ;;  %v8695_v62 = vld [vmem:[#allocation33_spill] sm:$0xff] }
 0x42d   :  { %v3037_v29 = vadd.f32 %v3036_v37, %v8690_v2  ;;  %v7105_v37 = vld [vmem:[#allocation5 + $0xee8] sm:$0xff] }
 0x42e   :  { %v2066_v23 = vadd.f32 %v2065_v43, %v1555_v25  ;;  %v1560_v43 = vmul.f32 %v7100_v27, %v6785_v13  ;;  %v8696_v13 = vld [vmem:[#allocation34_spill] sm:$0xff] }
 0x42f   :  { %v3038_v54 = vadd.f32 %v3037_v29, %v8691_v35  ;;  %v7110_v29 = vld [vmem:[#allocation5 + $0xef0] sm:$0xff] }
 0x430   :  { %v2067_v46 = vadd.f32 %v2066_v23, %v1556_v9  ;;  %v1561_v23 = vmul.f32 %v7105_v37, %v6793_v26  ;;  %v8697_v26 = vld [vmem:[#allocation35_spill] sm:$0xff] }
 0x431   :  { %v3039_v30 = vadd.f32 %v3038_v54, %v8692_v11  ;;  %v7115_v54 = vld [vmem:[#allocation5 + $0xef8] sm:$0xff] }
 0x432   :  { %v2068_v58 = vadd.f32 %v2067_v46, %v1557_v48  ;;  %v1562_v46 = vmul.f32 %v7110_v29, %v6801_v15  ;;  %v8698_v15 = vld [vmem:[#allocation36_spill] sm:$0xff] }
 0x433   :  { %v3040_v25 = vadd.f32 %v3039_v30, %v8693_v17  ;;  %v7120_v30 = vld [vmem:[#allocation5 + $0xf00] sm:$0xff] }
 0x434   :  { %v2069_v2 = vadd.f32 %v2068_v58, %v1558_v22  ;;  %v1563_v58 = vmul.f32 %v7115_v54, %v6809_v0  ;;  %v8699_v0 = vld [vmem:[#allocation37_spill] sm:$0xff] }
 0x435   :  { %v3041_v9 = vadd.f32 %v3040_v25, %v8694_v34  ;;  %v7125_v25 = vld [vmem:[#allocation5 + $0xf08] sm:$0xff] }
 0x436   :  { %v2070_v35 = vadd.f32 %v2069_v2, %v1559_v3  ;;  %v1564_v2 = vmul.f32 %v7120_v30, %v6817_v50  ;;  %v8700_v50 = vld [vmem:[#allocation38_spill] sm:$0xff] }
 0x437   :  { %v3042_v48 = vadd.f32 %v3041_v9, %v8695_v62  ;;  %v7130_v9 = vld [vmem:[#allocation5 + $0xf10] sm:$0xff] }
 0x438   :  { %v2071_v11 = vadd.f32 %v2070_v35, %v1560_v43  ;;  %v1565_v35 = vmul.f32 %v7125_v25, %v6825_v52  ;;  %v8701_v52 = vld [vmem:[#allocation39_spill] sm:$0xff] }
 0x439   :  { %v3043_v22 = vadd.f32 %v3042_v48, %v8696_v13  ;;  %v7135_v48 = vld [vmem:[#allocation5 + $0xf18] sm:$0xff] }
 0x43a   :  { %v2072_v17 = vadd.f32 %v2071_v11, %v1561_v23  ;;  %v1566_v11 = vmul.f32 %v7130_v9, %v6833_v39  ;;  %v8702_v39 = vld [vmem:[#allocation40_spill] sm:$0xff] }
 0x43b   :  { %v3044_v3 = vadd.f32 %v3043_v22, %v8697_v26  ;;  %v7140_v22 = vld [vmem:[#allocation5 + $0xf20] sm:$0xff] }
 0x43c   :  { %v2073_v34 = vadd.f32 %v2072_v17, %v1562_v46  ;;  %v1567_v17 = vmul.f32 %v7135_v48, %v6841_v1  ;;  %v8703_v1 = vld [vmem:[#allocation42_spill] sm:$0xff] }
 0x43d   :  { %v3045_v43 = vadd.f32 %v3044_v3, %v8698_v15  ;;  %v7145_v3 = vld [vmem:[#allocation5 + $0xf28] sm:$0xff] }
 0x43e   :  { %v2074_v62 = vadd.f32 %v2073_v34, %v1563_v58  ;;  %v1568_v34 = vmul.f32 %v7140_v22, %v6849_v42  ;;  %v8704_v42 = vld [vmem:[#allocation44_spill] sm:$0xff] }
 0x43f   :  { %v3046_v23 = vadd.f32 %v3045_v43, %v8699_v0  ;;  %v7150_v43 = vld [vmem:[#allocation5 + $0xf30] sm:$0xff] }
 0x440   :  { %v2075_v13 = vadd.f32 %v2074_v62, %v1564_v2  ;;  %v1569_v62 = vmul.f32 %v7145_v3, %v6857_v45  ;;  %v8705_v45 = vld [vmem:[#allocation11_spill] sm:$0xff] }
 0x441   :  { %v3047_v46 = vadd.f32 %v3046_v23, %v8700_v50  ;;  %v7155_v23 = vld [vmem:[#allocation5 + $0xf38] sm:$0xff] }
 0x442   :  { %v2076_v26 = vadd.f32 %v2075_v13, %v1565_v35  ;;  %v1570_v13 = vmul.f32 %v7150_v43, %v6865_v47  ;;  %v8706_v47 = vld [vmem:[#allocation12_spill] sm:$0xff] }
 0x443   :  { %v3048_v58 = vadd.f32 %v3047_v46, %v8701_v52  ;;  %v7160_v46 = vld [vmem:[#allocation5 + $0xf40] sm:$0xff] }
 0x444   :  { %v2077_v15 = vadd.f32 %v2076_v26, %v1566_v11  ;;  %v1571_v26 = vmul.f32 %v7155_v23, %v6873_v49  ;;  %v8707_v49 = vld [vmem:[#allocation47_spill] sm:$0xff] }
 0x445   :  { %v3049_v2 = vadd.f32 %v3048_v58, %v8702_v39  ;;  %v7165_v58 = vld [vmem:[#allocation5 + $0xf48] sm:$0xff] }
 0x446   :  { %v2078_v0 = vadd.f32 %v2077_v15, %v1567_v17  ;;  %v1572_v15 = vmul.f32 %v7160_v46, %v6881_v51  ;;  %v8708_v51 = vld [vmem:[#allocation48_spill] sm:$0xff] }
 0x447   :  { %v3050_v35 = vadd.f32 %v3049_v2, %v8703_v1  ;;  %v7170_v2 = vld [vmem:[#allocation5 + $0xf50] sm:$0xff] }
 0x448   :  { %v2079_v50 = vadd.f32 %v2078_v0, %v1568_v34  ;;  %v1573_v0 = vmul.f32 %v7165_v58, %v6889_v14  ;;  %v8709_v14 = vld [vmem:[#allocation66_spill] sm:$0xff] }
 0x449   :  { %v3051_v11 = vadd.f32 %v3050_v35, %v8704_v42  ;;  %v7175_v35 = vld [vmem:[#allocation5 + $0xf58] sm:$0xff] }
 0x44a   :  { %v2080_v52 = vadd.f32 %v2079_v50, %v1569_v62  ;;  %v1574_v50 = vmul.f32 %v7170_v2, %v6897_v41  ;;  %v8710_v41 = vld [vmem:[#allocation49_spill] sm:$0xff] }
 0x44b   :  { %v3052_v17 = vadd.f32 %v3051_v11, %v8705_v45  ;;  %v7180_v11 = vld [vmem:[#allocation5 + $0xf60] sm:$0xff] }
 0x44c   :  { %v2081_v39 = vadd.f32 %v2080_v52, %v1570_v13  ;;  %v1575_v52 = vmul.f32 %v7175_v35, %v6905_v60  ;;  %v8711_v60 = vld [vmem:[#allocation50_spill] sm:$0xff] }
 0x44d   :  { %v3053_v34 = vadd.f32 %v3052_v17, %v8706_v47  ;;  %v7185_v17 = vld [vmem:[#allocation5 + $0xf68] sm:$0xff] }
 0x44e   :  { %v2082_v1 = vadd.f32 %v2081_v39, %v1571_v26  ;;  %v1576_v39 = vmul.f32 %v7180_v11, %v6913_v59  ;;  %v8712_v59 = vld [vmem:[#allocation69_spill] sm:$0xff] }
 0x44f   :  { %v3054_v62 = vadd.f32 %v3053_v34, %v8707_v49  ;;  %v7190_v34 = vld [vmem:[#allocation5 + $0xf70] sm:$0xff] }
 0x450   :  { %v2083_v42 = vadd.f32 %v2082_v1, %v1572_v15  ;;  %v1577_v1 = vmul.f32 %v7185_v17, %v6921_v61  ;;  %v8713_v61 = vld [vmem:[#allocation51_spill] sm:$0xff] }
 0x451   :  { %v3055_v13 = vadd.f32 %v3054_v62, %v8708_v51  ;;  %v7195_v62 = vld [vmem:[#allocation5 + $0xf78] sm:$0xff] }
 0x452   :  { %v2084_v45 = vadd.f32 %v2083_v42, %v1573_v0  ;;  %v1578_v42 = vmul.f32 %v7190_v34, %v6929_v63  ;;  %v8714_v63 = vld [vmem:[#allocation52_spill] sm:$0xff] }
 0x453   :  { %v3056_v26 = vadd.f32 %v3055_v13, %v8709_v14  ;;  %v7200_v13 = vld [vmem:[#allocation5 + $0xf80] sm:$0xff] }
 0x454   :  { %v2085_v47 = vadd.f32 %v2084_v45, %v1574_v50  ;;  %v1579_v45 = vmul.f32 %v7195_v62, %v6937_v4  ;;  %v8715_v4 = vld [vmem:[#allocation53_spill] sm:$0xff] }
 0x455   :  { %v3057_v15 = vadd.f32 %v3056_v26, %v8710_v41  ;;  %v7205_v26 = vld [vmem:[#allocation5 + $0xf88] sm:$0xff] }
 0x456   :  { %v2086_v49 = vadd.f32 %v2085_v47, %v1575_v52  ;;  %v1580_v47 = vmul.f32 %v7200_v13, %v6945_v8  ;;  %v8716_v8 = vld [vmem:[#allocation54_spill] sm:$0xff] }
 0x457   :  { %v3058_v0 = vadd.f32 %v3057_v15, %v8711_v60  ;;  %v7210_v15 = vld [vmem:[#allocation5 + $0xf90] sm:$0xff] }
 0x458   :  { %v2087_v51 = vadd.f32 %v2086_v49, %v1576_v39  ;;  %v1581_v49 = vmul.f32 %v7205_v26, %v6953_v12  ;;  %v8717_v12 = vld [vmem:[#allocation55_spill] sm:$0xff] }
 0x459   :  { %v3059_v50 = vadd.f32 %v3058_v0, %v8712_v59  ;;  %v7215_v0 = vld [vmem:[#allocation5 + $0xf98] sm:$0xff] }
 0x45a   :  { %v2088_v14 = vadd.f32 %v2087_v51, %v1577_v1  ;;  %v1582_v51 = vmul.f32 %v7210_v15, %v6961_v16  ;;  %v8718_v16 = vld [vmem:[#allocation56_spill] sm:$0xff] }
 0x45b   :  { %v3060_v52 = vadd.f32 %v3059_v50, %v8713_v61  ;;  %v7220_v50 = vld [vmem:[#allocation5 + $0xfa0] sm:$0xff] }
 0x45c   :  { %v2089_v41 = vadd.f32 %v2088_v14, %v1578_v42  ;;  %v1583_v14 = vmul.f32 %v7215_v0, %v6969_v20  ;;  %v8719_v20 = vld [vmem:[#allocation57_spill] sm:$0xff] }
 0x45d   :  { %v3061_v39 = vadd.f32 %v3060_v52, %v8714_v63  ;;  %v7225_v52 = vld [vmem:[#allocation5 + $0xfa8] sm:$0xff] }
 0x45e   :  { %v2090_v60 = vadd.f32 %v2089_v41, %v1579_v45  ;;  %v1584_v41 = vmul.f32 %v7220_v50, %v6977_v24  ;;  %v8720_v24 = vld [vmem:[#allocation58_spill] sm:$0xff] }
 0x45f   :  { %v3062_v1 = vadd.f32 %v3061_v39, %v8715_v4  ;;  %v7230_v39 = vld [vmem:[#allocation5 + $0xfb0] sm:$0xff] }
 0x460   :  { %v2091_v59 = vadd.f32 %v2090_v60, %v1580_v47  ;;  %v1585_v60 = vmul.f32 %v7225_v52, %v6985_v28  ;;  %v8721_v28 = vld [vmem:[#allocation59_spill] sm:$0xff] }
 0x461   :  { %v3063_v42 = vadd.f32 %v3062_v1, %v8716_v8  ;;  %v7235_v1 = vld [vmem:[#allocation5 + $0xfb8] sm:$0xff] }
 0x462   :  { %v2092_v61 = vadd.f32 %v2091_v59, %v1581_v49  ;;  %v1586_v59 = vmul.f32 %v7230_v39, %v6993_v32  ;;  %v8722_v32 = vld [vmem:[#allocation60_spill] sm:$0xff] }
 0x463   :  { %v3064_v45 = vadd.f32 %v3063_v42, %v8717_v12  ;;  %v7240_v42 = vld [vmem:[#allocation5 + $0xfc0] sm:$0xff] }
 0x464   :  { %v2093_v63 = vadd.f32 %v2092_v61, %v1582_v51  ;;  %v1587_v61 = vmul.f32 %v7235_v1, %v7001_v36  ;;  %v8724_v36 = vld [vmem:[#allocation61_spill] sm:$0xff] }
 0x465   :  { %v3065_v47 = vadd.f32 %v3064_v45, %v8718_v16  ;;  %v7245_v45 = vld [vmem:[#allocation5 + $0xfc8] sm:$0xff] }
 0x466   :  { %v2094_v4 = vadd.f32 %v2093_v63, %v1583_v14  ;;  %v1588_v63 = vmul.f32 %v7240_v42, %v7009_v40  ;;  %v8726_v40 = vld [vmem:[#allocation62_spill] sm:$0xff] }
 0x467   :  { %v3066_v49 = vadd.f32 %v3065_v47, %v8719_v20  ;;  %v7250_v47 = vld [vmem:[#allocation5 + $0xfd0] sm:$0xff] }
 0x468   :  { %v2095_v8 = vadd.f32 %v2094_v4, %v1584_v41  ;;  %v1589_v4 = vmul.f32 %v7245_v45, %v7017_v44  ;;  %v8728_v44 = vld [vmem:[#allocation63_spill] sm:$0xff] }
 0x469   :  { %v3067_v51 = vadd.f32 %v3066_v49, %v8720_v24  ;;  %v7255_v49 = vld [vmem:[#allocation5 + $0xfd8] sm:$0xff] }
 0x46a   :  { %v2096_v12 = vadd.f32 %v2095_v8, %v1585_v60  ;;  %8723 = vst [vmem:[#allocation21_spill] sm:$0xff] %v7255_v49  ;;  %v1590_v8 = vmul.f32 %v7250_v47, %v7025_v33  ;;  %v8730_v33 = vld [vmem:[#allocation64_spill] sm:$0xff] }
 0x46b   :  { %v3068_v14 = vadd.f32 %v3067_v51, %v8721_v28  ;;  %v7260_v51 = vld [vmem:[#allocation5 + $0xfe0] sm:$0xff] }
 0x46c   :  { %v2097_v16 = vadd.f32 %v2096_v12, %v1586_v59  ;;  %8725 = vst [vmem:[#allocation22_spill] sm:$0xff] %v7260_v51  ;;  %v1591_v12 = vmul.f32 %v7255_v49, %v7033_v55  ;;  %v8731_v55 = vld [vmem:[#allocation23_spill] sm:$0xff]  ;;  %v8736_v49 = vld [vmem:[#allocation14_spill] sm:$0xff] }
 0x46d   :  { %v3069_v41 = vadd.f32 %v3068_v14, %v8722_v32  ;;  %v7265_v14 = vld [vmem:[#allocation5 + $0xfe8] sm:$0xff] }
 0x46e   :  { %v2098_v20 = vadd.f32 %v2097_v16, %v1587_v61  ;;  %8727 = vst [vmem:[#allocation41_spill] sm:$0xff] %v7265_v14  ;;  %v1592_v16 = vmul.f32 %v7260_v51, %v7041_v6  ;;  %v8734_v51 = vld [vmem:[#allocation43_spill] sm:$0xff] }
 0x46f   :  { %v3070_v60 = vadd.f32 %v3069_v41, %v8724_v36  ;;  %v7270_v41 = vld [vmem:[#allocation5 + $0xff0] sm:$0xff] }
 0x470   :  { %v2099_v24 = vadd.f32 %v2098_v20, %v1588_v63  ;;  %8729 = vst [vmem:[#allocation24_spill] sm:$0xff] %v7270_v41  ;;  %v1593_v20 = vmul.f32 %v7265_v14, %v7049_v38 }
 0x471   :  { %v3071_v59 = vadd.f32 %v3070_v60, %v8726_v40  ;;  %v7275_v60 = vld [vmem:[#allocation5 + $0xff8] sm:$0xff] }
 0x472   :  { %v2100_v28 = vadd.f32 %v2099_v24, %v1589_v4  ;;  %v1594_v24 = vmul.f32 %v7270_v41, %v7057_v31  ;;  %v1595_v6 = vmul.f32 %v7275_v60, %v7065_v7  ;;  %v8740_v41 = vld [vmem:[#allocation71_spill] sm:$0xff] }
 0x473   :  { %v3072_v61 = vadd.f32 %v3071_v59, %v8728_v44  ;;  %v8732_v59 = vld [vmem:[#allocation65_spill] sm:$0xff] }
 0x474   :  { %v2101_v32 = vadd.f32 %v2100_v28, %v1590_v8  ;;  %v8733_v28 = vld [vmem:[#allocation67_spill] sm:$0xff] }
 0x475   :  { %v3073_v63 = vadd.f32 %v3072_v61, %v8730_v33 }
 0x476   :  { %v2102_v36 = vadd.f32 %v2101_v32, %v1591_v12  ;;  %v8735_v32 = vld [vmem:[#allocation68_spill] sm:$0xff] }
 0x477   :  { %v3074_v4 = vadd.f32 %v3073_v63, %v8731_v55  ;;  %v8737_v55 = vld [vmem:[#allocation15_spill] sm:$0xff] }
 0x478   :  { %v2103_v40 = vadd.f32 %v2102_v36, %v1592_v16  ;;  %v8738_v16 = vld [vmem:[#allocation16_spill] sm:$0xff] }
 0x479   :  { %v3075_v44 = vadd.f32 %v3074_v4, %v8732_v59  ;;  %v8739_v4 = vld [vmem:[#allocation70_spill] sm:$0xff] }
 0x47a   :  { %v2104_v8 = vadd.f32 %v2103_v40, %v1593_v20  ;;  %v8741_v20 = vld [vmem:[#allocation72_spill] sm:$0xff] }
 0x47b   :  { %v3076_v61 = vadd.f32 %v3075_v44, %v8733_v28  ;;  %v8742_v44 = vld [vmem:[#allocation73_spill] sm:$0xff] }
 0x47c   :  { %v2105_v33 = vadd.f32 %v2104_v8, %v1594_v24  ;;  %v8743_v8 = vld [vmem:[#allocation74_spill] sm:$0xff] }
 0x47d   :  { %v3077_v38 = vadd.f32 %v3076_v61, %v8734_v51  ;;  %v8745_v61 = vld [vmem:[#allocation18_spill] sm:$0xff] }
 0x47e   :  { %v2106_v12 = vadd.f32 %v2105_v33, %v1595_v6  ;;  %v8744_v6 = vld [vmem:[#allocation17_spill] sm:$0xff] }
 0x47f   :  { %v3078_v14 = vadd.f32 %v3077_v38, %v8735_v32  ;;  %v8747_v38 = vld [vmem:[#allocation20_spill] sm:$0xff] }
 0x480   :  { %2108 = vst [vmem:[#allocation7] sm:$0xff] %v2106_v12 }
 0x481   :  { %v3079_v63 = vadd.f32 %v3078_v14, %v8736_v49  ;;  %v8746_v49 = vld [vmem:[#allocation19_spill] sm:$0xff] }
 0x483   :  { %v3080_v31 = vadd.f32 %v3079_v63, %v8737_v55 }
 0x485   :  { %v3081_v36 = vadd.f32 %v3080_v31, %v8738_v16 }
 0x487   :  { %v3082_v59 = vadd.f32 %v3081_v36, %v8739_v4 }
 0x489   :  { %v3083_v7 = vadd.f32 %v3082_v59, %v8740_v41 }
 0x48b   :  { %v3084_v40 = vadd.f32 %v3083_v7, %v8741_v20  ;;  %v8748_v20 = vld [vmem:[#allocation21_spill] sm:$0xff] }
 0x48d   :  { %v3085_v24 = vadd.f32 %v3084_v40, %v8742_v44  ;;  %v8749_v40 = vld [vmem:[#allocation22_spill] sm:$0xff]  ;;  %v8750_v44 = vld [vmem:[#allocation41_spill] sm:$0xff] }
 0x48f   :  { %v3086_v51 = vadd.f32 %v3085_v24, %v8743_v8  ;;  %v8751_v24 = vld [vmem:[#allocation24_spill] sm:$0xff] }
 0x491   :  { %v3087_v28 = vadd.f32 %v3086_v51, %v8744_v6 }
 0x493   :  { %v3088_v33 = vadd.f32 %v3087_v28, %v8745_v61 }
 0x495   :  { %v3089_v14 = vadd.f32 %v3088_v33, %v8746_v49 }
 0x497   :  { %v3090_v12 = vadd.f32 %v3089_v14, %v8747_v38 }
 0x499   :  { %v3091_v32 = vadd.f32 %v3090_v12, %v7053_v53 }
 0x49b   :  { %v3092_v63 = vadd.f32 %v3091_v32, %v7061_v19 }
 0x49d   :  { %v3093_v41 = vadd.f32 %v3092_v63, %v7069_v57 }
 0x49f   :  { %v3094_v55 = vadd.f32 %v3093_v41, %v7075_v18 }
 0x4a1   :  { %v3095_v31 = vadd.f32 %v3094_v55, %v7080_v56 }
 0x4a3   :  { %v3096_v16 = vadd.f32 %v3095_v31, %v7085_v5 }
 0x4a5   :  { %v3097_v36 = vadd.f32 %v3096_v16, %v7090_v10 }
 0x4a7   :  { %v3098_v4 = vadd.f32 %v3097_v36, %v7095_v21 }
 0x4a9   :  { %v3099_v59 = vadd.f32 %v3098_v4, %v7100_v27 }
 0x4ab   :  { %v3100_v7 = vadd.f32 %v3099_v59, %v7105_v37 }
 0x4ad   :  { %v3101_v53 = vadd.f32 %v3100_v7, %v7110_v29 }
 0x4af   :  { %v3102_v19 = vadd.f32 %v3101_v53, %v7115_v54 }
 0x4b1   :  { %v3103_v57 = vadd.f32 %v3102_v19, %v7120_v30 }
 0x4b3   :  { %v3104_v18 = vadd.f32 %v3103_v57, %v7125_v25 }
 0x4b5   :  { %v3105_v56 = vadd.f32 %v3104_v18, %v7130_v9 }
 0x4b7   :  { %v3106_v5 = vadd.f32 %v3105_v56, %v7135_v48 }
 0x4b9   :  { %v3107_v10 = vadd.f32 %v3106_v5, %v7140_v22 }
 0x4bb   :  { %v3108_v21 = vadd.f32 %v3107_v10, %v7145_v3 }
 0x4bd   :  { %v3109_v27 = vadd.f32 %v3108_v21, %v7150_v43 }
 0x4bf   :  { %v3110_v37 = vadd.f32 %v3109_v27, %v7155_v23 }
 0x4c1   :  { %v3111_v29 = vadd.f32 %v3110_v37, %v7160_v46 }
 0x4c3   :  { %v3112_v54 = vadd.f32 %v3111_v29, %v7165_v58 }
 0x4c5   :  { %v3113_v30 = vadd.f32 %v3112_v54, %v7170_v2 }
 0x4c7   :  { %v3114_v25 = vadd.f32 %v3113_v30, %v7175_v35 }
 0x4c9   :  { %v3115_v9 = vadd.f32 %v3114_v25, %v7180_v11 }
 0x4cb   :  { %v3116_v48 = vadd.f32 %v3115_v9, %v7185_v17 }
 0x4cd   :  { %v3117_v22 = vadd.f32 %v3116_v48, %v7190_v34 }
 0x4cf   :  { %v3118_v3 = vadd.f32 %v3117_v22, %v7195_v62 }
 0x4d1   :  { %v3119_v43 = vadd.f32 %v3118_v3, %v7200_v13 }
 0x4d3   :  { %v3120_v23 = vadd.f32 %v3119_v43, %v7205_v26 }
 0x4d5   :  { %v3121_v46 = vadd.f32 %v3120_v23, %v7210_v15 }
 0x4d7   :  { %v3122_v58 = vadd.f32 %v3121_v46, %v7215_v0 }
 0x4d9   :  { %v3123_v2 = vadd.f32 %v3122_v58, %v7220_v50 }
 0x4db   :  { %v3124_v35 = vadd.f32 %v3123_v2, %v7225_v52 }
 0x4dd   :  { %v3125_v11 = vadd.f32 %v3124_v35, %v7230_v39 }
 0x4df   :  { %v3126_v17 = vadd.f32 %v3125_v11, %v7235_v1 }
 0x4e1   :  { %v3127_v34 = vadd.f32 %v3126_v17, %v7240_v42 }
 0x4e3   :  { %v3128_v62 = vadd.f32 %v3127_v34, %v7245_v45 }
 0x4e5   :  { %v3129_v13 = vadd.f32 %v3128_v62, %v7250_v47 }
 0x4e7   :  { %v3130_v26 = vadd.f32 %v3129_v13, %v8748_v20 }
 0x4e9   :  { %v3131_v15 = vadd.f32 %v3130_v26, %v8749_v40 }
 0x4eb   :  { %v3132_v0 = vadd.f32 %v3131_v15, %v8750_v44 }
 0x4ed   :  { %v3133_v50 = vadd.f32 %v3132_v0, %v8751_v24 }
 0x4ef   :  { %v3134_v52 = vadd.f32 %v3133_v50, %v7275_v60 }
 0x4f1   :  { %3136 = vst [vmem:[#allocation7 + $0x10] sm:$0xff] %v3134_v52 }
 0x4f2   :  { %3216 = shalt.err (!%p3213_p6)
}
 0x4f3   :  { %s3217_s10 = scalar_lea.hbm %s7359_s2, 384 }
 0x4f4   :  { %p3218_p7 = scmp.ne.s32.totalorder %s7359_s2, %s3217_s10  ;;  %p3221_p8 = scmp.lt.u32.totalorder %s3217_s10, %s7359_s2 }
 0x4f6   :  { %p3223_p9 = pnand %p3221_p8, %p3218_p7 }
 0x4f8   :  { %3226 = shalt.err (!%p3223_p9)
}
 0x4f9   :  { %3148 = dma.vmem_to_hbm [thread:$0]  %s3143_s6, 384, %s7359_s2, [#allocation4], %s3234_s19, %s3234_s19, %s3235_s20  }
 0x4fa   :  { %3231 = dma.done.wait [#allocation4], 384  }
 0x4fb   :  { %3232 = vsyncadd [#allocation4], 4294966912 }
 0x4fc   :  { %3152 = vsyncpa [#allocation3], 1 }
 0x4fd   :  { %3153 = vsyncpa [#allocation6], 1 }
 0x4fe   :  { %3154 = vsyncpa [#allocation4], 1 }

</bundles_post_ra>
